<compile_context>
chip_gen: v6e
topology: v6e:2x2x1
jax: 0.10.0
libtpu: 0.0.40
codegen_flags: <defaults>
</compile_context>

<pallas_src>
import functools

import jax
import jax.numpy as jnp
from jax.experimental import pallas as pl
from jax.experimental.pallas import tpu as pltpu


# ---------------------------------------------------------------------------
# small helpers (plain Python / XLA glue)
# ---------------------------------------------------------------------------
def _round_up(x, m):
    return (x + m - 1) // m * m


def _w_to_s2d(w):
    """(Cout, Cin, 4, 4) -> (4, 4*Cin, Cout).

    First dim g = a*2+b indexes the (a, b) output shift; second dim is ordered
    (da*2+db)*Cin + c, matching the space-to-depth channel order of the input.
    """
    cout, cin, kh, kw = w.shape
    assert kh == 4 and kw == 4
    wt = w.transpose(2, 3, 1, 0)                   # (ki, kj, cin, cout)
    wt = wt.reshape(2, 2, 2, 2, cin, cout)         # (a, da, b, db, cin, cout)
    wt = wt.transpose(0, 2, 1, 3, 4, 5)            # (a, b, da, db, cin, cout)
    return wt.reshape(4, 4 * cin, cout)


def _prep_s2d(h, bn=None):
    """Single XLA fusion: [BN apply + LeakyReLU] + zero-pad(1) + space-to-depth.

    h: (N, H, W, C).  Returns xs: (N, H/2+1, W/2+1, 4*C) bf16 where
    xs[n, r, s, (da*2+db)*C + c] = pad(h)[n, 2r+da, 2s+db, c].
    The conv padding ring is exact zeros because padding happens *after* the
    normalization, which keeps the fused BN numerically faithful.
    """
    h = h.astype(jnp.float32)
    if bn is not None:
        mean, rstd, gamma, beta = bn
        h = (h - mean) * (rstd * gamma) + beta
        h = jnp.where(h >= 0, h, 0.2 * h)          # LeakyReLU(0.2)
    n, hh, ww, c = h.shape
    ho, wo = hh // 2, ww // 2
    hp = jnp.pad(h, ((0, 0), (1, 1), (1, 1), (0, 0)))
    xs = hp.reshape(n, ho + 1, 2, wo + 1, 2, c)
    xs = xs.transpose(0, 1, 3, 2, 4, 5).reshape(n, ho + 1, wo + 1, 4 * c)
    return xs.astype(jnp.bfloat16)


def _stats_to_mean_rstd(stats, m):
    """stats: (N, RT, 8, C) partial sums -> per-channel mean, rsqrt(var+eps)."""
    s = jnp.sum(stats[:, :, 0, :], axis=(0, 1))
    sq = jnp.sum(stats[:, :, 1, :], axis=(0, 1))
    mean = s / m
    var = jnp.maximum(sq / m - mean * mean, 0.0)   # biased var (BN train mode)
    rstd = jax.lax.rsqrt(var + 1e-5)
    return mean, rstd


# ---------------------------------------------------------------------------
# Pallas kernels
# ---------------------------------------------------------------------------
def _conv_s2d_kernel(xs_ref, w_ref, b_ref, *out_refs, act, collect_stats):
    """k=4/s=2/p=1 conv on the space-to-depth input, one row-tile per step.

    xs_ref: (1, Ho+1, Wo+1, 4*Cin) bf16 (whole image, VMEM resident per n)
    w_ref : (4, 4*Cin, Cout) bf16, b_ref: (1, Cout) f32
    out   : (1, Th, Wo, Cout) bf16 [+ stats (1, 1, 8, Cout) f32: sum / sumsq]
    """
    if collect_stats:
        o_ref, stats_ref = out_refs
    else:
        (o_ref,) = out_refs

    th = o_ref.shape[1]
    wo = o_ref.shape[2]
    cout = o_ref.shape[3]
    row0 = pl.program_id(1) * th           # top-level only (interpret-safe)
    bias = b_ref[...]                      # (1, Cout) f32

    def row_step(r, carry):
        s, sq = carry
        acc = jnp.zeros((wo, cout), jnp.float32)
        # The four (a, b) output shifts of the space-to-depth decomposition.
        for g, (a, b) in enumerate(((0, 0), (0, 1), (1, 0), (1, 1))):
            lhs = xs_ref[0, row0 + r + a, pl.ds(b, wo), :]      # (Wo, 4*Cin)
            acc = acc + jnp.dot(lhs, w_ref[g],
                                preferred_element_type=jnp.float32)
        y = acc + bias
        if act == "leaky":
            y = jnp.where(y >= 0, y, 0.2 * y)
        o_ref[0, r] = y.astype(o_ref.dtype)
        if collect_stats:
            s = s + jnp.sum(y, axis=0, keepdims=True)
            sq = sq + jnp.sum(y * y, axis=0, keepdims=True)
        return s, sq

    zeros = jnp.zeros((1, cout), jnp.float32)
    s, sq = jax.lax.fori_loop(0, th, row_step, (zeros, zeros))

    if collect_stats:
        stats_ref[0, 0] = jnp.concatenate(
            [s, sq, jnp.zeros((6, cout), jnp.float32)], axis=0)


def _head_kernel(y_ref, mean_ref, rstd_ref, g_ref, b_ref, w5_ref, b5_ref, o_ref):
    """layer4 BN + LeakyReLU fused with layer5 (512->1 1x1 conv) + Tanh.

    tanh is applied to the (rows, 1) reduction *before* the lane broadcast.
    """
    y = y_ref[...].astype(jnp.float32)
    yn = (y - mean_ref[...]) * (rstd_ref[...] * g_ref[...]) + b_ref[...]
    yn = jnp.where(yn >= 0, yn, 0.2 * yn)
    red = jnp.sum(yn * w5_ref[...], axis=-1, keepdims=True)    # (rows, 1)
    t = jnp.tanh(red + b5_ref[...])                            # (rows, 1)
    o_ref[...] = jnp.broadcast_to(t, o_ref.shape)              # lane-dense store


# ---------------------------------------------------------------------------
# pallas_call wrappers
# ---------------------------------------------------------------------------
def pallas_conv_s2d(xs, w2, bias, *, act="none", collect_stats=False):
    """Conv k4/s2/p1 with in-kernel window gather.  xs from `_prep_s2d`."""
    n, hs, ws, c4 = xs.shape
    ho, wo = hs - 1, ws - 1
    cout = w2.shape[-1]

    # Row tile: largest power-of-two divisor of Ho whose double-buffered output
    # block stays inside a conservative budget (fits v5e's 16 MiB scoped VMEM;
    # comfortably inside v6e/v7x's 32 MiB scoped default).
    th = ho
    while th > 1 and th % 2 == 0 and 2 * (th * wo * cout * 2) > (6 << 20):
        th //= 2
    rt = ho // th

    kernel = functools.partial(_conv_s2d_kernel, act=act,
                               collect_stats=collect_stats)

    in_specs = [
        # Whole per-image slab resident in VMEM across the row-tile axis.
        pl.BlockSpec((1, hs, ws, c4), lambda i, j: (i, 0, 0, 0)),
        # Whole weight matrix resident (full-Cout N tile, K not a grid axis).
        pl.BlockSpec((4, c4, cout), lambda i, j: (0, 0, 0)),
        pl.BlockSpec((1, cout), lambda i, j: (0, 0)),
    ]
    out_shapes = [jax.ShapeDtypeStruct((n, ho, wo, cout), jnp.bfloat16)]
    out_specs = [pl.BlockSpec((1, th, wo, cout), lambda i, j: (i, j, 0, 0))]
    if collect_stats:
        out_shapes.append(jax.ShapeDtypeStruct((n, rt, 8, cout), jnp.float32))
        out_specs.append(pl.BlockSpec((1, 1, 8, cout), lambda i, j: (i, j, 0, 0)))

    cost = pl.CostEstimate(
        flops=2 * n * ho * wo * (4 * c4) * cout,
        transcendentals=0,
        bytes_accessed=(xs.size * 2 + w2.size * 2 + cout * 4
                        + n * ho * wo * cout * 2))

    return pl.pallas_call(
        kernel,
        grid=(n, rt),
        in_specs=in_specs,
        out_specs=tuple(out_specs) if collect_stats else out_specs[0],
        out_shape=tuple(out_shapes) if collect_stats else out_shapes[0],
        compiler_params=pltpu.CompilerParams(
            dimension_semantics=("parallel", "parallel")),
        cost_estimate=cost,
    )(xs, w2.astype(jnp.bfloat16),
      bias.reshape(1, cout).astype(jnp.float32))


def pallas_head(yraw, mean, rstd, gamma, beta, w5, b5):
    """Fused layer4 BN + LeakyReLU + layer5 (512->1) + Tanh.  Returns (Mp,128) f32."""
    m, c = yraw.shape
    tm = m if m <= 512 else 256
    mp = _round_up(m, tm)
    if mp != m:
        yraw = jnp.pad(yraw, ((0, mp - m), (0, 0)))

    row = lambda v: v.reshape(1, -1).astype(jnp.float32)
    cspec = pl.BlockSpec((1, c), lambda i: (0, 0))
    return pl.pallas_call(
        _head_kernel,
        grid=(mp // tm,),
        in_specs=[pl.BlockSpec((tm, c), lambda i: (i, 0)),
                  cspec, cspec, cspec, cspec, cspec,
                  pl.BlockSpec((1, 1), lambda i: (0, 0))],
        out_specs=pl.BlockSpec((tm, 128), lambda i: (i, 0)),
        out_shape=jax.ShapeDtypeStruct((mp, 128), jnp.float32),
        compiler_params=pltpu.CompilerParams(dimension_semantics=("parallel",)),
    )(yraw, row(mean), row(rstd), row(gamma), row(beta), row(w5),
      b5.reshape(1, 1).astype(jnp.float32))


# ---------------------------------------------------------------------------
# parameters + forward pass
# ---------------------------------------------------------------------------
def init_params(key):
    """Deterministic synthetic parameters (DCGAN-style N(0, 0.02) conv init)."""
    params = {}
    specs = [
        ("layer1", 6, 64, 4),
        ("layer2", 64, 128, 4),
        ("layer3", 128, 256, 4),
        ("layer4", 256, 512, 4),
        ("layer5", 512, 1, 1),
    ]
    for name, cin, cout, k in specs:
        key, kw_, kb_ = jax.random.split(key, 3)
        params[name + "_w"] = 0.02 * jax.random.normal(
            kw_, (cout, cin, k, k), dtype=jnp.float32)
        params[name + "_b"] = 0.02 * jax.random.normal(
            kb_, (cout,), dtype=jnp.float32)
    for name, c in [("layer2", 128), ("layer3", 256), ("layer4", 512)]:
        params[name + "_gamma"] = jnp.ones((c,), dtype=jnp.float32)
        params[name + "_beta"] = jnp.zeros((c,), dtype=jnp.float32)
    return params


def discriminator_forward(params, x, y):
    # torch.cat((x, y), dim=1), then channel-last for the whole network.
    h = jnp.concatenate([x, y], axis=1)
    h = jnp.transpose(h, (0, 2, 3, 1))                          # (N, H, W, 6)

    # layer1: conv + LeakyReLU fused in the Pallas kernel (no BN).
    xs = _prep_s2d(h)
    act = pallas_conv_s2d(xs, _w_to_s2d(params["layer1_w"]),
                          params["layer1_b"], act="leaky",
                          collect_stats=False)                  # (N, 8, 8, 64)

    # layer2..4: conv emits the raw (pre-BN) output plus fused batch stats.
    # The BN apply + LeakyReLU is folded into the *next* layer's pad +
    # space-to-depth prep fusion (no standalone normalization pass over HBM).
    raw, bn = act, None
    n_ = ho_ = wo_ = c_ = None
    for name in ("layer2", "layer3", "layer4"):
        xs = _prep_s2d(raw, bn=bn)
        raw, stats = pallas_conv_s2d(xs, _w_to_s2d(params[name + "_w"]),
                                     params[name + "_b"], act="none",
                                     collect_stats=True)
        n_, ho_, wo_, c_ = raw.shape
        mean, rstd = _stats_to_mean_rstd(stats, n_ * ho_ * wo_)
        bn = (mean, rstd, params[name + "_gamma"], params[name + "_beta"])

    # Head: layer4 BN + LeakyReLU + layer5 (512->1 1x1 conv) + Tanh, one kernel.
    mean, rstd, gamma, beta = bn
    m = n_ * ho_ * wo_
    out = pallas_head(raw.reshape(m, c_), mean, rstd, gamma, beta,
                      params["layer5_w"].reshape(-1), params["layer5_b"])
    out = out[:m, :1].reshape(n_, ho_, wo_, 1).transpose(0, 3, 1, 2)   # NCHW
    return out


if __name__ == "__main__":
    key = jax.random.PRNGKey(0)
    kp, kx, ky = jax.random.split(key, 3)

    params = init_params(kp)
    # Small shapes: batch=2, 3-channel images of size 16x16 (x and y each).
    x = jax.random.normal(kx, (2, 3, 16, 16), dtype=jnp.float32)
    y = jax.random.normal(ky, (2, 3, 16, 16), dtype=jnp.float32)

    out = jax.jit(discriminator_forward)(params, x, y)
    out = jax.block_until_ready(out)

    assert out.shape == (2, 1, 1, 1), out.shape
    assert bool(jnp.all(jnp.isfinite(out)))
    print("KERNEL_OK")
</pallas_src>

<mosaic_0001>
module attributes {stable_mosaic.version = 11 : i64} {
  func.func @_conv_s2d_kernel(%arg0: i32, %arg1: i32, %arg2: memref<1x9x9x24xbf16, #tpu.memory_space<vmem>>, %arg3: memref<4x24x64xbf16, #tpu.memory_space<vmem>>, %arg4: memref<1x64xf32, #tpu.memory_space<vmem>>, %arg5: memref<1x8x8x64xbf16, #tpu.memory_space<vmem>>) attributes {dimension_semantics = [#tpu.dimension_semantics<parallel>, #tpu.dimension_semantics<parallel>], iteration_bounds = array<i64: 2, 1>, scalar_prefetch = 0 : i64, scratch_operands = 0 : i64, tpu.core_type = #tpu.core_type<tc>, window_params = [{transform_indices = @transform_0, window_bounds = array<i64: 1, 9, 9, 24>}, {pipeline_mode = #tpu.pipeline_mode<synchronous>, transform_indices = @transform_1, window_bounds = array<i64: 4, 24, 64>}, {pipeline_mode = #tpu.pipeline_mode<synchronous>, transform_indices = @transform_2, window_bounds = array<i64: 1, 64>}, {transform_indices = @transform_3, window_bounds = array<i64: 1, 8, 8, 64>}]} {
    %c8_i32 = arith.constant 8 : i32
    %0 = arith.muli %arg1, %c8_i32 : i32
    %c0 = arith.constant 0 : index
    %c0_0 = arith.constant 0 : index
    %1 = vector.load %arg4[%c0, %c0_0] : memref<1x64xf32, #tpu.memory_space<vmem>>, vector<1x64xf32>
    %c0_i32 = arith.constant 0 : i32
    %c8_i32_1 = arith.constant 8 : i32
    %2 = arith.addi %c0_i32, %c8_i32_1 : i32
    %c1_i32 = arith.constant 1 : i32
    scf.for %arg6 = %c0_i32 to %2 step %c1_i32  : i32 {
      %cst = arith.constant 0.000000e+00 : f32
      %3 = vector.broadcast %cst : f32 to vector<8x64xf32>
      %4 = arith.addi %0, %arg6 : i32
      %c0_i32_3 = arith.constant 0 : i32
      %5 = arith.addi %4, %c0_i32_3 : i32
      %c0_4 = arith.constant 0 : index
      %6 = arith.index_cast %5 : i32 to index
      %c0_5 = arith.constant 0 : index
      %c0_6 = arith.constant 0 : index
      %7 = vector.load %arg2[%c0_4, %6, %c0_5, %c0_6] : memref<1x9x9x24xbf16, #tpu.memory_space<vmem>>, vector<1x1x8x24xbf16>
      %8 = vector.shape_cast %7 : vector<1x1x8x24xbf16> to vector<8x24xbf16>
      %c0_7 = arith.constant 0 : index
      %c0_8 = arith.constant 0 : index
      %c0_9 = arith.constant 0 : index
      %9 = vector.load %arg3[%c0_7, %c0_8, %c0_9] : memref<4x24x64xbf16, #tpu.memory_space<vmem>>, vector<1x24x64xbf16>
      %10 = vector.shape_cast %9 : vector<1x24x64xbf16> to vector<24x64xbf16>
      %cst_10 = arith.constant dense<0.000000e+00> : vector<8x64xf32>
      %11 = tpu.matmul %8, %10, %cst_10 {dimension_numbers = #tpu.dot_dimension_numbers<[1], [0], [0], [1], [0, 0, 1, 1], [], []>} : vector<8x24xbf16>, vector<24x64xbf16>, vector<8x64xf32> -> vector<8x64xf32>
      %12 = arith.addf %3, %11 : vector<8x64xf32>
      %13 = arith.addi %0, %arg6 : i32
      %c0_i32_11 = arith.constant 0 : i32
      %14 = arith.addi %13, %c0_i32_11 : i32
      %c0_12 = arith.constant 0 : index
      %15 = arith.index_cast %14 : i32 to index
      %c1 = arith.constant 1 : index
      %c0_13 = arith.constant 0 : index
      %16 = vector.load %arg2[%c0_12, %15, %c1, %c0_13] : memref<1x9x9x24xbf16, #tpu.memory_space<vmem>>, vector<1x1x8x24xbf16>
      %17 = vector.shape_cast %16 : vector<1x1x8x24xbf16> to vector<8x24xbf16>
      %c1_14 = arith.constant 1 : index
      %c0_15 = arith.constant 0 : index
      %c0_16 = arith.constant 0 : index
      %18 = vector.load %arg3[%c1_14, %c0_15, %c0_16] : memref<4x24x64xbf16, #tpu.memory_space<vmem>>, vector<1x24x64xbf16>
      %19 = vector.shape_cast %18 : vector<1x24x64xbf16> to vector<24x64xbf16>
      %cst_17 = arith.constant dense<0.000000e+00> : vector<8x64xf32>
      %20 = tpu.matmul %17, %19, %cst_17 {dimension_numbers = #tpu.dot_dimension_numbers<[1], [0], [0], [1], [0, 0, 1, 1], [], []>} : vector<8x24xbf16>, vector<24x64xbf16>, vector<8x64xf32> -> vector<8x64xf32>
      %21 = arith.addf %12, %20 : vector<8x64xf32>
      %22 = arith.addi %0, %arg6 : i32
      %c1_i32_18 = arith.constant 1 : i32
      %23 = arith.addi %22, %c1_i32_18 : i32
      %c0_19 = arith.constant 0 : index
      %24 = arith.index_cast %23 : i32 to index
      %c0_20 = arith.constant 0 : index
      %c0_21 = arith.constant 0 : index
      %25 = vector.load %arg2[%c0_19, %24, %c0_20, %c0_21] : memref<1x9x9x24xbf16, #tpu.memory_space<vmem>>, vector<1x1x8x24xbf16>
      %26 = vector.shape_cast %25 : vector<1x1x8x24xbf16> to vector<8x24xbf16>
      %c2 = arith.constant 2 : index
      %c0_22 = arith.constant 0 : index
      %c0_23 = arith.constant 0 : index
      %27 = vector.load %arg3[%c2, %c0_22, %c0_23] : memref<4x24x64xbf16, #tpu.memory_space<vmem>>, vector<1x24x64xbf16>
      %28 = vector.shape_cast %27 : vector<1x24x64xbf16> to vector<24x64xbf16>
      %cst_24 = arith.constant dense<0.000000e+00> : vector<8x64xf32>
      %29 = tpu.matmul %26, %28, %cst_24 {dimension_numbers = #tpu.dot_dimension_numbers<[1], [0], [0], [1], [0, 0, 1, 1], [], []>} : vector<8x24xbf16>, vector<24x64xbf16>, vector<8x64xf32> -> vector<8x64xf32>
      %30 = arith.addf %21, %29 : vector<8x64xf32>
      %31 = arith.addi %0, %arg6 : i32
      %c1_i32_25 = arith.constant 1 : i32
      %32 = arith.addi %31, %c1_i32_25 : i32
      %c0_26 = arith.constant 0 : index
      %33 = arith.index_cast %32 : i32 to index
      %c1_27 = arith.constant 1 : index
      %c0_28 = arith.constant 0 : index
      %34 = vector.load %arg2[%c0_26, %33, %c1_27, %c0_28] : memref<1x9x9x24xbf16, #tpu.memory_space<vmem>>, vector<1x1x8x24xbf16>
      %35 = vector.shape_cast %34 : vector<1x1x8x24xbf16> to vector<8x24xbf16>
      %c3 = arith.constant 3 : index
      %c0_29 = arith.constant 0 : index
      %c0_30 = arith.constant 0 : index
      %36 = vector.load %arg3[%c3, %c0_29, %c0_30] : memref<4x24x64xbf16, #tpu.memory_space<vmem>>, vector<1x24x64xbf16>
      %37 = vector.shape_cast %36 : vector<1x24x64xbf16> to vector<24x64xbf16>
      %cst_31 = arith.constant dense<0.000000e+00> : vector<8x64xf32>
      %38 = tpu.matmul %35, %37, %cst_31 {dimension_numbers = #tpu.dot_dimension_numbers<[1], [0], [0], [1], [0, 0, 1, 1], [], []>} : vector<8x24xbf16>, vector<24x64xbf16>, vector<8x64xf32> -> vector<8x64xf32>
      %39 = arith.addf %30, %38 : vector<8x64xf32>
      %40 = vector.broadcast %1 : vector<1x64xf32> to vector<8x64xf32>
      %41 = arith.addf %39, %40 : vector<8x64xf32>
      %cst_32 = arith.constant 0.000000e+00 : f32
      %42 = vector.broadcast %cst_32 : f32 to vector<8x64xf32>
      %43 = arith.cmpf oge, %41, %42 : vector<8x64xf32>
      %cst_33 = arith.constant 2.000000e-01 : f32
      %44 = vector.broadcast %cst_33 : f32 to vector<8x64xf32>
      %45 = arith.mulf %44, %41 : vector<8x64xf32>
      %46 = arith.select %43, %41, %45 : vector<8x64xi1>, vector<8x64xf32>
      %47 = arith.truncf %46 : vector<8x64xf32> to vector<8x64xbf16>
      %c0_34 = arith.constant 0 : index
      %48 = arith.index_cast %arg6 : i32 to index
      %c0_35 = arith.constant 0 : index
      %c0_36 = arith.constant 0 : index
      %49 = vector.load %arg5[%c0_34, %48, %c0_35, %c0_36] : memref<1x8x8x64xbf16, #tpu.memory_space<vmem>>, vector<1x1x8x64xbf16>
      %50 = vector.shape_cast %49 : vector<1x1x8x64xbf16> to vector<8x64xbf16>
      %51 = vector.shape_cast %47 : vector<8x64xbf16> to vector<1x1x8x64xbf16>
      tpu.vector_store %arg5[%c0_34, %48, %c0_35, %c0_36], %51 {strides = array<i32>} : memref<1x8x8x64xbf16, #tpu.memory_space<vmem>>, vector<1x1x8x64xbf16>,
    }
    %c8_i32_2 = arith.constant 8 : i32
    return
  }
  func.func @transform_0(%arg0: i32, %arg1: i32) -> (i32, i32, i32, i32) {
    %c0_i32 = arith.constant 0 : i32
    %c0_i32_0 = arith.constant 0 : i32
    %c0_i32_1 = arith.constant 0 : i32
    %c0_i32_2 = arith.constant 0 : i32
    return %arg0, %c0_i32, %c0_i32_0, %c0_i32_1 : i32, i32, i32, i32
  }
  func.func @transform_1(%arg0: i32, %arg1: i32) -> (i32, i32, i32) {
    %c0_i32 = arith.constant 0 : i32
    %c0_i32_0 = arith.constant 0 : i32
    %c0_i32_1 = arith.constant 0 : i32
    %c0_i32_2 = arith.constant 0 : i32
    return %c0_i32, %c0_i32_0, %c0_i32_1 : i32, i32, i32
  }
  func.func @transform_2(%arg0: i32, %arg1: i32) -> (i32, i32) {
    %c0_i32 = arith.constant 0 : i32
    %c0_i32_0 = arith.constant 0 : i32
    %c0_i32_1 = arith.constant 0 : i32
    return %c0_i32, %c0_i32_0 : i32, i32
  }
  func.func @transform_3(%arg0: i32, %arg1: i32) -> (i32, i32, i32, i32) {
    %c0_i32 = arith.constant 0 : i32
    %c0_i32_0 = arith.constant 0 : i32
    %c0_i32_1 = arith.constant 0 : i32
    return %arg0, %arg1, %c0_i32, %c0_i32_0 : i32, i32, i32, i32
  }
}

module attributes {stable_mosaic.version = 11 : i64} {
  func.func @_conv_s2d_kernel(%arg0: i32, %arg1: i32, %arg2: memref<1x5x5x256xbf16, #tpu.memory_space<vmem>>, %arg3: memref<4x256x128xbf16, #tpu.memory_space<vmem>>, %arg4: memref<1x128xf32, #tpu.memory_space<vmem>>, %arg5: memref<1x4x4x128xbf16, #tpu.memory_space<vmem>>, %arg6: memref<1x1x8x128xf32, #tpu.memory_space<vmem>>) attributes {dimension_semantics = [#tpu.dimension_semantics<parallel>, #tpu.dimension_semantics<parallel>], iteration_bounds = array<i64: 2, 1>, scalar_prefetch = 0 : i64, scratch_operands = 0 : i64, tpu.core_type = #tpu.core_type<tc>, window_params = [{transform_indices = @transform_0, window_bounds = array<i64: 1, 5, 5, 256>}, {pipeline_mode = #tpu.pipeline_mode<synchronous>, transform_indices = @transform_1, window_bounds = array<i64: 4, 256, 128>}, {pipeline_mode = #tpu.pipeline_mode<synchronous>, transform_indices = @transform_2, window_bounds = array<i64: 1, 128>}, {transform_indices = @transform_3, window_bounds = array<i64: 1, 4, 4, 128>}, {transform_indices = @transform_4, window_bounds = array<i64: 1, 1, 8, 128>}]} {
    %c4_i32 = arith.constant 4 : i32
    %0 = arith.muli %arg1, %c4_i32 : i32
    %c0 = arith.constant 0 : index
    %c0_0 = arith.constant 0 : index
    %1 = vector.load %arg4[%c0, %c0_0] : memref<1x128xf32, #tpu.memory_space<vmem>>, vector<1x128xf32>
    %cst = arith.constant 0.000000e+00 : f32
    %2 = vector.broadcast %cst : f32 to vector<1x128xf32>
    %c0_i32 = arith.constant 0 : i32
    %c4_i32_1 = arith.constant 4 : i32
    %3 = arith.addi %c0_i32, %c4_i32_1 : i32
    %c1_i32 = arith.constant 1 : i32
    %4:2 = scf.for %arg7 = %c0_i32 to %3 step %c1_i32 iter_args(%arg8 = %2, %arg9 = %2) -> (vector<1x128xf32>, vector<1x128xf32>)  : i32 {
      %cst_8 = arith.constant 0.000000e+00 : f32
      %10 = vector.broadcast %cst_8 : f32 to vector<4x128xf32>
      %11 = arith.addi %0, %arg7 : i32
      %c0_i32_9 = arith.constant 0 : i32
      %12 = arith.addi %11, %c0_i32_9 : i32
      %c0_10 = arith.constant 0 : index
      %13 = arith.index_cast %12 : i32 to index
      %c0_11 = arith.constant 0 : index
      %c0_12 = arith.constant 0 : index
      %14 = vector.load %arg2[%c0_10, %13, %c0_11, %c0_12] : memref<1x5x5x256xbf16, #tpu.memory_space<vmem>>, vector<1x1x4x256xbf16>
      %15 = vector.shape_cast %14 : vector<1x1x4x256xbf16> to vector<4x256xbf16>
      %c0_13 = arith.constant 0 : index
      %c0_14 = arith.constant 0 : index
      %c0_15 = arith.constant 0 : index
      %16 = vector.load %arg3[%c0_13, %c0_14, %c0_15] : memref<4x256x128xbf16, #tpu.memory_space<vmem>>, vector<1x256x128xbf16>
      %17 = vector.shape_cast %16 : vector<1x256x128xbf16> to vector<256x128xbf16>
      %cst_16 = arith.constant dense<0.000000e+00> : vector<4x128xf32>
      %18 = tpu.matmul %15, %17, %cst_16 {dimension_numbers = #tpu.dot_dimension_numbers<[1], [0], [0], [1], [0, 0, 1, 1], [], []>} : vector<4x256xbf16>, vector<256x128xbf16>, vector<4x128xf32> -> vector<4x128xf32>
      %19 = arith.addf %10, %18 : vector<4x128xf32>
      %20 = arith.addi %0, %arg7 : i32
      %c0_i32_17 = arith.constant 0 : i32
      %21 = arith.addi %20, %c0_i32_17 : i32
      %c0_18 = arith.constant 0 : index
      %22 = arith.index_cast %21 : i32 to index
      %c1 = arith.constant 1 : index
      %c0_19 = arith.constant 0 : index
      %23 = vector.load %arg2[%c0_18, %22, %c1, %c0_19] : memref<1x5x5x256xbf16, #tpu.memory_space<vmem>>, vector<1x1x4x256xbf16>
      %24 = vector.shape_cast %23 : vector<1x1x4x256xbf16> to vector<4x256xbf16>
      %c1_20 = arith.constant 1 : index
      %c0_21 = arith.constant 0 : index
      %c0_22 = arith.constant 0 : index
      %25 = vector.load %arg3[%c1_20, %c0_21, %c0_22] : memref<4x256x128xbf16, #tpu.memory_space<vmem>>, vector<1x256x128xbf16>
      %26 = vector.shape_cast %25 : vector<1x256x128xbf16> to vector<256x128xbf16>
      %cst_23 = arith.constant dense<0.000000e+00> : vector<4x128xf32>
      %27 = tpu.matmul %24, %26, %cst_23 {dimension_numbers = #tpu.dot_dimension_numbers<[1], [0], [0], [1], [0, 0, 1, 1], [], []>} : vector<4x256xbf16>, vector<256x128xbf16>, vector<4x128xf32> -> vector<4x128xf32>
      %28 = arith.addf %19, %27 : vector<4x128xf32>
      %29 = arith.addi %0, %arg7 : i32
      %c1_i32_24 = arith.constant 1 : i32
      %30 = arith.addi %29, %c1_i32_24 : i32
      %c0_25 = arith.constant 0 : index
      %31 = arith.index_cast %30 : i32 to index
      %c0_26 = arith.constant 0 : index
      %c0_27 = arith.constant 0 : index
      %32 = vector.load %arg2[%c0_25, %31, %c0_26, %c0_27] : memref<1x5x5x256xbf16, #tpu.memory_space<vmem>>, vector<1x1x4x256xbf16>
      %33 = vector.shape_cast %32 : vector<1x1x4x256xbf16> to vector<4x256xbf16>
      %c2 = arith.constant 2 : index
      %c0_28 = arith.constant 0 : index
      %c0_29 = arith.constant 0 : index
      %34 = vector.load %arg3[%c2, %c0_28, %c0_29] : memref<4x256x128xbf16, #tpu.memory_space<vmem>>, vector<1x256x128xbf16>
      %35 = vector.shape_cast %34 : vector<1x256x128xbf16> to vector<256x128xbf16>
      %cst_30 = arith.constant dense<0.000000e+00> : vector<4x128xf32>
      %36 = tpu.matmul %33, %35, %cst_30 {dimension_numbers = #tpu.dot_dimension_numbers<[1], [0], [0], [1], [0, 0, 1, 1], [], []>} : vector<4x256xbf16>, vector<256x128xbf16>, vector<4x128xf32> -> vector<4x128xf32>
      %37 = arith.addf %28, %36 : vector<4x128xf32>
      %38 = arith.addi %0, %arg7 : i32
      %c1_i32_31 = arith.constant 1 : i32
      %39 = arith.addi %38, %c1_i32_31 : i32
      %c0_32 = arith.constant 0 : index
      %40 = arith.index_cast %39 : i32 to index
      %c1_33 = arith.constant 1 : index
      %c0_34 = arith.constant 0 : index
      %41 = vector.load %arg2[%c0_32, %40, %c1_33, %c0_34] : memref<1x5x5x256xbf16, #tpu.memory_space<vmem>>, vector<1x1x4x256xbf16>
      %42 = vector.shape_cast %41 : vector<1x1x4x256xbf16> to vector<4x256xbf16>
      %c3 = arith.constant 3 : index
      %c0_35 = arith.constant 0 : index
      %c0_36 = arith.constant 0 : index
      %43 = vector.load %arg3[%c3, %c0_35, %c0_36] : memref<4x256x128xbf16, #tpu.memory_space<vmem>>, vector<1x256x128xbf16>
      %44 = vector.shape_cast %43 : vector<1x256x128xbf16> to vector<256x128xbf16>
      %cst_37 = arith.constant dense<0.000000e+00> : vector<4x128xf32>
      %45 = tpu.matmul %42, %44, %cst_37 {dimension_numbers = #tpu.dot_dimension_numbers<[1], [0], [0], [1], [0, 0, 1, 1], [], []>} : vector<4x256xbf16>, vector<256x128xbf16>, vector<4x128xf32> -> vector<4x128xf32>
      %46 = arith.addf %37, %45 : vector<4x128xf32>
      %47 = vector.broadcast %1 : vector<1x128xf32> to vector<4x128xf32>
      %48 = arith.addf %46, %47 : vector<4x128xf32>
      %49 = arith.truncf %48 : vector<4x128xf32> to vector<4x128xbf16>
      %c0_38 = arith.constant 0 : index
      %50 = arith.index_cast %arg7 : i32 to index
      %c0_39 = arith.constant 0 : index
      %c0_40 = arith.constant 0 : index
      %51 = vector.load %arg5[%c0_38, %50, %c0_39, %c0_40] : memref<1x4x4x128xbf16, #tpu.memory_space<vmem>>, vector<1x1x4x128xbf16>
      %52 = vector.shape_cast %51 : vector<1x1x4x128xbf16> to vector<4x128xbf16>
      %53 = vector.shape_cast %49 : vector<4x128xbf16> to vector<1x1x4x128xbf16>
      tpu.vector_store %arg5[%c0_38, %50, %c0_39, %c0_40], %53 {strides = array<i32>} : memref<1x4x4x128xbf16, #tpu.memory_space<vmem>>, vector<1x1x4x128xbf16>,
      %cst_41 = arith.constant dense<0.000000e+00> : vector<128xf32>
      %54 = vector.multi_reduction <add>, %48, %cst_41 [0] : vector<4x128xf32> to vector<128xf32>
      %55 = vector.shape_cast %54 : vector<128xf32> to vector<1x128xf32>
      %56 = arith.addf %arg8, %55 : vector<1x128xf32>
      %57 = arith.mulf %48, %48 : vector<4x128xf32>
      %cst_42 = arith.constant dense<0.000000e+00> : vector<128xf32>
      %58 = vector.multi_reduction <add>, %57, %cst_42 [0] : vector<4x128xf32> to vector<128xf32>
      %59 = vector.shape_cast %58 : vector<128xf32> to vector<1x128xf32>
      %60 = arith.addf %arg9, %59 : vector<1x128xf32>
      scf.yield %56, %60 : vector<1x128xf32>, vector<1x128xf32>
    }
    %c4_i32_2 = arith.constant 4 : i32
    %cst_3 = arith.constant 0.000000e+00 : f32
    %5 = vector.broadcast %cst_3 : f32 to vector<6x128xf32>
    %6 = tpu.concatenate %4#0, %4#1, %5 in 0 : vector<1x128xf32>, vector<1x128xf32>, vector<6x128xf32> -> vector<8x128xf32>
    %c0_4 = arith.constant 0 : index
    %c0_5 = arith.constant 0 : index
    %c0_6 = arith.constant 0 : index
    %c0_7 = arith.constant 0 : index
    %7 = vector.load %arg6[%c0_4, %c0_5, %c0_6, %c0_7] : memref<1x1x8x128xf32, #tpu.memory_space<vmem>>, vector<1x1x8x128xf32>
    %8 = vector.shape_cast %7 : vector<1x1x8x128xf32> to vector<8x128xf32>
    %9 = vector.shape_cast %6 : vector<8x128xf32> to vector<1x1x8x128xf32>
    tpu.vector_store %arg6[%c0_4, %c0_5, %c0_6, %c0_7], %9 {strides = array<i32>} : memref<1x1x8x128xf32, #tpu.memory_space<vmem>>, vector<1x1x8x128xf32>,
    return
  }
  func.func @transform_0(%arg0: i32, %arg1: i32) -> (i32, i32, i32, i32) {
    %c0_i32 = arith.constant 0 : i32
    %c0_i32_0 = arith.constant 0 : i32
    %c0_i32_1 = arith.constant 0 : i32
    %c0_i32_2 = arith.constant 0 : i32
    return %arg0, %c0_i32, %c0_i32_0, %c0_i32_1 : i32, i32, i32, i32
  }
  func.func @transform_1(%arg0: i32, %arg1: i32) -> (i32, i32, i32) {
    %c0_i32 = arith.constant 0 : i32
    %c0_i32_0 = arith.constant 0 : i32
    %c0_i32_1 = arith.constant 0 : i32
    %c0_i32_2 = arith.constant 0 : i32
    return %c0_i32, %c0_i32_0, %c0_i32_1 : i32, i32, i32
  }
  func.func @transform_2(%arg0: i32, %arg1: i32) -> (i32, i32) {
    %c0_i32 = arith.constant 0 : i32
    %c0_i32_0 = arith.constant 0 : i32
    %c0_i32_1 = arith.constant 0 : i32
    return %c0_i32, %c0_i32_0 : i32, i32
  }
  func.func @transform_3(%arg0: i32, %arg1: i32) -> (i32, i32, i32, i32) {
    %c0_i32 = arith.constant 0 : i32
    %c0_i32_0 = arith.constant 0 : i32
    %c0_i32_1 = arith.constant 0 : i32
    return %arg0, %arg1, %c0_i32, %c0_i32_0 : i32, i32, i32, i32
  }
  func.func @transform_4(%arg0: i32, %arg1: i32) -> (i32, i32, i32, i32) {
    %c0_i32 = arith.constant 0 : i32
    %c0_i32_0 = arith.constant 0 : i32
    %c0_i32_1 = arith.constant 0 : i32
    return %arg0, %arg1, %c0_i32, %c0_i32_0 : i32, i32, i32, i32
  }
}

module attributes {stable_mosaic.version = 11 : i64} {
  func.func @_conv_s2d_kernel(%arg0: i32, %arg1: i32, %arg2: memref<1x3x3x512xbf16, #tpu.memory_space<vmem>>, %arg3: memref<4x512x256xbf16, #tpu.memory_space<vmem>>, %arg4: memref<1x256xf32, #tpu.memory_space<vmem>>, %arg5: memref<1x2x2x256xbf16, #tpu.memory_space<vmem>>, %arg6: memref<1x1x8x256xf32, #tpu.memory_space<vmem>>) attributes {dimension_semantics = [#tpu.dimension_semantics<parallel>, #tpu.dimension_semantics<parallel>], iteration_bounds = array<i64: 2, 1>, scalar_prefetch = 0 : i64, scratch_operands = 0 : i64, tpu.core_type = #tpu.core_type<tc>, window_params = [{transform_indices = @transform_0, window_bounds = array<i64: 1, 3, 3, 512>}, {pipeline_mode = #tpu.pipeline_mode<synchronous>, transform_indices = @transform_1, window_bounds = array<i64: 4, 512, 256>}, {pipeline_mode = #tpu.pipeline_mode<synchronous>, transform_indices = @transform_2, window_bounds = array<i64: 1, 256>}, {transform_indices = @transform_3, window_bounds = array<i64: 1, 2, 2, 256>}, {transform_indices = @transform_4, window_bounds = array<i64: 1, 1, 8, 256>}]} {
    %c2_i32 = arith.constant 2 : i32
    %0 = arith.muli %arg1, %c2_i32 : i32
    %c0 = arith.constant 0 : index
    %c0_0 = arith.constant 0 : index
    %1 = vector.load %arg4[%c0, %c0_0] : memref<1x256xf32, #tpu.memory_space<vmem>>, vector<1x256xf32>
    %cst = arith.constant 0.000000e+00 : f32
    %2 = vector.broadcast %cst : f32 to vector<1x256xf32>
    %c0_i32 = arith.constant 0 : i32
    %c2_i32_1 = arith.constant 2 : i32
    %3 = arith.addi %c0_i32, %c2_i32_1 : i32
    %c1_i32 = arith.constant 1 : i32
    %4:2 = scf.for %arg7 = %c0_i32 to %3 step %c1_i32 iter_args(%arg8 = %2, %arg9 = %2) -> (vector<1x256xf32>, vector<1x256xf32>)  : i32 {
      %cst_8 = arith.constant 0.000000e+00 : f32
      %10 = vector.broadcast %cst_8 : f32 to vector<2x256xf32>
      %11 = arith.addi %0, %arg7 : i32
      %c0_i32_9 = arith.constant 0 : i32
      %12 = arith.addi %11, %c0_i32_9 : i32
      %c0_10 = arith.constant 0 : index
      %13 = arith.index_cast %12 : i32 to index
      %c0_11 = arith.constant 0 : index
      %c0_12 = arith.constant 0 : index
      %14 = vector.load %arg2[%c0_10, %13, %c0_11, %c0_12] : memref<1x3x3x512xbf16, #tpu.memory_space<vmem>>, vector<1x1x2x512xbf16>
      %15 = vector.shape_cast %14 : vector<1x1x2x512xbf16> to vector<2x512xbf16>
      %c0_13 = arith.constant 0 : index
      %c0_14 = arith.constant 0 : index
      %c0_15 = arith.constant 0 : index
      %16 = vector.load %arg3[%c0_13, %c0_14, %c0_15] : memref<4x512x256xbf16, #tpu.memory_space<vmem>>, vector<1x512x256xbf16>
      %17 = vector.shape_cast %16 : vector<1x512x256xbf16> to vector<512x256xbf16>
      %cst_16 = arith.constant dense<0.000000e+00> : vector<2x256xf32>
      %18 = tpu.matmul %15, %17, %cst_16 {dimension_numbers = #tpu.dot_dimension_numbers<[1], [0], [0], [1], [0, 0, 1, 1], [], []>} : vector<2x512xbf16>, vector<512x256xbf16>, vector<2x256xf32> -> vector<2x256xf32>
      %19 = arith.addf %10, %18 : vector<2x256xf32>
      %20 = arith.addi %0, %arg7 : i32
      %c0_i32_17 = arith.constant 0 : i32
      %21 = arith.addi %20, %c0_i32_17 : i32
      %c0_18 = arith.constant 0 : index
      %22 = arith.index_cast %21 : i32 to index
      %c1 = arith.constant 1 : index
      %c0_19 = arith.constant 0 : index
      %23 = vector.load %arg2[%c0_18, %22, %c1, %c0_19] : memref<1x3x3x512xbf16, #tpu.memory_space<vmem>>, vector<1x1x2x512xbf16>
      %24 = vector.shape_cast %23 : vector<1x1x2x512xbf16> to vector<2x512xbf16>
      %c1_20 = arith.constant 1 : index
      %c0_21 = arith.constant 0 : index
      %c0_22 = arith.constant 0 : index
      %25 = vector.load %arg3[%c1_20, %c0_21, %c0_22] : memref<4x512x256xbf16, #tpu.memory_space<vmem>>, vector<1x512x256xbf16>
      %26 = vector.shape_cast %25 : vector<1x512x256xbf16> to vector<512x256xbf16>
      %cst_23 = arith.constant dense<0.000000e+00> : vector<2x256xf32>
      %27 = tpu.matmul %24, %26, %cst_23 {dimension_numbers = #tpu.dot_dimension_numbers<[1], [0], [0], [1], [0, 0, 1, 1], [], []>} : vector<2x512xbf16>, vector<512x256xbf16>, vector<2x256xf32> -> vector<2x256xf32>
      %28 = arith.addf %19, %27 : vector<2x256xf32>
      %29 = arith.addi %0, %arg7 : i32
      %c1_i32_24 = arith.constant 1 : i32
      %30 = arith.addi %29, %c1_i32_24 : i32
      %c0_25 = arith.constant 0 : index
      %31 = arith.index_cast %30 : i32 to index
      %c0_26 = arith.constant 0 : index
      %c0_27 = arith.constant 0 : index
      %32 = vector.load %arg2[%c0_25, %31, %c0_26, %c0_27] : memref<1x3x3x512xbf16, #tpu.memory_space<vmem>>, vector<1x1x2x512xbf16>
      %33 = vector.shape_cast %32 : vector<1x1x2x512xbf16> to vector<2x512xbf16>
      %c2 = arith.constant 2 : index
      %c0_28 = arith.constant 0 : index
      %c0_29 = arith.constant 0 : index
      %34 = vector.load %arg3[%c2, %c0_28, %c0_29] : memref<4x512x256xbf16, #tpu.memory_space<vmem>>, vector<1x512x256xbf16>
      %35 = vector.shape_cast %34 : vector<1x512x256xbf16> to vector<512x256xbf16>
      %cst_30 = arith.constant dense<0.000000e+00> : vector<2x256xf32>
      %36 = tpu.matmul %33, %35, %cst_30 {dimension_numbers = #tpu.dot_dimension_numbers<[1], [0], [0], [1], [0, 0, 1, 1], [], []>} : vector<2x512xbf16>, vector<512x256xbf16>, vector<2x256xf32> -> vector<2x256xf32>
      %37 = arith.addf %28, %36 : vector<2x256xf32>
      %38 = arith.addi %0, %arg7 : i32
      %c1_i32_31 = arith.constant 1 : i32
      %39 = arith.addi %38, %c1_i32_31 : i32
      %c0_32 = arith.constant 0 : index
      %40 = arith.index_cast %39 : i32 to index
      %c1_33 = arith.constant 1 : index
      %c0_34 = arith.constant 0 : index
      %41 = vector.load %arg2[%c0_32, %40, %c1_33, %c0_34] : memref<1x3x3x512xbf16, #tpu.memory_space<vmem>>, vector<1x1x2x512xbf16>
      %42 = vector.shape_cast %41 : vector<1x1x2x512xbf16> to vector<2x512xbf16>
      %c3 = arith.constant 3 : index
      %c0_35 = arith.constant 0 : index
      %c0_36 = arith.constant 0 : index
      %43 = vector.load %arg3[%c3, %c0_35, %c0_36] : memref<4x512x256xbf16, #tpu.memory_space<vmem>>, vector<1x512x256xbf16>
      %44 = vector.shape_cast %43 : vector<1x512x256xbf16> to vector<512x256xbf16>
      %cst_37 = arith.constant dense<0.000000e+00> : vector<2x256xf32>
      %45 = tpu.matmul %42, %44, %cst_37 {dimension_numbers = #tpu.dot_dimension_numbers<[1], [0], [0], [1], [0, 0, 1, 1], [], []>} : vector<2x512xbf16>, vector<512x256xbf16>, vector<2x256xf32> -> vector<2x256xf32>
      %46 = arith.addf %37, %45 : vector<2x256xf32>
      %47 = vector.broadcast %1 : vector<1x256xf32> to vector<2x256xf32>
      %48 = arith.addf %46, %47 : vector<2x256xf32>
      %49 = arith.truncf %48 : vector<2x256xf32> to vector<2x256xbf16>
      %c0_38 = arith.constant 0 : index
      %50 = arith.index_cast %arg7 : i32 to index
      %c0_39 = arith.constant 0 : index
      %c0_40 = arith.constant 0 : index
      %51 = vector.load %arg5[%c0_38, %50, %c0_39, %c0_40] : memref<1x2x2x256xbf16, #tpu.memory_space<vmem>>, vector<1x1x2x256xbf16>
      %52 = vector.shape_cast %51 : vector<1x1x2x256xbf16> to vector<2x256xbf16>
      %53 = vector.shape_cast %49 : vector<2x256xbf16> to vector<1x1x2x256xbf16>
      tpu.vector_store %arg5[%c0_38, %50, %c0_39, %c0_40], %53 {strides = array<i32>} : memref<1x2x2x256xbf16, #tpu.memory_space<vmem>>, vector<1x1x2x256xbf16>,
      %cst_41 = arith.constant dense<0.000000e+00> : vector<256xf32>
      %54 = vector.multi_reduction <add>, %48, %cst_41 [0] : vector<2x256xf32> to vector<256xf32>
      %55 = vector.shape_cast %54 : vector<256xf32> to vector<1x256xf32>
      %56 = arith.addf %arg8, %55 : vector<1x256xf32>
      %57 = arith.mulf %48, %48 : vector<2x256xf32>
      %cst_42 = arith.constant dense<0.000000e+00> : vector<256xf32>
      %58 = vector.multi_reduction <add>, %57, %cst_42 [0] : vector<2x256xf32> to vector<256xf32>
      %59 = vector.shape_cast %58 : vector<256xf32> to vector<1x256xf32>
      %60 = arith.addf %arg9, %59 : vector<1x256xf32>
      scf.yield %56, %60 : vector<1x256xf32>, vector<1x256xf32>
    }
    %c2_i32_2 = arith.constant 2 : i32
    %cst_3 = arith.constant 0.000000e+00 : f32
    %5 = vector.broadcast %cst_3 : f32 to vector<6x256xf32>
    %6 = tpu.concatenate %4#0, %4#1, %5 in 0 : vector<1x256xf32>, vector<1x256xf32>, vector<6x256xf32> -> vector<8x256xf32>
    %c0_4 = arith.constant 0 : index
    %c0_5 = arith.constant 0 : index
    %c0_6 = arith.constant 0 : index
    %c0_7 = arith.constant 0 : index
    %7 = vector.load %arg6[%c0_4, %c0_5, %c0_6, %c0_7] : memref<1x1x8x256xf32, #tpu.memory_space<vmem>>, vector<1x1x8x256xf32>
    %8 = vector.shape_cast %7 : vector<1x1x8x256xf32> to vector<8x256xf32>
    %9 = vector.shape_cast %6 : vector<8x256xf32> to vector<1x1x8x256xf32>
    tpu.vector_store %arg6[%c0_4, %c0_5, %c0_6, %c0_7], %9 {strides = array<i32>} : memref<1x1x8x256xf32, #tpu.memory_space<vmem>>, vector<1x1x8x256xf32>,
    return
  }
  func.func @transform_0(%arg0: i32, %arg1: i32) -> (i32, i32, i32, i32) {
    %c0_i32 = arith.constant 0 : i32
    %c0_i32_0 = arith.constant 0 : i32
    %c0_i32_1 = arith.constant 0 : i32
    %c0_i32_2 = arith.constant 0 : i32
    return %arg0, %c0_i32, %c0_i32_0, %c0_i32_1 : i32, i32, i32, i32
  }
  func.func @transform_1(%arg0: i32, %arg1: i32) -> (i32, i32, i32) {
    %c0_i32 = arith.constant 0 : i32
    %c0_i32_0 = arith.constant 0 : i32
    %c0_i32_1 = arith.constant 0 : i32
    %c0_i32_2 = arith.constant 0 : i32
    return %c0_i32, %c0_i32_0, %c0_i32_1 : i32, i32, i32
  }
  func.func @transform_2(%arg0: i32, %arg1: i32) -> (i32, i32) {
    %c0_i32 = arith.constant 0 : i32
    %c0_i32_0 = arith.constant 0 : i32
    %c0_i32_1 = arith.constant 0 : i32
    return %c0_i32, %c0_i32_0 : i32, i32
  }
  func.func @transform_3(%arg0: i32, %arg1: i32) -> (i32, i32, i32, i32) {
    %c0_i32 = arith.constant 0 : i32
    %c0_i32_0 = arith.constant 0 : i32
    %c0_i32_1 = arith.constant 0 : i32
    return %arg0, %arg1, %c0_i32, %c0_i32_0 : i32, i32, i32, i32
  }
  func.func @transform_4(%arg0: i32, %arg1: i32) -> (i32, i32, i32, i32) {
    %c0_i32 = arith.constant 0 : i32
    %c0_i32_0 = arith.constant 0 : i32
    %c0_i32_1 = arith.constant 0 : i32
    return %arg0, %arg1, %c0_i32, %c0_i32_0 : i32, i32, i32, i32
  }
}

module attributes {stable_mosaic.version = 11 : i64} {
  func.func @_conv_s2d_kernel(%arg0: i32, %arg1: i32, %arg2: memref<1x2x2x1024xbf16, #tpu.memory_space<vmem>>, %arg3: memref<4x1024x512xbf16, #tpu.memory_space<vmem>>, %arg4: memref<1x512xf32, #tpu.memory_space<vmem>>, %arg5: memref<1x1x1x512xbf16, #tpu.memory_space<vmem>>, %arg6: memref<1x1x8x512xf32, #tpu.memory_space<vmem>>) attributes {dimension_semantics = [#tpu.dimension_semantics<parallel>, #tpu.dimension_semantics<parallel>], iteration_bounds = array<i64: 2, 1>, scalar_prefetch = 0 : i64, scratch_operands = 0 : i64, tpu.core_type = #tpu.core_type<tc>, window_params = [{transform_indices = @transform_0, window_bounds = array<i64: 1, 2, 2, 1024>}, {pipeline_mode = #tpu.pipeline_mode<synchronous>, transform_indices = @transform_1, window_bounds = array<i64: 4, 1024, 512>}, {pipeline_mode = #tpu.pipeline_mode<synchronous>, transform_indices = @transform_2, window_bounds = array<i64: 1, 512>}, {transform_indices = @transform_3, window_bounds = array<i64: 1, 1, 1, 512>}, {transform_indices = @transform_4, window_bounds = array<i64: 1, 1, 8, 512>}]} {
    %c1_i32 = arith.constant 1 : i32
    %0 = arith.muli %arg1, %c1_i32 : i32
    %c0 = arith.constant 0 : index
    %c0_0 = arith.constant 0 : index
    %1 = vector.load %arg4[%c0, %c0_0] : memref<1x512xf32, #tpu.memory_space<vmem>>, vector<1x512xf32>
    %cst = arith.constant 0.000000e+00 : f32
    %2 = vector.broadcast %cst : f32 to vector<1x512xf32>
    %c0_i32 = arith.constant 0 : i32
    %cst_1 = arith.constant 0.000000e+00 : f32
    %3 = vector.broadcast %cst_1 : f32 to vector<1x512xf32>
    %4 = arith.addi %0, %c0_i32 : i32
    %c0_i32_2 = arith.constant 0 : i32
    %5 = arith.addi %4, %c0_i32_2 : i32
    %c0_3 = arith.constant 0 : index
    %6 = arith.index_cast %5 : i32 to index
    %c0_4 = arith.constant 0 : index
    %c0_5 = arith.constant 0 : index
    %7 = vector.load %arg2[%c0_3, %6, %c0_4, %c0_5] : memref<1x2x2x1024xbf16, #tpu.memory_space<vmem>>, vector<1x1x1x1024xbf16>
    %8 = vector.shape_cast %7 : vector<1x1x1x1024xbf16> to vector<1x1024xbf16>
    %c0_6 = arith.constant 0 : index
    %c0_7 = arith.constant 0 : index
    %c0_8 = arith.constant 0 : index
    %9 = vector.load %arg3[%c0_6, %c0_7, %c0_8] : memref<4x1024x512xbf16, #tpu.memory_space<vmem>>, vector<1x1024x512xbf16>
    %10 = vector.shape_cast %9 : vector<1x1024x512xbf16> to vector<1024x512xbf16>
    %cst_9 = arith.constant dense<0.000000e+00> : vector<1x512xf32>
    %11 = tpu.matmul %8, %10, %cst_9 {dimension_numbers = #tpu.dot_dimension_numbers<[1], [0], [0], [1], [0, 0, 1, 1], [], []>} : vector<1x1024xbf16>, vector<1024x512xbf16>, vector<1x512xf32> -> vector<1x512xf32>
    %12 = arith.addf %3, %11 : vector<1x512xf32>
    %13 = arith.addi %0, %c0_i32 : i32
    %c0_i32_10 = arith.constant 0 : i32
    %14 = arith.addi %13, %c0_i32_10 : i32
    %c0_11 = arith.constant 0 : index
    %15 = arith.index_cast %14 : i32 to index
    %c1 = arith.constant 1 : index
    %c0_12 = arith.constant 0 : index
    %16 = vector.load %arg2[%c0_11, %15, %c1, %c0_12] : memref<1x2x2x1024xbf16, #tpu.memory_space<vmem>>, vector<1x1x1x1024xbf16>
    %17 = vector.shape_cast %16 : vector<1x1x1x1024xbf16> to vector<1x1024xbf16>
    %c1_13 = arith.constant 1 : index
    %c0_14 = arith.constant 0 : index
    %c0_15 = arith.constant 0 : index
    %18 = vector.load %arg3[%c1_13, %c0_14, %c0_15] : memref<4x1024x512xbf16, #tpu.memory_space<vmem>>, vector<1x1024x512xbf16>
    %19 = vector.shape_cast %18 : vector<1x1024x512xbf16> to vector<1024x512xbf16>
    %cst_16 = arith.constant dense<0.000000e+00> : vector<1x512xf32>
    %20 = tpu.matmul %17, %19, %cst_16 {dimension_numbers = #tpu.dot_dimension_numbers<[1], [0], [0], [1], [0, 0, 1, 1], [], []>} : vector<1x1024xbf16>, vector<1024x512xbf16>, vector<1x512xf32> -> vector<1x512xf32>
    %21 = arith.addf %12, %20 : vector<1x512xf32>
    %22 = arith.addi %0, %c0_i32 : i32
    %c1_i32_17 = arith.constant 1 : i32
    %23 = arith.addi %22, %c1_i32_17 : i32
    %c0_18 = arith.constant 0 : index
    %24 = arith.index_cast %23 : i32 to index
    %c0_19 = arith.constant 0 : index
    %c0_20 = arith.constant 0 : index
    %25 = vector.load %arg2[%c0_18, %24, %c0_19, %c0_20] : memref<1x2x2x1024xbf16, #tpu.memory_space<vmem>>, vector<1x1x1x1024xbf16>
    %26 = vector.shape_cast %25 : vector<1x1x1x1024xbf16> to vector<1x1024xbf16>
    %c2 = arith.constant 2 : index
    %c0_21 = arith.constant 0 : index
    %c0_22 = arith.constant 0 : index
    %27 = vector.load %arg3[%c2, %c0_21, %c0_22] : memref<4x1024x512xbf16, #tpu.memory_space<vmem>>, vector<1x1024x512xbf16>
    %28 = vector.shape_cast %27 : vector<1x1024x512xbf16> to vector<1024x512xbf16>
    %cst_23 = arith.constant dense<0.000000e+00> : vector<1x512xf32>
    %29 = tpu.matmul %26, %28, %cst_23 {dimension_numbers = #tpu.dot_dimension_numbers<[1], [0], [0], [1], [0, 0, 1, 1], [], []>} : vector<1x1024xbf16>, vector<1024x512xbf16>, vector<1x512xf32> -> vector<1x512xf32>
    %30 = arith.addf %21, %29 : vector<1x512xf32>
    %31 = arith.addi %0, %c0_i32 : i32
    %c1_i32_24 = arith.constant 1 : i32
    %32 = arith.addi %31, %c1_i32_24 : i32
    %c0_25 = arith.constant 0 : index
    %33 = arith.index_cast %32 : i32 to index
    %c1_26 = arith.constant 1 : index
    %c0_27 = arith.constant 0 : index
    %34 = vector.load %arg2[%c0_25, %33, %c1_26, %c0_27] : memref<1x2x2x1024xbf16, #tpu.memory_space<vmem>>, vector<1x1x1x1024xbf16>
    %35 = vector.shape_cast %34 : vector<1x1x1x1024xbf16> to vector<1x1024xbf16>
    %c3 = arith.constant 3 : index
    %c0_28 = arith.constant 0 : index
    %c0_29 = arith.constant 0 : index
    %36 = vector.load %arg3[%c3, %c0_28, %c0_29] : memref<4x1024x512xbf16, #tpu.memory_space<vmem>>, vector<1x1024x512xbf16>
    %37 = vector.shape_cast %36 : vector<1x1024x512xbf16> to vector<1024x512xbf16>
    %cst_30 = arith.constant dense<0.000000e+00> : vector<1x512xf32>
    %38 = tpu.matmul %35, %37, %cst_30 {dimension_numbers = #tpu.dot_dimension_numbers<[1], [0], [0], [1], [0, 0, 1, 1], [], []>} : vector<1x1024xbf16>, vector<1024x512xbf16>, vector<1x512xf32> -> vector<1x512xf32>
    %39 = arith.addf %30, %38 : vector<1x512xf32>
    %40 = arith.addf %39, %1 : vector<1x512xf32>
    %41 = arith.truncf %40 : vector<1x512xf32> to vector<1x512xbf16>
    %c0_31 = arith.constant 0 : index
    %42 = arith.index_cast %c0_i32 : i32 to index
    %c0_32 = arith.constant 0 : index
    %c0_33 = arith.constant 0 : index
    %43 = vector.load %arg5[%c0_31, %42, %c0_32, %c0_33] : memref<1x1x1x512xbf16, #tpu.memory_space<vmem>>, vector<1x1x1x512xbf16>
    %44 = vector.shape_cast %43 : vector<1x1x1x512xbf16> to vector<1x512xbf16>
    %45 = vector.shape_cast %41 : vector<1x512xbf16> to vector<1x1x1x512xbf16>
    tpu.vector_store %arg5[%c0_31, %42, %c0_32, %c0_33], %45 {strides = array<i32>} : memref<1x1x1x512xbf16, #tpu.memory_space<vmem>>, vector<1x1x1x512xbf16>,
    %cst_34 = arith.constant dense<0.000000e+00> : vector<512xf32>
    %46 = vector.multi_reduction <add>, %40, %cst_34 [0] : vector<1x512xf32> to vector<512xf32>
    %47 = vector.shape_cast %46 : vector<512xf32> to vector<1x512xf32>
    %48 = arith.addf %2, %47 : vector<1x512xf32>
    %49 = arith.mulf %40, %40 : vector<1x512xf32>
    %cst_35 = arith.constant dense<0.000000e+00> : vector<512xf32>
    %50 = vector.multi_reduction <add>, %49, %cst_35 [0] : vector<1x512xf32> to vector<512xf32>
    %51 = vector.shape_cast %50 : vector<512xf32> to vector<1x512xf32>
    %52 = arith.addf %2, %51 : vector<1x512xf32>
    %c1_i32_36 = arith.constant 1 : i32
    %cst_37 = arith.constant 0.000000e+00 : f32
    %53 = vector.broadcast %cst_37 : f32 to vector<6x512xf32>
    %54 = tpu.concatenate %48, %52, %53 in 0 : vector<1x512xf32>, vector<1x512xf32>, vector<6x512xf32> -> vector<8x512xf32>
    %c0_38 = arith.constant 0 : index
    %c0_39 = arith.constant 0 : index
    %c0_40 = arith.constant 0 : index
    %c0_41 = arith.constant 0 : index
    %55 = vector.load %arg6[%c0_38, %c0_39, %c0_40, %c0_41] : memref<1x1x8x512xf32, #tpu.memory_space<vmem>>, vector<1x1x8x512xf32>
    %56 = vector.shape_cast %55 : vector<1x1x8x512xf32> to vector<8x512xf32>
    %57 = vector.shape_cast %54 : vector<8x512xf32> to vector<1x1x8x512xf32>
    tpu.vector_store %arg6[%c0_38, %c0_39, %c0_40, %c0_41], %57 {strides = array<i32>} : memref<1x1x8x512xf32, #tpu.memory_space<vmem>>, vector<1x1x8x512xf32>,
    return
  }
  func.func @transform_0(%arg0: i32, %arg1: i32) -> (i32, i32, i32, i32) {
    %c0_i32 = arith.constant 0 : i32
    %c0_i32_0 = arith.constant 0 : i32
    %c0_i32_1 = arith.constant 0 : i32
    %c0_i32_2 = arith.constant 0 : i32
    return %arg0, %c0_i32, %c0_i32_0, %c0_i32_1 : i32, i32, i32, i32
  }
  func.func @transform_1(%arg0: i32, %arg1: i32) -> (i32, i32, i32) {
    %c0_i32 = arith.constant 0 : i32
    %c0_i32_0 = arith.constant 0 : i32
    %c0_i32_1 = arith.constant 0 : i32
    %c0_i32_2 = arith.constant 0 : i32
    return %c0_i32, %c0_i32_0, %c0_i32_1 : i32, i32, i32
  }
  func.func @transform_2(%arg0: i32, %arg1: i32) -> (i32, i32) {
    %c0_i32 = arith.constant 0 : i32
    %c0_i32_0 = arith.constant 0 : i32
    %c0_i32_1 = arith.constant 0 : i32
    return %c0_i32, %c0_i32_0 : i32, i32
  }
  func.func @transform_3(%arg0: i32, %arg1: i32) -> (i32, i32, i32, i32) {
    %c0_i32 = arith.constant 0 : i32
    %c0_i32_0 = arith.constant 0 : i32
    %c0_i32_1 = arith.constant 0 : i32
    return %arg0, %arg1, %c0_i32, %c0_i32_0 : i32, i32, i32, i32
  }
  func.func @transform_4(%arg0: i32, %arg1: i32) -> (i32, i32, i32, i32) {
    %c0_i32 = arith.constant 0 : i32
    %c0_i32_0 = arith.constant 0 : i32
    %c0_i32_1 = arith.constant 0 : i32
    return %arg0, %arg1, %c0_i32, %c0_i32_0 : i32, i32, i32, i32
  }
}

module attributes {stable_mosaic.version = 11 : i64} {
  func.func @_head_kernel(%arg0: i32, %arg1: memref<2x512xbf16, #tpu.memory_space<vmem>>, %arg2: memref<1x512xf32, #tpu.memory_space<vmem>>, %arg3: memref<1x512xf32, #tpu.memory_space<vmem>>, %arg4: memref<1x512xf32, #tpu.memory_space<vmem>>, %arg5: memref<1x512xf32, #tpu.memory_space<vmem>>, %arg6: memref<1x512xf32, #tpu.memory_space<vmem>>, %arg7: memref<1x1xf32, #tpu.memory_space<vmem>>, %arg8: memref<2x128xf32, #tpu.memory_space<vmem>>) attributes {dimension_semantics = [#tpu.dimension_semantics<parallel>], iteration_bounds = array<i64: 1>, scalar_prefetch = 0 : i64, scratch_operands = 0 : i64, tpu.core_type = #tpu.core_type<tc>, window_params = [{transform_indices = @transform_0, window_bounds = array<i64: 2, 512>}, {pipeline_mode = #tpu.pipeline_mode<synchronous>, transform_indices = @transform_1, window_bounds = array<i64: 1, 512>}, {pipeline_mode = #tpu.pipeline_mode<synchronous>, transform_indices = @transform_2, window_bounds = array<i64: 1, 512>}, {pipeline_mode = #tpu.pipeline_mode<synchronous>, transform_indices = @transform_3, window_bounds = array<i64: 1, 512>}, {pipeline_mode = #tpu.pipeline_mode<synchronous>, transform_indices = @transform_4, window_bounds = array<i64: 1, 512>}, {pipeline_mode = #tpu.pipeline_mode<synchronous>, transform_indices = @transform_5, window_bounds = array<i64: 1, 512>}, {pipeline_mode = #tpu.pipeline_mode<synchronous>, transform_indices = @transform_6, window_bounds = array<i64: 1, 1>}, {transform_indices = @transform_7, window_bounds = array<i64: 2, 128>}]} {
    %c0 = arith.constant 0 : index
    %c0_0 = arith.constant 0 : index
    %0 = vector.load %arg1[%c0, %c0_0] : memref<2x512xbf16, #tpu.memory_space<vmem>>, vector<2x512xbf16>
    %1 = arith.extf %0 : vector<2x512xbf16> to vector<2x512xf32>
    %c0_1 = arith.constant 0 : index
    %c0_2 = arith.constant 0 : index
    %2 = vector.load %arg2[%c0_1, %c0_2] : memref<1x512xf32, #tpu.memory_space<vmem>>, vector<1x512xf32>
    %3 = vector.broadcast %2 : vector<1x512xf32> to vector<2x512xf32>
    %4 = arith.subf %1, %3 : vector<2x512xf32>
    %c0_3 = arith.constant 0 : index
    %c0_4 = arith.constant 0 : index
    %5 = vector.load %arg3[%c0_3, %c0_4] : memref<1x512xf32, #tpu.memory_space<vmem>>, vector<1x512xf32>
    %c0_5 = arith.constant 0 : index
    %c0_6 = arith.constant 0 : index
    %6 = vector.load %arg4[%c0_5, %c0_6] : memref<1x512xf32, #tpu.memory_space<vmem>>, vector<1x512xf32>
    %7 = arith.mulf %5, %6 : vector<1x512xf32>
    %8 = vector.broadcast %7 : vector<1x512xf32> to vector<2x512xf32>
    %9 = arith.mulf %4, %8 : vector<2x512xf32>
    %c0_7 = arith.constant 0 : index
    %c0_8 = arith.constant 0 : index
    %10 = vector.load %arg5[%c0_7, %c0_8] : memref<1x512xf32, #tpu.memory_space<vmem>>, vector<1x512xf32>
    %11 = vector.broadcast %10 : vector<1x512xf32> to vector<2x512xf32>
    %12 = arith.addf %9, %11 : vector<2x512xf32>
    %cst = arith.constant 0.000000e+00 : f32
    %13 = vector.broadcast %cst : f32 to vector<2x512xf32>
    %14 = arith.cmpf oge, %12, %13 : vector<2x512xf32>
    %cst_9 = arith.constant 2.000000e-01 : f32
    %15 = vector.broadcast %cst_9 : f32 to vector<2x512xf32>
    %16 = arith.mulf %15, %12 : vector<2x512xf32>
    %17 = arith.select %14, %12, %16 : vector<2x512xi1>, vector<2x512xf32>
    %c0_10 = arith.constant 0 : index
    %c0_11 = arith.constant 0 : index
    %18 = vector.load %arg6[%c0_10, %c0_11] : memref<1x512xf32, #tpu.memory_space<vmem>>, vector<1x512xf32>
    %19 = vector.broadcast %18 : vector<1x512xf32> to vector<2x512xf32>
    %20 = arith.mulf %17, %19 : vector<2x512xf32>
    %cst_12 = arith.constant dense<0.000000e+00> : vector<2xf32>
    %21 = vector.multi_reduction <add>, %20, %cst_12 [1] : vector<2x512xf32> to vector<2xf32>
    %22 = vector.shape_cast %21 : vector<2xf32> to vector<2x1xf32>
    %c0_13 = arith.constant 0 : index
    %c0_14 = arith.constant 0 : index
    %23 = vector.load %arg7[%c0_13, %c0_14] : memref<1x1xf32, #tpu.memory_space<vmem>>, vector<1x1xf32>
    %24 = vector.broadcast %23 : vector<1x1xf32> to vector<2x1xf32>
    %25 = arith.addf %22, %24 : vector<2x1xf32>
    %26 = math.tanh %25 : vector<2x1xf32>
    %27 = vector.shape_cast %26 : vector<2x1xf32> to vector<2x1xf32>
    %28 = vector.broadcast %27 : vector<2x1xf32> to vector<2x128xf32>
    %c0_15 = arith.constant 0 : index
    %c0_16 = arith.constant 0 : index
    %29 = vector.load %arg8[%c0_15, %c0_16] : memref<2x128xf32, #tpu.memory_space<vmem>>, vector<2x128xf32>
    tpu.vector_store %arg8[%c0_15, %c0_16], %28 {strides = array<i32>} : memref<2x128xf32, #tpu.memory_space<vmem>>, vector<2x128xf32>,
    return
  }
  func.func @transform_0(%arg0: i32) -> (i32, i32) {
    %c0_i32 = arith.constant 0 : i32
    %c0_i32_0 = arith.constant 0 : i32
    return %arg0, %c0_i32 : i32, i32
  }
  func.func @transform_1(%arg0: i32) -> (i32, i32) {
    %c0_i32 = arith.constant 0 : i32
    %c0_i32_0 = arith.constant 0 : i32
    %c0_i32_1 = arith.constant 0 : i32
    return %c0_i32, %c0_i32_0 : i32, i32
  }
  func.func @transform_2(%arg0: i32) -> (i32, i32) {
    %c0_i32 = arith.constant 0 : i32
    %c0_i32_0 = arith.constant 0 : i32
    %c0_i32_1 = arith.constant 0 : i32
    return %c0_i32, %c0_i32_0 : i32, i32
  }
  func.func @transform_3(%arg0: i32) -> (i32, i32) {
    %c0_i32 = arith.constant 0 : i32
    %c0_i32_0 = arith.constant 0 : i32
    %c0_i32_1 = arith.constant 0 : i32
    return %c0_i32, %c0_i32_0 : i32, i32
  }
  func.func @transform_4(%arg0: i32) -> (i32, i32) {
    %c0_i32 = arith.constant 0 : i32
    %c0_i32_0 = arith.constant 0 : i32
    %c0_i32_1 = arith.constant 0 : i32
    return %c0_i32, %c0_i32_0 : i32, i32
  }
  func.func @transform_5(%arg0: i32) -> (i32, i32) {
    %c0_i32 = arith.constant 0 : i32
    %c0_i32_0 = arith.constant 0 : i32
    %c0_i32_1 = arith.constant 0 : i32
    return %c0_i32, %c0_i32_0 : i32, i32
  }
  func.func @transform_6(%arg0: i32) -> (i32, i32) {
    %c0_i32 = arith.constant 0 : i32
    %c0_i32_0 = arith.constant 0 : i32
    %c0_i32_1 = arith.constant 0 : i32
    return %c0_i32, %c0_i32_0 : i32, i32
  }
  func.func @transform_7(%arg0: i32) -> (i32, i32) {
    %c0_i32 = arith.constant 0 : i32
    %c0_i32_0 = arith.constant 0 : i32
    return %arg0, %c0_i32 : i32, i32
  }
}

</mosaic_0001>

<bundles_post_ra>
// kernel: discriminator_forward.5
= control target key start
LH: loop header
LB: loop body
LE: loop exit
PB: predicated region body
PF: predicated region fallthrough
CT: control target
= control target key end

     0   :  { %8 = vsyncpa [#allocation3], 0  ;;  %s846_s12 = smov 0   ;;  %s848_s13 = smov 0   ;;  %s966_s0 = inlined_call_operand.vmem [shape: bf16[2,9,9,24], index: 0, kind: input, shape index: {}]   ;;  %s967_s1 = inlined_call_operand.vmem [shape: bf16[4,24,64], index: 1, kind: input, shape index: {}]   ;;  %s968_s2 = inlined_call_operand.hbm [shape: f32[1,64], index: 2, kind: input, shape index: {}]   ;;  %s969_s3 = inlined_call_operand.vmem [shape: bf16[2,8,8,64], index: 3, kind: output, shape index: {}]  }
   0x1   :  { %s850_s14 = smov 0  }
   0x2 LB: > { %s616_s15 = sadd.s32 4294967295, %s817_s14   ;;  %s26_s16 = sadd.s32 1, %s813_s13  ;;  %s817_s14 = sphi %s850_s14, %s14_s14   ;;  %s813_s13 = sphi %s848_s13, %s973_s13   ;;  %s809_s12 = sphi %s846_s12, %s972_s12  }
   0x3   : > { %p28_p0 = scmp.ge.s32.totalorder %s26_s16, 2  ;;  %p618_p1 = scmp.ge.s32.totalorder %s817_s14, 1 }
   0x4   : > { %p127_p2 = scmp.lt.s32.totalorder %s817_s14, 3  ;;  %p871_p4 = scmp.eq.s32.totalorder %s616_s15, 0 }
   0x5   : > { %s975_s16 = smov (%p28_p0, %s26_s16), 0  ;;  %s823_s19 = smov [#allocation2]  }
   0x6   : > { %p867_p3 = pnand %p618_p1, %p127_p2  ;;  %s143_s20 = sshll.u32 %s823_s19, 4  ;;  %s144_s20 = int_to_ptr.vmem [resolvable:$true] %s143_s20 }
   0x7   : > { %s772_s21 = scalar_lea.vmem %s144_s20, 16  ;;  %s779_s22 = scalar_lea.vmem %s144_s20, 32 }
   0x8   : > { %p710_p5 = pneg %p867_p3  ;;  %p773_p8 = scmp.ne.s32.totalorder %s144_s20, %s772_s21 }
   0x9   : > { %p780_p11 = scmp.lt.s32.totalorder %s144_s20, %s144_s20  ;;  %p781_p12 = scmp.lt.s32.totalorder %s779_s22, %s772_s21 }
   0xa   : > { %p711_p6 = pnand %p871_p4, %p710_p5 }
   0xb   : > { %p782_p13 = por %p781_p12, %p780_p11 }
   0xc   : > { %p763_p7 = pneg %p711_p6 }
   0xe   : > { %p775_p9 = pnand %p773_p8, %p763_p7 }
  0x10   : > { %p776_p10 = pneg %p775_p9 }
  0x12   : > { %p783_p0 = pnand %p782_p13, %p776_p10 }
  0x14   : > { %786 = shalt.err (!%p783_p0)
}
  0x15   : > { %713 = dma.hbm_to_vmem [thread:$0]  (!%p711_p6), %s968_s2, 16, %s144_s20, [#allocation3]  }
  0x16   : > { %164 = sbr.rel (%p867_p3) target bundleno = 259 (0x103), region = 32 }
  0x1b   : > { %804 = dma.done.wait (%p871_p4), [#allocation3], 16  }
  0x1c   : > { %806 = vsyncadd (%p871_p4), [#allocation3], 4294967280  ;;  %p192_p1 = scmp.lt.s32.totalorder %s809_s12, 1  ;;  %v900_v0 = vld [vmem:[#allocation2] ss:$0 sm:$0xff]  ;;  %s902_s6 = smov 0  }
  0x1e   : > { %s977_s12 = smov (!%p192_p1, %s809_s12), 1 }
  0x1f   : > { %s705_s25 = smul.u32 72, %s977_s12  ;;  %s659_s26 = sshll.u32 %s977_s12, 5 }
  0x20   : > { %s893_s29 = scalar_lea.vmem %s969_s3, %s659_s26 }
  0x21   : > { %s898_s5 = scalar_lea.vmem %s966_s0, %s705_s25 }
  0x22 LB: >> { %vm254_vm0 = vcmask 1043456   ;;  %v751_v1 = vld [vmem:[%s967_s1 + $0x8] ss:$0 sps:$4 sm:$0xff]   ;;  %v824_v2 = vmov 0.0   ;;  %v752_v3 = vld [vmem:[%s967_s1 + $0x14] ss:$0 sps:$4 sm:$0xff]   ;;  %s821_s6 = sphi %s902_s6, %s215_s6  }
  0x23   : >> { %681 = vmatprep.subr.bf16.mxu1 %v824_v2  ;;  %673 = vmatprep.subr.bf16.mxu0 %v824_v2  ;;  %v311_v4 = vsel %vm254_vm0, %v751_v1, 0  ;;  %v256_v5 = vsel %vm254_vm0, %v752_v3, 0  ;;  %v753_v6 = vld [vmem:[%s967_s1] sm:$0xff]   ;;  %s660_s15 = sshll.u32 %s821_s6, 3  ;;  %v754_v7 = vld [vmem:[%s967_s1 + $0xc] sm:$0xff]   ;;  %vm825_vm1 = vmmov 0  }
  0x24   : >> { %682 = vmatpush3.bf16.msra.mxu1 %v311_v4  ;;  %674 = vmatpush3.bf16.msra.mxu0 %v256_v5  ;;  %s923_s19 = scalar_lea.vmem %s898_s5, %s660_s15  ;;  %v756_v8 = vld [vmem:[%s967_s1 + $0x2c] ss:$0 sps:$4 sm:$0xff]   ;;  %vm250_vm2 = vcmask 195584   ;;  %v757_v13 = vld [vmem:[%s967_s1 + $0x20] ss:$0 sps:$4 sm:$0xff]   ;;  %v758_v18 = vld [vmem:[%s967_s1 + $0x24] sm:$0xff]  }
  0x25   : >> { %683 = vmatprep.subr.bf16.mxu1 %v824_v2  ;;  %675 = vmatprep.subr.bf16.mxu0 %v824_v2  ;;  %v220_v9 = vld [vmem:[%s923_s19] sm:$0xf]  ;;  %v224_v10 = vld [vmem:[%s923_s19 + $0x4] sm:$0x1]  ;;  %v449_v12 = vsel %vm254_vm0, %v756_v8, 0  ;;  %v375_v22 = vsel %vm254_vm0, %v757_v13, 0 }
  0x26   : >> { %685 = vmatprep.mubr.msk.bf16.mxu1 %vm825_vm1, %v824_v2  ;;  %v631_v11 = vcombine.low %v220_v9, %v224_v10  ;;  %677 = vmatprep.mubr.msk.bf16.mxu0 %vm825_vm1, %v824_v2  ;;  %v760_v16 = vld [vmem:[%s923_s19 + $0x8] sm:$0x1f]   ;;  %v759_v24 = vld [vmem:[%s967_s1 + $0x18] sm:$0xff]   ;;  %s656_s28 = sshll.u32 %s821_s6, 2  ;;  %vm505_vm4 = vcmask 519168   ;;  %s215_s6 = sadd.s32 1, %s821_s6  }
  0x27   : >> { %v430_v19 = vshrl.u32 %v760_v16, 16  ;;  %v432_v20 = vshll.u32 %v760_v16, 16  ;;  %v639_v26 = vld [vmem:[%s923_s19 + $0x8] sm:$0xf]  ;;  %s504_s30 = scalar_lea.vmem %s893_s29, %s656_s28  ;;  %p212_p2 = scmp.ge.s32.totalorder %s215_s6, 8  }
  0x28   : >> { %684 = vmatpush3.bf16.msra.mxu1 %v753_v6  ;;  %676 = vmatpush3.bf16.msra.mxu0 %v754_v7  ;;  %v235_v14 = vshrl.u32 %v631_v11, 16  ;;  %v237_v15 = vshll.u32 %v631_v11, 16 }
  0x29   : >> { %697 = vmatprep.subr.bf16.mxu1 %v824_v2  ;;  %689 = vmatprep.subr.bf16.mxu0 %v824_v2  ;;  %v434_v23 = vrot.slane %v432_v20, 1 }
  0x2a   : >> { %v239_v17 = vrot.slane %v237_v15, 1 }
  0x2b   : >> { %686 = vmatmul.mubr.msk.bf16.vlgmr.msra.gmra.mxu1 %vm250_vm2, %v220_v9  ;;  %v435_v25 = vor.u32 %v434_v23, %v430_v19 }
  0x2c   : >> { %698 = vmatpush3.bf16.msra.mxu1 %v449_v12  ;;  %701 = vmatprep.mubr.msk.bf16.mxu1 %vm825_vm1, %v824_v2  ;;  %v240_v21 = vor.u32 %v239_v17, %v235_v14 }
  0x2d   : >> { %699 = vmatprep.subr.bf16.mxu1 %v824_v2 }
  0x2e   : >> { %678 = vmatmul.mubr.msk.bf16.vlgmr.msra.gmra.mxu0 %vm250_vm2, %v240_v21 }
  0x2f   : >> { %690 = vmatpush3.bf16.msra.mxu0 %v375_v22  ;;  %693 = vmatprep.mubr.msk.bf16.mxu0 %vm825_vm1, %v824_v2 }
  0x30   : >> { %700 = vmatpush3.bf16.msra.mxu1 %v758_v18  ;;  %691 = vmatprep.subr.bf16.mxu0 %v824_v2 }
  0x33   : >> { %702 = vmatmul.mubr.msk.bf16.vlgmr.msra.gmra.mxu1 %vm250_vm2, %v435_v25  ;;  %692 = vmatpush3.bf16.msra.mxu0 %v759_v24 }
  0x36   : >> { %694 = vmatmul.mubr.msk.bf16.vlgmr.msra.gmra.mxu0 %vm250_vm2, %v639_v26 }
  0xeb   : >> { %v347_v27 = vpop.f32.mrf.mxu1 }
  0xed   : >> { %v687_v28 = vpop.f32.mrf.mxu1 }
  0xee   : >> { %v292_v29 = vpop.f32.mrf.mxu0 }
  0xef   : >> { %v350_v30 = vpop.f32.mrf.mxu1  ;;  %v348_v37 = vadd.f32 %v347_v27, %v292_v29 }
  0xf0   : >> { %v679_v31 = vpop.f32.mrf.mxu0 }
  0xf1   : >> { %v688_v32 = vpop.f32.mrf.mxu1 }
  0xf2   : >> { %v295_v33 = vpop.f32.mrf.mxu0 }
  0xf3   : >> { %v485_v34 = vpop.f32.mrf.mxu1 }
  0xf4   : >> { %v680_v35 = vpop.f32.mrf.mxu0 }
  0xf5   : >> { %v703_v36 = vpop.f32.mrf.mxu1 }
  0xf6   : >> { %v411_v38 = vpop.f32.mrf.mxu0 }
  0xf7   : >> { %v488_v39 = vpop.f32.mrf.mxu1  ;;  %v417_v40 = vadd.f32 %v411_v38, %v348_v37 }
  0xf8   : >> { %v695_v41 = vpop.f32.mrf.mxu0 }
  0xf9   : >> { %v704_v42 = vpop.f32.mrf.mxu1  ;;  %v491_v43 = vadd.f32 %v485_v34, %v417_v40 }
  0xfa   : >> { %v414_v44 = vpop.f32.mrf.mxu0 }
  0xfb   : >> { %v498_v45 = vadd.f32 %v900_v0, %v491_v43 }
  0xfc   : >> { %v696_v46 = vpop.f32.mrf.mxu0 }
  0xfd   : >> { %vm499_vm3 = vcmp.ge.f32.partialorder %v498_v45, 0.0  ;;  %v500_v47 = vmul.f32 0.2, %v498_v45 }
  0xfe   : > { %214 = sbr.rel (!%p212_p2) target bundleno = 34 (0x22), region = 80 }
  0xff   : >> { %v501_v48 = vsel %vm499_vm3, %v498_v45, %v500_v47 }
 0x100   : >> { %v502_v49 = vpack.c.bf16 %v501_v48, %v501_v48 }
 0x102   : >> { %506 = vst.msk [vmem:[%s504_s30] sm:$0xf] %vm505_vm4, %v502_v49 }
 0x103 PF: > { %s14_s14 = sadd.s32 1, %s817_s14   ;;  %s972_s12 = smov %s813_s13 }
 0x104   : > { %p11_p3 = scmp.ge.s32.totalorder %s14_s14, 4   ;;  %s973_s13 = smov %s975_s16 }
 0x106   :  { %13 = sbr.rel (!%p11_p3) target bundleno = 2 (0x2), region = 91 }
 0x10b   :  { %537 = vsyncpa [#allocation3], 1 }
 0x10c   :  { %539 = vsyncpa [#allocation3 + $0x1], 1 }

// kernel: discriminator_forward.6
= control target key start
LH: loop header
LB: loop body
LE: loop exit
PB: predicated region body
PF: predicated region fallthrough
CT: control target
= control target key end

     0   :  { %10 = vsyncpa [#allocation3], 0  ;;  %s1713_s15 = smov 0   ;;  %s1715_s16 = smov 0   ;;  %s2011_s0 = inlined_call_operand.vmem [shape: bf16[2,5,5,256], index: 0, kind: input, shape index: {}]   ;;  %s2012_s1 = inlined_call_operand.vmem [shape: bf16[4,256,128], index: 1, kind: input, shape index: {}]   ;;  %s2013_s2 = inlined_call_operand.hbm [shape: f32[1,128], index: 2, kind: input, shape index: {}]   ;;  %s2014_s3 = inlined_call_operand.vmem [shape: bf16[2,4,4,128], index: 3, kind: output, shape index: {0}]   ;;  %s2015_s4 = inlined_call_operand.vmem [shape: f32[2,1,8,128], index: 4, kind: output, shape index: {1}]  }
   0x1   :  { %s1717_s17 = smov 0  }
   0x2 LB: > { %s1199_s18 = sadd.s32 4294967295, %s1673_s17   ;;  %s28_s19 = sadd.s32 1, %s1669_s16  ;;  %s1673_s17 = sphi %s1717_s17, %s16_s17   ;;  %s1669_s16 = sphi %s1715_s16, %s2021_s16   ;;  %s1665_s15 = sphi %s1713_s15, %s2020_s15  }
   0x3   : > { %p30_p0 = scmp.ge.s32.totalorder %s28_s19, 2  ;;  %p1201_p1 = scmp.ge.s32.totalorder %s1673_s17, 1 }
   0x4   : > { %p157_p2 = scmp.lt.s32.totalorder %s1673_s17, 3  ;;  %p1738_p4 = scmp.eq.s32.totalorder %s1199_s18, 0 }
   0x5   : > { %s2023_s19 = smov (%p30_p0, %s28_s19), 0  ;;  %s1687_s22 = smov [#allocation2]  }
   0x6   : > { %p1734_p3 = pnand %p1201_p1, %p157_p2  ;;  %s173_s23 = sshll.u32 %s1687_s22, 4  ;;  %s174_s23 = int_to_ptr.vmem [resolvable:$true] %s173_s23 }
   0x7   : > { %s1620_s24 = scalar_lea.vmem %s174_s23, 16  ;;  %s1627_s25 = scalar_lea.vmem %s174_s23, 32 }
   0x8   : > { %p1482_p5 = pneg %p1734_p3  ;;  %p1621_p8 = scmp.ne.s32.totalorder %s174_s23, %s1620_s24 }
   0x9   : > { %p1628_p11 = scmp.lt.s32.totalorder %s174_s23, %s174_s23  ;;  %p1629_p12 = scmp.lt.s32.totalorder %s1627_s25, %s1620_s24 }
   0xa   : > { %p1483_p6 = pnand %p1738_p4, %p1482_p5 }
   0xb   : > { %p1630_p13 = por %p1629_p12, %p1628_p11 }
   0xc   : > { %p1611_p7 = pneg %p1483_p6 }
   0xe   : > { %p1623_p9 = pnand %p1621_p8, %p1611_p7 }
  0x10   : > { %p1624_p10 = pneg %p1623_p9 }
  0x12   : > { %p1631_p0 = pnand %p1630_p13, %p1624_p10 }
  0x14   : > { %1634 = shalt.err (!%p1631_p0)
}
  0x15   : > { %1485 = dma.hbm_to_vmem [thread:$0]  (!%p1483_p6), %s2013_s2, 16, %s174_s23, [#allocation3]  }
  0x16   : > { %194 = sbr.rel (%p1734_p3) target bundleno = 323 (0x143), region = 32 }
  0x1b   : > { %1660 = dma.done.wait (%p1738_p4), [#allocation3], 16  }
  0x1c   : > { %1662 = vsyncadd (%p1738_p4), [#allocation3], 4294967280  ;;  %p231_p1 = scmp.lt.s32.totalorder %s1665_s15, 1  ;;  %v1772_v0 = vld [vmem:[#allocation2] ss:$0 sm:$0xff]  ;;  %v1774_v1 = vmov 0.0  }
  0x1d   : > { %v1776_v2 = vmov 0.0   ;;  %s1778_s13 = smov 0  }
  0x1e   : > { %s2025_s15 = smov (!%p231_p1, %s1665_s15), 1 }
  0x1f   : > { %s1477_s28 = smul.u32 40, %s2025_s15  ;;  %s1387_s29 = sshll.u32 %s2025_s15, 3 }
  0x20   : > { %s1760_s6 = scalar_lea.vmem %s2014_s3, %s1387_s29  ;;  %s1765_s9 = scalar_lea.vmem %s2015_s4, %s1387_s29 }
  0x21   : > { %s1770_s12 = scalar_lea.vmem %s2011_s0, %s1477_s28 }
  0x22 LB: >> { %v1537_v3 = vld [vmem:[%s2012_s1 + $0xf8] sm:$0xff]   ;;  %v1541_v7 = vld [vmem:[%s2012_s1 + $0xf0] sm:$0xff]   ;;  %v1545_v11 = vld [vmem:[%s2012_s1 + $0xe8] sm:$0xff]   ;;  %s1388_s8 = sshll.u32 %s1685_s13, 3  ;;  %vm1020_vm0 = vcmask 1043456   ;;  %s1685_s13 = sphi %s1778_s13, %s261_s13   ;;  %v1681_v2 = vphi %v1776_v2, %v2019_v2   ;;  %v1677_v1 = vphi %v1774_v1, %v2018_v1  }
  0x23   : >> { %v1538_v4 = vld [vmem:[%s2012_s1 + $0x78] sm:$0xff]   ;;  %1389 = vmatprep.subr.bf16.mxu0 %v1537_v3  ;;  %v1542_v8 = vld [vmem:[%s2012_s1 + $0x70] sm:$0xff]   ;;  %v1546_v12 = vld [vmem:[%s2012_s1 + $0x68] sm:$0xff]   ;;  %s1881_s21 = scalar_lea.vmem %s1770_s12, %s1388_s8 }
  0x24   : >> { %v1539_v5 = vld [vmem:[%s2012_s1 + $0xb8] sm:$0xff]   ;;  %1411 = vmatprep.subr.bf16.mxu1 %v1538_v4  ;;  %v1543_v9 = vld [vmem:[%s2012_s1 + $0xb0] sm:$0xff]   ;;  %v1547_v13 = vld [vmem:[%s2012_s1 + $0xa8] sm:$0xff]  }
  0x25   : >> { %v1540_v6 = vld [vmem:[%s2012_s1 + $0x38] sm:$0xff]   ;;  %1390 = vmatpush3.bf16.msra.mxu0 %v1539_v5  ;;  %v1544_v10 = vld [vmem:[%s2012_s1 + $0x30] sm:$0xff]   ;;  %v1548_v14 = vld [vmem:[%s2012_s1 + $0x28] sm:$0xff]  }
  0x26   : >> { %1412 = vmatpush3.bf16.msra.mxu1 %v1540_v6  ;;  %1391 = vmatprep.subr.bf16.mxu0 %v1541_v7  ;;  %v1549_v15 = vld [vmem:[%s2012_s1 + $0xe0] sm:$0xff]   ;;  %v1553_v19 = vld [vmem:[%s2012_s1 + $0xd8] sm:$0xff]   ;;  %v1557_v23 = vld [vmem:[%s2012_s1 + $0xd0] sm:$0xff]  }
  0x27   : >> { %1413 = vmatprep.subr.bf16.mxu1 %v1542_v8  ;;  %v1550_v16 = vld [vmem:[%s2012_s1 + $0x60] sm:$0xff]   ;;  %v1554_v20 = vld [vmem:[%s2012_s1 + $0x58] sm:$0xff]   ;;  %v1558_v24 = vld [vmem:[%s2012_s1 + $0x50] sm:$0xff]  }
  0x28   : >> { %v1551_v17 = vld [vmem:[%s2012_s1 + $0xa0] sm:$0xff]   ;;  %v1555_v21 = vld [vmem:[%s2012_s1 + $0x98] sm:$0xff]   ;;  %v1559_v25 = vld [vmem:[%s2012_s1 + $0x90] sm:$0xff]  }
  0x29   : >> { %1392 = vmatpush3.bf16.msra.mxu0 %v1543_v9  ;;  %v1552_v18 = vld [vmem:[%s2012_s1 + $0x20] sm:$0xff]   ;;  %v1556_v22 = vld [vmem:[%s2012_s1 + $0x18] sm:$0xff]   ;;  %v1560_v26 = vld [vmem:[%s2012_s1 + $0x10] sm:$0xff]  }
  0x2a   : >> { %1414 = vmatpush3.bf16.msra.mxu1 %v1544_v10  ;;  %1393 = vmatprep.subr.bf16.mxu0 %v1545_v11  ;;  %v1561_v27 = vld [vmem:[%s2012_s1 + $0xc8] sm:$0xff]   ;;  %v1565_v31 = vld [vmem:[%s2012_s1 + $0xc0] sm:$0xff]   ;;  %v1573_v41 = vld [vmem:[%s2012_s1 + $0x178] sm:$0xff]  }
  0x2b   : >> { %1415 = vmatprep.subr.bf16.mxu1 %v1546_v12  ;;  %v1562_v28 = vld [vmem:[%s2012_s1 + $0x48] sm:$0xff]   ;;  %v1566_v32 = vld [vmem:[%s2012_s1 + $0x40] sm:$0xff]   ;;  %v1574_v42 = vld [vmem:[%s2012_s1 + $0x1f8] sm:$0xff]  }
  0x2c   : >> { %v1563_v29 = vld [vmem:[%s2012_s1 + $0x88] sm:$0xff]   ;;  %v1567_v33 = vld [vmem:[%s2012_s1 + $0x80] sm:$0xff]   ;;  %v1575_v49 = vld [vmem:[%s2012_s1 + $0x138] sm:$0xff]  }
  0x2d   : >> { %1394 = vmatpush3.bf16.msra.mxu0 %v1547_v13  ;;  %v1564_v30 = vld [vmem:[%s2012_s1 + $0x8] sm:$0xff]   ;;  %v1568_v34 = vld [vmem:[%s2012_s1] sm:$0xff]   ;;  %v1576_v50 = vld [vmem:[%s2012_s1 + $0x1b8] sm:$0xff]  }
  0x2e   : >> { %1416 = vmatpush3.bf16.msra.mxu1 %v1548_v14  ;;  %1395 = vmatprep.subr.bf16.mxu0 %v1549_v15  ;;  %v301_v35 = vld [vmem:[%s1881_s21] sm:$0x77]  ;;  %v1578_v53 = vld [vmem:[%s2012_s1 + $0x1f0] sm:$0xff]   ;;  %v1582_v57 = vld [vmem:[%s2012_s1 + $0x1e8] sm:$0xff]  }
  0x2f   : >> { %1417 = vmatprep.subr.bf16.mxu1 %v1550_v16  ;;  %v268_v36 = vld [vmem:[%s1881_s21] sm:$0x33]  ;;  %v1244_v37 = vcombine.low %v301_v35, %v301_v35  ;;  %v1245_v38 = vcombine.high %v301_v35, %v301_v35  ;;  %v1577_v54 = vld [vmem:[%s2012_s1 + $0x170] sm:$0xff]   ;;  %v1581_v58 = vld [vmem:[%s2012_s1 + $0x168] sm:$0xff]  }
  0x30   : >> { %v1262_v39 = vcombine.low %v268_v36, %v268_v36  ;;  %v1263_v40 = vcombine.high %v268_v36, %v268_v36  ;;  %v1580_v55 = vld [vmem:[%s2012_s1 + $0x1b0] sm:$0xff]   ;;  %v1584_v59 = vld [vmem:[%s2012_s1 + $0x1a8] sm:$0xff]   ;;  %v1586_v61 = vld [vmem:[%s2012_s1 + $0x1e0] sm:$0xff]  }
  0x31   : >> { %1396 = vmatpush3.bf16.msra.mxu0 %v1551_v17  ;;  %v348_v43 = vshrl.u32 %v1245_v38, 16  ;;  %v350_v44 = vshll.u32 %v1245_v38, 16  ;;  %v341_v45 = vshrl.u32 %v1244_v37, 16  ;;  %v343_v46 = vshll.u32 %v1244_v37, 16  ;;  %v1579_v56 = vld [vmem:[%s2012_s1 + $0x130] sm:$0xff]   ;;  %v1583_v60 = vld [vmem:[%s2012_s1 + $0x128] sm:$0xff]  }
  0x32   : >> { %1418 = vmatpush3.bf16.msra.mxu1 %v1552_v18  ;;  %1397 = vmatprep.subr.bf16.mxu0 %v1553_v19  ;;  %v1585_v62 = vld [vmem:[%s2012_s1 + $0x160] sm:$0xff]   ;;  %v1590_v4 = vld [vmem:[%s2012_s1 + $0x1d8] sm:$0xff]   ;;  %v1594_v8 = vld [vmem:[%s2012_s1 + $0x1d0] sm:$0xff]  }
  0x33   : >> { %1419 = vmatprep.subr.bf16.mxu1 %v1554_v20  ;;  %627 = vmatprep.mubr.bf16.mxu1 %v1263_v40  ;;  %v352_v47 = vrot.slane %v350_v44, 1  ;;  %v345_v48 = vrot.slane %v343_v46, 1  ;;  %v1588_v63 = vld [vmem:[%s2012_s1 + $0x1a0] sm:$0xff]   ;;  %v1589_v5 = vld [vmem:[%s2012_s1 + $0x158] sm:$0xff]   ;;  %v1593_v9 = vld [vmem:[%s2012_s1 + $0x150] sm:$0xff]  }
  0x34   : >> { %v1587_v3 = vld [vmem:[%s2012_s1 + $0x120] sm:$0xff]   ;;  %v1592_v6 = vld [vmem:[%s2012_s1 + $0x198] sm:$0xff]   ;;  %v1596_v10 = vld [vmem:[%s2012_s1 + $0x190] sm:$0xff]  }
  0x35   : >> { %1398 = vmatpush3.bf16.msra.mxu0 %v1555_v21  ;;  %v353_v51 = vor.u32 %v352_v47, %v348_v43  ;;  %v346_v52 = vor.u32 %v345_v48, %v341_v45  ;;  %v1591_v7 = vld [vmem:[%s2012_s1 + $0x118] sm:$0xff]   ;;  %v1595_v11 = vld [vmem:[%s2012_s1 + $0x110] sm:$0xff]   ;;  %v1598_v12 = vld [vmem:[%s2012_s1 + $0x1c8] sm:$0xff]  }
  0x36   : >> { %1420 = vmatpush3.bf16.msra.mxu1 %v1556_v22  ;;  %1399 = vmatprep.subr.bf16.mxu0 %v1557_v23  ;;  %v1597_v13 = vld [vmem:[%s2012_s1 + $0x148] sm:$0xff]   ;;  %v1602_v16 = vld [vmem:[%s2012_s1 + $0x1c0] sm:$0xff]  }
  0x37   : >> { %1421 = vmatprep.subr.bf16.mxu1 %v1558_v24  ;;  %484 = vmatprep.mubr.bf16.mxu0 %v353_v51  ;;  %v1600_v14 = vld [vmem:[%s2012_s1 + $0x188] sm:$0xff]   ;;  %v1601_v17 = vld [vmem:[%s2012_s1 + $0x140] sm:$0xff]  }
  0x38   : >> { %v1599_v15 = vld [vmem:[%s2012_s1 + $0x108] sm:$0xff]   ;;  %v1604_v18 = vld [vmem:[%s2012_s1 + $0x180] sm:$0xff]  }
  0x39   : >> { %1400 = vmatpush3.bf16.msra.mxu0 %v1559_v25  ;;  %v1281_v19 = vld [vmem:[%s1881_s21 + $0x8] sm:$0x33]  ;;  %v1603_v24 = vld [vmem:[%s2012_s1 + $0x100] sm:$0xff]  }
  0x3a   : >> { %1422 = vmatpush3.bf16.msra.mxu1 %v1560_v26  ;;  %1401 = vmatprep.subr.bf16.mxu0 %v1561_v27  ;;  %v1332_v20 = vld [vmem:[%s1881_s21 + $0x8] sm:$0x77]  ;;  %v1315_v21 = vcombine.high %v1281_v19, %v1281_v19  ;;  %s1384_s21 = sshll.u32 %s1685_s13, 1  ;;  %s261_s13 = sadd.s32 1, %s1685_s13  }
  0x3b   : >> { %1423 = vmatprep.subr.bf16.mxu1 %v1562_v28  ;;  %v1365_v22 = vcombine.low %v1332_v20, %v1332_v20  ;;  %v1366_v23 = vcombine.high %v1332_v20, %v1332_v20  ;;  %s1018_s14 = scalar_lea.vmem %s1760_s6, %s1384_s21  ;;  %p258_p2 = scmp.ge.s32.totalorder %s261_s13, 4  }
  0x3c   : > { %vm1038_vm1 = vcmask (%p258_p2), 1040384   ;;  %vm1040_vm2 = vcmask (%p258_p2), 1041408  }
  0x3d   : >> { %1402 = vmatpush3.bf16.msra.mxu0 %v1563_v29  ;;  %v864_v25 = vshrl.u32 %v1366_v23, 16  ;;  %v866_v26 = vshll.u32 %v1366_v23, 16  ;;  %v857_v27 = vshrl.u32 %v1365_v22, 16  ;;  %v859_v28 = vshll.u32 %v1365_v22, 16 }
  0x3e   : >> { %1424 = vmatpush3.bf16.msra.mxu1 %v1564_v30  ;;  %1403 = vmatprep.subr.bf16.mxu0 %v1565_v31  ;;  %v1314_v29 = vcombine.low %v1281_v19, %v1281_v19 }
  0x3f   : >> { %1425 = vmatprep.subr.bf16.mxu1 %v1566_v32  ;;  %v868_v30 = vrot.slane %v866_v26, 1  ;;  %v861_v31 = vrot.slane %v859_v28, 1 }
  0x41   : >> { %1404 = vmatpush3.bf16.msra.mxu0 %v1567_v33  ;;  %v869_v32 = vor.u32 %v868_v30, %v864_v25  ;;  %v862_v33 = vor.u32 %v861_v31, %v857_v27 }
  0x42   : >> { %1426 = vmatpush3.bf16.msra.mxu1 %v1568_v34  ;;  %1433 = vmatprep.subr.bf16.mxu0 %v1573_v41 }
  0x43   : >> { %1455 = vmatprep.subr.bf16.mxu1 %v1574_v42 }
  0x44   : >> { %485 = vmatmul.mubr.bf16.vlgmr.msra.gmra.mxu0 %v346_v52 }
  0x45   : >> { %628 = vmatmul.mubr.bf16.vlgmr.msra.gmra.mxu1 %v1262_v39  ;;  %1434 = vmatpush3.bf16.msra.mxu0 %v1575_v49 }
  0x46   : >> { %1456 = vmatpush3.bf16.msra.mxu1 %v1576_v50  ;;  %1435 = vmatprep.subr.bf16.mxu0 %v1577_v54 }
  0x47   : >> { %1457 = vmatprep.subr.bf16.mxu1 %v1578_v53  ;;  %808 = vmatprep.mubr.bf16.mxu0 %v1315_v21 }
  0x48   : >> { %1000 = vmatprep.mubr.bf16.mxu1 %v869_v32 }
  0x49   : >> { %1436 = vmatpush3.bf16.msra.mxu0 %v1579_v56 }
  0x4a   : >> { %1458 = vmatpush3.bf16.msra.mxu1 %v1580_v55  ;;  %1437 = vmatprep.subr.bf16.mxu0 %v1581_v58 }
  0x4b   : >> { %1459 = vmatprep.subr.bf16.mxu1 %v1582_v57 }
  0x4d   : >> { %1438 = vmatpush3.bf16.msra.mxu0 %v1583_v60 }
  0x4e   : >> { %1460 = vmatpush3.bf16.msra.mxu1 %v1584_v59  ;;  %1439 = vmatprep.subr.bf16.mxu0 %v1585_v62 }
  0x4f   : >> { %1461 = vmatprep.subr.bf16.mxu1 %v1586_v61 }
  0x51   : >> { %1440 = vmatpush3.bf16.msra.mxu0 %v1587_v3 }
  0x52   : >> { %1462 = vmatpush3.bf16.msra.mxu1 %v1588_v63  ;;  %1441 = vmatprep.subr.bf16.mxu0 %v1589_v5 }
  0x53   : >> { %1463 = vmatprep.subr.bf16.mxu1 %v1590_v4 }
  0x55   : >> { %1442 = vmatpush3.bf16.msra.mxu0 %v1591_v7 }
  0x56   : >> { %1464 = vmatpush3.bf16.msra.mxu1 %v1592_v6  ;;  %1443 = vmatprep.subr.bf16.mxu0 %v1593_v9 }
  0x57   : >> { %1465 = vmatprep.subr.bf16.mxu1 %v1594_v8 }
  0x59   : >> { %1444 = vmatpush3.bf16.msra.mxu0 %v1595_v11 }
  0x5a   : >> { %1466 = vmatpush3.bf16.msra.mxu1 %v1596_v10  ;;  %1445 = vmatprep.subr.bf16.mxu0 %v1597_v13 }
  0x5b   : >> { %1467 = vmatprep.subr.bf16.mxu1 %v1598_v12 }
  0x5d   : >> { %1446 = vmatpush3.bf16.msra.mxu0 %v1599_v15 }
  0x5e   : >> { %1468 = vmatpush3.bf16.msra.mxu1 %v1600_v14  ;;  %1447 = vmatprep.subr.bf16.mxu0 %v1601_v17 }
  0x5f   : >> { %1469 = vmatprep.subr.bf16.mxu1 %v1602_v16 }
  0x61   : >> { %1448 = vmatpush3.bf16.msra.mxu0 %v1603_v24 }
  0x62   : >> { %1470 = vmatpush3.bf16.msra.mxu1 %v1604_v18 }
  0x64   : >> { %809 = vmatmul.mubr.bf16.vlgmr.msra.gmra.mxu0 %v1314_v29 }
  0x65   : >> { %1001 = vmatmul.mubr.bf16.vlgmr.msra.gmra.mxu1 %v862_v33 }
 0x104   : >> { %v1405_v37 = vpop.f32.mrf.mxu0 }
 0x105   : >> { %v1427_v34 = vpop.f32.mrf.mxu1 }
 0x106   : >> { %v1406_v39 = vpop.f32.mrf.mxu0 }
 0x107   : >> { %v1428_v35 = vpop.f32.mrf.mxu1  ;;  %v1407_v42 = vadd.f32 %v1406_v39, %v1405_v37 }
 0x108   : >> { %v1408_v40 = vpop.f32.mrf.mxu0  ;;  %v1429_v43 = vadd.f32 %v1428_v35, %v1427_v34 }
 0x109   : >> { %v1430_v36 = vpop.f32.mrf.mxu1 }
 0x10a   : >> { %v1409_v41 = vpop.f32.mrf.mxu0  ;;  %v630_v47 = vadd.f32 %v1429_v43, %v1407_v42 }
 0x10b   : >> { %v1431_v38 = vpop.f32.mrf.mxu1 }
 0x124   : >> { %v1449_v44 = vpop.f32.mrf.mxu0 }
 0x125   : >> { %v1471_v45 = vpop.f32.mrf.mxu1 }
 0x126   : >> { %v1450_v46 = vpop.f32.mrf.mxu0 }
 0x127   : >> { %v1451_v48 = vadd.f32 %v1450_v46, %v1449_v44  ;;  %v1472_v49 = vpop.f32.mrf.mxu1 }
 0x128   : >> { %v1452_v50 = vpop.f32.mrf.mxu0  ;;  %v1473_v52 = vadd.f32 %v1472_v49, %v1471_v45 }
 0x129   : >> { %v816_v51 = vadd.f32 %v1451_v48, %v630_v47  ;;  %v1474_v53 = vpop.f32.mrf.mxu1 }
 0x12a   : >> { %v1453_v54 = vpop.f32.mrf.mxu0 }
 0x12b   : >> { %v1008_v55 = vadd.f32 %v1473_v52, %v816_v51  ;;  %v1475_v56 = vpop.f32.mrf.mxu1 }
 0x12d   : >> { %v1015_v57 = vadd.f32 %v1772_v0, %v1008_v55 }
 0x12f   : >> { %v1016_v58 = vpack.c.bf16 %v1015_v57, %v1015_v57  ;;  %v1021_v59 = vsel %vm1020_vm0, %v1015_v57, 0.0  ;;  %v1029_v60 = vmul.f32 %v1015_v57, %v1015_v57 }
 0x130   : >> { %v1022_v61 = vrot.slane %v1021_v59, 4 }
 0x131   : >> { %1019 = vst [vmem:[%s1018_s14] sm:$0x3] %v1016_v58  ;;  %v1030_v62 = vsel %vm1020_vm0, %v1029_v60, 0.0 }
 0x132   : >> { %v1023_v63 = vadd.f32 %v1022_v61, %v1021_v59  ;;  %v1031_v3 = vrot.slane %v1030_v62, 4 }
 0x134   : >> { %v1024_v4 = vrot.slane %v1023_v63, 2  ;;  %v1032_v5 = vadd.f32 %v1031_v3, %v1030_v62 }
 0x136   : >> { %v1025_v6 = vadd.f32 %v1024_v4, %v1023_v63  ;;  %v1033_v7 = vrot.slane %v1032_v5, 2 }
 0x138   : >> { %v1026_v8 = vrot.slane %v1025_v6, 1  ;;  %v1034_v9 = vadd.f32 %v1033_v7, %v1032_v5 }
 0x13a   : >> { %v1027_v10 = vadd.f32 %v1026_v8, %v1025_v6  ;;  %v1035_v11 = vrot.slane %v1034_v9, 1 }
 0x13c   : >> { %v1028_v12 = vadd.f32 %v1681_v2, %v1027_v10   ;;  %v1036_v13 = vadd.f32 %v1035_v11, %v1034_v9  ;;  %260 = sbr.rel (!%p258_p2) target bundleno = 34 (0x22), region = 92 }
 0x13e   : >> { %v1037_v14 = vadd.f32 %v1677_v1, %v1036_v13   ;;  %v2019_v2 = vmov %v1028_v12 }
 0x140   : >> { %v2018_v1 = vmov %v1037_v14  ;;  %v1039_v15 = vsel (%p258_p2), %vm1038_vm1, %v1028_v12, %v1037_v14 }
 0x141   : > { %v1041_v16 = vsel %vm1040_vm2, %v1039_v15, 0.0 }
 0x142   : > { %1042 = vst [vmem:[%s1765_s9] sm:$0xff] %v1041_v16 }
 0x143 PF: > { %s16_s17 = sadd.s32 1, %s1673_s17   ;;  %s2020_s15 = smov %s1669_s16 }
 0x144   : > { %p13_p3 = scmp.ge.s32.totalorder %s16_s17, 4   ;;  %s2021_s16 = smov %s2023_s19 }
 0x146   :  { %15 = sbr.rel (!%p13_p3) target bundleno = 2 (0x2), region = 103 }
 0x14b   :  { %1093 = vsyncpa [#allocation3], 1 }
 0x14c   :  { %1095 = vsyncpa [#allocation3 + $0x1], 1 }

// kernel: discriminator_forward.7
= control target key start
LH: loop header
LB: loop body
LE: loop exit
PB: predicated region body
PF: predicated region fallthrough
CT: control target
= control target key end

     0   :  { %s3539_s15 = smov 0   ;;  %s3541_s16 = smov 0   ;;  %s4462_s0 = inlined_call_operand.vmem [shape: bf16[2,3,3,512], index: 0, kind: input, shape index: {}]   ;;  %s4463_s1 = inlined_call_operand.vmem [shape: bf16[4,512,256], index: 1, kind: input, shape index: {}]   ;;  %s4464_s2 = inlined_call_operand.vmem [shape: f32[1,256], index: 2, kind: input, shape index: {}]   ;;  %s4465_s3 = inlined_call_operand.vmem [shape: bf16[2,2,2,256], index: 3, kind: output, shape index: {0}]   ;;  %s4466_s4 = inlined_call_operand.vmem [shape: f32[2,1,8,256], index: 4, kind: output, shape index: {1}]  }
   0x1   :  { %s3543_s17 = smov 0  }
   0x2 LB: > { %s27_s18 = sadd.s32 1, %s3486_s16  ;;  %p2528_p0 = scmp.ge.s32.totalorder %s3490_s17, 1  ;;  %s3490_s17 = sphi %s3543_s17, %s15_s17   ;;  %s3486_s16 = sphi %s3541_s16, %s4472_s16   ;;  %s3482_s15 = sphi %s3539_s15, %s4471_s15  }
   0x3   : > { %p29_p1 = scmp.ge.s32.totalorder %s27_s18, 2  ;;  %p181_p2 = scmp.lt.s32.totalorder %s3490_s17, 3 }
   0x5   : > { %s4474_s18 = smov (%p29_p1, %s27_s18), 0  ;;  %p182_p3 = pnand %p2528_p0, %p181_p2 }
   0x6   : > { %p220_p4 = scmp.lt.s32.totalorder (!%p182_p3), %s3482_s15, 1  ;;  %s3585_s7 = smov (!%p182_p3), 0  }
   0x7   : > { %185 = sbr.rel (%p182_p3) target bundleno = 495 (0x1ef), region = 32 }
   0xc   : > { %v3560_v0 = vld [vmem:[%s4464_s2] sm:$0x3]  ;;  %s4476_s15 = smov (!%p220_p4, %s3482_s15), 1  ;;  %v3577_v1 = vmov 0.0   ;;  %v3579_v2 = vmov 0.0   ;;  %v3581_v3 = vmov 0.0  }
   0xd   : > { %s2993_s21 = smul.u32 24, %s4476_s15  ;;  %s2530_s22 = sshll.u32 %s4476_s15, 2  ;;  %v3583_v4 = vmov 0.0  }
   0xe   : > { %s3565_s25 = scalar_lea.vmem %s4465_s3, %s2530_s22  ;;  %s2991_s26 = sshll.u32 %s4476_s15, 4 }
   0xf   : > { %s3570_s29 = scalar_lea.vmem %s4462_s0, %s2993_s21  ;;  %s3575_s6 = scalar_lea.vmem %s4466_s4, %s2991_s26 }
  0x10 LB: >> { %v3060_v5 = vld [vmem:[%s4463_s1 + $0x274] ss:$8 sps:$4 sm:$0xff]   ;;  %v3064_v7 = vld [vmem:[%s4463_s1 + $0x270] ss:$8 sps:$4 sm:$0xff]   ;;  %v3066_v9 = vld [vmem:[%s4463_s1 + $0x264] ss:$8 sps:$4 sm:$0xff]   ;;  %v396_v43 = vlaneseq  ;;  %s3510_s7 = sphi %s3585_s7, %s251_s7   ;;  %v3506_v4 = vphi %v3583_v4, %v4470_v4   ;;  %v3502_v3 = vphi %v3581_v3, %v4469_v3   ;;  %v3498_v2 = vphi %v3579_v2, %v4468_v2   ;;  %v3494_v1 = vphi %v3577_v1, %v4467_v1  }
  0x11   : >> { %v3062_v6 = vld [vmem:[%s4463_s1 + $0x374] ss:$8 sps:$4 sm:$0xff]   ;;  %761 = vmatprep.subr.bf16.mxu0 %v3060_v5  ;;  %v3065_v8 = vld [vmem:[%s4463_s1 + $0x370] ss:$8 sps:$4 sm:$0xff]   ;;  %v3068_v10 = vld [vmem:[%s4463_s1 + $0x364] ss:$8 sps:$4 sm:$0xff]  }
  0x12   : >> { %802 = vmatprep.subr.bf16.mxu1 %v3062_v6  ;;  %762 = vmatpush1.bf16.msra.mxu0 %v3064_v7  ;;  %v3070_v11 = vld [vmem:[%s4463_s1 + $0x260] ss:$8 sps:$4 sm:$0xff]   ;;  %v3072_v13 = vld [vmem:[%s4463_s1 + $0x254] ss:$8 sps:$4 sm:$0xff]   ;;  %v3076_v15 = vld [vmem:[%s4463_s1 + $0x250] ss:$8 sps:$4 sm:$0xff]  }
  0x13   : >> { %803 = vmatpush1.bf16.msra.mxu1 %v3065_v8  ;;  %763 = vmatprep.subr.bf16.mxu0 %v3066_v9  ;;  %v3071_v12 = vld [vmem:[%s4463_s1 + $0x360] ss:$8 sps:$4 sm:$0xff]   ;;  %v3074_v14 = vld [vmem:[%s4463_s1 + $0x354] ss:$8 sps:$4 sm:$0xff]   ;;  %v3077_v16 = vld [vmem:[%s4463_s1 + $0x350] ss:$8 sps:$4 sm:$0xff]  }
  0x14   : >> { %804 = vmatprep.subr.bf16.mxu1 %v3068_v10  ;;  %v3078_v17 = vld [vmem:[%s4463_s1 + $0x244] ss:$8 sps:$4 sm:$0xff]   ;;  %v3082_v19 = vld [vmem:[%s4463_s1 + $0x240] ss:$8 sps:$4 sm:$0xff]   ;;  %v3084_v21 = vld [vmem:[%s4463_s1 + $0x234] ss:$8 sps:$4 sm:$0xff]  }
  0x15   : >> { %v3080_v18 = vld [vmem:[%s4463_s1 + $0x344] ss:$8 sps:$4 sm:$0xff]   ;;  %v3083_v20 = vld [vmem:[%s4463_s1 + $0x340] ss:$8 sps:$4 sm:$0xff]   ;;  %v3086_v22 = vld [vmem:[%s4463_s1 + $0x334] ss:$8 sps:$4 sm:$0xff]  }
  0x16   : >> { %764 = vmatpush1.bf16.msra.mxu0 %v3070_v11  ;;  %v3088_v23 = vld [vmem:[%s4463_s1 + $0x230] ss:$8 sps:$4 sm:$0xff]   ;;  %v3090_v25 = vld [vmem:[%s4463_s1 + $0x224] ss:$8 sps:$4 sm:$0xff]   ;;  %v3094_v27 = vld [vmem:[%s4463_s1 + $0x220] ss:$8 sps:$4 sm:$0xff]  }
  0x17   : >> { %805 = vmatpush1.bf16.msra.mxu1 %v3071_v12  ;;  %765 = vmatprep.subr.bf16.mxu0 %v3072_v13  ;;  %v3089_v24 = vld [vmem:[%s4463_s1 + $0x330] ss:$8 sps:$4 sm:$0xff]   ;;  %v3092_v26 = vld [vmem:[%s4463_s1 + $0x324] ss:$8 sps:$4 sm:$0xff]   ;;  %v3095_v28 = vld [vmem:[%s4463_s1 + $0x320] ss:$8 sps:$4 sm:$0xff]  }
  0x18   : >> { %806 = vmatprep.subr.bf16.mxu1 %v3074_v14  ;;  %v3096_v29 = vld [vmem:[%s4463_s1 + $0x214] ss:$8 sps:$4 sm:$0xff]   ;;  %v3100_v31 = vld [vmem:[%s4463_s1 + $0x210] ss:$8 sps:$4 sm:$0xff]   ;;  %v3102_v33 = vld [vmem:[%s4463_s1 + $0x204] ss:$8 sps:$4 sm:$0xff]  }
  0x19   : >> { %v3098_v30 = vld [vmem:[%s4463_s1 + $0x314] ss:$8 sps:$4 sm:$0xff]   ;;  %v3101_v32 = vld [vmem:[%s4463_s1 + $0x310] ss:$8 sps:$4 sm:$0xff]   ;;  %v3104_v34 = vld [vmem:[%s4463_s1 + $0x304] ss:$8 sps:$4 sm:$0xff]  }
  0x1a   : >> { %766 = vmatpush1.bf16.msra.mxu0 %v3076_v15  ;;  %v3106_v35 = vld [vmem:[%s4463_s1 + $0x200] ss:$8 sps:$4 sm:$0xff]   ;;  %v3108_v37 = vld [vmem:[%s4463_s1 + $0x2f4] ss:$8 sps:$4 sm:$0xff]   ;;  %v3112_v39 = vld [vmem:[%s4463_s1 + $0x2f0] ss:$8 sps:$4 sm:$0xff]  }
  0x1b   : >> { %807 = vmatpush1.bf16.msra.mxu1 %v3077_v16  ;;  %767 = vmatprep.subr.bf16.mxu0 %v3078_v17  ;;  %v3107_v36 = vld [vmem:[%s4463_s1 + $0x300] ss:$8 sps:$4 sm:$0xff]   ;;  %v3110_v38 = vld [vmem:[%s4463_s1 + $0x3f4] ss:$8 sps:$4 sm:$0xff]   ;;  %v3113_v40 = vld [vmem:[%s4463_s1 + $0x3f0] ss:$8 sps:$4 sm:$0xff]  }
  0x1c   : >> { %808 = vmatprep.subr.bf16.mxu1 %v3080_v18  ;;  %v3512_v41 = vmov 1983009808   ;;  %v3114_v44 = vld [vmem:[%s4463_s1 + $0x2e4] ss:$8 sps:$4 sm:$0xff]   ;;  %v3118_v46 = vld [vmem:[%s4463_s1 + $0x2e0] ss:$8 sps:$4 sm:$0xff]  }
  0x1d   : >> { %v394_v42 = vunpack.c.l.s4 %v3512_v41  ;;  %v3116_v45 = vld [vmem:[%s4463_s1 + $0x3e4] ss:$8 sps:$4 sm:$0xff]   ;;  %v3719_v48 = vshrl.u32 %v396_v43, 7  ;;  %v3119_v49 = vld [vmem:[%s4463_s1 + $0x3e0] ss:$8 sps:$4 sm:$0xff]   ;;  %s2992_s14 = sshll.u32 %s3510_s7, 3 }
  0x1e   : >> { %768 = vmatpush1.bf16.msra.mxu0 %v3082_v19  ;;  %v3120_v50 = vld [vmem:[%s4463_s1 + $0x2d4] ss:$8 sps:$4 sm:$0xff]   ;;  %v3124_v52 = vld [vmem:[%s4463_s1 + $0x2d0] ss:$8 sps:$4 sm:$0xff]   ;;  %s3738_s24 = scalar_lea.vmem %s3570_s29, %s2992_s14  ;;  %v3126_v55 = vld [vmem:[%s4463_s1 + $0x2c4] ss:$8 sps:$4 sm:$0xff]  }
  0x1f   : >> { %809 = vmatpush1.bf16.msra.mxu1 %v3083_v20  ;;  %769 = vmatprep.subr.bf16.mxu0 %v3084_v21  ;;  %v395_v47 = vunpack.c.0.s8 %v394_v42  ;;  %v3122_v51 = vld [vmem:[%s4463_s1 + $0x3d4] ss:$8 sps:$4 sm:$0xff]   ;;  %v3125_v53 = vld [vmem:[%s4463_s1 + $0x3d0] ss:$8 sps:$4 sm:$0xff]   ;;  %v3128_v56 = vld [vmem:[%s4463_s1 + $0x3c4] ss:$8 sps:$4 sm:$0xff]  }
  0x20   : >> { %810 = vmatprep.subr.bf16.mxu1 %v3086_v22  ;;  %v325_v57 = vld [vmem:[%s3738_s24] sm:$0xff]  ;;  %v3132_v62 = vld [vmem:[%s4463_s1 + $0x2b4] ss:$8 sps:$4 sm:$0xff]   ;;  %v3136_v7 = vld [vmem:[%s4463_s1 + $0x2b0] ss:$8 sps:$4 sm:$0xff]   ;;  %vm2319_vm0 = vcmask 1041408  }
  0x21   : >> { %v3741_v54 = vsub.s32 %v395_v47, %v3719_v48  ;;  %v3130_v58 = vld [vmem:[%s4463_s1 + $0x2c0] ss:$8 sps:$4 sm:$0xff]   ;;  %v392_v60 = vcombine.high %v325_v57, %v325_v57  ;;  %v3134_v63 = vld [vmem:[%s4463_s1 + $0x3b4] ss:$8 sps:$4 sm:$0xff]   ;;  %v3137_v8 = vld [vmem:[%s4463_s1 + $0x3b0] ss:$8 sps:$4 sm:$0xff]  }
  0x22   : >> { %770 = vmatpush1.bf16.msra.mxu0 %v3088_v23  ;;  %v3131_v61 = vld [vmem:[%s4463_s1 + $0x3c0] ss:$8 sps:$4 sm:$0xff]   ;;  %v3138_v12 = vld [vmem:[%s4463_s1 + $0x2a4] ss:$8 sps:$4 sm:$0xff]   ;;  %v3144_v21 = vld [vmem:[%s4463_s1 + $0x294] ss:$8 sps:$4 sm:$0xff]  }
  0x23   : >> { %811 = vmatpush1.bf16.msra.mxu1 %v3089_v24  ;;  %771 = vmatprep.subr.bf16.mxu0 %v3090_v25  ;;  %v399_v59 = vrot.slane %v325_v57, %v3741_v54  ;;  %v406_v6 = vrot.slane %v392_v60, %v3741_v54  ;;  %v3140_v13 = vld [vmem:[%s4463_s1 + $0x3a4] ss:$8 sps:$4 sm:$0xff]   ;;  %v3142_v17 = vld [vmem:[%s4463_s1 + $0x2a0] ss:$8 sps:$4 sm:$0xff]   ;;  %v3146_v22 = vld [vmem:[%s4463_s1 + $0x394] ss:$8 sps:$4 sm:$0xff]  }
  0x24   : >> { %812 = vmatprep.subr.bf16.mxu1 %v3092_v26  ;;  %v3143_v18 = vld [vmem:[%s4463_s1 + $0x3a0] ss:$8 sps:$4 sm:$0xff]   ;;  %v3148_v24 = vld [vmem:[%s4463_s1 + $0x290] ss:$8 sps:$4 sm:$0xff]   ;;  %v3165_v42 = vld [vmem:[%s4463_s1 + $0x64] ss:$8 sps:$4 sm:$0xff]  }
  0x25   : >> { %v407_v5 = vcombine.high %v399_v59, %v399_v59  ;;  %v408_v11 = vcombine.high %v406_v6, %v406_v6  ;;  %v3149_v25 = vld [vmem:[%s4463_s1 + $0x390] ss:$8 sps:$4 sm:$0xff]   ;;  %v412_v26 = vshll.u32 %v399_v59, 16  ;;  %v3168_v43 = vld [vmem:[%s4463_s1 + $0x164] ss:$8 sps:$4 sm:$0xff]  }
  0x26   : >> { %772 = vmatpush1.bf16.msra.mxu0 %v3094_v27  ;;  %v426_v27 = vshll.u32 %v406_v6, 16  ;;  %v3160_v41 = vld [vmem:[%s4463_s1 + $0x170] ss:$8 sps:$4 sm:$0xff]   ;;  %v3174_v47 = vld [vmem:[%s4463_s1 + $0x154] ss:$8 sps:$4 sm:$0xff]  }
  0x27   : >> { %813 = vmatpush1.bf16.msra.mxu1 %v3095_v28  ;;  %773 = vmatprep.subr.bf16.mxu0 %v3096_v29  ;;  %v417_v9 = vshrl.u32 %v407_v5, 16  ;;  %v419_v10 = vshll.u32 %v407_v5, 16  ;;  %v431_v15 = vshrl.u32 %v408_v11, 16  ;;  %v433_v16 = vshll.u32 %v408_v11, 16  ;;  %v3150_v28 = vld [vmem:[%s4463_s1 + $0x284] ss:$8 sps:$4 sm:$0xff]  }
  0x28   : >> { %814 = vmatprep.subr.bf16.mxu1 %v3098_v30  ;;  %v3152_v29 = vld [vmem:[%s4463_s1 + $0x384] ss:$8 sps:$4 sm:$0xff]   ;;  %v3154_v30 = vld [vmem:[%s4463_s1 + $0x280] ss:$8 sps:$4 sm:$0xff]   ;;  %v3186_v57 = vld [vmem:[%s4463_s1 + $0x134] ss:$8 sps:$4 sm:$0xff]  }
  0x29   : >> { %v421_v14 = vrot.slane %v419_v10, 1  ;;  %v435_v20 = vrot.slane %v433_v16, 1  ;;  %v3189_v60 = vld [vmem:[%s4463_s1 + $0x24] ss:$8 sps:$4 sm:$0xff]   ;;  %v3195_v5 = vld [vmem:[%s4463_s1 + $0x14] ss:$8 sps:$4 sm:$0xff]  }
  0x2a   : >> { %774 = vmatpush1.bf16.msra.mxu0 %v3100_v31  ;;  %v3155_v31 = vld [vmem:[%s4463_s1 + $0x380] ss:$8 sps:$4 sm:$0xff]   ;;  %v3196_v11 = vld [vmem:[%s4463_s1 + $0x110] ss:$8 sps:$4 sm:$0xff]  }
  0x2b   : >> { %815 = vmatpush1.bf16.msra.mxu1 %v3101_v32  ;;  %775 = vmatprep.subr.bf16.mxu0 %v3102_v33  ;;  %v422_v19 = vor.u32 %v421_v14, %v417_v9  ;;  %v436_v23 = vor.u32 %v435_v20, %v431_v15  ;;  %v410_v32 = vshrl.u32 %v399_v59, 16  ;;  %v414_v33 = vrot.slane %v412_v26, 1  ;;  %v3184_v59 = vld [vmem:[%s4463_s1 + $0x130] ss:$8 sps:$4 sm:$0xff]   ;;  %v3199_v16 = vld [vmem:[%s4463_s1] ss:$8 sps:$4 sm:$0xff]  }
  0x2c   : >> { %816 = vmatprep.subr.bf16.mxu1 %v3104_v34  ;;  %v424_v34 = vshrl.u32 %v406_v6, 16  ;;  %v3198_v6 = vld [vmem:[%s4463_s1 + $0x114] ss:$8 sps:$4 sm:$0xff]   ;;  %v3214_v26 = vld [vmem:[%s4463_s1 + $0x1e0] ss:$8 sps:$4 sm:$0xff]  }
  0x2d   : >> { %793 = vmatprep.mubr.bf16.mxu0 %v422_v19  ;;  %834 = vmatprep.mubr.bf16.mxu1 %v436_v23  ;;  %v3207_v19 = vld [vmem:[%s4463_s1 + $0xf4] ss:$8 sps:$4 sm:$0xff]   ;;  %v3213_v23 = vld [vmem:[%s4463_s1 + $0xe4] ss:$8 sps:$4 sm:$0xff]  }
  0x2e   : >> { %776 = vmatpush1.bf16.msra.mxu0 %v3106_v35  ;;  %v428_v35 = vrot.slane %v426_v27, 1  ;;  %v3210_v20 = vld [vmem:[%s4463_s1 + $0x1f4] ss:$8 sps:$4 sm:$0xff]  }
  0x2f   : >> { %817 = vmatpush1.bf16.msra.mxu1 %v3107_v36  ;;  %777 = vmatprep.subr.bf16.mxu0 %v3108_v37  ;;  %v3159_v36 = vld [vmem:[%s4463_s1 + $0x74] ss:$8 sps:$4 sm:$0xff]  }
  0x30   : >> { %818 = vmatprep.subr.bf16.mxu1 %v3110_v38  ;;  %v3162_v37 = vld [vmem:[%s4463_s1 + $0x174] ss:$8 sps:$4 sm:$0xff]   ;;  %v415_v38 = vor.u32 %v414_v33, %v410_v32  ;;  %v3228_v32 = vld [vmem:[%s4463_s1 + $0x1c4] ss:$8 sps:$4 sm:$0xff]   ;;  %v3223_v33 = vld [vmem:[%s4463_s1 + $0xc0] ss:$8 sps:$4 sm:$0xff]  }
  0x31   : >> { %v3219_v27 = vld [vmem:[%s4463_s1 + $0xd4] ss:$8 sps:$4 sm:$0xff]  }
  0x32   : >> { %778 = vmatpush2.bf16.msra.mxu0 %v3112_v39  ;;  %v429_v39 = vor.u32 %v428_v35, %v424_v34  ;;  %v3226_v34 = vld [vmem:[%s4463_s1 + $0x1c0] ss:$8 sps:$4 sm:$0xff]   ;;  %v3231_v35 = vld [vmem:[%s4463_s1 + $0xb4] ss:$8 sps:$4 sm:$0xff]  }
  0x33   : >> { %819 = vmatpush2.bf16.msra.mxu1 %v3113_v40  ;;  %779 = vmatprep.subr.bf16.mxu0 %v3114_v44  ;;  %v3157_v40 = vld [vmem:[%s4463_s1 + $0x70] ss:$8 sps:$4 sm:$0xff]   ;;  %v3163_v44 = vld [vmem:[%s4463_s1 + $0x60] ss:$8 sps:$4 sm:$0xff]  }
  0x34   : >> { %820 = vmatprep.subr.bf16.mxu1 %v3116_v45  ;;  %v3166_v45 = vld [vmem:[%s4463_s1 + $0x160] ss:$8 sps:$4 sm:$0xff]  }
  0x36   : >> { %780 = vmatpush2.bf16.msra.mxu0 %v3118_v46  ;;  %v3171_v46 = vld [vmem:[%s4463_s1 + $0x54] ss:$8 sps:$4 sm:$0xff]  }
  0x37   : >> { %821 = vmatpush2.bf16.msra.mxu1 %v3119_v49  ;;  %781 = vmatprep.subr.bf16.mxu0 %v3120_v50  ;;  %v3169_v49 = vld [vmem:[%s4463_s1 + $0x50] ss:$8 sps:$4 sm:$0xff]  }
  0x38   : >> { %822 = vmatprep.subr.bf16.mxu1 %v3122_v51  ;;  %v3172_v50 = vld [vmem:[%s4463_s1 + $0x150] ss:$8 sps:$4 sm:$0xff]   ;;  %v3177_v51 = vld [vmem:[%s4463_s1 + $0x44] ss:$8 sps:$4 sm:$0xff]  }
  0x3a   : >> { %782 = vmatpush2.bf16.msra.mxu0 %v3124_v52  ;;  %v3180_v52 = vld [vmem:[%s4463_s1 + $0x144] ss:$8 sps:$4 sm:$0xff]  }
  0x3b   : >> { %823 = vmatpush2.bf16.msra.mxu1 %v3125_v53  ;;  %783 = vmatprep.subr.bf16.mxu0 %v3126_v55  ;;  %v3175_v53 = vld [vmem:[%s4463_s1 + $0x40] ss:$8 sps:$4 sm:$0xff]  }
  0x3c   : >> { %824 = vmatprep.subr.bf16.mxu1 %v3128_v56  ;;  %v3178_v55 = vld [vmem:[%s4463_s1 + $0x140] ss:$8 sps:$4 sm:$0xff]   ;;  %v3183_v56 = vld [vmem:[%s4463_s1 + $0x34] ss:$8 sps:$4 sm:$0xff]  }
  0x3e   : >> { %784 = vmatpush2.bf16.msra.mxu0 %v3130_v58  ;;  %v3181_v58 = vld [vmem:[%s4463_s1 + $0x30] ss:$8 sps:$4 sm:$0xff]  }
  0x3f   : >> { %825 = vmatpush2.bf16.msra.mxu1 %v3131_v61  ;;  %785 = vmatprep.subr.bf16.mxu0 %v3132_v62  ;;  %v3192_v61 = vld [vmem:[%s4463_s1 + $0x124] ss:$8 sps:$4 sm:$0xff]   ;;  %v3187_v62 = vld [vmem:[%s4463_s1 + $0x20] ss:$8 sps:$4 sm:$0xff]  }
  0x40   : >> { %826 = vmatprep.subr.bf16.mxu1 %v3134_v63  ;;  %v3190_v63 = vld [vmem:[%s4463_s1 + $0x120] ss:$8 sps:$4 sm:$0xff]  }
  0x42   : >> { %786 = vmatpush2.bf16.msra.mxu0 %v3136_v7  ;;  %v260_v7 = vld [vmem:[%s3738_s24] sm:$0x55] }
  0x43   : >> { %827 = vmatpush2.bf16.msra.mxu1 %v3137_v8  ;;  %787 = vmatprep.subr.bf16.mxu0 %v3138_v12  ;;  %v3193_v8 = vld [vmem:[%s4463_s1 + $0x10] ss:$8 sps:$4 sm:$0xff]   ;;  %v3889_v9 = vrot.slane %v260_v7, %v3741_v54  ;;  %v844_v10 = vcombine.high %v260_v7, %v260_v7  ;;  %v3201_v12 = vld [vmem:[%s4463_s1 + $0x4] ss:$8 sps:$4 sm:$0xff]   ;;  %v3268_v7 = vld [vmem:[%s4463_s1 + $0x454] ss:$8 sps:$4 sm:$0xff]  }
  0x44   : >> { %828 = vmatprep.subr.bf16.mxu1 %v3140_v13  ;;  %v3204_v13 = vld [vmem:[%s4463_s1 + $0x104] ss:$8 sps:$4 sm:$0xff]  }
  0x45   : >> { %v859_v14 = vcombine.high %v3889_v9, %v3889_v9  ;;  %v3903_v15 = vrot.slane %v844_v10, %v3741_v54  ;;  %v3266_v10 = vld [vmem:[%s4463_s1 + $0x450] ss:$8 sps:$4 sm:$0xff]  }
  0x46   : >> { %788 = vmatpush2.bf16.msra.mxu0 %v3142_v17 }
  0x47   : >> { %829 = vmatpush2.bf16.msra.mxu1 %v3143_v18  ;;  %789 = vmatprep.subr.bf16.mxu0 %v3144_v21  ;;  %v860_v17 = vcombine.high %v3903_v15, %v3903_v15  ;;  %v3202_v18 = vld [vmem:[%s4463_s1 + $0x100] ss:$8 sps:$4 sm:$0xff]   ;;  %v3205_v21 = vld [vmem:[%s4463_s1 + $0xf0] ss:$8 sps:$4 sm:$0xff]  }
  0x48   : >> { %830 = vmatprep.subr.bf16.mxu1 %v3146_v22  ;;  %v3208_v22 = vld [vmem:[%s4463_s1 + $0x1f0] ss:$8 sps:$4 sm:$0xff]  }
  0x4a   : >> { %790 = vmatpush2.bf16.msra.mxu0 %v3148_v24  ;;  %v3216_v24 = vld [vmem:[%s4463_s1 + $0x1e4] ss:$8 sps:$4 sm:$0xff]  }
  0x4b   : >> { %831 = vmatpush2.bf16.msra.mxu1 %v3149_v25  ;;  %791 = vmatprep.subr.bf16.mxu0 %v3150_v28  ;;  %v3211_v25 = vld [vmem:[%s4463_s1 + $0xe0] ss:$8 sps:$4 sm:$0xff]   ;;  %v3222_v28 = vld [vmem:[%s4463_s1 + $0x1d4] ss:$8 sps:$4 sm:$0xff]  }
  0x4c   : >> { %832 = vmatprep.subr.bf16.mxu1 %v3152_v29  ;;  %v3217_v29 = vld [vmem:[%s4463_s1 + $0xd0] ss:$8 sps:$4 sm:$0xff]  }
  0x4e   : >> { %792 = vmatpush2.bf16.msra.mxu0 %v3154_v30  ;;  %v3220_v30 = vld [vmem:[%s4463_s1 + $0x1d0] ss:$8 sps:$4 sm:$0xff]  }
  0x4f   : >> { %833 = vmatpush2.bf16.msra.mxu1 %v3155_v31  ;;  %1185 = vmatprep.subr.bf16.mxu0 %v3159_v36  ;;  %v3225_v31 = vld [vmem:[%s4463_s1 + $0xc4] ss:$8 sps:$4 sm:$0xff]   ;;  %v3234_v36 = vld [vmem:[%s4463_s1 + $0x1b4] ss:$8 sps:$4 sm:$0xff]  }
  0x50   : >> { %1226 = vmatprep.subr.bf16.mxu1 %v3162_v37  ;;  %v3229_v37 = vld [vmem:[%s4463_s1 + $0xb0] ss:$8 sps:$4 sm:$0xff]  }
  0x51   : >> { %794 = vmatmul.mubr.bf16.vlgmr.msra.gmra.mxu0 %v415_v38  ;;  %v3232_v38 = vld [vmem:[%s4463_s1 + $0x1b0] ss:$8 sps:$4 sm:$0xff]  }
  0x52   : >> { %835 = vmatmul.mubr.bf16.vlgmr.msra.gmra.mxu1 %v429_v39  ;;  %1186 = vmatpush1.bf16.msra.mxu0 %v3157_v40  ;;  %v3237_v39 = vld [vmem:[%s4463_s1 + $0xa4] ss:$8 sps:$4 sm:$0xff]  }
  0x53   : >> { %1227 = vmatpush1.bf16.msra.mxu1 %v3160_v41  ;;  %1187 = vmatprep.subr.bf16.mxu0 %v3165_v42  ;;  %v3240_v40 = vld [vmem:[%s4463_s1 + $0x1a4] ss:$8 sps:$4 sm:$0xff]   ;;  %v3235_v41 = vld [vmem:[%s4463_s1 + $0xa0] ss:$8 sps:$4 sm:$0xff]  }
  0x54   : >> { %1228 = vmatprep.subr.bf16.mxu1 %v3168_v43  ;;  %1217 = vmatprep.mubr.bf16.mxu0 %v859_v14  ;;  %v3238_v42 = vld [vmem:[%s4463_s1 + $0x1a0] ss:$8 sps:$4 sm:$0xff]   ;;  %v3243_v43 = vld [vmem:[%s4463_s1 + $0x94] ss:$8 sps:$4 sm:$0xff]  }
  0x55   : >> { %1258 = vmatprep.mubr.bf16.mxu1 %v860_v17  ;;  %v3272_v14 = vld [vmem:[%s4463_s1 + $0x440] ss:$8 sps:$4 sm:$0xff]   ;;  %v3283_v17 = vld [vmem:[%s4463_s1 + $0x534] ss:$8 sps:$4 sm:$0xff]  }
  0x56   : >> { %1188 = vmatpush1.bf16.msra.mxu0 %v3163_v44  ;;  %v3246_v44 = vld [vmem:[%s4463_s1 + $0x194] ss:$8 sps:$4 sm:$0xff]  }
  0x57   : >> { %1229 = vmatpush1.bf16.msra.mxu1 %v3166_v45  ;;  %1189 = vmatprep.subr.bf16.mxu0 %v3171_v46  ;;  %v3241_v45 = vld [vmem:[%s4463_s1 + $0x90] ss:$8 sps:$4 sm:$0xff]  }
  0x58   : >> { %1230 = vmatprep.subr.bf16.mxu1 %v3174_v47  ;;  %v3244_v46 = vld [vmem:[%s4463_s1 + $0x190] ss:$8 sps:$4 sm:$0xff]   ;;  %v3249_v47 = vld [vmem:[%s4463_s1 + $0x84] ss:$8 sps:$4 sm:$0xff]  }
  0x5a   : >> { %1190 = vmatpush1.bf16.msra.mxu0 %v3169_v49  ;;  %v3252_v49 = vld [vmem:[%s4463_s1 + $0x184] ss:$8 sps:$4 sm:$0xff]  }
  0x5b   : >> { %1231 = vmatpush1.bf16.msra.mxu1 %v3172_v50  ;;  %1191 = vmatprep.subr.bf16.mxu0 %v3177_v51  ;;  %v3247_v50 = vld [vmem:[%s4463_s1 + $0x80] ss:$8 sps:$4 sm:$0xff]  }
  0x5c   : >> { %1232 = vmatprep.subr.bf16.mxu1 %v3180_v52  ;;  %v3250_v51 = vld [vmem:[%s4463_s1 + $0x180] ss:$8 sps:$4 sm:$0xff]   ;;  %v3256_v52 = vld [vmem:[%s4463_s1 + $0x474] ss:$8 sps:$4 sm:$0xff]  }
  0x5e   : >> { %1192 = vmatpush1.bf16.msra.mxu0 %v3175_v53  ;;  %v3259_v53 = vld [vmem:[%s4463_s1 + $0x574] ss:$8 sps:$4 sm:$0xff]  }
  0x5f   : >> { %1233 = vmatpush1.bf16.msra.mxu1 %v3178_v55  ;;  %1193 = vmatprep.subr.bf16.mxu0 %v3183_v56  ;;  %v3254_v55 = vld [vmem:[%s4463_s1 + $0x470] ss:$8 sps:$4 sm:$0xff]  }
  0x60   : >> { %1234 = vmatprep.subr.bf16.mxu1 %v3186_v57  ;;  %v3257_v56 = vld [vmem:[%s4463_s1 + $0x570] ss:$8 sps:$4 sm:$0xff]   ;;  %v3262_v57 = vld [vmem:[%s4463_s1 + $0x464] ss:$8 sps:$4 sm:$0xff]  }
  0x62   : >> { %1194 = vmatpush1.bf16.msra.mxu0 %v3181_v58  ;;  %v3265_v58 = vld [vmem:[%s4463_s1 + $0x564] ss:$8 sps:$4 sm:$0xff]  }
  0x63   : >> { %1235 = vmatpush1.bf16.msra.mxu1 %v3184_v59  ;;  %1195 = vmatprep.subr.bf16.mxu0 %v3189_v60  ;;  %v2728_v59 = vld [vmem:[%s3738_s24 + $0x8] sm:$0x55] }
  0x64   : >> { %1236 = vmatprep.subr.bf16.mxu1 %v3192_v61  ;;  %v4029_v60 = vrot.slane %v2728_v59, %v3741_v54  ;;  %v1338_v61 = vcombine.high %v2728_v59, %v2728_v59 }
  0x66   : >> { %1196 = vmatpush1.bf16.msra.mxu0 %v3187_v62  ;;  %v3260_v62 = vld [vmem:[%s4463_s1 + $0x460] ss:$8 sps:$4 sm:$0xff]  }
  0x67   : >> { %1237 = vmatpush1.bf16.msra.mxu1 %v3190_v63  ;;  %1197 = vmatprep.subr.bf16.mxu0 %v3195_v5  ;;  %v3263_v63 = vld [vmem:[%s4463_s1 + $0x560] ss:$8 sps:$4 sm:$0xff]   ;;  %v1353_v5 = vcombine.high %v4029_v60, %v4029_v60 }
  0x68   : >> { %1238 = vmatprep.subr.bf16.mxu1 %v3198_v6  ;;  %v4042_v6 = vrot.slane %v1338_v61, %v3741_v54  ;;  %v3332_v61 = vld [vmem:[%s4463_s1 + $0x4a0] ss:$8 sps:$4 sm:$0xff]  }
  0x6a   : >> { %1198 = vmatpush1.bf16.msra.mxu0 %v3193_v8  ;;  %v3271_v8 = vld [vmem:[%s4463_s1 + $0x554] ss:$8 sps:$4 sm:$0xff]  }
  0x6b   : >> { %1239 = vmatpush1.bf16.msra.mxu1 %v3196_v11  ;;  %1199 = vmatprep.subr.bf16.mxu0 %v3201_v12  ;;  %v3269_v11 = vld [vmem:[%s4463_s1 + $0x550] ss:$8 sps:$4 sm:$0xff]   ;;  %v3274_v12 = vld [vmem:[%s4463_s1 + $0x444] ss:$8 sps:$4 sm:$0xff]  }
  0x6c   : >> { %1240 = vmatprep.subr.bf16.mxu1 %v3204_v13  ;;  %v3277_v13 = vld [vmem:[%s4463_s1 + $0x544] ss:$8 sps:$4 sm:$0xff]  }
  0x6e   : >> { %1200 = vmatpush1.bf16.msra.mxu0 %v3199_v16  ;;  %v3280_v16 = vld [vmem:[%s4463_s1 + $0x434] ss:$8 sps:$4 sm:$0xff]  }
  0x6f   : >> { %1241 = vmatpush1.bf16.msra.mxu1 %v3202_v18  ;;  %1201 = vmatprep.subr.bf16.mxu0 %v3207_v19  ;;  %v3278_v18 = vld [vmem:[%s4463_s1 + $0x430] ss:$8 sps:$4 sm:$0xff]  }
  0x70   : >> { %1242 = vmatprep.subr.bf16.mxu1 %v3210_v20  ;;  %v3281_v19 = vld [vmem:[%s4463_s1 + $0x530] ss:$8 sps:$4 sm:$0xff]   ;;  %v3286_v20 = vld [vmem:[%s4463_s1 + $0x424] ss:$8 sps:$4 sm:$0xff]  }
  0x72   : >> { %1202 = vmatpush2.bf16.msra.mxu0 %v3205_v21  ;;  %v3289_v21 = vld [vmem:[%s4463_s1 + $0x524] ss:$8 sps:$4 sm:$0xff]  }
  0x73   : >> { %1243 = vmatpush2.bf16.msra.mxu1 %v3208_v22  ;;  %1203 = vmatprep.subr.bf16.mxu0 %v3213_v23  ;;  %v3284_v22 = vld [vmem:[%s4463_s1 + $0x420] ss:$8 sps:$4 sm:$0xff]  }
  0x74   : >> { %1244 = vmatprep.subr.bf16.mxu1 %v3216_v24  ;;  %v3287_v23 = vld [vmem:[%s4463_s1 + $0x520] ss:$8 sps:$4 sm:$0xff]   ;;  %v3292_v24 = vld [vmem:[%s4463_s1 + $0x414] ss:$8 sps:$4 sm:$0xff]  }
  0x76   : >> { %1204 = vmatpush2.bf16.msra.mxu0 %v3211_v25  ;;  %v3295_v25 = vld [vmem:[%s4463_s1 + $0x514] ss:$8 sps:$4 sm:$0xff]  }
  0x77   : >> { %1245 = vmatpush2.bf16.msra.mxu1 %v3214_v26  ;;  %1205 = vmatprep.subr.bf16.mxu0 %v3219_v27  ;;  %v3290_v26 = vld [vmem:[%s4463_s1 + $0x410] ss:$8 sps:$4 sm:$0xff]  }
  0x78   : >> { %1246 = vmatprep.subr.bf16.mxu1 %v3222_v28  ;;  %v3293_v27 = vld [vmem:[%s4463_s1 + $0x510] ss:$8 sps:$4 sm:$0xff]   ;;  %v3298_v28 = vld [vmem:[%s4463_s1 + $0x404] ss:$8 sps:$4 sm:$0xff]  }
  0x7a   : >> { %1206 = vmatpush2.bf16.msra.mxu0 %v3217_v29  ;;  %v3301_v29 = vld [vmem:[%s4463_s1 + $0x504] ss:$8 sps:$4 sm:$0xff]  }
  0x7b   : >> { %1247 = vmatpush2.bf16.msra.mxu1 %v3220_v30  ;;  %1207 = vmatprep.subr.bf16.mxu0 %v3225_v31  ;;  %v3296_v30 = vld [vmem:[%s4463_s1 + $0x400] ss:$8 sps:$4 sm:$0xff]  }
  0x7c   : >> { %1248 = vmatprep.subr.bf16.mxu1 %v3228_v32  ;;  %v3299_v31 = vld [vmem:[%s4463_s1 + $0x500] ss:$8 sps:$4 sm:$0xff]   ;;  %v3304_v32 = vld [vmem:[%s4463_s1 + $0x4f4] ss:$8 sps:$4 sm:$0xff]  }
  0x7e   : >> { %1208 = vmatpush2.bf16.msra.mxu0 %v3223_v33  ;;  %v3307_v33 = vld [vmem:[%s4463_s1 + $0x5f4] ss:$8 sps:$4 sm:$0xff]  }
  0x7f   : >> { %1249 = vmatpush2.bf16.msra.mxu1 %v3226_v34  ;;  %1209 = vmatprep.subr.bf16.mxu0 %v3231_v35  ;;  %v3302_v34 = vld [vmem:[%s4463_s1 + $0x4f0] ss:$8 sps:$4 sm:$0xff]  }
  0x80   : >> { %1250 = vmatprep.subr.bf16.mxu1 %v3234_v36  ;;  %v3305_v35 = vld [vmem:[%s4463_s1 + $0x5f0] ss:$8 sps:$4 sm:$0xff]   ;;  %v3310_v36 = vld [vmem:[%s4463_s1 + $0x4e4] ss:$8 sps:$4 sm:$0xff]  }
  0x82   : >> { %1210 = vmatpush2.bf16.msra.mxu0 %v3229_v37  ;;  %v3313_v37 = vld [vmem:[%s4463_s1 + $0x5e4] ss:$8 sps:$4 sm:$0xff]  }
  0x83   : >> { %1251 = vmatpush2.bf16.msra.mxu1 %v3232_v38  ;;  %1211 = vmatprep.subr.bf16.mxu0 %v3237_v39  ;;  %v3308_v38 = vld [vmem:[%s4463_s1 + $0x4e0] ss:$8 sps:$4 sm:$0xff]  }
  0x84   : >> { %1252 = vmatprep.subr.bf16.mxu1 %v3240_v40  ;;  %v3311_v39 = vld [vmem:[%s4463_s1 + $0x5e0] ss:$8 sps:$4 sm:$0xff]   ;;  %v3316_v40 = vld [vmem:[%s4463_s1 + $0x4d4] ss:$8 sps:$4 sm:$0xff]  }
  0x86   : >> { %1212 = vmatpush2.bf16.msra.mxu0 %v3235_v41  ;;  %v3319_v41 = vld [vmem:[%s4463_s1 + $0x5d4] ss:$8 sps:$4 sm:$0xff]  }
  0x87   : >> { %1253 = vmatpush2.bf16.msra.mxu1 %v3238_v42  ;;  %1213 = vmatprep.subr.bf16.mxu0 %v3243_v43  ;;  %v3314_v42 = vld [vmem:[%s4463_s1 + $0x4d0] ss:$8 sps:$4 sm:$0xff]  }
  0x88   : >> { %1254 = vmatprep.subr.bf16.mxu1 %v3246_v44  ;;  %v3317_v43 = vld [vmem:[%s4463_s1 + $0x5d0] ss:$8 sps:$4 sm:$0xff]   ;;  %v3322_v44 = vld [vmem:[%s4463_s1 + $0x4c4] ss:$8 sps:$4 sm:$0xff]  }
  0x8a   : >> { %1214 = vmatpush2.bf16.msra.mxu0 %v3241_v45  ;;  %v3325_v45 = vld [vmem:[%s4463_s1 + $0x5c4] ss:$8 sps:$4 sm:$0xff]  }
  0x8b   : >> { %1255 = vmatpush2.bf16.msra.mxu1 %v3244_v46  ;;  %1215 = vmatprep.subr.bf16.mxu0 %v3249_v47  ;;  %v3320_v46 = vld [vmem:[%s4463_s1 + $0x4c0] ss:$8 sps:$4 sm:$0xff]  }
  0x8c   : >> { %1256 = vmatprep.subr.bf16.mxu1 %v3252_v49  ;;  %v3323_v47 = vld [vmem:[%s4463_s1 + $0x5c0] ss:$8 sps:$4 sm:$0xff]  }
  0x8d   : >> { %v2857_v49 = vld [vmem:[%s3738_s24 + $0x8] sm:$0xff]  ;;  %s2987_s24 = sshll.u32 %s3510_s7, 1  ;;  %s251_s7 = sadd.s32 1, %s3510_s7  }
  0x8e   : >> { %1216 = vmatpush2.bf16.msra.mxu0 %v3247_v50  ;;  %v3328_v50 = vld [vmem:[%s4463_s1 + $0x4b4] ss:$8 sps:$4 sm:$0xff]   ;;  %s2317_s28 = scalar_lea.vmem %s3565_s25, %s2987_s24  ;;  %p248_p5 = scmp.ge.s32.totalorder %s251_s7, 2  }
  0x8f   : >> { %1257 = vmatpush2.bf16.msra.mxu1 %v3250_v51  ;;  %1679 = vmatprep.subr.bf16.mxu0 %v3256_v52  ;;  %v3331_v51 = vld [vmem:[%s4463_s1 + $0x5b4] ss:$8 sps:$4 sm:$0xff]   ;;  %v1830_v52 = vcombine.high %v2857_v49, %v2857_v49  ;;  %vm2354_vm1 = vcmask (%p248_p5), 1040384  }
  0x90   : >> { %1720 = vmatprep.subr.bf16.mxu1 %v3259_v53  ;;  %v3326_v53 = vld [vmem:[%s4463_s1 + $0x4b0] ss:$8 sps:$4 sm:$0xff]  }
  0x91   : >> { %1218 = vmatmul.mubr.bf16.vlgmr.msra.gmra.mxu0 %v3889_v9  ;;  %v1354_v9 = vcombine.high %v4042_v6, %v4042_v6  ;;  %v4189_v59 = vrot.slane %v1830_v52, %v3741_v54  ;;  %v3396_v52 = vld [vmem:[%s4463_s1 + $0x700] ss:$8 sps:$4 sm:$0xff]  }
  0x92   : >> { %1259 = vmatmul.mubr.bf16.vlgmr.msra.gmra.mxu1 %v3903_v15  ;;  %1680 = vmatpush1.bf16.msra.mxu0 %v3254_v55  ;;  %v3275_v15 = vld [vmem:[%s4463_s1 + $0x540] ss:$8 sps:$4 sm:$0xff]   ;;  %v3329_v55 = vld [vmem:[%s4463_s1 + $0x5b0] ss:$8 sps:$4 sm:$0xff]  }
  0x93   : >> { %1721 = vmatpush1.bf16.msra.mxu1 %v3257_v56  ;;  %1681 = vmatprep.subr.bf16.mxu0 %v3262_v57  ;;  %v3334_v56 = vld [vmem:[%s4463_s1 + $0x4a4] ss:$8 sps:$4 sm:$0xff]  }
  0x94   : >> { %1722 = vmatprep.subr.bf16.mxu1 %v3265_v58  ;;  %1711 = vmatprep.mubr.bf16.mxu0 %v1353_v5  ;;  %v3337_v57 = vld [vmem:[%s4463_s1 + $0x5a4] ss:$8 sps:$4 sm:$0xff]   ;;  %v4186_v58 = vrot.slane %v2857_v49, %v3741_v54  ;;  %v3343_v54 = vld [vmem:[%s4463_s1 + $0x594] ss:$8 sps:$4 sm:$0xff]  }
  0x95   : >> { %1752 = vmatprep.mubr.bf16.mxu1 %v1354_v9  ;;  %v3341_v9 = vld [vmem:[%s4463_s1 + $0x590] ss:$8 sps:$4 sm:$0xff]   ;;  %v3395_v49 = vld [vmem:[%s4463_s1 + $0x604] ss:$8 sps:$4 sm:$0xff]  }
  0x96   : >> { %1682 = vmatpush1.bf16.msra.mxu0 %v3260_v62  ;;  %v3335_v62 = vld [vmem:[%s4463_s1 + $0x5a0] ss:$8 sps:$4 sm:$0xff]   ;;  %v1845_v5 = vcombine.high %v4186_v58, %v4186_v58 }
  0x97   : >> { %1723 = vmatpush1.bf16.msra.mxu1 %v3263_v63  ;;  %1683 = vmatprep.subr.bf16.mxu0 %v3268_v7  ;;  %v3340_v63 = vld [vmem:[%s4463_s1 + $0x494] ss:$8 sps:$4 sm:$0xff]   ;;  %v1846_v7 = vcombine.high %v4189_v59, %v4189_v59 }
  0x98   : >> { %1724 = vmatprep.subr.bf16.mxu1 %v3271_v8  ;;  %v3338_v8 = vld [vmem:[%s4463_s1 + $0x490] ss:$8 sps:$4 sm:$0xff]  }
  0x9a   : >> { %1684 = vmatpush1.bf16.msra.mxu0 %v3266_v10  ;;  %v3346_v10 = vld [vmem:[%s4463_s1 + $0x484] ss:$8 sps:$4 sm:$0xff]  }
  0x9b   : >> { %1725 = vmatpush1.bf16.msra.mxu1 %v3269_v11  ;;  %1685 = vmatprep.subr.bf16.mxu0 %v3274_v12  ;;  %v3349_v11 = vld [vmem:[%s4463_s1 + $0x584] ss:$8 sps:$4 sm:$0xff]   ;;  %v1857_v12 = vshll.u32 %v1845_v5, 16 }
  0x9c   : >> { %1726 = vmatprep.subr.bf16.mxu1 %v3277_v13  ;;  %v1871_v13 = vshll.u32 %v1846_v7, 16 }
  0x9e   : >> { %1686 = vmatpush1.bf16.msra.mxu0 %v3272_v14  ;;  %v3344_v14 = vld [vmem:[%s4463_s1 + $0x480] ss:$8 sps:$4 sm:$0xff]  }
  0x9f   : >> { %1727 = vmatpush1.bf16.msra.mxu1 %v3275_v15  ;;  %1687 = vmatprep.subr.bf16.mxu0 %v3280_v16  ;;  %v3347_v15 = vld [vmem:[%s4463_s1 + $0x580] ss:$8 sps:$4 sm:$0xff]   ;;  %v3353_v16 = vld [vmem:[%s4463_s1 + $0x674] ss:$8 sps:$4 sm:$0xff]  }
  0xa0   : >> { %1728 = vmatprep.subr.bf16.mxu1 %v3283_v17  ;;  %v3356_v17 = vld [vmem:[%s4463_s1 + $0x774] ss:$8 sps:$4 sm:$0xff]  }
  0xa2   : >> { %1688 = vmatpush1.bf16.msra.mxu0 %v3278_v18  ;;  %v1855_v18 = vshrl.u32 %v1845_v5, 16  ;;  %v3413_v5 = vld [vmem:[%s4463_s1 + $0x6d4] ss:$8 sps:$4 sm:$0xff]  }
  0xa3   : >> { %1729 = vmatpush1.bf16.msra.mxu1 %v3281_v19  ;;  %1689 = vmatprep.subr.bf16.mxu0 %v3286_v20  ;;  %v1859_v19 = vrot.slane %v1857_v12, 1  ;;  %v1869_v20 = vshrl.u32 %v1846_v7, 16  ;;  %v3416_v7 = vld [vmem:[%s4463_s1 + $0x7d4] ss:$8 sps:$4 sm:$0xff]   ;;  %v3417_v12 = vld [vmem:[%s4463_s1 + $0x6c0] ss:$8 sps:$4 sm:$0xff]  }
  0xa4   : >> { %1730 = vmatprep.subr.bf16.mxu1 %v3289_v21  ;;  %v1873_v21 = vrot.slane %v1871_v13, 1  ;;  %v3420_v13 = vld [vmem:[%s4463_s1 + $0x7c0] ss:$8 sps:$4 sm:$0xff]  }
  0xa6   : >> { %1690 = vmatpush1.bf16.msra.mxu0 %v3284_v22  ;;  %v3351_v22 = vld [vmem:[%s4463_s1 + $0x670] ss:$8 sps:$4 sm:$0xff]  }
  0xa7   : >> { %1731 = vmatpush1.bf16.msra.mxu1 %v3287_v23  ;;  %1691 = vmatprep.subr.bf16.mxu0 %v3292_v24  ;;  %v3354_v23 = vld [vmem:[%s4463_s1 + $0x770] ss:$8 sps:$4 sm:$0xff]   ;;  %v3359_v24 = vld [vmem:[%s4463_s1 + $0x664] ss:$8 sps:$4 sm:$0xff]  }
  0xa8   : >> { %1732 = vmatprep.subr.bf16.mxu1 %v3295_v25  ;;  %v3362_v25 = vld [vmem:[%s4463_s1 + $0x764] ss:$8 sps:$4 sm:$0xff]  }
  0xaa   : >> { %1692 = vmatpush1.bf16.msra.mxu0 %v3290_v26  ;;  %v1860_v26 = vor.u32 %v1859_v19, %v1855_v18  ;;  %v3431_v18 = vld [vmem:[%s4463_s1 + $0x6a4] ss:$8 sps:$4 sm:$0xff]  }
  0xab   : >> { %1733 = vmatpush1.bf16.msra.mxu1 %v3293_v27  ;;  %1693 = vmatprep.subr.bf16.mxu0 %v3298_v28  ;;  %v1874_v27 = vor.u32 %v1873_v21, %v1869_v20  ;;  %v3357_v28 = vld [vmem:[%s4463_s1 + $0x660] ss:$8 sps:$4 sm:$0xff]   ;;  %v3434_v19 = vld [vmem:[%s4463_s1 + $0x7a4] ss:$8 sps:$4 sm:$0xff]  }
  0xac   : >> { %1734 = vmatprep.subr.bf16.mxu1 %v3301_v29  ;;  %v3360_v29 = vld [vmem:[%s4463_s1 + $0x760] ss:$8 sps:$4 sm:$0xff]  }
  0xad   : >> { %v3429_v20 = vld [vmem:[%s4463_s1 + $0x6a0] ss:$8 sps:$4 sm:$0xff]  }
  0xae   : >> { %1694 = vmatpush1.bf16.msra.mxu0 %v3296_v30  ;;  %v3365_v30 = vld [vmem:[%s4463_s1 + $0x654] ss:$8 sps:$4 sm:$0xff]   ;;  %v3432_v21 = vld [vmem:[%s4463_s1 + $0x7a0] ss:$8 sps:$4 sm:$0xff]  }
  0xaf   : >> { %1735 = vmatpush1.bf16.msra.mxu1 %v3299_v31  ;;  %1695 = vmatprep.subr.bf16.mxu0 %v3304_v32  ;;  %v3366_v31 = vld [vmem:[%s4463_s1 + $0x750] ss:$8 sps:$4 sm:$0xff]   ;;  %v3371_v32 = vld [vmem:[%s4463_s1 + $0x644] ss:$8 sps:$4 sm:$0xff]  }
  0xb0   : >> { %1736 = vmatprep.subr.bf16.mxu1 %v3307_v33  ;;  %v3374_v33 = vld [vmem:[%s4463_s1 + $0x744] ss:$8 sps:$4 sm:$0xff]  }
  0xb2   : >> { %1696 = vmatpush2.bf16.msra.mxu0 %v3302_v34  ;;  %v3369_v34 = vld [vmem:[%s4463_s1 + $0x640] ss:$8 sps:$4 sm:$0xff]  }
  0xb3   : >> { %1737 = vmatpush2.bf16.msra.mxu1 %v3305_v35  ;;  %1697 = vmatprep.subr.bf16.mxu0 %v3310_v36  ;;  %v3372_v35 = vld [vmem:[%s4463_s1 + $0x740] ss:$8 sps:$4 sm:$0xff]   ;;  %v3377_v36 = vld [vmem:[%s4463_s1 + $0x634] ss:$8 sps:$4 sm:$0xff]  }
  0xb4   : >> { %1738 = vmatprep.subr.bf16.mxu1 %v3313_v37  ;;  %v3380_v37 = vld [vmem:[%s4463_s1 + $0x734] ss:$8 sps:$4 sm:$0xff]  }
  0xb6   : >> { %1698 = vmatpush2.bf16.msra.mxu0 %v3308_v38  ;;  %v3375_v38 = vld [vmem:[%s4463_s1 + $0x630] ss:$8 sps:$4 sm:$0xff]  }
  0xb7   : >> { %1739 = vmatpush2.bf16.msra.mxu1 %v3311_v39  ;;  %1699 = vmatprep.subr.bf16.mxu0 %v3316_v40  ;;  %v3378_v39 = vld [vmem:[%s4463_s1 + $0x730] ss:$8 sps:$4 sm:$0xff]   ;;  %v3383_v40 = vld [vmem:[%s4463_s1 + $0x624] ss:$8 sps:$4 sm:$0xff]  }
  0xb8   : >> { %1740 = vmatprep.subr.bf16.mxu1 %v3319_v41  ;;  %v3386_v41 = vld [vmem:[%s4463_s1 + $0x724] ss:$8 sps:$4 sm:$0xff]  }
  0xba   : >> { %1700 = vmatpush2.bf16.msra.mxu0 %v3314_v42  ;;  %v3381_v42 = vld [vmem:[%s4463_s1 + $0x620] ss:$8 sps:$4 sm:$0xff]  }
  0xbb   : >> { %1741 = vmatpush2.bf16.msra.mxu1 %v3317_v43  ;;  %1701 = vmatprep.subr.bf16.mxu0 %v3322_v44  ;;  %v3384_v43 = vld [vmem:[%s4463_s1 + $0x720] ss:$8 sps:$4 sm:$0xff]   ;;  %v3389_v44 = vld [vmem:[%s4463_s1 + $0x614] ss:$8 sps:$4 sm:$0xff]  }
  0xbc   : >> { %1742 = vmatprep.subr.bf16.mxu1 %v3325_v45  ;;  %v3392_v45 = vld [vmem:[%s4463_s1 + $0x714] ss:$8 sps:$4 sm:$0xff]  }
  0xbe   : >> { %1702 = vmatpush2.bf16.msra.mxu0 %v3320_v46  ;;  %v3387_v46 = vld [vmem:[%s4463_s1 + $0x610] ss:$8 sps:$4 sm:$0xff]  }
  0xbf   : >> { %1743 = vmatpush2.bf16.msra.mxu1 %v3323_v47  ;;  %1703 = vmatprep.subr.bf16.mxu0 %v3328_v50  ;;  %v3390_v47 = vld [vmem:[%s4463_s1 + $0x710] ss:$8 sps:$4 sm:$0xff]   ;;  %v3398_v50 = vld [vmem:[%s4463_s1 + $0x704] ss:$8 sps:$4 sm:$0xff]  }
  0xc0   : >> { %1744 = vmatprep.subr.bf16.mxu1 %v3331_v51  ;;  %v3393_v51 = vld [vmem:[%s4463_s1 + $0x600] ss:$8 sps:$4 sm:$0xff]  }
  0xc2   : >> { %1704 = vmatpush2.bf16.msra.mxu0 %v3326_v53  ;;  %v3401_v53 = vld [vmem:[%s4463_s1 + $0x6f4] ss:$8 sps:$4 sm:$0xff]  }
  0xc3   : >> { %1745 = vmatpush2.bf16.msra.mxu1 %v3329_v55  ;;  %1705 = vmatprep.subr.bf16.mxu0 %v3334_v56  ;;  %v3404_v55 = vld [vmem:[%s4463_s1 + $0x7f4] ss:$8 sps:$4 sm:$0xff]   ;;  %v3399_v56 = vld [vmem:[%s4463_s1 + $0x6f0] ss:$8 sps:$4 sm:$0xff]  }
  0xc4   : >> { %1746 = vmatprep.subr.bf16.mxu1 %v3337_v57  ;;  %v3402_v57 = vld [vmem:[%s4463_s1 + $0x7f0] ss:$8 sps:$4 sm:$0xff]  }
  0xc6   : >> { %1706 = vmatpush2.bf16.msra.mxu0 %v3332_v61  ;;  %v3407_v61 = vld [vmem:[%s4463_s1 + $0x6e4] ss:$8 sps:$4 sm:$0xff]  }
  0xc7   : >> { %1747 = vmatpush2.bf16.msra.mxu1 %v3335_v62  ;;  %1707 = vmatprep.subr.bf16.mxu0 %v3340_v63  ;;  %v3410_v62 = vld [vmem:[%s4463_s1 + $0x7e4] ss:$8 sps:$4 sm:$0xff]   ;;  %v3405_v63 = vld [vmem:[%s4463_s1 + $0x6e0] ss:$8 sps:$4 sm:$0xff]  }
  0xc8   : >> { %1748 = vmatprep.subr.bf16.mxu1 %v3343_v54  ;;  %v3408_v54 = vld [vmem:[%s4463_s1 + $0x7e0] ss:$8 sps:$4 sm:$0xff]  }
  0xca   : >> { %1708 = vmatpush2.bf16.msra.mxu0 %v3338_v8  ;;  %v3411_v8 = vld [vmem:[%s4463_s1 + $0x6d0] ss:$8 sps:$4 sm:$0xff]  }
  0xcb   : >> { %1749 = vmatpush2.bf16.msra.mxu1 %v3341_v9  ;;  %1709 = vmatprep.subr.bf16.mxu0 %v3346_v10  ;;  %v3414_v9 = vld [vmem:[%s4463_s1 + $0x7d0] ss:$8 sps:$4 sm:$0xff]   ;;  %v3419_v10 = vld [vmem:[%s4463_s1 + $0x6c4] ss:$8 sps:$4 sm:$0xff]  }
  0xcc   : >> { %1750 = vmatprep.subr.bf16.mxu1 %v3349_v11  ;;  %v3422_v11 = vld [vmem:[%s4463_s1 + $0x7c4] ss:$8 sps:$4 sm:$0xff]  }
  0xce   : >> { %1710 = vmatpush2.bf16.msra.mxu0 %v3344_v14  ;;  %v3425_v14 = vld [vmem:[%s4463_s1 + $0x6b4] ss:$8 sps:$4 sm:$0xff]  }
  0xcf   : >> { %1751 = vmatpush2.bf16.msra.mxu1 %v3347_v15  ;;  %2199 = vmatprep.subr.bf16.mxu0 %v3353_v16  ;;  %v3428_v15 = vld [vmem:[%s4463_s1 + $0x7b4] ss:$8 sps:$4 sm:$0xff]   ;;  %v3423_v16 = vld [vmem:[%s4463_s1 + $0x6b0] ss:$8 sps:$4 sm:$0xff]  }
  0xd0   : >> { %2240 = vmatprep.subr.bf16.mxu1 %v3356_v17  ;;  %v3426_v17 = vld [vmem:[%s4463_s1 + $0x7b0] ss:$8 sps:$4 sm:$0xff]  }
  0xd1   : >> { %1712 = vmatmul.mubr.bf16.vlgmr.msra.gmra.mxu0 %v4029_v60  ;;  %v3368_v60 = vld [vmem:[%s4463_s1 + $0x754] ss:$8 sps:$4 sm:$0xff]  }
  0xd2   : >> { %1753 = vmatmul.mubr.bf16.vlgmr.msra.gmra.mxu1 %v4042_v6  ;;  %2200 = vmatpush1.bf16.msra.mxu0 %v3351_v22  ;;  %v3363_v6 = vld [vmem:[%s4463_s1 + $0x650] ss:$8 sps:$4 sm:$0xff]   ;;  %v3437_v22 = vld [vmem:[%s4463_s1 + $0x694] ss:$8 sps:$4 sm:$0xff]  }
  0xd3   : >> { %2241 = vmatpush1.bf16.msra.mxu1 %v3354_v23  ;;  %2201 = vmatprep.subr.bf16.mxu0 %v3359_v24  ;;  %v3440_v23 = vld [vmem:[%s4463_s1 + $0x794] ss:$8 sps:$4 sm:$0xff]   ;;  %v1850_v24 = vshll.u32 %v4186_v58, 16 }
  0xd4   : >> { %2242 = vmatprep.subr.bf16.mxu1 %v3362_v25  ;;  %2231 = vmatprep.mubr.bf16.mxu0 %v1860_v26  ;;  %v1864_v25 = vshll.u32 %v4189_v59, 16  ;;  %v3435_v26 = vld [vmem:[%s4463_s1 + $0x690] ss:$8 sps:$4 sm:$0xff]  }
  0xd5   : >> { %2272 = vmatprep.mubr.bf16.mxu1 %v1874_v27  ;;  %v3438_v27 = vld [vmem:[%s4463_s1 + $0x790] ss:$8 sps:$4 sm:$0xff]  }
  0xd6   : >> { %2202 = vmatpush1.bf16.msra.mxu0 %v3357_v28  ;;  %v3443_v28 = vld [vmem:[%s4463_s1 + $0x684] ss:$8 sps:$4 sm:$0xff]  }
  0xd7   : >> { %2243 = vmatpush1.bf16.msra.mxu1 %v3360_v29  ;;  %2203 = vmatprep.subr.bf16.mxu0 %v3365_v30  ;;  %v3446_v29 = vld [vmem:[%s4463_s1 + $0x784] ss:$8 sps:$4 sm:$0xff]   ;;  %v1848_v30 = vshrl.u32 %v4186_v58, 16 }
  0xd8   : >> { %2244 = vmatprep.subr.bf16.mxu1 %v3368_v60  ;;  %v1852_v60 = vrot.slane %v1850_v24, 1 }
  0xda   : >> { %2204 = vmatpush1.bf16.msra.mxu0 %v3363_v6  ;;  %v1862_v6 = vshrl.u32 %v4189_v59, 16 }
  0xdb   : >> { %2245 = vmatpush1.bf16.msra.mxu1 %v3366_v31  ;;  %2205 = vmatprep.subr.bf16.mxu0 %v3371_v32  ;;  %v1866_v31 = vrot.slane %v1864_v25, 1  ;;  %v3441_v32 = vld [vmem:[%s4463_s1 + $0x680] ss:$8 sps:$4 sm:$0xff]  }
  0xdc   : >> { %2246 = vmatprep.subr.bf16.mxu1 %v3374_v33  ;;  %v3444_v33 = vld [vmem:[%s4463_s1 + $0x780] ss:$8 sps:$4 sm:$0xff]  }
  0xde   : >> { %2206 = vmatpush1.bf16.msra.mxu0 %v3369_v34  ;;  %v1853_v34 = vor.u32 %v1852_v60, %v1848_v30 }
  0xdf   : >> { %2247 = vmatpush1.bf16.msra.mxu1 %v3372_v35  ;;  %2207 = vmatprep.subr.bf16.mxu0 %v3377_v36  ;;  %v1867_v35 = vor.u32 %v1866_v31, %v1862_v6 }
  0xe0   : >> { %2248 = vmatprep.subr.bf16.mxu1 %v3380_v37 }
  0xe2   : >> { %2208 = vmatpush1.bf16.msra.mxu0 %v3375_v38 }
  0xe3   : >> { %2249 = vmatpush1.bf16.msra.mxu1 %v3378_v39  ;;  %2209 = vmatprep.subr.bf16.mxu0 %v3383_v40 }
  0xe4   : >> { %2250 = vmatprep.subr.bf16.mxu1 %v3386_v41 }
  0xe6   : >> { %2210 = vmatpush1.bf16.msra.mxu0 %v3381_v42 }
  0xe7   : >> { %2251 = vmatpush1.bf16.msra.mxu1 %v3384_v43  ;;  %2211 = vmatprep.subr.bf16.mxu0 %v3389_v44 }
  0xe8   : >> { %2252 = vmatprep.subr.bf16.mxu1 %v3392_v45 }
  0xea   : >> { %2212 = vmatpush1.bf16.msra.mxu0 %v3387_v46 }
  0xeb   : >> { %2253 = vmatpush1.bf16.msra.mxu1 %v3390_v47  ;;  %2213 = vmatprep.subr.bf16.mxu0 %v3395_v49 }
  0xec   : >> { %2254 = vmatprep.subr.bf16.mxu1 %v3398_v50 }
  0xee   : >> { %2214 = vmatpush1.bf16.msra.mxu0 %v3393_v51 }
  0xef   : >> { %2255 = vmatpush1.bf16.msra.mxu1 %v3396_v52  ;;  %2215 = vmatprep.subr.bf16.mxu0 %v3401_v53 }
  0xf0   : >> { %2256 = vmatprep.subr.bf16.mxu1 %v3404_v55 }
  0xf2   : >> { %2216 = vmatpush2.bf16.msra.mxu0 %v3399_v56 }
  0xf3   : >> { %2257 = vmatpush2.bf16.msra.mxu1 %v3402_v57  ;;  %2217 = vmatprep.subr.bf16.mxu0 %v3407_v61 }
  0xf4   : >> { %2258 = vmatprep.subr.bf16.mxu1 %v3410_v62 }
  0xf6   : >> { %2218 = vmatpush2.bf16.msra.mxu0 %v3405_v63 }
  0xf7   : >> { %2259 = vmatpush2.bf16.msra.mxu1 %v3408_v54  ;;  %2219 = vmatprep.subr.bf16.mxu0 %v3413_v5 }
  0xf8   : >> { %2260 = vmatprep.subr.bf16.mxu1 %v3416_v7 }
  0xfa   : >> { %2220 = vmatpush2.bf16.msra.mxu0 %v3411_v8 }
  0xfb   : >> { %2261 = vmatpush2.bf16.msra.mxu1 %v3414_v9  ;;  %2221 = vmatprep.subr.bf16.mxu0 %v3419_v10 }
  0xfc   : >> { %2262 = vmatprep.subr.bf16.mxu1 %v3422_v11 }
  0xfe   : >> { %2222 = vmatpush2.bf16.msra.mxu0 %v3417_v12  ;;  %v2286_v12 = vsub.s32 0, %v3719_v48 }
  0xff   : >> { %2263 = vmatpush2.bf16.msra.mxu1 %v3420_v13  ;;  %2223 = vmatprep.subr.bf16.mxu0 %v3425_v14  ;;  %v2290_v13 = vsub.s32 1, %v3719_v48 }
 0x100   : >> { %2264 = vmatprep.subr.bf16.mxu1 %v3428_v15  ;;  %v3513_v15 = vmov 1966171168  }
 0x102   : >> { %2224 = vmatpush2.bf16.msra.mxu0 %v3423_v16  ;;  %v2302_v16 = vunpack.c.l.s4 %v3513_v15 }
 0x103   : >> { %2265 = vmatpush2.bf16.msra.mxu1 %v3426_v17  ;;  %2225 = vmatprep.subr.bf16.mxu0 %v3431_v18 }
 0x104   : >> { %2266 = vmatprep.subr.bf16.mxu1 %v3434_v19 }
 0x106   : >> { %2226 = vmatpush2.bf16.msra.mxu0 %v3429_v20  ;;  %v2287_v20 = vrot.slane %v3560_v0, %v2286_v12 }
 0x107   : >> { %2267 = vmatpush2.bf16.msra.mxu1 %v3432_v21  ;;  %2227 = vmatprep.subr.bf16.mxu0 %v3437_v22 }
 0x108   : >> { %2268 = vmatprep.subr.bf16.mxu1 %v3440_v23  ;;  %v2291_v23 = vrot.slane %v3560_v0, %v2290_v13 }
 0x10a   : >> { %2228 = vmatpush2.bf16.msra.mxu0 %v3435_v26 }
 0x10b   : >> { %2269 = vmatpush2.bf16.msra.mxu1 %v3438_v27  ;;  %2229 = vmatprep.subr.bf16.mxu0 %v3443_v28  ;;  %v2303_v27 = vunpack.c.0.s8 %v2302_v16 }
 0x10c   : >> { %2270 = vmatprep.subr.bf16.mxu1 %v3446_v29 }
 0x10e   : >> { %2230 = vmatpush2.bf16.msra.mxu0 %v3441_v32 }
 0x10f   : >> { %2271 = vmatpush2.bf16.msra.mxu1 %v3444_v33 }
 0x111   : >> { %v795_v58 = vpop.f32.mrf.mxu0  ;;  %2232 = vmatmul.mubr.bf16.vlgmr.msra.gmra.mxu0 %v1853_v34 }
 0x112   : >> { %v836_v36 = vpop.f32.mrf.mxu1  ;;  %2273 = vmatmul.mubr.bf16.vlgmr.msra.gmra.mxu1 %v1867_v35  ;;  %v2306_v35 = vsub.s32 %v2303_v27, %v3719_v48 }
 0x113   : >> { %v837_v59 = vadd.f32 %v836_v36, %v795_v58  ;;  %v797_v37 = vpop.f32.mrf.mxu0 }
 0x114   : >> { %v838_v38 = vpop.f32.mrf.mxu1 }
 0x115   : >> { %v839_v39 = vadd.f32 %v838_v38, %v797_v37  ;;  %v799_v40 = vpop.f32.mrf.mxu0 }
 0x116   : >> { %v840_v41 = vpop.f32.mrf.mxu1 }
 0x117   : >> { %v800_v42 = vpop.f32.mrf.mxu0 }
 0x118   : >> { %v841_v43 = vpop.f32.mrf.mxu1 }
 0x151   : >> { %v1219_v44 = vpop.f32.mrf.mxu0 }
 0x152   : >> { %v1260_v45 = vpop.f32.mrf.mxu1  ;;  %v1220_v46 = vadd.f32 %v1219_v44, %v837_v59 }
 0x153   : >> { %v1221_v47 = vpop.f32.mrf.mxu0 }
 0x154   : >> { %v1262_v49 = vpop.f32.mrf.mxu1  ;;  %v1261_v50 = vadd.f32 %v1260_v45, %v1220_v46  ;;  %v1222_v51 = vadd.f32 %v1221_v47, %v839_v39 }
 0x155   : >> { %v1223_v52 = vpop.f32.mrf.mxu0 }
 0x156   : >> { %v1264_v53 = vpop.f32.mrf.mxu1  ;;  %v1263_v55 = vadd.f32 %v1262_v49, %v1222_v51 }
 0x157   : >> { %v1224_v56 = vpop.f32.mrf.mxu0 }
 0x158   : >> { %v1265_v57 = vpop.f32.mrf.mxu1 }
 0x191   : >> { %v1713_v61 = vpop.f32.mrf.mxu0 }
 0x192   : >> { %v1754_v62 = vpop.f32.mrf.mxu1 }
 0x193   : >> { %v1755_v63 = vadd.f32 %v1754_v62, %v1713_v61  ;;  %v1715_v54 = vpop.f32.mrf.mxu0 }
 0x194   : >> { %v1756_v5 = vpop.f32.mrf.mxu1 }
 0x195   : >> { %v1761_v7 = vadd.f32 %v1755_v63, %v1261_v50  ;;  %v1717_v8 = vpop.f32.mrf.mxu0  ;;  %v1757_v14 = vadd.f32 %v1756_v5, %v1715_v54 }
 0x196   : >> { %v1758_v9 = vpop.f32.mrf.mxu1 }
 0x197   : >> { %v1718_v10 = vpop.f32.mrf.mxu0  ;;  %v1762_v24 = vadd.f32 %v1757_v14, %v1263_v55 }
 0x198   : >> { %v1759_v11 = vpop.f32.mrf.mxu1 }
 0x1d1   : >> { %v2233_v17 = vpop.f32.mrf.mxu0 }
 0x1d2   : >> { %v2274_v18 = vpop.f32.mrf.mxu1 }
 0x1d3   : >> { %v2275_v19 = vadd.f32 %v2274_v18, %v2233_v17  ;;  %v2235_v21 = vpop.f32.mrf.mxu0 }
 0x1d4   : >> { %v2276_v22 = vpop.f32.mrf.mxu1 }
 0x1d5   : >> { %v2281_v25 = vadd.f32 %v2275_v19, %v1761_v7  ;;  %v2277_v26 = vadd.f32 %v2276_v22, %v2235_v21  ;;  %v2237_v28 = vpop.f32.mrf.mxu0 }
 0x1d6   : >> { %v2278_v29 = vpop.f32.mrf.mxu1 }
 0x1d7   : >> { %v2294_v30 = vadd.f32 %v2287_v20, %v2281_v25  ;;  %v2282_v60 = vadd.f32 %v2277_v26, %v1762_v24  ;;  %v2238_v6 = vpop.f32.mrf.mxu0 }
 0x1d8   : >> { %v2279_v31 = vpop.f32.mrf.mxu1 }
 0x1d9   : >> { %v2320_v32 = vsel %vm2319_vm0, %v2294_v30, 0.0  ;;  %v2336_v33 = vmul.f32 %v2294_v30, %v2294_v30  ;;  %v2295_v34 = vadd.f32 %v2291_v23, %v2282_v60 }
 0x1da   : >> { %v2321_v58 = vrot.slane %v2320_v32, 4 }
 0x1db   : >> { %v2338_v36 = vsel %vm2319_vm0, %v2336_v33, 0.0  ;;  %v2986_v59 = vpack.c.bf16 %v2295_v34, %v2294_v30  ;;  %v2327_v37 = vsel %vm2319_vm0, %v2295_v34, 0.0  ;;  %v2337_v38 = vmul.f32 %v2295_v34, %v2295_v34 }
 0x1dc   : >> { %v2322_v39 = vadd.f32 %v2321_v58, %v2320_v32  ;;  %v2339_v40 = vrot.slane %v2338_v36, 4  ;;  %v2328_v41 = vrot.slane %v2327_v37, 4 }
 0x1dd   : >> { %v2307_v42 = vrot.slane %v2986_v59, %v2306_v35  ;;  %v2345_v43 = vsel %vm2319_vm0, %v2337_v38, 0.0 }
 0x1de   : >> { %v2323_v44 = vrot.slane %v2322_v39, 2  ;;  %v2340_v45 = vadd.f32 %v2339_v40, %v2338_v36  ;;  %v2329_v46 = vadd.f32 %v2328_v41, %v2327_v37  ;;  %v2346_v47 = vrot.slane %v2345_v43, 4 }
 0x1df   : >> { %2988 = vst.sshfl [vmem:[%s2317_s28] sm:$0x5 pattern:$0x73625140] %v2307_v42 }
 0x1e0   : >> { %v2324_v48 = vadd.f32 %v2323_v44, %v2322_v39  ;;  %v2341_v49 = vrot.slane %v2340_v45, 2  ;;  %v2330_v50 = vrot.slane %v2329_v46, 2  ;;  %v2347_v51 = vadd.f32 %v2346_v47, %v2345_v43 }
 0x1e2   : >> { %v2325_v52 = vrot.slane %v2324_v48, 1  ;;  %v2342_v53 = vadd.f32 %v2341_v49, %v2340_v45  ;;  %v2331_v55 = vadd.f32 %v2330_v50, %v2329_v46  ;;  %v2348_v56 = vrot.slane %v2347_v51, 2 }
 0x1e4   : >> { %v2326_v57 = vadd.f32 %v2325_v52, %v2324_v48  ;;  %v2343_v61 = vrot.slane %v2342_v53, 1  ;;  %v2332_v62 = vrot.slane %v2331_v55, 1  ;;  %v2349_v63 = vadd.f32 %v2348_v56, %v2347_v51 }
 0x1e6   : >> { %v2334_v54 = vadd.f32 %v3506_v4, %v2326_v57   ;;  %v2344_v5 = vadd.f32 %v2343_v61, %v2342_v53  ;;  %v2333_v7 = vadd.f32 %v2332_v62, %v2331_v55  ;;  %v2350_v8 = vrot.slane %v2349_v63, 1 }
 0x1e8   : >> { %v2352_v9 = vadd.f32 %v3498_v2, %v2344_v5   ;;  %v2335_v10 = vadd.f32 %v3502_v3, %v2333_v7   ;;  %v2351_v11 = vadd.f32 %v2350_v8, %v2349_v63  ;;  %v4470_v4 = vmov %v2334_v54  ;;  %250 = sbr.rel (!%p248_p5) target bundleno = 16 (0x10), region = 87 }
 0x1ea   : >> { %v2353_v12 = vadd.f32 %v3494_v1, %v2351_v11   ;;  %v4468_v2 = vmov %v2352_v9  ;;  %v4469_v3 = vmov %v2335_v10  ;;  %v2355_v4 = vsel (%p248_p5), %vm2354_vm1, %v2334_v54, %v2352_v9 }
 0x1eb   : > { %v2358_v14 = vsel (%p248_p5), %vm2319_vm0, %v2355_v4, 0.0 }
 0x1ec   : >> { %v4467_v1 = vmov %v2353_v12  ;;  %v2356_v13 = vsel (%p248_p5), %vm2354_vm1, %v2335_v10, %v2353_v12  ;;  %2360 = vst [vmem:[%s3575_s6] sm:$0xff] (%p248_p5), %v2358_v14 }
 0x1ed   : > { %v2359_v15 = vsel %vm2319_vm0, %v2356_v13, 0.0 }
 0x1ee   : > { %2361 = vst [vmem:[%s3575_s6 + $0x8] sm:$0xff] %v2359_v15 }
 0x1ef PF: > { %s15_s17 = sadd.s32 1, %s3490_s17   ;;  %s4471_s15 = smov %s3486_s16 }
 0x1f0   : > { %p12_p6 = scmp.ge.s32.totalorder %s15_s17, 4   ;;  %s4472_s16 = smov %s4474_s18 }
 0x1f2   :  { %14 = sbr.rel (!%p12_p6) target bundleno = 2 (0x2), region = 98 }

// kernel: discriminator_forward.9
= control target key start
LH: loop header
LB: loop body
LE: loop exit
PB: predicated region body
PF: predicated region fallthrough
CT: control target
= control target key end

     0   :  { %v32_v0 = vlaneseq  ;;  %v240_v1 = vmov 1983009808   ;;  %vm205_vm1 = vcmask 1041408   ;;  %s306_s0 = inlined_call_operand.vmem [shape: bf16[2,512], index: 0, kind: input, shape index: {}]   ;;  %s307_s1 = inlined_call_operand.vmem [shape: f32[1,512], index: 1, kind: input, shape index: {}]   ;;  %s308_s2 = inlined_call_operand.vmem [shape: f32[1,512], index: 2, kind: input, shape index: {}]   ;;  %s309_s3 = inlined_call_operand.vmem [shape: f32[1,512], index: 3, kind: input, shape index: {}]   ;;  %s310_s6 = inlined_call_operand.<no memory space> [shape: f32[1,1], index: 6, kind: input, shape index: {}]   ;;  %s311_s4 = inlined_call_operand.vmem [shape: f32[1,512], index: 4, kind: input, shape index: {}]   ;;  %s312_s5 = inlined_call_operand.vmem [shape: f32[1,512], index: 5, kind: input, shape index: {}]   ;;  %s313_s7 = inlined_call_operand.vmem [shape: f32[2,128], index: 7, kind: output, shape index: {}]  }
   0x1   :  { %v51_v2 = vunpack.c.l.s4 %v240_v1  ;;  %v67_v3 = vld [vmem:[%s308_s2] sm:$0xf]  ;;  %v12_v4 = vstv %s310_s6 }
   0x2   :  { %v28_v5 = vld [vmem:[%s306_s0] sm:$0xf]  ;;  %v33_v6 = vshrl.u32 %v32_v0, 7  ;;  %13 = vst [vmem:[#allocation2] sm:$0x1] %v12_v4 }
   0x3   :  { %v68_v7 = vld [vmem:[%s309_s3] sm:$0xf]  ;;  %v52_v9 = vunpack.c.0.s8 %v51_v2  ;;  %v29_v15 = vunpack.c.l.bf16 %v28_v5 }
   0x4   :  { %v30_v8 = vld [vmem:[%s307_s1] sm:$0xf]  ;;  %v69_v10 = vmul.f32 %v68_v7, %v67_v3  ;;  %v34_v11 = vsub.s32 0, %v33_v6  ;;  %v38_v12 = vsub.s32 1, %v33_v6  ;;  %v42_v13 = vsub.s32 2, %v33_v6 }
   0x5   :  { %v46_v14 = vsub.s32 3, %v33_v6  ;;  %v55_v16 = vsub.s32 %v52_v9, %v33_v6  ;;  %v106_v17 = vld [vmem:[%s311_s4] sm:$0xf]  ;;  %v241_v9 = vmov 0  }
   0x6   :  { %v35_v18 = vrot.slane %v30_v8, %v34_v11  ;;  %v39_v19 = vrot.slane %v30_v8, %v38_v12  ;;  %v43_v20 = vrot.slane %v30_v8, %v42_v13  ;;  %v74_v22 = vrot.slane %v69_v10, %v34_v11  ;;  %v146_v26 = vld [vmem:[%s312_s5] sm:$0xf]  ;;  %237 = vset.pattern.permute.xlu0 %v241_v9 }
   0x7   :  { %v47_v21 = vrot.slane %v30_v8, %v46_v14  ;;  %v78_v23 = vrot.slane %v69_v10, %v38_v12  ;;  %v82_v24 = vrot.slane %v69_v10, %v42_v13  ;;  %v86_v25 = vrot.slane %v69_v10, %v46_v14 }
   0x8   :  { %v48_v27 = vcombine.low %v35_v18, %v39_v19  ;;  %v111_v29 = vrot.slane %v106_v17, %v34_v11  ;;  %v115_v30 = vrot.slane %v106_v17, %v38_v12  ;;  %v119_v33 = vrot.slane %v106_v17, %v42_v13 }
   0x9   :  { %v49_v28 = vcombine.low %v43_v20, %v47_v21  ;;  %v87_v31 = vcombine.low %v74_v22, %v78_v23  ;;  %v88_v32 = vcombine.low %v82_v24, %v86_v25  ;;  %v123_v34 = vrot.slane %v106_v17, %v46_v14  ;;  %v234_v10 = vld [vmem:[#allocation2] ss:$0 sm:$0xff] }
   0xa   :  { %v56_v35 = vrot.slane %v48_v27, %v55_v16  ;;  %v124_v37 = vcombine.low %v111_v29, %v115_v30  ;;  %v151_v38 = vrot.slane %v146_v26, %v34_v11  ;;  %v155_v42 = vrot.slane %v146_v26, %v38_v12 }
   0xb   :  { %v63_v36 = vrot.slane %v49_v28, %v55_v16  ;;  %v95_v39 = vrot.slane %v87_v31, %v55_v16  ;;  %v102_v40 = vrot.slane %v88_v32, %v55_v16  ;;  %v125_v41 = vcombine.low %v119_v33, %v123_v34 }
   0xc   :  { %v132_v44 = vrot.slane %v124_v37, %v55_v16  ;;  %v159_v45 = vrot.slane %v146_v26, %v42_v13  ;;  %v163_v46 = vrot.slane %v146_v26, %v46_v14  ;;  %v164_v49 = vcombine.low %v151_v38, %v155_v42 }
   0xd   :  { %v64_v43 = vcombine.low %v56_v35, %v63_v36  ;;  %v103_v47 = vcombine.low %v95_v39, %v102_v40  ;;  %v139_v48 = vrot.slane %v125_v41, %v55_v16 }
   0xe   :  { %v165_v51 = vcombine.low %v159_v45, %v163_v46  ;;  %v172_v53 = vrot.slane %v164_v49, %v55_v16 }
   0xf   :  { %v66_v50 = vsub.f32 %v29_v15, %v64_v43  ;;  %v140_v52 = vcombine.low %v132_v44, %v139_v48 }
  0x10   :  { %v179_v55 = vrot.slane %v165_v51, %v55_v16 }
  0x11   :  { %v105_v54 = vmul.f32 %v103_v47, %v66_v50 }
  0x12   :  { %v180_v57 = vcombine.low %v172_v53, %v179_v55 }
  0x13   :  { %v142_v56 = vadd.f32 %v140_v52, %v105_v54 }
  0x15   :  { %vm143_vm0 = vcmp.ge.f32.partialorder %v142_v56, 0.0  ;;  %v144_v58 = vmul.f32 0.2, %v142_v56 }
  0x17   :  { %v145_v59 = vsel %vm143_vm0, %v142_v56, %v144_v58 }
  0x18   :  { %v182_v60 = vmul.f32 %v180_v57, %v145_v59 }
  0x1a   :  { %v184_v61 = vcombine.high %v182_v60, %v182_v60  ;;  %v191_v62 = vrot.slane %v182_v60, %v55_v16 }
  0x1c   :  { %v198_v63 = vrot.slane %v184_v61, %v55_v16  ;;  %v199_v0 = vcombine.high %v191_v62, %v191_v62  ;;  %v206_v1 = vsel %vm205_vm1, %v191_v62, 0.0 }
  0x1e   :  { %v200_v2 = vcombine.high %v198_v63, %v198_v63  ;;  %v207_v3 = vsel %vm205_vm1, %v199_v0, 0.0  ;;  %v209_v4 = vsel %vm205_vm1, %v198_v63, 0.0 }
  0x1f   :  { %v208_v5 = vadd.f32 %v207_v3, %v206_v1 }
  0x20   :  { %v211_v6 = vsel %vm205_vm1, %v200_v2, 0.0 }
  0x21   :  { %v210_v7 = vadd.f32 %v209_v4, %v208_v5 }
  0x23   :  { %v212_v8 = vadd.f32 %v211_v6, %v210_v7 }
  0x25   :  { %213 = vadd.xlane.f32.xlu0 %v212_v8 }
  0xae   :  { %v214_v11 = vpop.xlane.xlu0 %213 }
  0xaf   :  { %v222_v12 = vadd.f32 %v234_v10, %v214_v11 }
  0xb1   :  { %238 = vtanh.f32 %v222_v12 }
  0xbe   :  { %v239_v13 = vpop.eup %238 }
  0xbf   :  { %226 = vperm.xlu0 %237, %v239_v13  }
 0x13a   :  { %v227_v14 = vpop.permute.xlu0 %226 }
 0x13b   :  { %229 = vst [vmem:[%s313_s7] sm:$0x3] %v227_v14 }

// kernel: discriminator_forward.8
= control target key start
LH: loop header
LB: loop body
LE: loop exit
PB: predicated region body
PF: predicated region fallthrough
CT: control target
= control target key end

     0   :  { %s11623_s15 = smov 0   ;;  %s11625_s16 = smov 0   ;;  %s15102_s0 = inlined_call_operand.vmem [shape: bf16[2,2,2,1024], index: 0, kind: input, shape index: {}]   ;;  %s15103_s1 = inlined_call_operand.vmem [shape: bf16[4,1024,512], index: 1, kind: input, shape index: {}]   ;;  %s15104_s2 = inlined_call_operand.vmem [shape: f32[1,512], index: 2, kind: input, shape index: {}]   ;;  %s15105_s3 = inlined_call_operand.vmem [shape: bf16[2,1,1,512], index: 3, kind: output, shape index: {0}]   ;;  %s15106_s4 = inlined_call_operand.vmem [shape: f32[2,1,8,512], index: 4, kind: output, shape index: {1}]  }
   0x1   :  { %s11627_s17 = smov 0  }
   0x2 LB: > { %s27_s18 = sadd.s32 1, %s11591_s16  ;;  %p8205_p0 = scmp.ge.s32.totalorder %s11595_s17, 1  ;;  %s11595_s17 = sphi %s11627_s17, %s15_s17   ;;  %s11591_s16 = sphi %s11625_s16, %s15114_s16   ;;  %s11587_s15 = sphi %s11623_s15, %s15113_s15  }
   0x3   : > { %p29_p1 = scmp.ge.s32.totalorder %s27_s18, 2  ;;  %p180_p2 = scmp.lt.s32.totalorder %s11595_s17, 3 }
   0x5   : > { %s15116_s18 = smov (%p29_p1, %s27_s18), 0  ;;  %p181_p3 = pnand %p8205_p0, %p180_p2 }
   0x6   : > { %p217_p4 = scmp.lt.s32.totalorder (!%p181_p3), %s11587_s15, 1 }
   0x7   : > { %184 = sbr.rel (%p181_p3) target bundleno = 1250 (0x4e2), region = 32 }
   0xc   : > { %v10034_v0 = vld [vmem:[%s15103_s1 + $0x8e4] ss:$16 sps:$4 sm:$0xff]   ;;  %v10038_v2 = vld [vmem:[%s15103_s1 + $0x8e0] ss:$16 sps:$4 sm:$0xff]   ;;  %v11597_v36 = vmov 1966171168   ;;  %v760_v38 = vlaneseq }
   0xd   : > { %v10036_v1 = vld [vmem:[%s15103_s1 + $0xae4] ss:$16 sps:$4 sm:$0xff]   ;;  %2117 = vmatprep.subr.bf16.mxu0 %v10034_v0  ;;  %v10039_v3 = vld [vmem:[%s15103_s1 + $0xae0] ss:$16 sps:$4 sm:$0xff]   ;;  %v758_v37 = vunpack.c.l.s4 %v11597_v36  ;;  %s15118_s15 = smov (!%p217_p4, %s11587_s15), 1  ;;  %vm8002_vm0 = vcmask 1040384  }
   0xe   : > { %2158 = vmatprep.subr.bf16.mxu1 %v10036_v1  ;;  %v10040_v4 = vld [vmem:[%s15103_s1 + $0x8c4] ss:$16 sps:$4 sm:$0xff]   ;;  %2118 = vmatpush1.bf16.msra.mxu0 %v10038_v2  ;;  %v10044_v6 = vld [vmem:[%s15103_s1 + $0x8c0] ss:$16 sps:$4 sm:$0xff]   ;;  %v11764_v43 = vshrl.u32 %v760_v38, 7  ;;  %s8206_s9 = sshll.u32 %s15118_s15, 4 }
   0xf   : > { %2159 = vmatpush1.bf16.msra.mxu1 %v10039_v3  ;;  %v10042_v5 = vld [vmem:[%s15103_s1 + $0xac4] ss:$16 sps:$4 sm:$0xff]   ;;  %2119 = vmatprep.subr.bf16.mxu0 %v10040_v4  ;;  %v10045_v7 = vld [vmem:[%s15103_s1 + $0xac0] ss:$16 sps:$4 sm:$0xff]   ;;  %v759_v42 = vunpack.c.0.s8 %v758_v37  ;;  %s11785_s22 = scalar_lea.vmem %s15102_s0, %s8206_s9  ;;  %s10008_s28 = sshll.u32 %s15118_s15, 5  ;;  %vm8057_vm1 = vcmask 1041408  }
  0x10   : > { %2160 = vmatprep.subr.bf16.mxu1 %v10042_v5  ;;  %v10046_v8 = vld [vmem:[%s15103_s1 + $0x8a4] ss:$16 sps:$4 sm:$0xff]   ;;  %v10050_v10 = vld [vmem:[%s15103_s1 + $0x8a0] ss:$16 sps:$4 sm:$0xff]   ;;  %s15046_s5 = scalar_lea.vmem %s15106_s4, %s10008_s28  ;;  %vm8003_vm2 = vsmask.f32 256 }
  0x11   : > { %v10048_v9 = vld [vmem:[%s15103_s1 + $0xaa4] ss:$16 sps:$4 sm:$0xff]   ;;  %v10051_v11 = vld [vmem:[%s15103_s1 + $0xaa0] ss:$16 sps:$4 sm:$0xff]   ;;  %v11788_v49 = vsub.s32 %v759_v42, %v11764_v43  ;;  %vm8005_vm3 = vcmask 1041409   ;;  %vm15059_vm5 = vmand %vm8002_vm0, %vm8003_vm2  ;;  %vm8009_vm7 = vcmask 1042434  }
  0x12   : > { %2120 = vmatpush1.bf16.msra.mxu0 %v10044_v6  ;;  %v10052_v12 = vld [vmem:[%s15103_s1 + $0x884] ss:$16 sps:$4 sm:$0xff]   ;;  %v10056_v14 = vld [vmem:[%s15103_s1 + $0x880] ss:$16 sps:$4 sm:$0xff]   ;;  %vm8006_vm4 = vsmask.f32 1280 }
  0x13   : > { %2161 = vmatpush1.bf16.msra.mxu1 %v10045_v7  ;;  %2121 = vmatprep.subr.bf16.mxu0 %v10046_v8  ;;  %v10054_v13 = vld [vmem:[%s15103_s1 + $0xa84] ss:$16 sps:$4 sm:$0xff]   ;;  %v10057_v15 = vld [vmem:[%s15103_s1 + $0xa80] ss:$16 sps:$4 sm:$0xff]   ;;  %vm15063_vm6 = vmand %vm8005_vm3, %vm8006_vm4  ;;  %vm8010_vm8 = vsmask.f32 2304 }
  0x14   : > { %2162 = vmatprep.subr.bf16.mxu1 %v10048_v9  ;;  %v10058_v16 = vld [vmem:[%s15103_s1 + $0x864] ss:$16 sps:$4 sm:$0xff]   ;;  %v10062_v18 = vld [vmem:[%s15103_s1 + $0x860] ss:$16 sps:$4 sm:$0xff]   ;;  %vm8008_vm9 = vmor %vm15063_vm6, %vm15059_vm5  ;;  %s8207_s6 = sshll.u32 %s15118_s15, 2  ;;  %vm8013_vm11 = vcmask 1043459  }
  0x15   : > { %v10060_v17 = vld [vmem:[%s15103_s1 + $0xa64] ss:$16 sps:$4 sm:$0xff]   ;;  %v10063_v19 = vld [vmem:[%s15103_s1 + $0xa60] ss:$16 sps:$4 sm:$0xff]   ;;  %vm8011_vm10 = vmand %vm8009_vm7, %vm8010_vm8  ;;  %vm8014_vm12 = vsmask.f32 3328  ;;  %s228_s9 = scalar_lea.vmem %s15105_s3, %s8207_s6 }
  0x16   : > { %2122 = vmatpush1.bf16.msra.mxu0 %v10050_v10  ;;  %v10064_v20 = vld [vmem:[%s15103_s1 + $0x844] ss:$16 sps:$4 sm:$0xff]   ;;  %v10068_v22 = vld [vmem:[%s15103_s1 + $0x840] ss:$16 sps:$4 sm:$0xff]   ;;  %vm15075_vm13 = vmor %vm8011_vm10, %vm8008_vm9 }
  0x17   : > { %2163 = vmatpush1.bf16.msra.mxu1 %v10051_v11  ;;  %2123 = vmatprep.subr.bf16.mxu0 %v10052_v12  ;;  %v10066_v21 = vld [vmem:[%s15103_s1 + $0xa44] ss:$16 sps:$4 sm:$0xff]   ;;  %v10069_v23 = vld [vmem:[%s15103_s1 + $0xa40] ss:$16 sps:$4 sm:$0xff]   ;;  %vm8015_vm14 = vmand %vm8013_vm11, %vm8014_vm12 }
  0x18   : > { %2164 = vmatprep.subr.bf16.mxu1 %v10054_v13  ;;  %v10070_v24 = vld [vmem:[%s15103_s1 + $0x824] ss:$16 sps:$4 sm:$0xff]   ;;  %v10074_v26 = vld [vmem:[%s15103_s1 + $0x820] ss:$16 sps:$4 sm:$0xff]   ;;  %vm8016_vm15 = vmor %vm8015_vm14, %vm15075_vm13 }
  0x19   : > { %v10072_v25 = vld [vmem:[%s15103_s1 + $0xa24] ss:$16 sps:$4 sm:$0xff]   ;;  %v10075_v27 = vld [vmem:[%s15103_s1 + $0xa20] ss:$16 sps:$4 sm:$0xff]  }
  0x1a   : > { %2124 = vmatpush1.bf16.msra.mxu0 %v10056_v14  ;;  %v10076_v28 = vld [vmem:[%s15103_s1 + $0x804] ss:$16 sps:$4 sm:$0xff]   ;;  %v10080_v30 = vld [vmem:[%s15103_s1 + $0x800] ss:$16 sps:$4 sm:$0xff]  }
  0x1b   : > { %2165 = vmatpush1.bf16.msra.mxu1 %v10057_v15  ;;  %2125 = vmatprep.subr.bf16.mxu0 %v10058_v16  ;;  %v10078_v29 = vld [vmem:[%s15103_s1 + $0xa04] ss:$16 sps:$4 sm:$0xff]   ;;  %v10081_v31 = vld [vmem:[%s15103_s1 + $0xa00] ss:$16 sps:$4 sm:$0xff]  }
  0x1c   : > { %2166 = vmatprep.subr.bf16.mxu1 %v10060_v17  ;;  %v10082_v32 = vld [vmem:[%s15103_s1 + $0x9e4] ss:$16 sps:$4 sm:$0xff]   ;;  %v10086_v34 = vld [vmem:[%s15103_s1 + $0x9e0] ss:$16 sps:$4 sm:$0xff]  }
  0x1d   : > { %v10084_v33 = vld [vmem:[%s15103_s1 + $0xbe4] ss:$16 sps:$4 sm:$0xff]   ;;  %v10087_v35 = vld [vmem:[%s15103_s1 + $0xbe0] ss:$16 sps:$4 sm:$0xff]  }
  0x1e   : > { %2126 = vmatpush1.bf16.msra.mxu0 %v10062_v18  ;;  %v10088_v39 = vld [vmem:[%s15103_s1 + $0x9c4] ss:$16 sps:$4 sm:$0xff]   ;;  %v10092_v41 = vld [vmem:[%s15103_s1 + $0x9c0] ss:$16 sps:$4 sm:$0xff]  }
  0x1f   : > { %2167 = vmatpush1.bf16.msra.mxu1 %v10063_v19  ;;  %2127 = vmatprep.subr.bf16.mxu0 %v10064_v20  ;;  %v10090_v40 = vld [vmem:[%s15103_s1 + $0xbc4] ss:$16 sps:$4 sm:$0xff]   ;;  %v10093_v44 = vld [vmem:[%s15103_s1 + $0xbc0] ss:$16 sps:$4 sm:$0xff]  }
  0x20   : > { %2168 = vmatprep.subr.bf16.mxu1 %v10066_v21  ;;  %v10094_v45 = vld [vmem:[%s15103_s1 + $0x9a4] ss:$16 sps:$4 sm:$0xff]   ;;  %v10098_v47 = vld [vmem:[%s15103_s1 + $0x9a0] ss:$16 sps:$4 sm:$0xff]  }
  0x21   : > { %v10096_v46 = vld [vmem:[%s15103_s1 + $0xba4] ss:$16 sps:$4 sm:$0xff]   ;;  %v10099_v48 = vld [vmem:[%s15103_s1 + $0xba0] ss:$16 sps:$4 sm:$0xff]  }
  0x22   : > { %2128 = vmatpush1.bf16.msra.mxu0 %v10068_v22  ;;  %v10100_v50 = vld [vmem:[%s15103_s1 + $0x984] ss:$16 sps:$4 sm:$0xff]   ;;  %v10104_v53 = vld [vmem:[%s15103_s1 + $0x980] ss:$16 sps:$4 sm:$0xff]  }
  0x23   : > { %2169 = vmatpush1.bf16.msra.mxu1 %v10069_v23  ;;  %2129 = vmatprep.subr.bf16.mxu0 %v10070_v24  ;;  %v10102_v51 = vld [vmem:[%s15103_s1 + $0xb84] ss:$16 sps:$4 sm:$0xff]   ;;  %v10105_v55 = vld [vmem:[%s15103_s1 + $0xb80] ss:$16 sps:$4 sm:$0xff]  }
  0x24   : > { %2170 = vmatprep.subr.bf16.mxu1 %v10072_v25  ;;  %v241_v52 = vld [vmem:[%s11785_s22] sm:$0xff] }
  0x25   : > { %v763_v54 = vrot.slane %v241_v52, %v11788_v49  ;;  %v10106_v56 = vld [vmem:[%s15103_s1 + $0x964] ss:$16 sps:$4 sm:$0xff]   ;;  %v756_v59 = vcombine.high %v241_v52, %v241_v52  ;;  %v10110_v60 = vld [vmem:[%s15103_s1 + $0x960] ss:$16 sps:$4 sm:$0xff]  }
  0x26   : > { %2130 = vmatpush1.bf16.msra.mxu0 %v10074_v26  ;;  %v10108_v57 = vld [vmem:[%s15103_s1 + $0xb64] ss:$16 sps:$4 sm:$0xff]   ;;  %v10111_v62 = vld [vmem:[%s15103_s1 + $0xb60] ss:$16 sps:$4 sm:$0xff]  }
  0x27   : > { %2171 = vmatpush1.bf16.msra.mxu1 %v10075_v27  ;;  %2131 = vmatprep.subr.bf16.mxu0 %v10076_v28  ;;  %v771_v58 = vcombine.high %v763_v54, %v763_v54  ;;  %v10112_v63 = vld [vmem:[%s15103_s1 + $0x944] ss:$16 sps:$4 sm:$0xff]   ;;  %v11831_v3 = vrot.slane %v756_v59, %v11788_v49  ;;  %v10116_v5 = vld [vmem:[%s15103_s1 + $0x940] ss:$16 sps:$4 sm:$0xff]   ;;  %v11853_v10 = vrot.slane %v763_v54, %v11788_v49 }
  0x28   : > { %2172 = vmatprep.subr.bf16.mxu1 %v10078_v29  ;;  %v10114_v0 = vld [vmem:[%s15103_s1 + $0xb44] ss:$16 sps:$4 sm:$0xff]   ;;  %v10117_v6 = vld [vmem:[%s15103_s1 + $0xb40] ss:$16 sps:$4 sm:$0xff]  }
  0x29   : > { %v11814_v61 = vrot.slane %v771_v58, %v11788_v49  ;;  %v10118_v7 = vld [vmem:[%s15103_s1 + $0x924] ss:$16 sps:$4 sm:$0xff]   ;;  %v772_v9 = vcombine.high %v11831_v3, %v11831_v3  ;;  %v10122_v11 = vld [vmem:[%s15103_s1 + $0x920] ss:$16 sps:$4 sm:$0xff]   ;;  %v11872_v16 = vcombine.high %v11853_v10, %v11853_v10  ;;  %v806_v22 = vshrl.u32 %v11853_v10, 16 }
  0x2a   : > { %2132 = vmatpush1.bf16.msra.mxu0 %v10080_v30  ;;  %v10120_v8 = vld [vmem:[%s15103_s1 + $0xb24] ss:$16 sps:$4 sm:$0xff]   ;;  %v10123_v12 = vld [vmem:[%s15103_s1 + $0xb20] ss:$16 sps:$4 sm:$0xff]  }
  0x2b   : > { %2173 = vmatpush1.bf16.msra.mxu1 %v10081_v31  ;;  %2133 = vmatprep.subr.bf16.mxu0 %v10082_v32  ;;  %v809_v1 = vshrl.u32 %v11814_v61, 16  ;;  %v11828_v2 = vcombine.high %v11814_v61, %v11814_v61  ;;  %v10124_v13 = vld [vmem:[%s15103_s1 + $0x904] ss:$16 sps:$4 sm:$0xff]   ;;  %v11868_v15 = vrot.slane %v772_v9, %v11788_v49  ;;  %v10128_v17 = vld [vmem:[%s15103_s1 + $0x900] ss:$16 sps:$4 sm:$0xff]   ;;  %v812_v23 = vshrl.u32 %v11872_v16, 16 }
  0x2c   : > { %2174 = vmatprep.subr.bf16.mxu1 %v10084_v33  ;;  %v10126_v14 = vld [vmem:[%s15103_s1 + $0xb04] ss:$16 sps:$4 sm:$0xff]   ;;  %v10129_v18 = vld [vmem:[%s15103_s1 + $0xb00] ss:$16 sps:$4 sm:$0xff]  }
  0x2d   : > { %2149 = vmatprep.mubr.bf16.mxu0 %v809_v1  ;;  %v815_v4 = vshrl.u32 %v11828_v2, 16  ;;  %v10133_v19 = vld [vmem:[%s15103_s1 + $0xce4] ss:$16 sps:$4 sm:$0xff]   ;;  %v11888_v21 = vcombine.high %v11868_v15, %v11868_v15  ;;  %v10131_v24 = vld [vmem:[%s15103_s1 + $0xce0] ss:$16 sps:$4 sm:$0xff]   ;;  %v821_v28 = vshrl.u32 %v11868_v15, 16 }
  0x2e   : > { %2134 = vmatpush2.bf16.msra.mxu0 %v10086_v34  ;;  %v10136_v20 = vld [vmem:[%s15103_s1 + $0xee4] ss:$16 sps:$4 sm:$0xff]   ;;  %v10134_v25 = vld [vmem:[%s15103_s1 + $0xee0] ss:$16 sps:$4 sm:$0xff]  }
  0x2f   : > { %2175 = vmatpush2.bf16.msra.mxu1 %v10087_v35  ;;  %2135 = vmatprep.subr.bf16.mxu0 %v10088_v39  ;;  %v10139_v26 = vld [vmem:[%s15103_s1 + $0xcc4] ss:$16 sps:$4 sm:$0xff]   ;;  %v827_v29 = vshrl.u32 %v11888_v21, 16  ;;  %v10137_v30 = vld [vmem:[%s15103_s1 + $0xcc0] ss:$16 sps:$4 sm:$0xff]  }
  0x30   : > { %2176 = vmatprep.subr.bf16.mxu1 %v10090_v40  ;;  %2190 = vmatprep.mubr.bf16.mxu1 %v815_v4  ;;  %v10142_v27 = vld [vmem:[%s15103_s1 + $0xec4] ss:$16 sps:$4 sm:$0xff]   ;;  %v10140_v31 = vld [vmem:[%s15103_s1 + $0xec0] ss:$16 sps:$4 sm:$0xff]  }
  0x31   : > { %v10145_v32 = vld [vmem:[%s15103_s1 + $0xca4] ss:$16 sps:$4 sm:$0xff]   ;;  %v10143_v34 = vld [vmem:[%s15103_s1 + $0xca0] ss:$16 sps:$4 sm:$0xff]  }
  0x32   : > { %2136 = vmatpush2.bf16.msra.mxu0 %v10092_v41  ;;  %v10148_v33 = vld [vmem:[%s15103_s1 + $0xea4] ss:$16 sps:$4 sm:$0xff]   ;;  %v10146_v35 = vld [vmem:[%s15103_s1 + $0xea0] ss:$16 sps:$4 sm:$0xff]  }
  0x33   : > { %2177 = vmatpush2.bf16.msra.mxu1 %v10093_v44  ;;  %2137 = vmatprep.subr.bf16.mxu0 %v10094_v45  ;;  %v10151_v36 = vld [vmem:[%s15103_s1 + $0xc84] ss:$16 sps:$4 sm:$0xff]   ;;  %v10149_v38 = vld [vmem:[%s15103_s1 + $0xc80] ss:$16 sps:$4 sm:$0xff]  }
  0x34   : > { %2178 = vmatprep.subr.bf16.mxu1 %v10096_v46  ;;  %v10154_v37 = vld [vmem:[%s15103_s1 + $0xe84] ss:$16 sps:$4 sm:$0xff]   ;;  %v10152_v39 = vld [vmem:[%s15103_s1 + $0xe80] ss:$16 sps:$4 sm:$0xff]  }
  0x35   : > { %v10157_v40 = vld [vmem:[%s15103_s1 + $0xc64] ss:$16 sps:$4 sm:$0xff]   ;;  %v10155_v42 = vld [vmem:[%s15103_s1 + $0xc60] ss:$16 sps:$4 sm:$0xff]  }
  0x36   : > { %2138 = vmatpush2.bf16.msra.mxu0 %v10098_v47  ;;  %v10160_v41 = vld [vmem:[%s15103_s1 + $0xe64] ss:$16 sps:$4 sm:$0xff]   ;;  %v10158_v44 = vld [vmem:[%s15103_s1 + $0xe60] ss:$16 sps:$4 sm:$0xff]  }
  0x37   : > { %2179 = vmatpush2.bf16.msra.mxu1 %v10099_v48  ;;  %2139 = vmatprep.subr.bf16.mxu0 %v10100_v50  ;;  %v10163_v45 = vld [vmem:[%s15103_s1 + $0xc44] ss:$16 sps:$4 sm:$0xff]   ;;  %v10161_v47 = vld [vmem:[%s15103_s1 + $0xc40] ss:$16 sps:$4 sm:$0xff]  }
  0x38   : > { %2180 = vmatprep.subr.bf16.mxu1 %v10102_v51  ;;  %v10166_v46 = vld [vmem:[%s15103_s1 + $0xe44] ss:$16 sps:$4 sm:$0xff]   ;;  %v10164_v48 = vld [vmem:[%s15103_s1 + $0xe40] ss:$16 sps:$4 sm:$0xff]  }
  0x39   : > { %v10169_v50 = vld [vmem:[%s15103_s1 + $0xc24] ss:$16 sps:$4 sm:$0xff]   ;;  %v10167_v52 = vld [vmem:[%s15103_s1 + $0xc20] ss:$16 sps:$4 sm:$0xff]  }
  0x3a   : > { %2140 = vmatpush2.bf16.msra.mxu0 %v10104_v53  ;;  %v10172_v51 = vld [vmem:[%s15103_s1 + $0xe24] ss:$16 sps:$4 sm:$0xff]   ;;  %v10170_v53 = vld [vmem:[%s15103_s1 + $0xe20] ss:$16 sps:$4 sm:$0xff]  }
  0x3b   : > { %2181 = vmatpush2.bf16.msra.mxu1 %v10105_v55  ;;  %2141 = vmatprep.subr.bf16.mxu0 %v10106_v56  ;;  %v10175_v54 = vld [vmem:[%s15103_s1 + $0xc04] ss:$16 sps:$4 sm:$0xff]   ;;  %v10173_v56 = vld [vmem:[%s15103_s1 + $0xc00] ss:$16 sps:$4 sm:$0xff]  }
  0x3c   : > { %2182 = vmatprep.subr.bf16.mxu1 %v10108_v57  ;;  %v10178_v55 = vld [vmem:[%s15103_s1 + $0xe04] ss:$16 sps:$4 sm:$0xff]   ;;  %v10176_v57 = vld [vmem:[%s15103_s1 + $0xe00] ss:$16 sps:$4 sm:$0xff]  }
  0x3d   : > { %v10181_v58 = vld [vmem:[%s15103_s1 + $0xde4] ss:$16 sps:$4 sm:$0xff]   ;;  %v10191_v9 = vld [vmem:[%s15103_s1 + $0xda0] ss:$16 sps:$4 sm:$0xff]  }
  0x3e   : > { %2142 = vmatpush2.bf16.msra.mxu0 %v10110_v60  ;;  %v10184_v59 = vld [vmem:[%s15103_s1 + $0xfe4] ss:$16 sps:$4 sm:$0xff]   ;;  %v10179_v60 = vld [vmem:[%s15103_s1 + $0xde0] ss:$16 sps:$4 sm:$0xff]  }
  0x3f   : > { %2183 = vmatpush2.bf16.msra.mxu1 %v10111_v62  ;;  %2143 = vmatprep.subr.bf16.mxu0 %v10112_v63  ;;  %v10182_v62 = vld [vmem:[%s15103_s1 + $0xfe0] ss:$16 sps:$4 sm:$0xff]   ;;  %v10187_v63 = vld [vmem:[%s15103_s1 + $0xdc4] ss:$16 sps:$4 sm:$0xff]  }
  0x40   : > { %2184 = vmatprep.subr.bf16.mxu1 %v10114_v0  ;;  %v10190_v0 = vld [vmem:[%s15103_s1 + $0xfc4] ss:$16 sps:$4 sm:$0xff]  }
  0x42   : > { %2144 = vmatpush2.bf16.msra.mxu0 %v10116_v5  ;;  %v10185_v5 = vld [vmem:[%s15103_s1 + $0xdc0] ss:$16 sps:$4 sm:$0xff]  }
  0x43   : > { %2185 = vmatpush2.bf16.msra.mxu1 %v10117_v6  ;;  %2145 = vmatprep.subr.bf16.mxu0 %v10118_v7  ;;  %v10188_v6 = vld [vmem:[%s15103_s1 + $0xfc0] ss:$16 sps:$4 sm:$0xff]   ;;  %v10193_v7 = vld [vmem:[%s15103_s1 + $0xda4] ss:$16 sps:$4 sm:$0xff]  }
  0x44   : > { %2186 = vmatprep.subr.bf16.mxu1 %v10120_v8  ;;  %v10196_v8 = vld [vmem:[%s15103_s1 + $0xfa4] ss:$16 sps:$4 sm:$0xff]  }
  0x46   : > { %2146 = vmatpush2.bf16.msra.mxu0 %v10122_v11  ;;  %v10194_v11 = vld [vmem:[%s15103_s1 + $0xfa0] ss:$16 sps:$4 sm:$0xff]  }
  0x47   : > { %2187 = vmatpush2.bf16.msra.mxu1 %v10123_v12  ;;  %2147 = vmatprep.subr.bf16.mxu0 %v10124_v13  ;;  %v10199_v12 = vld [vmem:[%s15103_s1 + $0xd84] ss:$16 sps:$4 sm:$0xff]  }
  0x48   : > { %2188 = vmatprep.subr.bf16.mxu1 %v10126_v14  ;;  %v10202_v13 = vld [vmem:[%s15103_s1 + $0xf84] ss:$16 sps:$4 sm:$0xff]   ;;  %v10197_v14 = vld [vmem:[%s15103_s1 + $0xd80] ss:$16 sps:$4 sm:$0xff]  }
  0x4a   : > { %2148 = vmatpush2.bf16.msra.mxu0 %v10128_v17  ;;  %v10200_v17 = vld [vmem:[%s15103_s1 + $0xf80] ss:$16 sps:$4 sm:$0xff]  }
  0x4b   : > { %2189 = vmatpush2.bf16.msra.mxu1 %v10129_v18  ;;  %2199 = vmatprep.subr.bf16.mxu0 %v10133_v19  ;;  %v10205_v18 = vld [vmem:[%s15103_s1 + $0xd64] ss:$16 sps:$4 sm:$0xff]  }
  0x4c   : > { %2240 = vmatprep.subr.bf16.mxu1 %v10136_v20  ;;  %v10208_v19 = vld [vmem:[%s15103_s1 + $0xf64] ss:$16 sps:$4 sm:$0xff]   ;;  %v10203_v20 = vld [vmem:[%s15103_s1 + $0xd60] ss:$16 sps:$4 sm:$0xff]  }
  0x4d   : > { %2150 = vmatmul.mubr.bf16.vlgmr.msra.gmra.mxu0 %v806_v22 }
  0x4e   : > { %2191 = vmatmul.mubr.bf16.vlgmr.msra.gmra.mxu1 %v812_v23  ;;  %2200 = vmatpush1.bf16.msra.mxu0 %v10131_v24  ;;  %v10206_v24 = vld [vmem:[%s15103_s1 + $0xf60] ss:$16 sps:$4 sm:$0xff]  }
  0x4f   : > { %2241 = vmatpush1.bf16.msra.mxu1 %v10134_v25  ;;  %2201 = vmatprep.subr.bf16.mxu0 %v10139_v26  ;;  %v10211_v25 = vld [vmem:[%s15103_s1 + $0xd44] ss:$16 sps:$4 sm:$0xff]  }
  0x50   : > { %2242 = vmatprep.subr.bf16.mxu1 %v10142_v27  ;;  %2231 = vmatprep.mubr.bf16.mxu0 %v821_v28  ;;  %v10214_v26 = vld [vmem:[%s15103_s1 + $0xf44] ss:$16 sps:$4 sm:$0xff]   ;;  %v10209_v27 = vld [vmem:[%s15103_s1 + $0xd40] ss:$16 sps:$4 sm:$0xff]  }
  0x51   : > { %2272 = vmatprep.mubr.bf16.mxu1 %v827_v29 }
  0x52   : > { %2202 = vmatpush1.bf16.msra.mxu0 %v10137_v30  ;;  %v10212_v30 = vld [vmem:[%s15103_s1 + $0xf40] ss:$16 sps:$4 sm:$0xff]  }
  0x53   : > { %2243 = vmatpush1.bf16.msra.mxu1 %v10140_v31  ;;  %2203 = vmatprep.subr.bf16.mxu0 %v10145_v32  ;;  %v10217_v31 = vld [vmem:[%s15103_s1 + $0xd24] ss:$16 sps:$4 sm:$0xff]  }
  0x54   : > { %2244 = vmatprep.subr.bf16.mxu1 %v10148_v33  ;;  %v10220_v32 = vld [vmem:[%s15103_s1 + $0xf24] ss:$16 sps:$4 sm:$0xff]   ;;  %v12072_v33 = vrot.slane %v11831_v3, %v11788_v49 }
  0x55   : > { %v10226_v3 = vld [vmem:[%s15103_s1 + $0xf04] ss:$16 sps:$4 sm:$0xff]  }
  0x56   : > { %2204 = vmatpush1.bf16.msra.mxu0 %v10143_v34  ;;  %v10215_v34 = vld [vmem:[%s15103_s1 + $0xd20] ss:$16 sps:$4 sm:$0xff]  }
  0x57   : > { %2245 = vmatpush1.bf16.msra.mxu1 %v10146_v35  ;;  %2205 = vmatprep.subr.bf16.mxu0 %v10151_v36  ;;  %v10218_v35 = vld [vmem:[%s15103_s1 + $0xf20] ss:$16 sps:$4 sm:$0xff]   ;;  %v10223_v36 = vld [vmem:[%s15103_s1 + $0xd04] ss:$16 sps:$4 sm:$0xff]  }
  0x58   : > { %2246 = vmatprep.subr.bf16.mxu1 %v10154_v37  ;;  %v12088_v37 = vcombine.high %v12072_v33, %v12072_v33 }
  0x5a   : > { %2206 = vmatpush1.bf16.msra.mxu0 %v10149_v38  ;;  %v10221_v38 = vld [vmem:[%s15103_s1 + $0xd00] ss:$16 sps:$4 sm:$0xff]  }
  0x5b   : > { %2247 = vmatpush1.bf16.msra.mxu1 %v10152_v39  ;;  %2207 = vmatprep.subr.bf16.mxu0 %v10157_v40  ;;  %v10224_v39 = vld [vmem:[%s15103_s1 + $0xf00] ss:$16 sps:$4 sm:$0xff]   ;;  %v10229_v40 = vld [vmem:[%s15103_s1 + $0x8ec] ss:$16 sps:$4 sm:$0xff]  }
  0x5c   : > { %2248 = vmatprep.subr.bf16.mxu1 %v10160_v41  ;;  %v10232_v41 = vld [vmem:[%s15103_s1 + $0xaec] ss:$16 sps:$4 sm:$0xff]  }
  0x5e   : > { %2208 = vmatpush1.bf16.msra.mxu0 %v10155_v42  ;;  %v818_v42 = vshrl.u32 %v12072_v33, 16 }
  0x5f   : > { %2249 = vmatpush1.bf16.msra.mxu1 %v10158_v44  ;;  %2209 = vmatprep.subr.bf16.mxu0 %v10163_v45  ;;  %v824_v44 = vshrl.u32 %v12088_v37, 16  ;;  %v10227_v45 = vld [vmem:[%s15103_s1 + $0x8e8] ss:$16 sps:$4 sm:$0xff]  }
  0x60   : > { %2250 = vmatprep.subr.bf16.mxu1 %v10166_v46  ;;  %v10230_v46 = vld [vmem:[%s15103_s1 + $0xae8] ss:$16 sps:$4 sm:$0xff]  }
  0x62   : > { %2210 = vmatpush1.bf16.msra.mxu0 %v10161_v47  ;;  %v10235_v47 = vld [vmem:[%s15103_s1 + $0x8cc] ss:$16 sps:$4 sm:$0xff]  }
  0x63   : > { %2251 = vmatpush1.bf16.msra.mxu1 %v10164_v48  ;;  %2211 = vmatprep.subr.bf16.mxu0 %v10169_v50  ;;  %v10238_v48 = vld [vmem:[%s15103_s1 + $0xacc] ss:$16 sps:$4 sm:$0xff]   ;;  %v10233_v50 = vld [vmem:[%s15103_s1 + $0x8c8] ss:$16 sps:$4 sm:$0xff]  }
  0x64   : > { %2252 = vmatprep.subr.bf16.mxu1 %v10172_v51  ;;  %v10236_v51 = vld [vmem:[%s15103_s1 + $0xac8] ss:$16 sps:$4 sm:$0xff]  }
  0x66   : > { %2212 = vmatpush1.bf16.msra.mxu0 %v10167_v52  ;;  %v10241_v52 = vld [vmem:[%s15103_s1 + $0x8ac] ss:$16 sps:$4 sm:$0xff]  }
  0x67   : > { %2253 = vmatpush1.bf16.msra.mxu1 %v10170_v53  ;;  %2213 = vmatprep.subr.bf16.mxu0 %v10175_v54  ;;  %v10244_v53 = vld [vmem:[%s15103_s1 + $0xaac] ss:$16 sps:$4 sm:$0xff]   ;;  %v10239_v54 = vld [vmem:[%s15103_s1 + $0x8a8] ss:$16 sps:$4 sm:$0xff]  }
  0x68   : > { %2254 = vmatprep.subr.bf16.mxu1 %v10178_v55  ;;  %v10242_v55 = vld [vmem:[%s15103_s1 + $0xaa8] ss:$16 sps:$4 sm:$0xff]  }
  0x6a   : > { %2214 = vmatpush1.bf16.msra.mxu0 %v10173_v56  ;;  %v10247_v56 = vld [vmem:[%s15103_s1 + $0x88c] ss:$16 sps:$4 sm:$0xff]  }
  0x6b   : > { %2255 = vmatpush1.bf16.msra.mxu1 %v10176_v57  ;;  %2215 = vmatprep.subr.bf16.mxu0 %v10181_v58  ;;  %v10248_v57 = vld [vmem:[%s15103_s1 + $0xa88] ss:$16 sps:$4 sm:$0xff]   ;;  %v10253_v58 = vld [vmem:[%s15103_s1 + $0x86c] ss:$16 sps:$4 sm:$0xff]  }
  0x6c   : > { %2256 = vmatprep.subr.bf16.mxu1 %v10184_v59  ;;  %v10256_v59 = vld [vmem:[%s15103_s1 + $0xa6c] ss:$16 sps:$4 sm:$0xff]  }
  0x6e   : > { %2216 = vmatpush2.bf16.msra.mxu0 %v10179_v60  ;;  %v10251_v60 = vld [vmem:[%s15103_s1 + $0x868] ss:$16 sps:$4 sm:$0xff]  }
  0x6f   : > { %2257 = vmatpush2.bf16.msra.mxu1 %v10182_v62  ;;  %2217 = vmatprep.subr.bf16.mxu0 %v10187_v63  ;;  %v10254_v62 = vld [vmem:[%s15103_s1 + $0xa68] ss:$16 sps:$4 sm:$0xff]   ;;  %v10259_v63 = vld [vmem:[%s15103_s1 + $0x84c] ss:$16 sps:$4 sm:$0xff]  }
  0x70   : > { %2258 = vmatprep.subr.bf16.mxu1 %v10190_v0  ;;  %v10262_v0 = vld [vmem:[%s15103_s1 + $0xa4c] ss:$16 sps:$4 sm:$0xff]  }
  0x72   : > { %2218 = vmatpush2.bf16.msra.mxu0 %v10185_v5  ;;  %v10257_v5 = vld [vmem:[%s15103_s1 + $0x848] ss:$16 sps:$4 sm:$0xff]  }
  0x73   : > { %2259 = vmatpush2.bf16.msra.mxu1 %v10188_v6  ;;  %2219 = vmatprep.subr.bf16.mxu0 %v10193_v7  ;;  %v10260_v6 = vld [vmem:[%s15103_s1 + $0xa48] ss:$16 sps:$4 sm:$0xff]   ;;  %v10265_v7 = vld [vmem:[%s15103_s1 + $0x82c] ss:$16 sps:$4 sm:$0xff]  }
  0x74   : > { %2260 = vmatprep.subr.bf16.mxu1 %v10196_v8  ;;  %v10268_v8 = vld [vmem:[%s15103_s1 + $0xa2c] ss:$16 sps:$4 sm:$0xff]  }
  0x76   : > { %2220 = vmatpush2.bf16.msra.mxu0 %v10191_v9  ;;  %v10263_v9 = vld [vmem:[%s15103_s1 + $0x828] ss:$16 sps:$4 sm:$0xff]  }
  0x77   : > { %2261 = vmatpush2.bf16.msra.mxu1 %v10194_v11  ;;  %2221 = vmatprep.subr.bf16.mxu0 %v10199_v12  ;;  %v10266_v11 = vld [vmem:[%s15103_s1 + $0xa28] ss:$16 sps:$4 sm:$0xff]   ;;  %v10271_v12 = vld [vmem:[%s15103_s1 + $0x80c] ss:$16 sps:$4 sm:$0xff]  }
  0x78   : > { %2262 = vmatprep.subr.bf16.mxu1 %v10202_v13  ;;  %v10274_v13 = vld [vmem:[%s15103_s1 + $0xa0c] ss:$16 sps:$4 sm:$0xff]  }
  0x7a   : > { %2222 = vmatpush2.bf16.msra.mxu0 %v10197_v14  ;;  %v10269_v14 = vld [vmem:[%s15103_s1 + $0x808] ss:$16 sps:$4 sm:$0xff]  }
  0x7b   : > { %2263 = vmatpush2.bf16.msra.mxu1 %v10200_v17  ;;  %2223 = vmatprep.subr.bf16.mxu0 %v10205_v18  ;;  %v10272_v17 = vld [vmem:[%s15103_s1 + $0xa08] ss:$16 sps:$4 sm:$0xff]   ;;  %v10277_v18 = vld [vmem:[%s15103_s1 + $0x9ec] ss:$16 sps:$4 sm:$0xff]  }
  0x7c   : > { %2264 = vmatprep.subr.bf16.mxu1 %v10208_v19  ;;  %v10280_v19 = vld [vmem:[%s15103_s1 + $0xbec] ss:$16 sps:$4 sm:$0xff]  }
  0x7e   : > { %2224 = vmatpush2.bf16.msra.mxu0 %v10203_v20  ;;  %v10275_v20 = vld [vmem:[%s15103_s1 + $0x9e8] ss:$16 sps:$4 sm:$0xff]  }
  0x7f   : > { %2265 = vmatpush2.bf16.msra.mxu1 %v10206_v24  ;;  %2225 = vmatprep.subr.bf16.mxu0 %v10211_v25  ;;  %v10278_v24 = vld [vmem:[%s15103_s1 + $0xbe8] ss:$16 sps:$4 sm:$0xff]   ;;  %v10283_v25 = vld [vmem:[%s15103_s1 + $0x9cc] ss:$16 sps:$4 sm:$0xff]  }
  0x80   : > { %2266 = vmatprep.subr.bf16.mxu1 %v10214_v26  ;;  %v10286_v26 = vld [vmem:[%s15103_s1 + $0xbcc] ss:$16 sps:$4 sm:$0xff]  }
  0x82   : > { %2226 = vmatpush2.bf16.msra.mxu0 %v10209_v27  ;;  %v10281_v27 = vld [vmem:[%s15103_s1 + $0x9c8] ss:$16 sps:$4 sm:$0xff]  }
  0x83   : > { %2267 = vmatpush2.bf16.msra.mxu1 %v10212_v30  ;;  %2227 = vmatprep.subr.bf16.mxu0 %v10217_v31  ;;  %v10284_v30 = vld [vmem:[%s15103_s1 + $0xbc8] ss:$16 sps:$4 sm:$0xff]   ;;  %v10289_v31 = vld [vmem:[%s15103_s1 + $0x9ac] ss:$16 sps:$4 sm:$0xff]  }
  0x84   : > { %2268 = vmatprep.subr.bf16.mxu1 %v10220_v32  ;;  %v10292_v32 = vld [vmem:[%s15103_s1 + $0xbac] ss:$16 sps:$4 sm:$0xff]  }
  0x86   : > { %2228 = vmatpush2.bf16.msra.mxu0 %v10215_v34  ;;  %v10287_v34 = vld [vmem:[%s15103_s1 + $0x9a8] ss:$16 sps:$4 sm:$0xff]  }
  0x87   : > { %2269 = vmatpush2.bf16.msra.mxu1 %v10218_v35  ;;  %2229 = vmatprep.subr.bf16.mxu0 %v10223_v36  ;;  %v10290_v35 = vld [vmem:[%s15103_s1 + $0xba8] ss:$16 sps:$4 sm:$0xff]   ;;  %v10295_v36 = vld [vmem:[%s15103_s1 + $0x98c] ss:$16 sps:$4 sm:$0xff]  }
  0x88   : > { %2270 = vmatprep.subr.bf16.mxu1 %v10226_v3  ;;  %v10298_v3 = vld [vmem:[%s15103_s1 + $0xb8c] ss:$16 sps:$4 sm:$0xff]  }
  0x8a   : > { %2230 = vmatpush2.bf16.msra.mxu0 %v10221_v38  ;;  %v10293_v38 = vld [vmem:[%s15103_s1 + $0x988] ss:$16 sps:$4 sm:$0xff]  }
  0x8b   : > { %2271 = vmatpush2.bf16.msra.mxu1 %v10224_v39  ;;  %2281 = vmatprep.subr.bf16.mxu0 %v10229_v40  ;;  %v10296_v39 = vld [vmem:[%s15103_s1 + $0xb88] ss:$16 sps:$4 sm:$0xff]   ;;  %v10301_v40 = vld [vmem:[%s15103_s1 + $0x96c] ss:$16 sps:$4 sm:$0xff]  }
  0x8c   : > { %2322 = vmatprep.subr.bf16.mxu1 %v10232_v41  ;;  %v10304_v41 = vld [vmem:[%s15103_s1 + $0xb6c] ss:$16 sps:$4 sm:$0xff]  }
  0x8d   : > { %2232 = vmatmul.mubr.bf16.vlgmr.msra.gmra.mxu0 %v818_v42 }
  0x8e   : > { %2273 = vmatmul.mubr.bf16.vlgmr.msra.gmra.mxu1 %v824_v44  ;;  %2282 = vmatpush1.bf16.msra.mxu0 %v10227_v45  ;;  %v10299_v45 = vld [vmem:[%s15103_s1 + $0x968] ss:$16 sps:$4 sm:$0xff]  }
  0x8f   : > { %2323 = vmatpush1.bf16.msra.mxu1 %v10230_v46  ;;  %2283 = vmatprep.subr.bf16.mxu0 %v10235_v47  ;;  %v10302_v46 = vld [vmem:[%s15103_s1 + $0xb68] ss:$16 sps:$4 sm:$0xff]   ;;  %v10307_v47 = vld [vmem:[%s15103_s1 + $0x94c] ss:$16 sps:$4 sm:$0xff]  }
  0x90   : > { %2324 = vmatprep.subr.bf16.mxu1 %v10238_v48  ;;  %2313 = vmatprep.mubr.bf16.mxu0 %v809_v1  ;;  %v10250_v1 = vld [vmem:[%s15103_s1 + $0xa8c] ss:$16 sps:$4 sm:$0xff]  }
  0x91   : > { %2354 = vmatprep.mubr.bf16.mxu1 %v815_v4  ;;  %v10245_v4 = vld [vmem:[%s15103_s1 + $0x888] ss:$16 sps:$4 sm:$0xff]   ;;  %v10310_v48 = vld [vmem:[%s15103_s1 + $0xb4c] ss:$16 sps:$4 sm:$0xff]  }
  0x92   : > { %2284 = vmatpush1.bf16.msra.mxu0 %v10233_v50  ;;  %v10305_v50 = vld [vmem:[%s15103_s1 + $0x948] ss:$16 sps:$4 sm:$0xff]  }
  0x93   : > { %2325 = vmatpush1.bf16.msra.mxu1 %v10236_v51  ;;  %2285 = vmatprep.subr.bf16.mxu0 %v10241_v52  ;;  %v10308_v51 = vld [vmem:[%s15103_s1 + $0xb48] ss:$16 sps:$4 sm:$0xff]   ;;  %v10313_v52 = vld [vmem:[%s15103_s1 + $0x92c] ss:$16 sps:$4 sm:$0xff]  }
  0x94   : > { %2326 = vmatprep.subr.bf16.mxu1 %v10244_v53  ;;  %v10316_v53 = vld [vmem:[%s15103_s1 + $0xb2c] ss:$16 sps:$4 sm:$0xff]  }
  0x96   : > { %2286 = vmatpush1.bf16.msra.mxu0 %v10239_v54  ;;  %v10311_v54 = vld [vmem:[%s15103_s1 + $0x928] ss:$16 sps:$4 sm:$0xff]  }
  0x97   : > { %2327 = vmatpush1.bf16.msra.mxu1 %v10242_v55  ;;  %2287 = vmatprep.subr.bf16.mxu0 %v10247_v56  ;;  %v10314_v55 = vld [vmem:[%s15103_s1 + $0xb28] ss:$16 sps:$4 sm:$0xff]   ;;  %v10319_v56 = vld [vmem:[%s15103_s1 + $0x90c] ss:$16 sps:$4 sm:$0xff]  }
  0x98   : > { %2328 = vmatprep.subr.bf16.mxu1 %v10250_v1  ;;  %v10322_v1 = vld [vmem:[%s15103_s1 + $0xb0c] ss:$16 sps:$4 sm:$0xff]  }
  0x9a   : > { %2288 = vmatpush1.bf16.msra.mxu0 %v10245_v4  ;;  %v10317_v4 = vld [vmem:[%s15103_s1 + $0x908] ss:$16 sps:$4 sm:$0xff]  }
  0x9b   : > { %2329 = vmatpush1.bf16.msra.mxu1 %v10248_v57  ;;  %2289 = vmatprep.subr.bf16.mxu0 %v10253_v58  ;;  %v10320_v57 = vld [vmem:[%s15103_s1 + $0xb08] ss:$16 sps:$4 sm:$0xff]   ;;  %v10325_v58 = vld [vmem:[%s15103_s1 + $0xcec] ss:$16 sps:$4 sm:$0xff]  }
  0x9c   : > { %2330 = vmatprep.subr.bf16.mxu1 %v10256_v59  ;;  %v10328_v59 = vld [vmem:[%s15103_s1 + $0xeec] ss:$16 sps:$4 sm:$0xff]  }
  0x9e   : > { %2290 = vmatpush1.bf16.msra.mxu0 %v10251_v60  ;;  %v10323_v60 = vld [vmem:[%s15103_s1 + $0xce8] ss:$16 sps:$4 sm:$0xff]  }
  0x9f   : > { %2331 = vmatpush1.bf16.msra.mxu1 %v10254_v62  ;;  %2291 = vmatprep.subr.bf16.mxu0 %v10259_v63  ;;  %v10326_v62 = vld [vmem:[%s15103_s1 + $0xee8] ss:$16 sps:$4 sm:$0xff]   ;;  %v10331_v63 = vld [vmem:[%s15103_s1 + $0xccc] ss:$16 sps:$4 sm:$0xff]  }
  0xa0   : > { %2332 = vmatprep.subr.bf16.mxu1 %v10262_v0  ;;  %v10334_v0 = vld [vmem:[%s15103_s1 + $0xecc] ss:$16 sps:$4 sm:$0xff]  }
  0xa2   : > { %2292 = vmatpush1.bf16.msra.mxu0 %v10257_v5  ;;  %v10329_v5 = vld [vmem:[%s15103_s1 + $0xcc8] ss:$16 sps:$4 sm:$0xff]  }
  0xa3   : > { %2333 = vmatpush1.bf16.msra.mxu1 %v10260_v6  ;;  %2293 = vmatprep.subr.bf16.mxu0 %v10265_v7  ;;  %v10332_v6 = vld [vmem:[%s15103_s1 + $0xec8] ss:$16 sps:$4 sm:$0xff]   ;;  %v10337_v7 = vld [vmem:[%s15103_s1 + $0xcac] ss:$16 sps:$4 sm:$0xff]  }
  0xa4   : > { %2334 = vmatprep.subr.bf16.mxu1 %v10268_v8  ;;  %v10338_v8 = vld [vmem:[%s15103_s1 + $0xea8] ss:$16 sps:$4 sm:$0xff]  }
  0xa6   : > { %2294 = vmatpush1.bf16.msra.mxu0 %v10263_v9  ;;  %v10343_v9 = vld [vmem:[%s15103_s1 + $0xc8c] ss:$16 sps:$4 sm:$0xff]  }
  0xa7   : > { %2335 = vmatpush1.bf16.msra.mxu1 %v10266_v11  ;;  %2295 = vmatprep.subr.bf16.mxu0 %v10271_v12  ;;  %v10344_v11 = vld [vmem:[%s15103_s1 + $0xe88] ss:$16 sps:$4 sm:$0xff]   ;;  %v10349_v12 = vld [vmem:[%s15103_s1 + $0xc6c] ss:$16 sps:$4 sm:$0xff]  }
  0xa8   : > { %2336 = vmatprep.subr.bf16.mxu1 %v10274_v13  ;;  %v10352_v13 = vld [vmem:[%s15103_s1 + $0xe6c] ss:$16 sps:$4 sm:$0xff]  }
  0xaa   : > { %2296 = vmatpush1.bf16.msra.mxu0 %v10269_v14  ;;  %v10347_v14 = vld [vmem:[%s15103_s1 + $0xc68] ss:$16 sps:$4 sm:$0xff]  }
  0xab   : > { %2337 = vmatpush1.bf16.msra.mxu1 %v10272_v17  ;;  %2297 = vmatprep.subr.bf16.mxu0 %v10277_v18  ;;  %v10350_v17 = vld [vmem:[%s15103_s1 + $0xe68] ss:$16 sps:$4 sm:$0xff]   ;;  %v10355_v18 = vld [vmem:[%s15103_s1 + $0xc4c] ss:$16 sps:$4 sm:$0xff]  }
  0xac   : > { %2338 = vmatprep.subr.bf16.mxu1 %v10280_v19  ;;  %v10358_v19 = vld [vmem:[%s15103_s1 + $0xe4c] ss:$16 sps:$4 sm:$0xff]  }
  0xae   : > { %2298 = vmatpush2.bf16.msra.mxu0 %v10275_v20  ;;  %v10353_v20 = vld [vmem:[%s15103_s1 + $0xc48] ss:$16 sps:$4 sm:$0xff]  }
  0xaf   : > { %2339 = vmatpush2.bf16.msra.mxu1 %v10278_v24  ;;  %2299 = vmatprep.subr.bf16.mxu0 %v10283_v25  ;;  %v10356_v24 = vld [vmem:[%s15103_s1 + $0xe48] ss:$16 sps:$4 sm:$0xff]   ;;  %v10361_v25 = vld [vmem:[%s15103_s1 + $0xc2c] ss:$16 sps:$4 sm:$0xff]  }
  0xb0   : > { %2340 = vmatprep.subr.bf16.mxu1 %v10286_v26  ;;  %v10364_v26 = vld [vmem:[%s15103_s1 + $0xe2c] ss:$16 sps:$4 sm:$0xff]  }
  0xb2   : > { %2300 = vmatpush2.bf16.msra.mxu0 %v10281_v27  ;;  %v10359_v27 = vld [vmem:[%s15103_s1 + $0xc28] ss:$16 sps:$4 sm:$0xff]  }
  0xb3   : > { %2341 = vmatpush2.bf16.msra.mxu1 %v10284_v30  ;;  %2301 = vmatprep.subr.bf16.mxu0 %v10289_v31  ;;  %v10362_v30 = vld [vmem:[%s15103_s1 + $0xe28] ss:$16 sps:$4 sm:$0xff]   ;;  %v10367_v31 = vld [vmem:[%s15103_s1 + $0xc0c] ss:$16 sps:$4 sm:$0xff]  }
  0xb4   : > { %2342 = vmatprep.subr.bf16.mxu1 %v10292_v32  ;;  %v10370_v32 = vld [vmem:[%s15103_s1 + $0xe0c] ss:$16 sps:$4 sm:$0xff]  }
  0xb6   : > { %2302 = vmatpush2.bf16.msra.mxu0 %v10287_v34  ;;  %v10365_v34 = vld [vmem:[%s15103_s1 + $0xc08] ss:$16 sps:$4 sm:$0xff]  }
  0xb7   : > { %2343 = vmatpush2.bf16.msra.mxu1 %v10290_v35  ;;  %2303 = vmatprep.subr.bf16.mxu0 %v10295_v36  ;;  %v10368_v35 = vld [vmem:[%s15103_s1 + $0xe08] ss:$16 sps:$4 sm:$0xff]   ;;  %v10373_v36 = vld [vmem:[%s15103_s1 + $0xdec] ss:$16 sps:$4 sm:$0xff]  }
  0xb8   : > { %2344 = vmatprep.subr.bf16.mxu1 %v10298_v3  ;;  %v10376_v3 = vld [vmem:[%s15103_s1 + $0xfec] ss:$16 sps:$4 sm:$0xff]  }
  0xba   : > { %2304 = vmatpush2.bf16.msra.mxu0 %v10293_v38  ;;  %v10371_v38 = vld [vmem:[%s15103_s1 + $0xde8] ss:$16 sps:$4 sm:$0xff]  }
  0xbb   : > { %2345 = vmatpush2.bf16.msra.mxu1 %v10296_v39  ;;  %2305 = vmatprep.subr.bf16.mxu0 %v10301_v40  ;;  %v10374_v39 = vld [vmem:[%s15103_s1 + $0xfe8] ss:$16 sps:$4 sm:$0xff]   ;;  %v10379_v40 = vld [vmem:[%s15103_s1 + $0xdcc] ss:$16 sps:$4 sm:$0xff]  }
  0xbc   : > { %2346 = vmatprep.subr.bf16.mxu1 %v10304_v41  ;;  %v10382_v41 = vld [vmem:[%s15103_s1 + $0xfcc] ss:$16 sps:$4 sm:$0xff]  }
  0xbe   : > { %2306 = vmatpush2.bf16.msra.mxu0 %v10299_v45  ;;  %v10377_v45 = vld [vmem:[%s15103_s1 + $0xdc8] ss:$16 sps:$4 sm:$0xff]  }
  0xbf   : > { %2347 = vmatpush2.bf16.msra.mxu1 %v10302_v46  ;;  %2307 = vmatprep.subr.bf16.mxu0 %v10307_v47  ;;  %v10380_v46 = vld [vmem:[%s15103_s1 + $0xfc8] ss:$16 sps:$4 sm:$0xff]   ;;  %v10385_v47 = vld [vmem:[%s15103_s1 + $0xdac] ss:$16 sps:$4 sm:$0xff]  }
  0xc0   : > { %2348 = vmatprep.subr.bf16.mxu1 %v10310_v48  ;;  %v10388_v48 = vld [vmem:[%s15103_s1 + $0xfac] ss:$16 sps:$4 sm:$0xff]  }
  0xc2   : > { %2308 = vmatpush2.bf16.msra.mxu0 %v10305_v50  ;;  %v10383_v50 = vld [vmem:[%s15103_s1 + $0xda8] ss:$16 sps:$4 sm:$0xff]  }
  0xc3   : > { %2349 = vmatpush2.bf16.msra.mxu1 %v10308_v51  ;;  %2309 = vmatprep.subr.bf16.mxu0 %v10313_v52  ;;  %v10386_v51 = vld [vmem:[%s15103_s1 + $0xfa8] ss:$16 sps:$4 sm:$0xff]   ;;  %v10391_v52 = vld [vmem:[%s15103_s1 + $0xd8c] ss:$16 sps:$4 sm:$0xff]  }
  0xc4   : > { %2350 = vmatprep.subr.bf16.mxu1 %v10316_v53  ;;  %v10394_v53 = vld [vmem:[%s15103_s1 + $0xf8c] ss:$16 sps:$4 sm:$0xff]  }
  0xc6   : > { %2310 = vmatpush2.bf16.msra.mxu0 %v10311_v54  ;;  %v10389_v54 = vld [vmem:[%s15103_s1 + $0xd88] ss:$16 sps:$4 sm:$0xff]  }
  0xc7   : > { %2351 = vmatpush2.bf16.msra.mxu1 %v10314_v55  ;;  %2311 = vmatprep.subr.bf16.mxu0 %v10319_v56  ;;  %v10392_v55 = vld [vmem:[%s15103_s1 + $0xf88] ss:$16 sps:$4 sm:$0xff]   ;;  %v10397_v56 = vld [vmem:[%s15103_s1 + $0xd6c] ss:$16 sps:$4 sm:$0xff]  }
  0xc8   : > { %2352 = vmatprep.subr.bf16.mxu1 %v10322_v1  ;;  %v10400_v1 = vld [vmem:[%s15103_s1 + $0xf6c] ss:$16 sps:$4 sm:$0xff]  }
  0xca   : > { %2312 = vmatpush2.bf16.msra.mxu0 %v10317_v4  ;;  %v10395_v4 = vld [vmem:[%s15103_s1 + $0xd68] ss:$16 sps:$4 sm:$0xff]  }
  0xcb   : > { %2353 = vmatpush2.bf16.msra.mxu1 %v10320_v57  ;;  %2363 = vmatprep.subr.bf16.mxu0 %v10325_v58  ;;  %v10398_v57 = vld [vmem:[%s15103_s1 + $0xf68] ss:$16 sps:$4 sm:$0xff]   ;;  %v10403_v58 = vld [vmem:[%s15103_s1 + $0xd4c] ss:$16 sps:$4 sm:$0xff]  }
  0xcc   : > { %2404 = vmatprep.subr.bf16.mxu1 %v10328_v59  ;;  %v10406_v59 = vld [vmem:[%s15103_s1 + $0xf4c] ss:$16 sps:$4 sm:$0xff]  }
  0xcd   : > { %2314 = vmatmul.mubr.bf16.vlgmr.msra.gmra.mxu0 %v806_v22  ;;  %v10340_v22 = vld [vmem:[%s15103_s1 + $0xeac] ss:$16 sps:$4 sm:$0xff]  }
  0xce   : > { %2355 = vmatmul.mubr.bf16.vlgmr.msra.gmra.mxu1 %v812_v23  ;;  %2364 = vmatpush1.bf16.msra.mxu0 %v10323_v60  ;;  %v10335_v23 = vld [vmem:[%s15103_s1 + $0xca8] ss:$16 sps:$4 sm:$0xff]  }
  0xcf   : > { %2405 = vmatpush1.bf16.msra.mxu1 %v10326_v62  ;;  %2365 = vmatprep.subr.bf16.mxu0 %v10331_v63  ;;  %v10401_v60 = vld [vmem:[%s15103_s1 + $0xd48] ss:$16 sps:$4 sm:$0xff]   ;;  %v10409_v63 = vld [vmem:[%s15103_s1 + $0xd2c] ss:$16 sps:$4 sm:$0xff]  }
  0xd0   : > { %2406 = vmatprep.subr.bf16.mxu1 %v10334_v0  ;;  %2395 = vmatprep.mubr.bf16.mxu0 %v821_v28  ;;  %v10346_v28 = vld [vmem:[%s15103_s1 + $0xe8c] ss:$16 sps:$4 sm:$0xff]   ;;  %v10404_v62 = vld [vmem:[%s15103_s1 + $0xf48] ss:$16 sps:$4 sm:$0xff]  }
  0xd1   : > { %2436 = vmatprep.mubr.bf16.mxu1 %v827_v29  ;;  %v10341_v29 = vld [vmem:[%s15103_s1 + $0xc88] ss:$16 sps:$4 sm:$0xff]   ;;  %v10412_v0 = vld [vmem:[%s15103_s1 + $0xf2c] ss:$16 sps:$4 sm:$0xff]  }
  0xd2   : > { %2366 = vmatpush1.bf16.msra.mxu0 %v10329_v5  ;;  %v10407_v5 = vld [vmem:[%s15103_s1 + $0xd28] ss:$16 sps:$4 sm:$0xff]  }
  0xd3   : > { %2407 = vmatpush1.bf16.msra.mxu1 %v10332_v6  ;;  %2367 = vmatprep.subr.bf16.mxu0 %v10337_v7  ;;  %v10410_v6 = vld [vmem:[%s15103_s1 + $0xf28] ss:$16 sps:$4 sm:$0xff]   ;;  %v10415_v7 = vld [vmem:[%s15103_s1 + $0xd0c] ss:$16 sps:$4 sm:$0xff]  }
  0xd4   : > { %2408 = vmatprep.subr.bf16.mxu1 %v10340_v22  ;;  %v10418_v22 = vld [vmem:[%s15103_s1 + $0xf0c] ss:$16 sps:$4 sm:$0xff]  }
  0xd6   : > { %2368 = vmatpush1.bf16.msra.mxu0 %v10335_v23  ;;  %v10413_v23 = vld [vmem:[%s15103_s1 + $0xd08] ss:$16 sps:$4 sm:$0xff]  }
  0xd7   : > { %2409 = vmatpush1.bf16.msra.mxu1 %v10338_v8  ;;  %2369 = vmatprep.subr.bf16.mxu0 %v10343_v9  ;;  %v10416_v8 = vld [vmem:[%s15103_s1 + $0xf08] ss:$16 sps:$4 sm:$0xff]   ;;  %v10421_v9 = vld [vmem:[%s15103_s1 + $0xe4] ss:$16 sps:$4 sm:$0xff]  }
  0xd8   : > { %2410 = vmatprep.subr.bf16.mxu1 %v10346_v28  ;;  %v10424_v28 = vld [vmem:[%s15103_s1 + $0x2e4] ss:$16 sps:$4 sm:$0xff]  }
  0xda   : > { %2370 = vmatpush1.bf16.msra.mxu0 %v10341_v29  ;;  %v10419_v29 = vld [vmem:[%s15103_s1 + $0xe0] ss:$16 sps:$4 sm:$0xff]  }
  0xdb   : > { %2411 = vmatpush1.bf16.msra.mxu1 %v10344_v11  ;;  %2371 = vmatprep.subr.bf16.mxu0 %v10349_v12  ;;  %v10422_v11 = vld [vmem:[%s15103_s1 + $0x2e0] ss:$16 sps:$4 sm:$0xff]   ;;  %v10427_v12 = vld [vmem:[%s15103_s1 + $0xc4] ss:$16 sps:$4 sm:$0xff]  }
  0xdc   : > { %2412 = vmatprep.subr.bf16.mxu1 %v10352_v13  ;;  %v10430_v13 = vld [vmem:[%s15103_s1 + $0x2c4] ss:$16 sps:$4 sm:$0xff]  }
  0xde   : > { %2372 = vmatpush1.bf16.msra.mxu0 %v10347_v14  ;;  %v10425_v14 = vld [vmem:[%s15103_s1 + $0xc0] ss:$16 sps:$4 sm:$0xff]  }
  0xdf   : > { %2413 = vmatpush1.bf16.msra.mxu1 %v10350_v17  ;;  %2373 = vmatprep.subr.bf16.mxu0 %v10355_v18 }
  0xe0   : > { %2414 = vmatprep.subr.bf16.mxu1 %v10358_v19  ;;  %v10428_v19 = vld [vmem:[%s15103_s1 + $0x2c0] ss:$16 sps:$4 sm:$0xff]  }
  0xe2   : > { %2374 = vmatpush1.bf16.msra.mxu0 %v10353_v20 }
  0xe3   : > { %2415 = vmatpush1.bf16.msra.mxu1 %v10356_v24  ;;  %2375 = vmatprep.subr.bf16.mxu0 %v10361_v25 }
  0xe4   : > { %2416 = vmatprep.subr.bf16.mxu1 %v10364_v26  ;;  %v10433_v26 = vld [vmem:[%s15103_s1 + $0xa4] ss:$16 sps:$4 sm:$0xff]  }
  0xe6   : > { %2376 = vmatpush1.bf16.msra.mxu0 %v10359_v27  ;;  %v10431_v27 = vld [vmem:[%s15103_s1 + $0xa0] ss:$16 sps:$4 sm:$0xff]  }
  0xe7   : > { %2417 = vmatpush1.bf16.msra.mxu1 %v10362_v30  ;;  %2377 = vmatprep.subr.bf16.mxu0 %v10367_v31  ;;  %v10434_v30 = vld [vmem:[%s15103_s1 + $0x2a0] ss:$16 sps:$4 sm:$0xff]  }
  0xe8   : > { %2418 = vmatprep.subr.bf16.mxu1 %v10370_v32 }
  0xea   : > { %2378 = vmatpush1.bf16.msra.mxu0 %v10365_v34 }
  0xeb   : > { %2419 = vmatpush1.bf16.msra.mxu1 %v10368_v35  ;;  %2379 = vmatprep.subr.bf16.mxu0 %v10373_v36  ;;  %v10439_v36 = vld [vmem:[%s15103_s1 + $0x84] ss:$16 sps:$4 sm:$0xff]  }
  0xec   : > { %2420 = vmatprep.subr.bf16.mxu1 %v10376_v3  ;;  %v10442_v3 = vld [vmem:[%s15103_s1 + $0x284] ss:$16 sps:$4 sm:$0xff]  }
  0xee   : > { %2380 = vmatpush2.bf16.msra.mxu0 %v10371_v38  ;;  %v10437_v38 = vld [vmem:[%s15103_s1 + $0x80] ss:$16 sps:$4 sm:$0xff]  }
  0xef   : > { %2421 = vmatpush2.bf16.msra.mxu1 %v10374_v39  ;;  %2381 = vmatprep.subr.bf16.mxu0 %v10379_v40  ;;  %v10440_v39 = vld [vmem:[%s15103_s1 + $0x280] ss:$16 sps:$4 sm:$0xff]   ;;  %v10445_v40 = vld [vmem:[%s15103_s1 + $0x64] ss:$16 sps:$4 sm:$0xff]  }
  0xf0   : > { %2422 = vmatprep.subr.bf16.mxu1 %v10382_v41  ;;  %v10448_v41 = vld [vmem:[%s15103_s1 + $0x264] ss:$16 sps:$4 sm:$0xff]  }
  0xf2   : > { %2382 = vmatpush2.bf16.msra.mxu0 %v10377_v45  ;;  %v10443_v45 = vld [vmem:[%s15103_s1 + $0x60] ss:$16 sps:$4 sm:$0xff]  }
  0xf3   : > { %2423 = vmatpush2.bf16.msra.mxu1 %v10380_v46  ;;  %2383 = vmatprep.subr.bf16.mxu0 %v10385_v47  ;;  %v10446_v46 = vld [vmem:[%s15103_s1 + $0x260] ss:$16 sps:$4 sm:$0xff]   ;;  %v10451_v47 = vld [vmem:[%s15103_s1 + $0x44] ss:$16 sps:$4 sm:$0xff]  }
  0xf4   : > { %2424 = vmatprep.subr.bf16.mxu1 %v10388_v48  ;;  %v10454_v48 = vld [vmem:[%s15103_s1 + $0x244] ss:$16 sps:$4 sm:$0xff]  }
  0xf6   : > { %2384 = vmatpush2.bf16.msra.mxu0 %v10383_v50  ;;  %v10449_v50 = vld [vmem:[%s15103_s1 + $0x40] ss:$16 sps:$4 sm:$0xff]  }
  0xf7   : > { %2425 = vmatpush2.bf16.msra.mxu1 %v10386_v51  ;;  %2385 = vmatprep.subr.bf16.mxu0 %v10391_v52  ;;  %v10452_v51 = vld [vmem:[%s15103_s1 + $0x240] ss:$16 sps:$4 sm:$0xff]   ;;  %v10457_v52 = vld [vmem:[%s15103_s1 + $0x24] ss:$16 sps:$4 sm:$0xff]  }
  0xf8   : > { %2426 = vmatprep.subr.bf16.mxu1 %v10394_v53  ;;  %v10460_v53 = vld [vmem:[%s15103_s1 + $0x224] ss:$16 sps:$4 sm:$0xff]  }
  0xfa   : > { %2386 = vmatpush2.bf16.msra.mxu0 %v10389_v54  ;;  %v10455_v54 = vld [vmem:[%s15103_s1 + $0x20] ss:$16 sps:$4 sm:$0xff]  }
  0xfb   : > { %2427 = vmatpush2.bf16.msra.mxu1 %v10392_v55  ;;  %2387 = vmatprep.subr.bf16.mxu0 %v10397_v56  ;;  %v10458_v55 = vld [vmem:[%s15103_s1 + $0x220] ss:$16 sps:$4 sm:$0xff]   ;;  %v10463_v56 = vld [vmem:[%s15103_s1 + $0x4] ss:$16 sps:$4 sm:$0xff]  }
  0xfc   : > { %2428 = vmatprep.subr.bf16.mxu1 %v10400_v1  ;;  %v10466_v1 = vld [vmem:[%s15103_s1 + $0x204] ss:$16 sps:$4 sm:$0xff]  }
  0xfe   : > { %2388 = vmatpush2.bf16.msra.mxu0 %v10395_v4  ;;  %v10461_v4 = vld [vmem:[%s15103_s1] ss:$16 sps:$4 sm:$0xff]  }
  0xff   : > { %2429 = vmatpush2.bf16.msra.mxu1 %v10398_v57  ;;  %2389 = vmatprep.subr.bf16.mxu0 %v10403_v58  ;;  %v10464_v57 = vld [vmem:[%s15103_s1 + $0x200] ss:$16 sps:$4 sm:$0xff]   ;;  %v10469_v58 = vld [vmem:[%s15103_s1 + $0x1e4] ss:$16 sps:$4 sm:$0xff]  }
 0x100   : > { %2430 = vmatprep.subr.bf16.mxu1 %v10406_v59  ;;  %v10472_v59 = vld [vmem:[%s15103_s1 + $0x3e4] ss:$16 sps:$4 sm:$0xff]  }
 0x102   : > { %2390 = vmatpush2.bf16.msra.mxu0 %v10401_v60  ;;  %v10467_v60 = vld [vmem:[%s15103_s1 + $0x1e0] ss:$16 sps:$4 sm:$0xff]  }
 0x103   : > { %2431 = vmatpush2.bf16.msra.mxu1 %v10404_v62  ;;  %2391 = vmatprep.subr.bf16.mxu0 %v10409_v63  ;;  %v10470_v62 = vld [vmem:[%s15103_s1 + $0x3e0] ss:$16 sps:$4 sm:$0xff]   ;;  %v10475_v63 = vld [vmem:[%s15103_s1 + $0x1c4] ss:$16 sps:$4 sm:$0xff]  }
 0x104   : > { %2432 = vmatprep.subr.bf16.mxu1 %v10412_v0  ;;  %v10478_v0 = vld [vmem:[%s15103_s1 + $0x3c4] ss:$16 sps:$4 sm:$0xff]  }
 0x106   : > { %2392 = vmatpush2.bf16.msra.mxu0 %v10407_v5  ;;  %v10473_v5 = vld [vmem:[%s15103_s1 + $0x1c0] ss:$16 sps:$4 sm:$0xff]  }
 0x107   : > { %2433 = vmatpush2.bf16.msra.mxu1 %v10410_v6  ;;  %2393 = vmatprep.subr.bf16.mxu0 %v10415_v7  ;;  %v10476_v6 = vld [vmem:[%s15103_s1 + $0x3c0] ss:$16 sps:$4 sm:$0xff]   ;;  %v10481_v7 = vld [vmem:[%s15103_s1 + $0x1a4] ss:$16 sps:$4 sm:$0xff]  }
 0x108   : > { %2434 = vmatprep.subr.bf16.mxu1 %v10418_v22  ;;  %v10484_v22 = vld [vmem:[%s15103_s1 + $0x3a4] ss:$16 sps:$4 sm:$0xff]  }
 0x10a   : > { %2394 = vmatpush2.bf16.msra.mxu0 %v10413_v23  ;;  %v10479_v23 = vld [vmem:[%s15103_s1 + $0x1a0] ss:$16 sps:$4 sm:$0xff]  }
 0x10b   : > { %2435 = vmatpush2.bf16.msra.mxu1 %v10416_v8  ;;  %3733 = vmatprep.subr.bf16.mxu0 %v10421_v9  ;;  %v10482_v8 = vld [vmem:[%s15103_s1 + $0x3a0] ss:$16 sps:$4 sm:$0xff]   ;;  %v10487_v9 = vld [vmem:[%s15103_s1 + $0x184] ss:$16 sps:$4 sm:$0xff]  }
 0x10c   : > { %3774 = vmatprep.subr.bf16.mxu1 %v10424_v28  ;;  %v10490_v28 = vld [vmem:[%s15103_s1 + $0x384] ss:$16 sps:$4 sm:$0xff]  }
 0x10d   : > { %v2151_v17 = vpop.f32.mrf.mxu0  ;;  %2396 = vmatmul.mubr.bf16.vlgmr.msra.gmra.mxu0 %v818_v42  ;;  %v10436_v42 = vld [vmem:[%s15103_s1 + $0x2a4] ss:$16 sps:$4 sm:$0xff]  }
 0x10e   : > { %v2192_v18 = vpop.f32.mrf.mxu1  ;;  %2437 = vmatmul.mubr.bf16.vlgmr.msra.gmra.mxu1 %v824_v44  ;;  %3734 = vmatpush1.bf16.msra.mxu0 %v10419_v29  ;;  %v10485_v29 = vld [vmem:[%s15103_s1 + $0x180] ss:$16 sps:$4 sm:$0xff]  }
 0x10f   : > { %v12526_v20 = vadd.f32 %v2192_v18, %v2151_v17  ;;  %3775 = vmatpush1.bf16.msra.mxu1 %v10422_v11  ;;  %v2153_v24 = vpop.f32.mrf.mxu0  ;;  %3735 = vmatprep.subr.bf16.mxu0 %v10427_v12  ;;  %v10488_v11 = vld [vmem:[%s15103_s1 + $0x380] ss:$16 sps:$4 sm:$0xff]   ;;  %v10493_v12 = vld [vmem:[%s15103_s1 + $0x164] ss:$16 sps:$4 sm:$0xff]  }
 0x110   : > { %v2194_v25 = vpop.f32.mrf.mxu1  ;;  %3776 = vmatprep.subr.bf16.mxu1 %v10430_v13  ;;  %3765 = vmatprep.mubr.bf16.mxu0 %v11814_v61  ;;  %v10496_v13 = vld [vmem:[%s15103_s1 + $0x364] ss:$16 sps:$4 sm:$0xff]   ;;  %v10494_v17 = vld [vmem:[%s15103_s1 + $0x360] ss:$16 sps:$4 sm:$0xff]  }
 0x111   : > { %v12534_v44 = vadd.f32 %v2194_v25, %v2153_v24  ;;  %3806 = vmatprep.mubr.bf16.mxu1 %v11828_v2  ;;  %v2155_v31 = vpop.f32.mrf.mxu0  ;;  %v10499_v18 = vld [vmem:[%s15103_s1 + $0x144] ss:$16 sps:$4 sm:$0xff]   ;;  %v10497_v24 = vld [vmem:[%s15103_s1 + $0x140] ss:$16 sps:$4 sm:$0xff]  }
 0x112   : > { %v2196_v32 = vpop.f32.mrf.mxu1  ;;  %3736 = vmatpush1.bf16.msra.mxu0 %v10425_v14  ;;  %v10491_v14 = vld [vmem:[%s15103_s1 + $0x160] ss:$16 sps:$4 sm:$0xff]   ;;  %v10511_v31 = vld [vmem:[%s15103_s1 + $0x104] ss:$16 sps:$4 sm:$0xff]  }
 0x113   : > { %3777 = vmatpush1.bf16.msra.mxu1 %v10428_v19  ;;  %v2156_v34 = vpop.f32.mrf.mxu0  ;;  %3737 = vmatprep.subr.bf16.mxu0 %v10433_v26  ;;  %v10502_v19 = vld [vmem:[%s15103_s1 + $0x344] ss:$16 sps:$4 sm:$0xff]   ;;  %v10500_v25 = vld [vmem:[%s15103_s1 + $0x340] ss:$16 sps:$4 sm:$0xff]  }
 0x114   : > { %v2197_v35 = vpop.f32.mrf.mxu1  ;;  %3778 = vmatprep.subr.bf16.mxu1 %v10436_v42  ;;  %v10505_v26 = vld [vmem:[%s15103_s1 + $0x124] ss:$16 sps:$4 sm:$0xff]   ;;  %v10509_v34 = vld [vmem:[%s15103_s1 + $0x100] ss:$16 sps:$4 sm:$0xff]  }
 0x115   : > { %v10508_v42 = vld [vmem:[%s15103_s1 + $0x324] ss:$16 sps:$4 sm:$0xff]   ;;  %v10512_v35 = vld [vmem:[%s15103_s1 + $0x300] ss:$16 sps:$4 sm:$0xff]  }
 0x116   : > { %3738 = vmatpush1.bf16.msra.mxu0 %v10431_v27  ;;  %v10503_v27 = vld [vmem:[%s15103_s1 + $0x120] ss:$16 sps:$4 sm:$0xff]   ;;  %v10514_v32 = vld [vmem:[%s15103_s1 + $0x304] ss:$16 sps:$4 sm:$0xff]  }
 0x117   : > { %3779 = vmatpush1.bf16.msra.mxu1 %v10434_v30  ;;  %3739 = vmatprep.subr.bf16.mxu0 %v10439_v36  ;;  %v10506_v30 = vld [vmem:[%s15103_s1 + $0x320] ss:$16 sps:$4 sm:$0xff]   ;;  %v10517_v36 = vld [vmem:[%s15103_s1 + $0x4e4] ss:$16 sps:$4 sm:$0xff]  }
 0x118   : > { %3780 = vmatprep.subr.bf16.mxu1 %v10442_v3  ;;  %v10520_v3 = vld [vmem:[%s15103_s1 + $0x6e4] ss:$16 sps:$4 sm:$0xff]  }
 0x11a   : > { %3740 = vmatpush1.bf16.msra.mxu0 %v10437_v38  ;;  %v10515_v38 = vld [vmem:[%s15103_s1 + $0x4e0] ss:$16 sps:$4 sm:$0xff]  }
 0x11b   : > { %3781 = vmatpush1.bf16.msra.mxu1 %v10440_v39  ;;  %3741 = vmatprep.subr.bf16.mxu0 %v10445_v40  ;;  %v10518_v39 = vld [vmem:[%s15103_s1 + $0x6e0] ss:$16 sps:$4 sm:$0xff]   ;;  %v10523_v40 = vld [vmem:[%s15103_s1 + $0x4c4] ss:$16 sps:$4 sm:$0xff]  }
 0x11c   : > { %3782 = vmatprep.subr.bf16.mxu1 %v10448_v41  ;;  %v10526_v41 = vld [vmem:[%s15103_s1 + $0x6c4] ss:$16 sps:$4 sm:$0xff]  }
 0x11e   : > { %3742 = vmatpush1.bf16.msra.mxu0 %v10443_v45  ;;  %v10521_v45 = vld [vmem:[%s15103_s1 + $0x4c0] ss:$16 sps:$4 sm:$0xff]  }
 0x11f   : > { %3783 = vmatpush1.bf16.msra.mxu1 %v10446_v46  ;;  %3743 = vmatprep.subr.bf16.mxu0 %v10451_v47  ;;  %v10524_v46 = vld [vmem:[%s15103_s1 + $0x6c0] ss:$16 sps:$4 sm:$0xff]  }
 0x120   : > { %3784 = vmatprep.subr.bf16.mxu1 %v10454_v48 }
 0x122   : > { %3744 = vmatpush1.bf16.msra.mxu0 %v10449_v50 }
 0x123   : > { %3785 = vmatpush1.bf16.msra.mxu1 %v10452_v51  ;;  %3745 = vmatprep.subr.bf16.mxu0 %v10457_v52 }
 0x124   : > { %3786 = vmatprep.subr.bf16.mxu1 %v10460_v53  ;;  %v10529_v53 = vld [vmem:[%s15103_s1 + $0x4a4] ss:$16 sps:$4 sm:$0xff]  }
 0x126   : > { %3746 = vmatpush1.bf16.msra.mxu0 %v10455_v54  ;;  %v10532_v54 = vld [vmem:[%s15103_s1 + $0x6a4] ss:$16 sps:$4 sm:$0xff]  }
 0x127   : > { %3787 = vmatpush1.bf16.msra.mxu1 %v10458_v55  ;;  %3747 = vmatprep.subr.bf16.mxu0 %v10463_v56 }
 0x128   : > { %3788 = vmatprep.subr.bf16.mxu1 %v10466_v1  ;;  %v10530_v1 = vld [vmem:[%s15103_s1 + $0x6a0] ss:$16 sps:$4 sm:$0xff]  }
 0x12a   : > { %3748 = vmatpush1.bf16.msra.mxu0 %v10461_v4 }
 0x12b   : > { %3789 = vmatpush1.bf16.msra.mxu1 %v10464_v57  ;;  %3749 = vmatprep.subr.bf16.mxu0 %v10469_v58 }
 0x12c   : > { %3790 = vmatprep.subr.bf16.mxu1 %v10472_v59 }
 0x12e   : > { %3750 = vmatpush2.bf16.msra.mxu0 %v10467_v60  ;;  %v10535_v60 = vld [vmem:[%s15103_s1 + $0x484] ss:$16 sps:$4 sm:$0xff]  }
 0x12f   : > { %3791 = vmatpush2.bf16.msra.mxu1 %v10470_v62  ;;  %3751 = vmatprep.subr.bf16.mxu0 %v10475_v63  ;;  %v10538_v62 = vld [vmem:[%s15103_s1 + $0x684] ss:$16 sps:$4 sm:$0xff]   ;;  %v10533_v63 = vld [vmem:[%s15103_s1 + $0x480] ss:$16 sps:$4 sm:$0xff]  }
 0x130   : > { %3792 = vmatprep.subr.bf16.mxu1 %v10478_v0  ;;  %v10536_v0 = vld [vmem:[%s15103_s1 + $0x680] ss:$16 sps:$4 sm:$0xff]  }
 0x132   : > { %3752 = vmatpush2.bf16.msra.mxu0 %v10473_v5  ;;  %v10541_v5 = vld [vmem:[%s15103_s1 + $0x464] ss:$16 sps:$4 sm:$0xff]  }
 0x133   : > { %3793 = vmatpush2.bf16.msra.mxu1 %v10476_v6  ;;  %3753 = vmatprep.subr.bf16.mxu0 %v10481_v7  ;;  %v10544_v6 = vld [vmem:[%s15103_s1 + $0x664] ss:$16 sps:$4 sm:$0xff]   ;;  %v10539_v7 = vld [vmem:[%s15103_s1 + $0x460] ss:$16 sps:$4 sm:$0xff]  }
 0x134   : > { %3794 = vmatprep.subr.bf16.mxu1 %v10484_v22  ;;  %v10542_v22 = vld [vmem:[%s15103_s1 + $0x660] ss:$16 sps:$4 sm:$0xff]  }
 0x136   : > { %3754 = vmatpush2.bf16.msra.mxu0 %v10479_v23  ;;  %v10547_v23 = vld [vmem:[%s15103_s1 + $0x444] ss:$16 sps:$4 sm:$0xff]  }
 0x137   : > { %3795 = vmatpush2.bf16.msra.mxu1 %v10482_v8  ;;  %3755 = vmatprep.subr.bf16.mxu0 %v10487_v9  ;;  %v10550_v8 = vld [vmem:[%s15103_s1 + $0x644] ss:$16 sps:$4 sm:$0xff]   ;;  %v10545_v9 = vld [vmem:[%s15103_s1 + $0x440] ss:$16 sps:$4 sm:$0xff]  }
 0x138   : > { %3796 = vmatprep.subr.bf16.mxu1 %v10490_v28  ;;  %v10548_v28 = vld [vmem:[%s15103_s1 + $0x640] ss:$16 sps:$4 sm:$0xff]  }
 0x13a   : > { %3756 = vmatpush2.bf16.msra.mxu0 %v10485_v29  ;;  %v10553_v29 = vld [vmem:[%s15103_s1 + $0x424] ss:$16 sps:$4 sm:$0xff]  }
 0x13b   : > { %3797 = vmatpush2.bf16.msra.mxu1 %v10488_v11  ;;  %3757 = vmatprep.subr.bf16.mxu0 %v10493_v12  ;;  %v10556_v11 = vld [vmem:[%s15103_s1 + $0x624] ss:$16 sps:$4 sm:$0xff]   ;;  %v10551_v12 = vld [vmem:[%s15103_s1 + $0x420] ss:$16 sps:$4 sm:$0xff]  }
 0x13c   : > { %3798 = vmatprep.subr.bf16.mxu1 %v10496_v13  ;;  %v10554_v13 = vld [vmem:[%s15103_s1 + $0x620] ss:$16 sps:$4 sm:$0xff]  }
 0x13e   : > { %3758 = vmatpush2.bf16.msra.mxu0 %v10491_v14  ;;  %v10559_v14 = vld [vmem:[%s15103_s1 + $0x404] ss:$16 sps:$4 sm:$0xff]  }
 0x13f   : > { %3799 = vmatpush2.bf16.msra.mxu1 %v10494_v17  ;;  %3759 = vmatprep.subr.bf16.mxu0 %v10499_v18  ;;  %v10562_v17 = vld [vmem:[%s15103_s1 + $0x604] ss:$16 sps:$4 sm:$0xff]   ;;  %v10557_v18 = vld [vmem:[%s15103_s1 + $0x400] ss:$16 sps:$4 sm:$0xff]  }
 0x140   : > { %3800 = vmatprep.subr.bf16.mxu1 %v10502_v19  ;;  %v10560_v19 = vld [vmem:[%s15103_s1 + $0x600] ss:$16 sps:$4 sm:$0xff]  }
 0x142   : > { %3760 = vmatpush2.bf16.msra.mxu0 %v10497_v24  ;;  %v10565_v24 = vld [vmem:[%s15103_s1 + $0x5e4] ss:$16 sps:$4 sm:$0xff]  }
 0x143   : > { %3801 = vmatpush2.bf16.msra.mxu1 %v10500_v25  ;;  %3761 = vmatprep.subr.bf16.mxu0 %v10505_v26  ;;  %v10568_v25 = vld [vmem:[%s15103_s1 + $0x7e4] ss:$16 sps:$4 sm:$0xff]   ;;  %v10563_v26 = vld [vmem:[%s15103_s1 + $0x5e0] ss:$16 sps:$4 sm:$0xff]  }
 0x144   : > { %3802 = vmatprep.subr.bf16.mxu1 %v10508_v42  ;;  %v10566_v42 = vld [vmem:[%s15103_s1 + $0x7e0] ss:$16 sps:$4 sm:$0xff]  }
 0x146   : > { %3762 = vmatpush2.bf16.msra.mxu0 %v10503_v27  ;;  %v10571_v27 = vld [vmem:[%s15103_s1 + $0x5c4] ss:$16 sps:$4 sm:$0xff]  }
 0x147   : > { %3803 = vmatpush2.bf16.msra.mxu1 %v10506_v30  ;;  %3763 = vmatprep.subr.bf16.mxu0 %v10511_v31  ;;  %v10574_v30 = vld [vmem:[%s15103_s1 + $0x7c4] ss:$16 sps:$4 sm:$0xff]   ;;  %v10569_v31 = vld [vmem:[%s15103_s1 + $0x5c0] ss:$16 sps:$4 sm:$0xff]  }
 0x148   : > { %3804 = vmatprep.subr.bf16.mxu1 %v10514_v32  ;;  %v10572_v32 = vld [vmem:[%s15103_s1 + $0x7c0] ss:$16 sps:$4 sm:$0xff]  }
 0x14a   : > { %3764 = vmatpush2.bf16.msra.mxu0 %v10509_v34  ;;  %v10577_v34 = vld [vmem:[%s15103_s1 + $0x5a4] ss:$16 sps:$4 sm:$0xff]  }
 0x14b   : > { %3805 = vmatpush2.bf16.msra.mxu1 %v10512_v35  ;;  %3815 = vmatprep.subr.bf16.mxu0 %v10517_v36  ;;  %v10580_v35 = vld [vmem:[%s15103_s1 + $0x7a4] ss:$16 sps:$4 sm:$0xff]   ;;  %v10575_v36 = vld [vmem:[%s15103_s1 + $0x5a0] ss:$16 sps:$4 sm:$0xff]  }
 0x14c   : > { %3856 = vmatprep.subr.bf16.mxu1 %v10520_v3  ;;  %v10578_v3 = vld [vmem:[%s15103_s1 + $0x7a0] ss:$16 sps:$4 sm:$0xff]  }
 0x14d   : > { %v2233_v47 = vpop.f32.mrf.mxu0  ;;  %3766 = vmatmul.mubr.bf16.vlgmr.msra.gmra.mxu0 %v11853_v10 }
 0x14e   : > { %v2274_v48 = vpop.f32.mrf.mxu1  ;;  %3807 = vmatmul.mubr.bf16.vlgmr.msra.gmra.mxu1 %v11872_v16  ;;  %v2234_v50 = vadd.f32 %v2233_v47, %v12526_v20  ;;  %3816 = vmatpush1.bf16.msra.mxu0 %v10515_v38  ;;  %v10527_v20 = vld [vmem:[%s15103_s1 + $0x4a0] ss:$16 sps:$4 sm:$0xff]   ;;  %v10583_v38 = vld [vmem:[%s15103_s1 + $0x584] ss:$16 sps:$4 sm:$0xff]  }
 0x14f   : > { %3857 = vmatpush1.bf16.msra.mxu1 %v10518_v39  ;;  %v2235_v51 = vpop.f32.mrf.mxu0  ;;  %3817 = vmatprep.subr.bf16.mxu0 %v10523_v40  ;;  %v10586_v39 = vld [vmem:[%s15103_s1 + $0x784] ss:$16 sps:$4 sm:$0xff]   ;;  %v10581_v40 = vld [vmem:[%s15103_s1 + $0x580] ss:$16 sps:$4 sm:$0xff]  }
 0x150   : > { %v2276_v52 = vpop.f32.mrf.mxu1  ;;  %3858 = vmatprep.subr.bf16.mxu1 %v10526_v41  ;;  %v12733_v55 = vadd.f32 %v2274_v48, %v2234_v50  ;;  %v2236_v56 = vadd.f32 %v2235_v51, %v12534_v44  ;;  %3847 = vmatprep.mubr.bf16.mxu0 %v11868_v15  ;;  %v10584_v41 = vld [vmem:[%s15103_s1 + $0x780] ss:$16 sps:$4 sm:$0xff]   ;;  %v10595_v50 = vld [vmem:[%s15103_s1 + $0x544] ss:$16 sps:$4 sm:$0xff]  }
 0x151   : > { %3888 = vmatprep.mubr.bf16.mxu1 %v11888_v21  ;;  %v2237_v4 = vpop.f32.mrf.mxu0  ;;  %v10587_v47 = vld [vmem:[%s15103_s1 + $0x560] ss:$16 sps:$4 sm:$0xff]   ;;  %v10598_v51 = vld [vmem:[%s15103_s1 + $0x744] ss:$16 sps:$4 sm:$0xff]  }
 0x152   : > { %v2278_v57 = vpop.f32.mrf.mxu1  ;;  %v12744_v58 = vadd.f32 %v2276_v52, %v2236_v56  ;;  %3818 = vmatpush1.bf16.msra.mxu0 %v10521_v45  ;;  %v10589_v45 = vld [vmem:[%s15103_s1 + $0x564] ss:$16 sps:$4 sm:$0xff]   ;;  %v10590_v48 = vld [vmem:[%s15103_s1 + $0x760] ss:$16 sps:$4 sm:$0xff]  }
 0x153   : > { %3859 = vmatpush1.bf16.msra.mxu1 %v10524_v46  ;;  %v2238_v59 = vpop.f32.mrf.mxu0  ;;  %3819 = vmatprep.subr.bf16.mxu0 %v10529_v53  ;;  %v10592_v46 = vld [vmem:[%s15103_s1 + $0x764] ss:$16 sps:$4 sm:$0xff]   ;;  %v10593_v52 = vld [vmem:[%s15103_s1 + $0x540] ss:$16 sps:$4 sm:$0xff]  }
 0x154   : > { %v2279_v44 = vpop.f32.mrf.mxu1  ;;  %3860 = vmatprep.subr.bf16.mxu1 %v10532_v54  ;;  %v10596_v53 = vld [vmem:[%s15103_s1 + $0x740] ss:$16 sps:$4 sm:$0xff]   ;;  %v10601_v54 = vld [vmem:[%s15103_s1 + $0x524] ss:$16 sps:$4 sm:$0xff]  }
 0x155   : > { %v10604_v56 = vld [vmem:[%s15103_s1 + $0x724] ss:$16 sps:$4 sm:$0xff]   ;;  %v10605_v59 = vld [vmem:[%s15103_s1 + $0x500] ss:$16 sps:$4 sm:$0xff]  }
 0x156   : > { %3820 = vmatpush1.bf16.msra.mxu0 %v10527_v20  ;;  %v10599_v20 = vld [vmem:[%s15103_s1 + $0x520] ss:$16 sps:$4 sm:$0xff]   ;;  %v10607_v4 = vld [vmem:[%s15103_s1 + $0x504] ss:$16 sps:$4 sm:$0xff]  }
 0x157   : > { %3861 = vmatpush1.bf16.msra.mxu1 %v10530_v1  ;;  %3821 = vmatprep.subr.bf16.mxu0 %v10535_v60  ;;  %v10602_v1 = vld [vmem:[%s15103_s1 + $0x720] ss:$16 sps:$4 sm:$0xff]   ;;  %v10610_v57 = vld [vmem:[%s15103_s1 + $0x704] ss:$16 sps:$4 sm:$0xff]   ;;  %v10613_v60 = vld [vmem:[%s15103_s1 + $0xec] ss:$16 sps:$4 sm:$0xff]  }
 0x158   : > { %3862 = vmatprep.subr.bf16.mxu1 %v10538_v62  ;;  %v10608_v44 = vld [vmem:[%s15103_s1 + $0x700] ss:$16 sps:$4 sm:$0xff]   ;;  %v10616_v62 = vld [vmem:[%s15103_s1 + $0x2ec] ss:$16 sps:$4 sm:$0xff]  }
 0x15a   : > { %3822 = vmatpush1.bf16.msra.mxu0 %v10533_v63  ;;  %v10611_v63 = vld [vmem:[%s15103_s1 + $0xe8] ss:$16 sps:$4 sm:$0xff]  }
 0x15b   : > { %3863 = vmatpush1.bf16.msra.mxu1 %v10536_v0  ;;  %3823 = vmatprep.subr.bf16.mxu0 %v10541_v5  ;;  %v10614_v0 = vld [vmem:[%s15103_s1 + $0x2e8] ss:$16 sps:$4 sm:$0xff]   ;;  %v10619_v5 = vld [vmem:[%s15103_s1 + $0xcc] ss:$16 sps:$4 sm:$0xff]  }
 0x15c   : > { %3864 = vmatprep.subr.bf16.mxu1 %v10544_v6  ;;  %v10622_v6 = vld [vmem:[%s15103_s1 + $0x2cc] ss:$16 sps:$4 sm:$0xff]  }
 0x15e   : > { %3824 = vmatpush1.bf16.msra.mxu0 %v10539_v7  ;;  %v10617_v7 = vld [vmem:[%s15103_s1 + $0xc8] ss:$16 sps:$4 sm:$0xff]  }
 0x15f   : > { %3865 = vmatpush1.bf16.msra.mxu1 %v10542_v22  ;;  %3825 = vmatprep.subr.bf16.mxu0 %v10547_v23  ;;  %v10620_v22 = vld [vmem:[%s15103_s1 + $0x2c8] ss:$16 sps:$4 sm:$0xff]  }
 0x160   : > { %3866 = vmatprep.subr.bf16.mxu1 %v10550_v8 }
 0x162   : > { %3826 = vmatpush1.bf16.msra.mxu0 %v10545_v9 }
 0x163   : > { %3867 = vmatpush1.bf16.msra.mxu1 %v10548_v28  ;;  %3827 = vmatprep.subr.bf16.mxu0 %v10553_v29 }
 0x164   : > { %3868 = vmatprep.subr.bf16.mxu1 %v10556_v11  ;;  %v10625_v11 = vld [vmem:[%s15103_s1 + $0xac] ss:$16 sps:$4 sm:$0xff]  }
 0x166   : > { %3828 = vmatpush1.bf16.msra.mxu0 %v10551_v12  ;;  %v10628_v12 = vld [vmem:[%s15103_s1 + $0x2ac] ss:$16 sps:$4 sm:$0xff]  }
 0x167   : > { %3869 = vmatpush1.bf16.msra.mxu1 %v10554_v13  ;;  %3829 = vmatprep.subr.bf16.mxu0 %v10559_v14  ;;  %v10623_v14 = vld [vmem:[%s15103_s1 + $0xa8] ss:$16 sps:$4 sm:$0xff]  }
 0x168   : > { %3870 = vmatprep.subr.bf16.mxu1 %v10562_v17  ;;  %v10626_v17 = vld [vmem:[%s15103_s1 + $0x2a8] ss:$16 sps:$4 sm:$0xff]  }
 0x16a   : > { %3830 = vmatpush1.bf16.msra.mxu0 %v10557_v18 }
 0x16b   : > { %3871 = vmatpush1.bf16.msra.mxu1 %v10560_v19  ;;  %3831 = vmatprep.subr.bf16.mxu0 %v10565_v24 }
 0x16c   : > { %3872 = vmatprep.subr.bf16.mxu1 %v10568_v25 }
 0x16e   : > { %3832 = vmatpush2.bf16.msra.mxu0 %v10563_v26  ;;  %v10631_v26 = vld [vmem:[%s15103_s1 + $0x8c] ss:$16 sps:$4 sm:$0xff]  }
 0x16f   : > { %3873 = vmatpush2.bf16.msra.mxu1 %v10566_v42  ;;  %3833 = vmatprep.subr.bf16.mxu0 %v10571_v27  ;;  %v10634_v42 = vld [vmem:[%s15103_s1 + $0x28c] ss:$16 sps:$4 sm:$0xff]  }
 0x170   : > { %3874 = vmatprep.subr.bf16.mxu1 %v10574_v30  ;;  %v10637_v27 = vld [vmem:[%s15103_s1 + $0x6c] ss:$16 sps:$4 sm:$0xff]  }
 0x171   : > { %v10640_v30 = vld [vmem:[%s15103_s1 + $0x26c] ss:$16 sps:$4 sm:$0xff]  }
 0x172   : > { %3834 = vmatpush2.bf16.msra.mxu0 %v10569_v31  ;;  %v10635_v31 = vld [vmem:[%s15103_s1 + $0x68] ss:$16 sps:$4 sm:$0xff]  }
 0x173   : > { %3875 = vmatpush2.bf16.msra.mxu1 %v10572_v32  ;;  %3835 = vmatprep.subr.bf16.mxu0 %v10577_v34  ;;  %v10638_v32 = vld [vmem:[%s15103_s1 + $0x268] ss:$16 sps:$4 sm:$0xff]   ;;  %v10643_v34 = vld [vmem:[%s15103_s1 + $0x4c] ss:$16 sps:$4 sm:$0xff]  }
 0x174   : > { %3876 = vmatprep.subr.bf16.mxu1 %v10580_v35  ;;  %v10646_v35 = vld [vmem:[%s15103_s1 + $0x24c] ss:$16 sps:$4 sm:$0xff]  }
 0x176   : > { %3836 = vmatpush2.bf16.msra.mxu0 %v10575_v36  ;;  %v10641_v36 = vld [vmem:[%s15103_s1 + $0x48] ss:$16 sps:$4 sm:$0xff]  }
 0x177   : > { %3877 = vmatpush2.bf16.msra.mxu1 %v10578_v3  ;;  %3837 = vmatprep.subr.bf16.mxu0 %v10583_v38  ;;  %v10644_v3 = vld [vmem:[%s15103_s1 + $0x248] ss:$16 sps:$4 sm:$0xff]   ;;  %v10649_v38 = vld [vmem:[%s15103_s1 + $0x2c] ss:$16 sps:$4 sm:$0xff]  }
 0x178   : > { %3878 = vmatprep.subr.bf16.mxu1 %v10586_v39  ;;  %v10652_v39 = vld [vmem:[%s15103_s1 + $0x22c] ss:$16 sps:$4 sm:$0xff]  }
 0x17a   : > { %3838 = vmatpush2.bf16.msra.mxu0 %v10581_v40  ;;  %v10647_v40 = vld [vmem:[%s15103_s1 + $0x28] ss:$16 sps:$4 sm:$0xff]  }
 0x17b   : > { %3879 = vmatpush2.bf16.msra.mxu1 %v10584_v41  ;;  %3839 = vmatprep.subr.bf16.mxu0 %v10589_v45  ;;  %v10650_v41 = vld [vmem:[%s15103_s1 + $0x228] ss:$16 sps:$4 sm:$0xff]   ;;  %v10655_v45 = vld [vmem:[%s15103_s1 + $0xc] ss:$16 sps:$4 sm:$0xff]  }
 0x17c   : > { %3880 = vmatprep.subr.bf16.mxu1 %v10592_v46  ;;  %v10658_v46 = vld [vmem:[%s15103_s1 + $0x20c] ss:$16 sps:$4 sm:$0xff]  }
 0x17e   : > { %3840 = vmatpush2.bf16.msra.mxu0 %v10587_v47  ;;  %v10653_v47 = vld [vmem:[%s15103_s1 + $0x8] ss:$16 sps:$4 sm:$0xff]  }
 0x17f   : > { %3881 = vmatpush2.bf16.msra.mxu1 %v10590_v48  ;;  %3841 = vmatprep.subr.bf16.mxu0 %v10595_v50  ;;  %v10656_v48 = vld [vmem:[%s15103_s1 + $0x208] ss:$16 sps:$4 sm:$0xff]   ;;  %v10661_v50 = vld [vmem:[%s15103_s1 + $0x1ec] ss:$16 sps:$4 sm:$0xff]  }
 0x180   : > { %3882 = vmatprep.subr.bf16.mxu1 %v10598_v51  ;;  %v10664_v51 = vld [vmem:[%s15103_s1 + $0x3ec] ss:$16 sps:$4 sm:$0xff]  }
 0x182   : > { %3842 = vmatpush2.bf16.msra.mxu0 %v10593_v52  ;;  %v10659_v52 = vld [vmem:[%s15103_s1 + $0x1e8] ss:$16 sps:$4 sm:$0xff]  }
 0x183   : > { %3883 = vmatpush2.bf16.msra.mxu1 %v10596_v53  ;;  %3843 = vmatprep.subr.bf16.mxu0 %v10601_v54  ;;  %v10662_v53 = vld [vmem:[%s15103_s1 + $0x3e8] ss:$16 sps:$4 sm:$0xff]   ;;  %v10667_v54 = vld [vmem:[%s15103_s1 + $0x1cc] ss:$16 sps:$4 sm:$0xff]  }
 0x184   : > { %3884 = vmatprep.subr.bf16.mxu1 %v10604_v56  ;;  %v10670_v56 = vld [vmem:[%s15103_s1 + $0x3cc] ss:$16 sps:$4 sm:$0xff]  }
 0x186   : > { %3844 = vmatpush2.bf16.msra.mxu0 %v10599_v20  ;;  %v10665_v20 = vld [vmem:[%s15103_s1 + $0x1c8] ss:$16 sps:$4 sm:$0xff]  }
 0x187   : > { %3885 = vmatpush2.bf16.msra.mxu1 %v10602_v1  ;;  %3845 = vmatprep.subr.bf16.mxu0 %v10607_v4  ;;  %v10668_v1 = vld [vmem:[%s15103_s1 + $0x3c8] ss:$16 sps:$4 sm:$0xff]   ;;  %v10673_v4 = vld [vmem:[%s15103_s1 + $0x1ac] ss:$16 sps:$4 sm:$0xff]  }
 0x188   : > { %3886 = vmatprep.subr.bf16.mxu1 %v10610_v57  ;;  %v10676_v57 = vld [vmem:[%s15103_s1 + $0x3ac] ss:$16 sps:$4 sm:$0xff]  }
 0x18a   : > { %3846 = vmatpush2.bf16.msra.mxu0 %v10605_v59  ;;  %v10671_v59 = vld [vmem:[%s15103_s1 + $0x1a8] ss:$16 sps:$4 sm:$0xff]  }
 0x18b   : > { %3887 = vmatpush2.bf16.msra.mxu1 %v10608_v44  ;;  %3897 = vmatprep.subr.bf16.mxu0 %v10613_v60  ;;  %v10674_v44 = vld [vmem:[%s15103_s1 + $0x3a8] ss:$16 sps:$4 sm:$0xff]   ;;  %v10679_v60 = vld [vmem:[%s15103_s1 + $0x18c] ss:$16 sps:$4 sm:$0xff]  }
 0x18c   : > { %3938 = vmatprep.subr.bf16.mxu1 %v10616_v62  ;;  %v10682_v62 = vld [vmem:[%s15103_s1 + $0x38c] ss:$16 sps:$4 sm:$0xff]  }
 0x18d   : > { %v2315_v23 = vpop.f32.mrf.mxu0  ;;  %3848 = vmatmul.mubr.bf16.vlgmr.msra.gmra.mxu0 %v12072_v33 }
 0x18e   : > { %v2356_v8 = vpop.f32.mrf.mxu1  ;;  %3889 = vmatmul.mubr.bf16.vlgmr.msra.gmra.mxu1 %v12088_v37  ;;  %3898 = vmatpush1.bf16.msra.mxu0 %v10611_v63  ;;  %v10677_v63 = vld [vmem:[%s15103_s1 + $0x188] ss:$16 sps:$4 sm:$0xff]  }
 0x18f   : > { %v12928_v9 = vadd.f32 %v2356_v8, %v2315_v23  ;;  %3939 = vmatpush1.bf16.msra.mxu1 %v10614_v0  ;;  %v2317_v28 = vpop.f32.mrf.mxu0  ;;  %3899 = vmatprep.subr.bf16.mxu0 %v10619_v5  ;;  %v10680_v0 = vld [vmem:[%s15103_s1 + $0x388] ss:$16 sps:$4 sm:$0xff]   ;;  %v10685_v5 = vld [vmem:[%s15103_s1 + $0x16c] ss:$16 sps:$4 sm:$0xff]  }
 0x190   : > { %v2358_v29 = vpop.f32.mrf.mxu1  ;;  %3940 = vmatprep.subr.bf16.mxu1 %v10622_v6  ;;  %3929 = vmatprep.mubr.bf16.mxu0 %v11814_v61  ;;  %v10629_v61 = vld [vmem:[%s15103_s1 + $0x88] ss:$16 sps:$4 sm:$0xff]   ;;  %v10688_v6 = vld [vmem:[%s15103_s1 + $0x36c] ss:$16 sps:$4 sm:$0xff]  }
 0x191   : > { %v12936_v13 = vadd.f32 %v2358_v29, %v2317_v28  ;;  %3970 = vmatprep.mubr.bf16.mxu1 %v11828_v2  ;;  %v2319_v18 = vpop.f32.mrf.mxu0  ;;  %v10632_v2 = vld [vmem:[%s15103_s1 + $0x288] ss:$16 sps:$4 sm:$0xff]   ;;  %v10691_v23 = vld [vmem:[%s15103_s1 + $0x14c] ss:$16 sps:$4 sm:$0xff]  }
 0x192   : > { %v2360_v19 = vpop.f32.mrf.mxu1  ;;  %3900 = vmatpush1.bf16.msra.mxu0 %v10617_v7  ;;  %v10683_v7 = vld [vmem:[%s15103_s1 + $0x168] ss:$16 sps:$4 sm:$0xff]   ;;  %v10694_v8 = vld [vmem:[%s15103_s1 + $0x34c] ss:$16 sps:$4 sm:$0xff]  }
 0x193   : > { %3941 = vmatpush1.bf16.msra.mxu1 %v10620_v22  ;;  %v2320_v24 = vpop.f32.mrf.mxu0  ;;  %3901 = vmatprep.subr.bf16.mxu0 %v10625_v11  ;;  %v10686_v22 = vld [vmem:[%s15103_s1 + $0x368] ss:$16 sps:$4 sm:$0xff]   ;;  %v10697_v11 = vld [vmem:[%s15103_s1 + $0x12c] ss:$16 sps:$4 sm:$0xff]  }
 0x194   : > { %v2361_v25 = vpop.f32.mrf.mxu1  ;;  %3942 = vmatprep.subr.bf16.mxu1 %v10628_v12  ;;  %v10689_v28 = vld [vmem:[%s15103_s1 + $0x148] ss:$16 sps:$4 sm:$0xff]   ;;  %v10700_v12 = vld [vmem:[%s15103_s1 + $0x32c] ss:$16 sps:$4 sm:$0xff]  }
 0x195   : > { %v10692_v29 = vld [vmem:[%s15103_s1 + $0x348] ss:$16 sps:$4 sm:$0xff]   ;;  %v10703_v18 = vld [vmem:[%s15103_s1 + $0x10c] ss:$16 sps:$4 sm:$0xff]  }
 0x196   : > { %3902 = vmatpush1.bf16.msra.mxu0 %v10623_v14  ;;  %v10695_v14 = vld [vmem:[%s15103_s1 + $0x128] ss:$16 sps:$4 sm:$0xff]   ;;  %v10706_v19 = vld [vmem:[%s15103_s1 + $0x30c] ss:$16 sps:$4 sm:$0xff]  }
 0x197   : > { %3943 = vmatpush1.bf16.msra.mxu1 %v10626_v17  ;;  %3903 = vmatprep.subr.bf16.mxu0 %v10631_v26  ;;  %v10698_v17 = vld [vmem:[%s15103_s1 + $0x328] ss:$16 sps:$4 sm:$0xff]   ;;  %v10709_v26 = vld [vmem:[%s15103_s1 + $0x4ec] ss:$16 sps:$4 sm:$0xff]  }
 0x198   : > { %3944 = vmatprep.subr.bf16.mxu1 %v10634_v42  ;;  %v10701_v24 = vld [vmem:[%s15103_s1 + $0x108] ss:$16 sps:$4 sm:$0xff]   ;;  %v10712_v42 = vld [vmem:[%s15103_s1 + $0x6ec] ss:$16 sps:$4 sm:$0xff]  }
 0x199   : > { %v10704_v25 = vld [vmem:[%s15103_s1 + $0x308] ss:$16 sps:$4 sm:$0xff]  }
 0x19a   : > { %3904 = vmatpush1.bf16.msra.mxu0 %v10629_v61  ;;  %v10707_v61 = vld [vmem:[%s15103_s1 + $0x4e8] ss:$16 sps:$4 sm:$0xff]  }
 0x19b   : > { %3945 = vmatpush1.bf16.msra.mxu1 %v10632_v2  ;;  %3905 = vmatprep.subr.bf16.mxu0 %v10637_v27  ;;  %v10710_v2 = vld [vmem:[%s15103_s1 + $0x6e8] ss:$16 sps:$4 sm:$0xff]   ;;  %v10715_v27 = vld [vmem:[%s15103_s1 + $0x4cc] ss:$16 sps:$4 sm:$0xff]  }
 0x19c   : > { %3946 = vmatprep.subr.bf16.mxu1 %v10640_v30  ;;  %v10718_v30 = vld [vmem:[%s15103_s1 + $0x6cc] ss:$16 sps:$4 sm:$0xff]  }
 0x19e   : > { %3906 = vmatpush1.bf16.msra.mxu0 %v10635_v31  ;;  %v10713_v31 = vld [vmem:[%s15103_s1 + $0x4c8] ss:$16 sps:$4 sm:$0xff]  }
 0x19f   : > { %3947 = vmatpush1.bf16.msra.mxu1 %v10638_v32  ;;  %3907 = vmatprep.subr.bf16.mxu0 %v10643_v34  ;;  %v10716_v32 = vld [vmem:[%s15103_s1 + $0x6c8] ss:$16 sps:$4 sm:$0xff]  }
 0x1a0   : > { %3948 = vmatprep.subr.bf16.mxu1 %v10646_v35 }
 0x1a2   : > { %3908 = vmatpush1.bf16.msra.mxu0 %v10641_v36 }
 0x1a3   : > { %3949 = vmatpush1.bf16.msra.mxu1 %v10644_v3  ;;  %3909 = vmatprep.subr.bf16.mxu0 %v10649_v38 }
 0x1a4   : > { %3950 = vmatprep.subr.bf16.mxu1 %v10652_v39  ;;  %v10721_v39 = vld [vmem:[%s15103_s1 + $0x4ac] ss:$16 sps:$4 sm:$0xff]  }
 0x1a6   : > { %3910 = vmatpush1.bf16.msra.mxu0 %v10647_v40  ;;  %v10724_v40 = vld [vmem:[%s15103_s1 + $0x6ac] ss:$16 sps:$4 sm:$0xff]  }
 0x1a7   : > { %3951 = vmatpush1.bf16.msra.mxu1 %v10650_v41  ;;  %3911 = vmatprep.subr.bf16.mxu0 %v10655_v45 }
 0x1a8   : > { %3952 = vmatprep.subr.bf16.mxu1 %v10658_v46 }
 0x1aa   : > { %3912 = vmatpush1.bf16.msra.mxu0 %v10653_v47 }
 0x1ab   : > { %3953 = vmatpush1.bf16.msra.mxu1 %v10656_v48  ;;  %3913 = vmatprep.subr.bf16.mxu0 %v10661_v50  ;;  %v10727_v50 = vld [vmem:[%s15103_s1 + $0x48c] ss:$16 sps:$4 sm:$0xff]  }
 0x1ac   : > { %3954 = vmatprep.subr.bf16.mxu1 %v10664_v51  ;;  %v10728_v51 = vld [vmem:[%s15103_s1 + $0x688] ss:$16 sps:$4 sm:$0xff]  }
 0x1ae   : > { %3914 = vmatpush2.bf16.msra.mxu0 %v10659_v52  ;;  %v10733_v52 = vld [vmem:[%s15103_s1 + $0x46c] ss:$16 sps:$4 sm:$0xff]  }
 0x1af   : > { %3955 = vmatpush2.bf16.msra.mxu1 %v10662_v53  ;;  %3915 = vmatprep.subr.bf16.mxu0 %v10667_v54  ;;  %v10736_v53 = vld [vmem:[%s15103_s1 + $0x66c] ss:$16 sps:$4 sm:$0xff]   ;;  %v10731_v54 = vld [vmem:[%s15103_s1 + $0x468] ss:$16 sps:$4 sm:$0xff]  }
 0x1b0   : > { %3956 = vmatprep.subr.bf16.mxu1 %v10670_v56  ;;  %v10734_v56 = vld [vmem:[%s15103_s1 + $0x668] ss:$16 sps:$4 sm:$0xff]  }
 0x1b2   : > { %3916 = vmatpush2.bf16.msra.mxu0 %v10665_v20  ;;  %v10739_v20 = vld [vmem:[%s15103_s1 + $0x44c] ss:$16 sps:$4 sm:$0xff]  }
 0x1b3   : > { %3957 = vmatpush2.bf16.msra.mxu1 %v10668_v1  ;;  %3917 = vmatprep.subr.bf16.mxu0 %v10673_v4  ;;  %v10742_v1 = vld [vmem:[%s15103_s1 + $0x64c] ss:$16 sps:$4 sm:$0xff]   ;;  %v10737_v4 = vld [vmem:[%s15103_s1 + $0x448] ss:$16 sps:$4 sm:$0xff]  }
 0x1b4   : > { %3958 = vmatprep.subr.bf16.mxu1 %v10676_v57  ;;  %v10740_v57 = vld [vmem:[%s15103_s1 + $0x648] ss:$16 sps:$4 sm:$0xff]  }
 0x1b6   : > { %3918 = vmatpush2.bf16.msra.mxu0 %v10671_v59  ;;  %v10745_v59 = vld [vmem:[%s15103_s1 + $0x42c] ss:$16 sps:$4 sm:$0xff]  }
 0x1b7   : > { %3959 = vmatpush2.bf16.msra.mxu1 %v10674_v44  ;;  %3919 = vmatprep.subr.bf16.mxu0 %v10679_v60  ;;  %v10748_v44 = vld [vmem:[%s15103_s1 + $0x62c] ss:$16 sps:$4 sm:$0xff]   ;;  %v10743_v60 = vld [vmem:[%s15103_s1 + $0x428] ss:$16 sps:$4 sm:$0xff]  }
 0x1b8   : > { %3960 = vmatprep.subr.bf16.mxu1 %v10682_v62  ;;  %v10746_v62 = vld [vmem:[%s15103_s1 + $0x628] ss:$16 sps:$4 sm:$0xff]  }
 0x1ba   : > { %3920 = vmatpush2.bf16.msra.mxu0 %v10677_v63  ;;  %v10751_v63 = vld [vmem:[%s15103_s1 + $0x40c] ss:$16 sps:$4 sm:$0xff]  }
 0x1bb   : > { %3961 = vmatpush2.bf16.msra.mxu1 %v10680_v0  ;;  %3921 = vmatprep.subr.bf16.mxu0 %v10685_v5  ;;  %v10754_v0 = vld [vmem:[%s15103_s1 + $0x60c] ss:$16 sps:$4 sm:$0xff]   ;;  %v10749_v5 = vld [vmem:[%s15103_s1 + $0x408] ss:$16 sps:$4 sm:$0xff]  }
 0x1bc   : > { %3962 = vmatprep.subr.bf16.mxu1 %v10688_v6  ;;  %v10752_v6 = vld [vmem:[%s15103_s1 + $0x608] ss:$16 sps:$4 sm:$0xff]  }
 0x1be   : > { %3922 = vmatpush2.bf16.msra.mxu0 %v10683_v7  ;;  %v10757_v7 = vld [vmem:[%s15103_s1 + $0x5ec] ss:$16 sps:$4 sm:$0xff]  }
 0x1bf   : > { %3963 = vmatpush2.bf16.msra.mxu1 %v10686_v22  ;;  %3923 = vmatprep.subr.bf16.mxu0 %v10691_v23  ;;  %v10760_v22 = vld [vmem:[%s15103_s1 + $0x7ec] ss:$16 sps:$4 sm:$0xff]   ;;  %v10755_v23 = vld [vmem:[%s15103_s1 + $0x5e8] ss:$16 sps:$4 sm:$0xff]  }
 0x1c0   : > { %3964 = vmatprep.subr.bf16.mxu1 %v10694_v8  ;;  %v10758_v8 = vld [vmem:[%s15103_s1 + $0x7e8] ss:$16 sps:$4 sm:$0xff]  }
 0x1c2   : > { %3924 = vmatpush2.bf16.msra.mxu0 %v10689_v28  ;;  %v10763_v28 = vld [vmem:[%s15103_s1 + $0x5cc] ss:$16 sps:$4 sm:$0xff]  }
 0x1c3   : > { %3965 = vmatpush2.bf16.msra.mxu1 %v10692_v29  ;;  %3925 = vmatprep.subr.bf16.mxu0 %v10697_v11  ;;  %v10766_v29 = vld [vmem:[%s15103_s1 + $0x7cc] ss:$16 sps:$4 sm:$0xff]   ;;  %v10761_v11 = vld [vmem:[%s15103_s1 + $0x5c8] ss:$16 sps:$4 sm:$0xff]  }
 0x1c4   : > { %3966 = vmatprep.subr.bf16.mxu1 %v10700_v12  ;;  %v10764_v12 = vld [vmem:[%s15103_s1 + $0x7c8] ss:$16 sps:$4 sm:$0xff]  }
 0x1c6   : > { %3926 = vmatpush2.bf16.msra.mxu0 %v10695_v14  ;;  %v10769_v14 = vld [vmem:[%s15103_s1 + $0x5ac] ss:$16 sps:$4 sm:$0xff]  }
 0x1c7   : > { %3967 = vmatpush2.bf16.msra.mxu1 %v10698_v17  ;;  %3927 = vmatprep.subr.bf16.mxu0 %v10703_v18  ;;  %v10772_v17 = vld [vmem:[%s15103_s1 + $0x7ac] ss:$16 sps:$4 sm:$0xff]   ;;  %v10767_v18 = vld [vmem:[%s15103_s1 + $0x5a8] ss:$16 sps:$4 sm:$0xff]  }
 0x1c8   : > { %3968 = vmatprep.subr.bf16.mxu1 %v10706_v19  ;;  %v10770_v19 = vld [vmem:[%s15103_s1 + $0x7a8] ss:$16 sps:$4 sm:$0xff]  }
 0x1ca   : > { %3928 = vmatpush2.bf16.msra.mxu0 %v10701_v24  ;;  %v10775_v24 = vld [vmem:[%s15103_s1 + $0x58c] ss:$16 sps:$4 sm:$0xff]  }
 0x1cb   : > { %3969 = vmatpush2.bf16.msra.mxu1 %v10704_v25  ;;  %3979 = vmatprep.subr.bf16.mxu0 %v10709_v26  ;;  %v10778_v25 = vld [vmem:[%s15103_s1 + $0x78c] ss:$16 sps:$4 sm:$0xff]   ;;  %v10773_v26 = vld [vmem:[%s15103_s1 + $0x588] ss:$16 sps:$4 sm:$0xff]  }
 0x1cc   : > { %4020 = vmatprep.subr.bf16.mxu1 %v10712_v42  ;;  %v10776_v42 = vld [vmem:[%s15103_s1 + $0x788] ss:$16 sps:$4 sm:$0xff]  }
 0x1cd   : > { %v2397_v34 = vpop.f32.mrf.mxu0  ;;  %3930 = vmatmul.mubr.bf16.vlgmr.msra.gmra.mxu0 %v11853_v10 }
 0x1ce   : > { %v2438_v35 = vpop.f32.mrf.mxu1  ;;  %3971 = vmatmul.mubr.bf16.vlgmr.msra.gmra.mxu1 %v11872_v16  ;;  %v2398_v36 = vadd.f32 %v2397_v34, %v12928_v9  ;;  %3980 = vmatpush1.bf16.msra.mxu0 %v10707_v61  ;;  %v10719_v16 = vld [vmem:[%s15103_s1 + $0x4a8] ss:$16 sps:$4 sm:$0xff]   ;;  %v10781_v61 = vld [vmem:[%s15103_s1 + $0x56c] ss:$16 sps:$4 sm:$0xff]  }
 0x1cf   : > { %4021 = vmatpush1.bf16.msra.mxu1 %v10710_v2  ;;  %v2399_v3 = vpop.f32.mrf.mxu0  ;;  %3981 = vmatprep.subr.bf16.mxu0 %v10715_v27  ;;  %v10722_v9 = vld [vmem:[%s15103_s1 + $0x6a8] ss:$16 sps:$4 sm:$0xff]   ;;  %v10784_v2 = vld [vmem:[%s15103_s1 + $0x76c] ss:$16 sps:$4 sm:$0xff]  }
 0x1d0   : > { %v2440_v38 = vpop.f32.mrf.mxu1  ;;  %4022 = vmatprep.subr.bf16.mxu1 %v10718_v30  ;;  %v13135_v41 = vadd.f32 %v2438_v35, %v2398_v36  ;;  %v2400_v10 = vadd.f32 %v2399_v3, %v12936_v13  ;;  %4011 = vmatprep.mubr.bf16.mxu0 %v11868_v15  ;;  %v10730_v15 = vld [vmem:[%s15103_s1 + $0x68c] ss:$16 sps:$4 sm:$0xff]   ;;  %v10779_v27 = vld [vmem:[%s15103_s1 + $0x568] ss:$16 sps:$4 sm:$0xff]  }
 0x1d1   : > { %4052 = vmatprep.mubr.bf16.mxu1 %v11888_v21  ;;  %v2401_v45 = vpop.f32.mrf.mxu0  ;;  %v10725_v21 = vld [vmem:[%s15103_s1 + $0x488] ss:$16 sps:$4 sm:$0xff]   ;;  %v10793_v3 = vld [vmem:[%s15103_s1 + $0x52c] ss:$16 sps:$4 sm:$0xff]  }
 0x1d2   : > { %v2442_v46 = vpop.f32.mrf.mxu1  ;;  %v13146_v47 = vadd.f32 %v2440_v38, %v2400_v10  ;;  %3982 = vmatpush1.bf16.msra.mxu0 %v10713_v31  ;;  %v10782_v30 = vld [vmem:[%s15103_s1 + $0x768] ss:$16 sps:$4 sm:$0xff]   ;;  %v10787_v31 = vld [vmem:[%s15103_s1 + $0x54c] ss:$16 sps:$4 sm:$0xff]  }
 0x1d3   : > { %4023 = vmatpush1.bf16.msra.mxu1 %v10716_v32  ;;  %v2402_v48 = vpop.f32.mrf.mxu0  ;;  %3983 = vmatprep.subr.bf16.mxu0 %v10721_v39  ;;  %v10790_v32 = vld [vmem:[%s15103_s1 + $0x74c] ss:$16 sps:$4 sm:$0xff]   ;;  %v10785_v35 = vld [vmem:[%s15103_s1 + $0x548] ss:$16 sps:$4 sm:$0xff]  }
 0x1d4   : > { %v2443_v13 = vpop.f32.mrf.mxu1  ;;  %4024 = vmatprep.subr.bf16.mxu1 %v10724_v40  ;;  %v13275_v34 = vld [vmem:[%s11785_s22 + $0x8] sm:$0xff] }
 0x1d5   : > { %v10788_v36 = vld [vmem:[%s15103_s1 + $0x748] ss:$16 sps:$4 sm:$0xff]   ;;  %v10796_v38 = vld [vmem:[%s15103_s1 + $0x72c] ss:$16 sps:$4 sm:$0xff]   ;;  %v13291_v39 = vrot.slane %v13275_v34, %v11788_v49  ;;  %v10805_v13 = vld [vmem:[%s15103_s1 + $0x10e4] ss:$16 sps:$4 sm:$0xff]  }
 0x1d6   : > { %3984 = vmatpush1.bf16.msra.mxu0 %v10719_v16  ;;  %v10791_v40 = vld [vmem:[%s15103_s1 + $0x528] ss:$16 sps:$4 sm:$0xff]   ;;  %v10799_v16 = vld [vmem:[%s15103_s1 + $0x50c] ss:$16 sps:$4 sm:$0xff]  }
 0x1d7   : > { %4025 = vmatpush1.bf16.msra.mxu1 %v10722_v9  ;;  %3985 = vmatprep.subr.bf16.mxu0 %v10727_v50  ;;  %v10794_v10 = vld [vmem:[%s15103_s1 + $0x728] ss:$16 sps:$4 sm:$0xff]   ;;  %v10802_v9 = vld [vmem:[%s15103_s1 + $0x70c] ss:$16 sps:$4 sm:$0xff]   ;;  %v4338_v45 = vcombine.high %v13291_v39, %v13291_v39  ;;  %v10808_v50 = vld [vmem:[%s15103_s1 + $0x12e4] ss:$16 sps:$4 sm:$0xff]  }
 0x1d8   : > { %4026 = vmatprep.subr.bf16.mxu1 %v10730_v15  ;;  %v10797_v46 = vld [vmem:[%s15103_s1 + $0x508] ss:$16 sps:$4 sm:$0xff]   ;;  %v10803_v15 = vld [vmem:[%s15103_s1 + $0x10e0] ss:$16 sps:$4 sm:$0xff]  }
 0x1d9   : > { %v10800_v48 = vld [vmem:[%s15103_s1 + $0x708] ss:$16 sps:$4 sm:$0xff]  }
 0x1da   : > { %3986 = vmatpush1.bf16.msra.mxu0 %v10725_v21  ;;  %v10806_v21 = vld [vmem:[%s15103_s1 + $0x12e0] ss:$16 sps:$4 sm:$0xff]  }
 0x1db   : > { %4027 = vmatpush1.bf16.msra.mxu1 %v10728_v51  ;;  %3987 = vmatprep.subr.bf16.mxu0 %v10733_v52  ;;  %v13326_v51 = vrot.slane %v4338_v45, %v11788_v49  ;;  %v10811_v52 = vld [vmem:[%s15103_s1 + $0x10c4] ss:$16 sps:$4 sm:$0xff]  }
 0x1dc   : > { %4028 = vmatprep.subr.bf16.mxu1 %v10736_v53  ;;  %v10814_v53 = vld [vmem:[%s15103_s1 + $0x12c4] ss:$16 sps:$4 sm:$0xff]  }
 0x1dd   : > { %v10868_v45 = vld [vmem:[%s15103_s1 + $0x13a4] ss:$16 sps:$4 sm:$0xff]  }
 0x1de   : > { %3988 = vmatpush1.bf16.msra.mxu0 %v10731_v54  ;;  %v10809_v54 = vld [vmem:[%s15103_s1 + $0x10c0] ss:$16 sps:$4 sm:$0xff]  }
 0x1df   : > { %4029 = vmatpush1.bf16.msra.mxu1 %v10734_v56  ;;  %3989 = vmatprep.subr.bf16.mxu0 %v10739_v20  ;;  %v10812_v56 = vld [vmem:[%s15103_s1 + $0x12c0] ss:$16 sps:$4 sm:$0xff]   ;;  %v13342_v20 = vcombine.high %v13326_v51, %v13326_v51 }
 0x1e0   : > { %4030 = vmatprep.subr.bf16.mxu1 %v10742_v1 }
 0x1e2   : > { %3990 = vmatpush1.bf16.msra.mxu0 %v10737_v4 }
 0x1e3   : > { %4031 = vmatpush1.bf16.msra.mxu1 %v10740_v57  ;;  %3991 = vmatprep.subr.bf16.mxu0 %v10745_v59 }
 0x1e4   : > { %4032 = vmatprep.subr.bf16.mxu1 %v10748_v44 }
 0x1e6   : > { %3992 = vmatpush1.bf16.msra.mxu0 %v10743_v60  ;;  %v10817_v60 = vld [vmem:[%s15103_s1 + $0x10a4] ss:$16 sps:$4 sm:$0xff]  }
 0x1e7   : > { %4033 = vmatpush1.bf16.msra.mxu1 %v10746_v62  ;;  %3993 = vmatprep.subr.bf16.mxu0 %v10751_v63  ;;  %v10820_v62 = vld [vmem:[%s15103_s1 + $0x12a4] ss:$16 sps:$4 sm:$0xff]  }
 0x1e8   : > { %4034 = vmatprep.subr.bf16.mxu1 %v10754_v0 }
 0x1ea   : > { %3994 = vmatpush1.bf16.msra.mxu0 %v10749_v5 }
 0x1eb   : > { %4035 = vmatpush1.bf16.msra.mxu1 %v10752_v6  ;;  %3995 = vmatprep.subr.bf16.mxu0 %v10757_v7 }
 0x1ec   : > { %4036 = vmatprep.subr.bf16.mxu1 %v10760_v22  ;;  %v10823_v22 = vld [vmem:[%s15103_s1 + $0x1084] ss:$16 sps:$4 sm:$0xff]  }
 0x1ee   : > { %3996 = vmatpush2.bf16.msra.mxu0 %v10755_v23  ;;  %v10826_v23 = vld [vmem:[%s15103_s1 + $0x1284] ss:$16 sps:$4 sm:$0xff]  }
 0x1ef   : > { %4037 = vmatpush2.bf16.msra.mxu1 %v10758_v8  ;;  %3997 = vmatprep.subr.bf16.mxu0 %v10763_v28  ;;  %v10821_v8 = vld [vmem:[%s15103_s1 + $0x1080] ss:$16 sps:$4 sm:$0xff]  }
 0x1f0   : > { %4038 = vmatprep.subr.bf16.mxu1 %v10766_v29  ;;  %v10824_v28 = vld [vmem:[%s15103_s1 + $0x1280] ss:$16 sps:$4 sm:$0xff]   ;;  %v10829_v29 = vld [vmem:[%s15103_s1 + $0x1064] ss:$16 sps:$4 sm:$0xff]  }
 0x1f2   : > { %3998 = vmatpush2.bf16.msra.mxu0 %v10761_v11  ;;  %v10832_v11 = vld [vmem:[%s15103_s1 + $0x1264] ss:$16 sps:$4 sm:$0xff]  }
 0x1f3   : > { %4039 = vmatpush2.bf16.msra.mxu1 %v10764_v12  ;;  %3999 = vmatprep.subr.bf16.mxu0 %v10769_v14  ;;  %v10827_v12 = vld [vmem:[%s15103_s1 + $0x1060] ss:$16 sps:$4 sm:$0xff]  }
 0x1f4   : > { %4040 = vmatprep.subr.bf16.mxu1 %v10772_v17  ;;  %v10830_v14 = vld [vmem:[%s15103_s1 + $0x1260] ss:$16 sps:$4 sm:$0xff]   ;;  %v10835_v17 = vld [vmem:[%s15103_s1 + $0x1044] ss:$16 sps:$4 sm:$0xff]  }
 0x1f6   : > { %4000 = vmatpush2.bf16.msra.mxu0 %v10767_v18  ;;  %v10838_v18 = vld [vmem:[%s15103_s1 + $0x1244] ss:$16 sps:$4 sm:$0xff]  }
 0x1f7   : > { %4041 = vmatpush2.bf16.msra.mxu1 %v10770_v19  ;;  %4001 = vmatprep.subr.bf16.mxu0 %v10775_v24  ;;  %v10833_v19 = vld [vmem:[%s15103_s1 + $0x1040] ss:$16 sps:$4 sm:$0xff]  }
 0x1f8   : > { %4042 = vmatprep.subr.bf16.mxu1 %v10778_v25  ;;  %v10836_v24 = vld [vmem:[%s15103_s1 + $0x1240] ss:$16 sps:$4 sm:$0xff]   ;;  %v10841_v25 = vld [vmem:[%s15103_s1 + $0x1024] ss:$16 sps:$4 sm:$0xff]  }
 0x1fa   : > { %4002 = vmatpush2.bf16.msra.mxu0 %v10773_v26  ;;  %v10844_v26 = vld [vmem:[%s15103_s1 + $0x1224] ss:$16 sps:$4 sm:$0xff]  }
 0x1fb   : > { %4043 = vmatpush2.bf16.msra.mxu1 %v10776_v42  ;;  %4003 = vmatprep.subr.bf16.mxu0 %v10781_v61  ;;  %v10839_v42 = vld [vmem:[%s15103_s1 + $0x1020] ss:$16 sps:$4 sm:$0xff]  }
 0x1fc   : > { %4044 = vmatprep.subr.bf16.mxu1 %v10784_v2  ;;  %v10842_v61 = vld [vmem:[%s15103_s1 + $0x1220] ss:$16 sps:$4 sm:$0xff]   ;;  %v10847_v2 = vld [vmem:[%s15103_s1 + $0x1004] ss:$16 sps:$4 sm:$0xff]  }
 0x1fe   : > { %4004 = vmatpush2.bf16.msra.mxu0 %v10779_v27  ;;  %v10850_v27 = vld [vmem:[%s15103_s1 + $0x1204] ss:$16 sps:$4 sm:$0xff]  }
 0x1ff   : > { %4045 = vmatpush2.bf16.msra.mxu1 %v10782_v30  ;;  %4005 = vmatprep.subr.bf16.mxu0 %v10787_v31  ;;  %v10845_v30 = vld [vmem:[%s15103_s1 + $0x1000] ss:$16 sps:$4 sm:$0xff]  }
 0x200   : > { %4046 = vmatprep.subr.bf16.mxu1 %v10790_v32  ;;  %v10848_v31 = vld [vmem:[%s15103_s1 + $0x1200] ss:$16 sps:$4 sm:$0xff]   ;;  %v10853_v32 = vld [vmem:[%s15103_s1 + $0x11e4] ss:$16 sps:$4 sm:$0xff]  }
 0x202   : > { %4006 = vmatpush2.bf16.msra.mxu0 %v10785_v35  ;;  %v10856_v35 = vld [vmem:[%s15103_s1 + $0x13e4] ss:$16 sps:$4 sm:$0xff]  }
 0x203   : > { %4047 = vmatpush2.bf16.msra.mxu1 %v10788_v36  ;;  %4007 = vmatprep.subr.bf16.mxu0 %v10793_v3  ;;  %v10851_v36 = vld [vmem:[%s15103_s1 + $0x11e0] ss:$16 sps:$4 sm:$0xff]  }
 0x204   : > { %4048 = vmatprep.subr.bf16.mxu1 %v10796_v38  ;;  %v10854_v3 = vld [vmem:[%s15103_s1 + $0x13e0] ss:$16 sps:$4 sm:$0xff]   ;;  %v10859_v38 = vld [vmem:[%s15103_s1 + $0x11c4] ss:$16 sps:$4 sm:$0xff]  }
 0x206   : > { %4008 = vmatpush2.bf16.msra.mxu0 %v10791_v40  ;;  %v10862_v40 = vld [vmem:[%s15103_s1 + $0x13c4] ss:$16 sps:$4 sm:$0xff]  }
 0x207   : > { %4049 = vmatpush2.bf16.msra.mxu1 %v10794_v10  ;;  %4009 = vmatprep.subr.bf16.mxu0 %v10799_v16  ;;  %v10857_v10 = vld [vmem:[%s15103_s1 + $0x11c0] ss:$16 sps:$4 sm:$0xff]  }
 0x208   : > { %4050 = vmatprep.subr.bf16.mxu1 %v10802_v9  ;;  %v10860_v16 = vld [vmem:[%s15103_s1 + $0x13c0] ss:$16 sps:$4 sm:$0xff]   ;;  %v10865_v9 = vld [vmem:[%s15103_s1 + $0x11a4] ss:$16 sps:$4 sm:$0xff]  }
 0x20a   : > { %4010 = vmatpush2.bf16.msra.mxu0 %v10797_v46  ;;  %v10863_v46 = vld [vmem:[%s15103_s1 + $0x11a0] ss:$16 sps:$4 sm:$0xff]  }
 0x20b   : > { %4051 = vmatpush2.bf16.msra.mxu1 %v10800_v48  ;;  %5660 = vmatprep.subr.bf16.mxu0 %v10805_v13  ;;  %v10866_v48 = vld [vmem:[%s15103_s1 + $0x13a0] ss:$16 sps:$4 sm:$0xff]   ;;  %v10871_v13 = vld [vmem:[%s15103_s1 + $0x1184] ss:$16 sps:$4 sm:$0xff]  }
 0x20c   : > { %5701 = vmatprep.subr.bf16.mxu1 %v10808_v50  ;;  %v10874_v50 = vld [vmem:[%s15103_s1 + $0x1384] ss:$16 sps:$4 sm:$0xff]  }
 0x20d   : > { %v3767_v1 = vpop.f32.mrf.mxu0  ;;  %4012 = vmatmul.mubr.bf16.vlgmr.msra.gmra.mxu0 %v12072_v33 }
 0x20e   : > { %v3808_v4 = vpop.f32.mrf.mxu1  ;;  %4053 = vmatmul.mubr.bf16.vlgmr.msra.gmra.mxu1 %v12088_v37  ;;  %v3768_v57 = vadd.f32 %v3767_v1, %v12733_v55  ;;  %5661 = vmatpush1.bf16.msra.mxu0 %v10803_v15  ;;  %v10815_v37 = vld [vmem:[%s15103_s1 + $0x10a0] ss:$16 sps:$4 sm:$0xff]   ;;  %v10883_v1 = vld [vmem:[%s15103_s1 + $0x1144] ss:$16 sps:$4 sm:$0xff]  }
 0x20f   : > { %5702 = vmatpush1.bf16.msra.mxu1 %v10806_v21  ;;  %v3769_v59 = vpop.f32.mrf.mxu0  ;;  %5662 = vmatprep.subr.bf16.mxu0 %v10811_v52  ;;  %v10818_v55 = vld [vmem:[%s15103_s1 + $0x12a0] ss:$16 sps:$4 sm:$0xff]   ;;  %v10877_v52 = vld [vmem:[%s15103_s1 + $0x1164] ss:$16 sps:$4 sm:$0xff]  }
 0x210   : > { %v3810_v44 = vpop.f32.mrf.mxu1  ;;  %5703 = vmatprep.subr.bf16.mxu1 %v10814_v53  ;;  %v13353_v63 = vadd.f32 %v3808_v4, %v3768_v57  ;;  %v3770_v33 = vadd.f32 %v3769_v59, %v12744_v58  ;;  %5692 = vmatprep.mubr.bf16.mxu0 %v13326_v51  ;;  %v10869_v15 = vld [vmem:[%s15103_s1 + $0x1180] ss:$16 sps:$4 sm:$0xff]   ;;  %v10880_v53 = vld [vmem:[%s15103_s1 + $0x1364] ss:$16 sps:$4 sm:$0xff]   ;;  %v4323_v57 = vcombine.high %v13275_v34, %v13275_v34 }
 0x211   : > { %5733 = vmatprep.mubr.bf16.mxu1 %v13342_v20  ;;  %v3771_v0 = vpop.f32.mrf.mxu0  ;;  %v10872_v21 = vld [vmem:[%s15103_s1 + $0x1380] ss:$16 sps:$4 sm:$0xff]   ;;  %v10886_v4 = vld [vmem:[%s15103_s1 + $0x1344] ss:$16 sps:$4 sm:$0xff]  }
 0x212   : > { %v3812_v5 = vpop.f32.mrf.mxu1  ;;  %v13364_v6 = vadd.f32 %v3810_v44, %v3770_v33  ;;  %5663 = vmatpush1.bf16.msra.mxu0 %v10809_v54  ;;  %v10875_v54 = vld [vmem:[%s15103_s1 + $0x1160] ss:$16 sps:$4 sm:$0xff]   ;;  %v10892_v34 = vld [vmem:[%s15103_s1 + $0x1324] ss:$16 sps:$4 sm:$0xff]  }
 0x213   : > { %5704 = vmatpush1.bf16.msra.mxu1 %v10812_v56  ;;  %v3772_v7 = vpop.f32.mrf.mxu0  ;;  %5664 = vmatprep.subr.bf16.mxu0 %v10817_v60  ;;  %v10878_v56 = vld [vmem:[%s15103_s1 + $0x1360] ss:$16 sps:$4 sm:$0xff]   ;;  %v10889_v60 = vld [vmem:[%s15103_s1 + $0x1124] ss:$16 sps:$4 sm:$0xff]  }
 0x214   : > { %v3813_v58 = vpop.f32.mrf.mxu1  ;;  %5705 = vmatprep.subr.bf16.mxu1 %v10820_v62  ;;  %v10881_v59 = vld [vmem:[%s15103_s1 + $0x1140] ss:$16 sps:$4 sm:$0xff]   ;;  %v13507_v62 = vrot.slane %v4323_v57, %v11788_v49  ;;  %v10898_v0 = vld [vmem:[%s15103_s1 + $0x1304] ss:$16 sps:$4 sm:$0xff]   ;;  %v13525_v7 = vrot.slane %v13291_v39, %v11788_v49 }
 0x215   : > { %v10884_v44 = vld [vmem:[%s15103_s1 + $0x1340] ss:$16 sps:$4 sm:$0xff]   ;;  %v10904_v39 = vld [vmem:[%s15103_s1 + $0x16e4] ss:$16 sps:$4 sm:$0xff]  }
 0x216   : > { %5665 = vmatpush1.bf16.msra.mxu0 %v10815_v37  ;;  %v10887_v33 = vld [vmem:[%s15103_s1 + $0x1120] ss:$16 sps:$4 sm:$0xff]   ;;  %v4339_v5 = vcombine.high %v13507_v62, %v13507_v62  ;;  %v10946_v57 = vld [vmem:[%s15103_s1 + $0x1604] ss:$16 sps:$4 sm:$0xff]  }
 0x217   : > { %5706 = vmatpush1.bf16.msra.mxu1 %v10818_v55  ;;  %5666 = vmatprep.subr.bf16.mxu0 %v10823_v22  ;;  %v10890_v37 = vld [vmem:[%s15103_s1 + $0x1320] ss:$16 sps:$4 sm:$0xff]   ;;  %v10895_v55 = vld [vmem:[%s15103_s1 + $0x1104] ss:$16 sps:$4 sm:$0xff]  }
 0x218   : > { %5707 = vmatprep.subr.bf16.mxu1 %v10826_v23  ;;  %v10893_v58 = vld [vmem:[%s15103_s1 + $0x1100] ss:$16 sps:$4 sm:$0xff]   ;;  %v10901_v23 = vld [vmem:[%s15103_s1 + $0x14e4] ss:$16 sps:$4 sm:$0xff]  }
 0x219   : > { %v10896_v22 = vld [vmem:[%s15103_s1 + $0x1300] ss:$16 sps:$4 sm:$0xff]  }
 0x21a   : > { %5667 = vmatpush1.bf16.msra.mxu0 %v10821_v8  ;;  %v10899_v8 = vld [vmem:[%s15103_s1 + $0x14e0] ss:$16 sps:$4 sm:$0xff]  }
 0x21b   : > { %5708 = vmatpush1.bf16.msra.mxu1 %v10824_v28  ;;  %5668 = vmatprep.subr.bf16.mxu0 %v10829_v29  ;;  %v10902_v28 = vld [vmem:[%s15103_s1 + $0x16e0] ss:$16 sps:$4 sm:$0xff]   ;;  %v13546_v29 = vrot.slane %v4339_v5, %v11788_v49 }
 0x21c   : > { %5709 = vmatprep.subr.bf16.mxu1 %v10832_v11  ;;  %v13550_v11 = vcombine.high %v13525_v7, %v13525_v7  ;;  %v10953_v5 = vld [vmem:[%s15103_s1 + $0x15c0] ss:$16 sps:$4 sm:$0xff]  }
 0x21e   : > { %5669 = vmatpush1.bf16.msra.mxu0 %v10827_v12  ;;  %v10907_v12 = vld [vmem:[%s15103_s1 + $0x14c4] ss:$16 sps:$4 sm:$0xff]  }
 0x21f   : > { %5710 = vmatpush1.bf16.msra.mxu1 %v10830_v14  ;;  %5670 = vmatprep.subr.bf16.mxu0 %v10835_v17  ;;  %v10910_v14 = vld [vmem:[%s15103_s1 + $0x16c4] ss:$16 sps:$4 sm:$0xff]   ;;  %v13560_v17 = vcombine.high %v13546_v29, %v13546_v29 }
 0x220   : > { %5711 = vmatprep.subr.bf16.mxu1 %v10838_v18 }
 0x222   : > { %5671 = vmatpush1.bf16.msra.mxu0 %v10833_v19 }
 0x223   : > { %5712 = vmatpush1.bf16.msra.mxu1 %v10836_v24  ;;  %5672 = vmatprep.subr.bf16.mxu0 %v10841_v25  ;;  %v10905_v25 = vld [vmem:[%s15103_s1 + $0x14c0] ss:$16 sps:$4 sm:$0xff]  }
 0x224   : > { %5713 = vmatprep.subr.bf16.mxu1 %v10844_v26  ;;  %v10908_v26 = vld [vmem:[%s15103_s1 + $0x16c0] ss:$16 sps:$4 sm:$0xff]  }
 0x226   : > { %5673 = vmatpush1.bf16.msra.mxu0 %v10839_v42 }
 0x227   : > { %5714 = vmatpush1.bf16.msra.mxu1 %v10842_v61  ;;  %5674 = vmatprep.subr.bf16.mxu0 %v10847_v2  ;;  %v10913_v2 = vld [vmem:[%s15103_s1 + $0x14a4] ss:$16 sps:$4 sm:$0xff]  }
 0x228   : > { %5715 = vmatprep.subr.bf16.mxu1 %v10850_v27 }
 0x22a   : > { %5675 = vmatpush1.bf16.msra.mxu0 %v10845_v30 }
 0x22b   : > { %5716 = vmatpush1.bf16.msra.mxu1 %v10848_v31  ;;  %5676 = vmatprep.subr.bf16.mxu0 %v10853_v32 }
 0x22c   : > { %5717 = vmatprep.subr.bf16.mxu1 %v10856_v35 }
 0x22e   : > { %5677 = vmatpush2.bf16.msra.mxu0 %v10851_v36  ;;  %v10911_v36 = vld [vmem:[%s15103_s1 + $0x14a0] ss:$16 sps:$4 sm:$0xff]  }
 0x22f   : > { %5718 = vmatpush2.bf16.msra.mxu1 %v10854_v3  ;;  %5678 = vmatprep.subr.bf16.mxu0 %v10859_v38  ;;  %v10914_v3 = vld [vmem:[%s15103_s1 + $0x16a0] ss:$16 sps:$4 sm:$0xff]  }
 0x230   : > { %5719 = vmatprep.subr.bf16.mxu1 %v10862_v40  ;;  %v10919_v40 = vld [vmem:[%s15103_s1 + $0x1484] ss:$16 sps:$4 sm:$0xff]  }
 0x232   : > { %5679 = vmatpush2.bf16.msra.mxu0 %v10857_v10  ;;  %v10922_v10 = vld [vmem:[%s15103_s1 + $0x1684] ss:$16 sps:$4 sm:$0xff]  }
 0x233   : > { %5720 = vmatpush2.bf16.msra.mxu1 %v10860_v16  ;;  %5680 = vmatprep.subr.bf16.mxu0 %v10865_v9  ;;  %v10917_v16 = vld [vmem:[%s15103_s1 + $0x1480] ss:$16 sps:$4 sm:$0xff]  }
 0x234   : > { %5721 = vmatprep.subr.bf16.mxu1 %v10868_v45  ;;  %v10920_v9 = vld [vmem:[%s15103_s1 + $0x1680] ss:$16 sps:$4 sm:$0xff]   ;;  %v10925_v45 = vld [vmem:[%s15103_s1 + $0x1464] ss:$16 sps:$4 sm:$0xff]  }
 0x236   : > { %5681 = vmatpush2.bf16.msra.mxu0 %v10863_v46  ;;  %v10928_v46 = vld [vmem:[%s15103_s1 + $0x1664] ss:$16 sps:$4 sm:$0xff]  }
 0x237   : > { %5722 = vmatpush2.bf16.msra.mxu1 %v10866_v48  ;;  %5682 = vmatprep.subr.bf16.mxu0 %v10871_v13  ;;  %v10923_v48 = vld [vmem:[%s15103_s1 + $0x1460] ss:$16 sps:$4 sm:$0xff]  }
 0x238   : > { %5723 = vmatprep.subr.bf16.mxu1 %v10874_v50  ;;  %v10926_v13 = vld [vmem:[%s15103_s1 + $0x1660] ss:$16 sps:$4 sm:$0xff]   ;;  %v10931_v50 = vld [vmem:[%s15103_s1 + $0x1444] ss:$16 sps:$4 sm:$0xff]  }
 0x23a   : > { %5683 = vmatpush2.bf16.msra.mxu0 %v10869_v15  ;;  %v10934_v15 = vld [vmem:[%s15103_s1 + $0x1644] ss:$16 sps:$4 sm:$0xff]  }
 0x23b   : > { %5724 = vmatpush2.bf16.msra.mxu1 %v10872_v21  ;;  %5684 = vmatprep.subr.bf16.mxu0 %v10877_v52  ;;  %v10929_v21 = vld [vmem:[%s15103_s1 + $0x1440] ss:$16 sps:$4 sm:$0xff]  }
 0x23c   : > { %5725 = vmatprep.subr.bf16.mxu1 %v10880_v53  ;;  %v10932_v52 = vld [vmem:[%s15103_s1 + $0x1640] ss:$16 sps:$4 sm:$0xff]   ;;  %v10937_v53 = vld [vmem:[%s15103_s1 + $0x1424] ss:$16 sps:$4 sm:$0xff]  }
 0x23e   : > { %5685 = vmatpush2.bf16.msra.mxu0 %v10875_v54  ;;  %v10940_v54 = vld [vmem:[%s15103_s1 + $0x1624] ss:$16 sps:$4 sm:$0xff]  }
 0x23f   : > { %5726 = vmatpush2.bf16.msra.mxu1 %v10878_v56  ;;  %5686 = vmatprep.subr.bf16.mxu0 %v10883_v1  ;;  %v10935_v56 = vld [vmem:[%s15103_s1 + $0x1420] ss:$16 sps:$4 sm:$0xff]  }
 0x240   : > { %5727 = vmatprep.subr.bf16.mxu1 %v10886_v4  ;;  %v10938_v1 = vld [vmem:[%s15103_s1 + $0x1620] ss:$16 sps:$4 sm:$0xff]   ;;  %v10943_v4 = vld [vmem:[%s15103_s1 + $0x1404] ss:$16 sps:$4 sm:$0xff]  }
 0x242   : > { %5687 = vmatpush2.bf16.msra.mxu0 %v10881_v59  ;;  %v10941_v59 = vld [vmem:[%s15103_s1 + $0x1400] ss:$16 sps:$4 sm:$0xff]  }
 0x243   : > { %5728 = vmatpush2.bf16.msra.mxu1 %v10884_v44  ;;  %5688 = vmatprep.subr.bf16.mxu0 %v10889_v60  ;;  %v10944_v44 = vld [vmem:[%s15103_s1 + $0x1600] ss:$16 sps:$4 sm:$0xff]   ;;  %v10949_v60 = vld [vmem:[%s15103_s1 + $0x15e4] ss:$16 sps:$4 sm:$0xff]  }
 0x244   : > { %5729 = vmatprep.subr.bf16.mxu1 %v10892_v34  ;;  %v10952_v34 = vld [vmem:[%s15103_s1 + $0x17e4] ss:$16 sps:$4 sm:$0xff]  }
 0x246   : > { %5689 = vmatpush2.bf16.msra.mxu0 %v10887_v33  ;;  %v10947_v33 = vld [vmem:[%s15103_s1 + $0x15e0] ss:$16 sps:$4 sm:$0xff]  }
 0x247   : > { %5730 = vmatpush2.bf16.msra.mxu1 %v10890_v37  ;;  %5690 = vmatprep.subr.bf16.mxu0 %v10895_v55  ;;  %v10950_v37 = vld [vmem:[%s15103_s1 + $0x17e0] ss:$16 sps:$4 sm:$0xff]   ;;  %v10955_v55 = vld [vmem:[%s15103_s1 + $0x15c4] ss:$16 sps:$4 sm:$0xff]  }
 0x248   : > { %5731 = vmatprep.subr.bf16.mxu1 %v10898_v0  ;;  %v10958_v0 = vld [vmem:[%s15103_s1 + $0x17c4] ss:$16 sps:$4 sm:$0xff]  }
 0x24a   : > { %5691 = vmatpush2.bf16.msra.mxu0 %v10893_v58  ;;  %v10956_v58 = vld [vmem:[%s15103_s1 + $0x17c0] ss:$16 sps:$4 sm:$0xff]  }
 0x24b   : > { %5732 = vmatpush2.bf16.msra.mxu1 %v10896_v22  ;;  %5742 = vmatprep.subr.bf16.mxu0 %v10901_v23  ;;  %v10961_v22 = vld [vmem:[%s15103_s1 + $0x15a4] ss:$16 sps:$4 sm:$0xff]  }
 0x24c   : > { %5783 = vmatprep.subr.bf16.mxu1 %v10904_v39  ;;  %v10964_v23 = vld [vmem:[%s15103_s1 + $0x17a4] ss:$16 sps:$4 sm:$0xff]   ;;  %v10959_v39 = vld [vmem:[%s15103_s1 + $0x15a0] ss:$16 sps:$4 sm:$0xff]  }
 0x24d   : > { %v3849_v18 = vpop.f32.mrf.mxu0  ;;  %5693 = vmatmul.mubr.bf16.vlgmr.msra.gmra.mxu0 %v13525_v7 }
 0x24e   : > { %v3890_v19 = vpop.f32.mrf.mxu1  ;;  %5734 = vmatmul.mubr.bf16.vlgmr.msra.gmra.mxu1 %v13550_v11  ;;  %v3850_v24 = vadd.f32 %v3849_v18, %v13353_v63  ;;  %5743 = vmatpush1.bf16.msra.mxu0 %v10899_v8  ;;  %v10916_v63 = vld [vmem:[%s15103_s1 + $0x16a4] ss:$16 sps:$4 sm:$0xff]   ;;  %v10962_v8 = vld [vmem:[%s15103_s1 + $0x17a0] ss:$16 sps:$4 sm:$0xff]  }
 0x24f   : > { %5784 = vmatpush1.bf16.msra.mxu1 %v10902_v28  ;;  %v3851_v42 = vpop.f32.mrf.mxu0  ;;  %5744 = vmatprep.subr.bf16.mxu0 %v10907_v12  ;;  %v10967_v28 = vld [vmem:[%s15103_s1 + $0x1584] ss:$16 sps:$4 sm:$0xff]   ;;  %v10968_v18 = vld [vmem:[%s15103_s1 + $0x1780] ss:$16 sps:$4 sm:$0xff]  }
 0x250   : > { %v3892_v61 = vpop.f32.mrf.mxu1  ;;  %5785 = vmatprep.subr.bf16.mxu1 %v10910_v14  ;;  %v13577_v27 = vadd.f32 %v3890_v19, %v3850_v24  ;;  %v3852_v30 = vadd.f32 %v3851_v42, %v13364_v6  ;;  %5774 = vmatprep.mubr.bf16.mxu0 %v13546_v29  ;;  %v10970_v12 = vld [vmem:[%s15103_s1 + $0x1784] ss:$16 sps:$4 sm:$0xff]   ;;  %v10965_v14 = vld [vmem:[%s15103_s1 + $0x1580] ss:$16 sps:$4 sm:$0xff]  }
 0x251   : > { %5815 = vmatprep.mubr.bf16.mxu1 %v13560_v17  ;;  %v3853_v31 = vpop.f32.mrf.mxu0  ;;  %v10973_v19 = vld [vmem:[%s15103_s1 + $0x1564] ss:$16 sps:$4 sm:$0xff]  }
 0x252   : > { %v3894_v32 = vpop.f32.mrf.mxu1  ;;  %v13582_v35 = vadd.f32 %v3892_v61, %v3852_v30  ;;  %5745 = vmatpush1.bf16.msra.mxu0 %v10905_v25  ;;  %v10976_v24 = vld [vmem:[%s15103_s1 + $0x1764] ss:$16 sps:$4 sm:$0xff]   ;;  %v10971_v25 = vld [vmem:[%s15103_s1 + $0x1560] ss:$16 sps:$4 sm:$0xff]  }
 0x253   : > { %5786 = vmatpush1.bf16.msra.mxu1 %v10908_v26  ;;  %v3854_v38 = vpop.f32.mrf.mxu0  ;;  %5746 = vmatprep.subr.bf16.mxu0 %v10913_v2  ;;  %v10974_v26 = vld [vmem:[%s15103_s1 + $0x1760] ss:$16 sps:$4 sm:$0xff]   ;;  %v10979_v42 = vld [vmem:[%s15103_s1 + $0x1544] ss:$16 sps:$4 sm:$0xff]  }
 0x254   : > { %v3895_v6 = vpop.f32.mrf.mxu1  ;;  %5787 = vmatprep.subr.bf16.mxu1 %v10916_v63  ;;  %v10982_v61 = vld [vmem:[%s15103_s1 + $0x1744] ss:$16 sps:$4 sm:$0xff]   ;;  %v10977_v2 = vld [vmem:[%s15103_s1 + $0x1540] ss:$16 sps:$4 sm:$0xff]  }
 0x255   : > { %v10980_v63 = vld [vmem:[%s15103_s1 + $0x1740] ss:$16 sps:$4 sm:$0xff]   ;;  %v10985_v30 = vld [vmem:[%s15103_s1 + $0x1524] ss:$16 sps:$4 sm:$0xff]   ;;  %v13742_v6 = vrot.slane %v13507_v62, %v11788_v49  ;;  %v11001_v62 = vld [vmem:[%s15103_s1 + $0x12ec] ss:$16 sps:$4 sm:$0xff]  }
 0x256   : > { %5747 = vmatpush1.bf16.msra.mxu0 %v10911_v36  ;;  %v10988_v31 = vld [vmem:[%s15103_s1 + $0x1724] ss:$16 sps:$4 sm:$0xff]   ;;  %v10983_v32 = vld [vmem:[%s15103_s1 + $0x1520] ss:$16 sps:$4 sm:$0xff]  }
 0x257   : > { %5788 = vmatpush1.bf16.msra.mxu1 %v10914_v3  ;;  %5748 = vmatprep.subr.bf16.mxu0 %v10919_v40  ;;  %v10986_v36 = vld [vmem:[%s15103_s1 + $0x1720] ss:$16 sps:$4 sm:$0xff]   ;;  %v10991_v3 = vld [vmem:[%s15103_s1 + $0x1504] ss:$16 sps:$4 sm:$0xff]  }
 0x258   : > { %5789 = vmatprep.subr.bf16.mxu1 %v10922_v10  ;;  %v10994_v38 = vld [vmem:[%s15103_s1 + $0x1704] ss:$16 sps:$4 sm:$0xff]   ;;  %v10989_v40 = vld [vmem:[%s15103_s1 + $0x1500] ss:$16 sps:$4 sm:$0xff]  }
 0x259   : > { %v10992_v10 = vld [vmem:[%s15103_s1 + $0x1700] ss:$16 sps:$4 sm:$0xff]  }
 0x25a   : > { %5749 = vmatpush1.bf16.msra.mxu0 %v10917_v16  ;;  %v10998_v16 = vld [vmem:[%s15103_s1 + $0x10ec] ss:$16 sps:$4 sm:$0xff]  }
 0x25b   : > { %5790 = vmatpush1.bf16.msra.mxu1 %v10920_v9  ;;  %5750 = vmatprep.subr.bf16.mxu0 %v10925_v45  ;;  %v13758_v9 = vcombine.high %v13742_v6, %v13742_v6  ;;  %v10996_v45 = vld [vmem:[%s15103_s1 + $0x10e8] ss:$16 sps:$4 sm:$0xff]  }
 0x25c   : > { %5791 = vmatprep.subr.bf16.mxu1 %v10928_v46  ;;  %v10999_v46 = vld [vmem:[%s15103_s1 + $0x12e8] ss:$16 sps:$4 sm:$0xff]  }
 0x25e   : > { %5751 = vmatpush1.bf16.msra.mxu0 %v10923_v48  ;;  %v11004_v48 = vld [vmem:[%s15103_s1 + $0x10cc] ss:$16 sps:$4 sm:$0xff]  }
 0x25f   : > { %5792 = vmatpush1.bf16.msra.mxu1 %v10926_v13  ;;  %5752 = vmatprep.subr.bf16.mxu0 %v10931_v50  ;;  %v11007_v13 = vld [vmem:[%s15103_s1 + $0x12cc] ss:$16 sps:$4 sm:$0xff]  }
 0x260   : > { %5793 = vmatprep.subr.bf16.mxu1 %v10934_v15 }
 0x262   : > { %5753 = vmatpush1.bf16.msra.mxu0 %v10929_v21 }
 0x263   : > { %5794 = vmatpush1.bf16.msra.mxu1 %v10932_v52  ;;  %5754 = vmatprep.subr.bf16.mxu0 %v10937_v53  ;;  %v11002_v52 = vld [vmem:[%s15103_s1 + $0x10c8] ss:$16 sps:$4 sm:$0xff]  }
 0x264   : > { %5795 = vmatprep.subr.bf16.mxu1 %v10940_v54  ;;  %v11005_v53 = vld [vmem:[%s15103_s1 + $0x12c8] ss:$16 sps:$4 sm:$0xff]  }
 0x266   : > { %5755 = vmatpush1.bf16.msra.mxu0 %v10935_v56 }
 0x267   : > { %5796 = vmatpush1.bf16.msra.mxu1 %v10938_v1  ;;  %5756 = vmatprep.subr.bf16.mxu0 %v10943_v4  ;;  %v11010_v1 = vld [vmem:[%s15103_s1 + $0x10ac] ss:$16 sps:$4 sm:$0xff]  }
 0x268   : > { %5797 = vmatprep.subr.bf16.mxu1 %v10946_v57 }
 0x26a   : > { %5757 = vmatpush1.bf16.msra.mxu0 %v10941_v59 }
 0x26b   : > { %5798 = vmatpush1.bf16.msra.mxu1 %v10944_v44  ;;  %5758 = vmatprep.subr.bf16.mxu0 %v10949_v60 }
 0x26c   : > { %5799 = vmatprep.subr.bf16.mxu1 %v10952_v34  ;;  %v11008_v34 = vld [vmem:[%s15103_s1 + $0x10a8] ss:$16 sps:$4 sm:$0xff]  }
 0x26e   : > { %5759 = vmatpush2.bf16.msra.mxu0 %v10947_v33  ;;  %v11011_v33 = vld [vmem:[%s15103_s1 + $0x12a8] ss:$16 sps:$4 sm:$0xff]  }
 0x26f   : > { %5800 = vmatpush2.bf16.msra.mxu1 %v10950_v37  ;;  %5760 = vmatprep.subr.bf16.mxu0 %v10955_v55  ;;  %v11014_v55 = vld [vmem:[%s15103_s1 + $0x1088] ss:$16 sps:$4 sm:$0xff]  }
 0x270   : > { %5801 = vmatprep.subr.bf16.mxu1 %v10958_v0  ;;  %v11017_v0 = vld [vmem:[%s15103_s1 + $0x1288] ss:$16 sps:$4 sm:$0xff]  }
 0x272   : > { %5761 = vmatpush2.bf16.msra.mxu0 %v10953_v5  ;;  %v11022_v5 = vld [vmem:[%s15103_s1 + $0x106c] ss:$16 sps:$4 sm:$0xff]  }
 0x273   : > { %5802 = vmatpush2.bf16.msra.mxu1 %v10956_v58  ;;  %5762 = vmatprep.subr.bf16.mxu0 %v10961_v22  ;;  %v11025_v58 = vld [vmem:[%s15103_s1 + $0x126c] ss:$16 sps:$4 sm:$0xff]   ;;  %v11020_v22 = vld [vmem:[%s15103_s1 + $0x1068] ss:$16 sps:$4 sm:$0xff]  }
 0x274   : > { %5803 = vmatprep.subr.bf16.mxu1 %v10964_v23  ;;  %v11023_v23 = vld [vmem:[%s15103_s1 + $0x1268] ss:$16 sps:$4 sm:$0xff]  }
 0x276   : > { %5763 = vmatpush2.bf16.msra.mxu0 %v10959_v39  ;;  %v11028_v39 = vld [vmem:[%s15103_s1 + $0x104c] ss:$16 sps:$4 sm:$0xff]  }
 0x277   : > { %5804 = vmatpush2.bf16.msra.mxu1 %v10962_v8  ;;  %5764 = vmatprep.subr.bf16.mxu0 %v10967_v28  ;;  %v11031_v8 = vld [vmem:[%s15103_s1 + $0x124c] ss:$16 sps:$4 sm:$0xff]   ;;  %v11026_v28 = vld [vmem:[%s15103_s1 + $0x1048] ss:$16 sps:$4 sm:$0xff]  }
 0x278   : > { %5805 = vmatprep.subr.bf16.mxu1 %v10970_v12  ;;  %v11029_v12 = vld [vmem:[%s15103_s1 + $0x1248] ss:$16 sps:$4 sm:$0xff]  }
 0x27a   : > { %5765 = vmatpush2.bf16.msra.mxu0 %v10965_v14  ;;  %v11034_v14 = vld [vmem:[%s15103_s1 + $0x102c] ss:$16 sps:$4 sm:$0xff]  }
 0x27b   : > { %5806 = vmatpush2.bf16.msra.mxu1 %v10968_v18  ;;  %5766 = vmatprep.subr.bf16.mxu0 %v10973_v19  ;;  %v11037_v18 = vld [vmem:[%s15103_s1 + $0x122c] ss:$16 sps:$4 sm:$0xff]   ;;  %v11032_v19 = vld [vmem:[%s15103_s1 + $0x1028] ss:$16 sps:$4 sm:$0xff]  }
 0x27c   : > { %5807 = vmatprep.subr.bf16.mxu1 %v10976_v24  ;;  %v11035_v24 = vld [vmem:[%s15103_s1 + $0x1228] ss:$16 sps:$4 sm:$0xff]  }
 0x27e   : > { %5767 = vmatpush2.bf16.msra.mxu0 %v10971_v25  ;;  %v11040_v25 = vld [vmem:[%s15103_s1 + $0x100c] ss:$16 sps:$4 sm:$0xff]  }
 0x27f   : > { %5808 = vmatpush2.bf16.msra.mxu1 %v10974_v26  ;;  %5768 = vmatprep.subr.bf16.mxu0 %v10979_v42  ;;  %v11043_v26 = vld [vmem:[%s15103_s1 + $0x120c] ss:$16 sps:$4 sm:$0xff]   ;;  %v11038_v42 = vld [vmem:[%s15103_s1 + $0x1008] ss:$16 sps:$4 sm:$0xff]  }
 0x280   : > { %5809 = vmatprep.subr.bf16.mxu1 %v10982_v61  ;;  %v11041_v61 = vld [vmem:[%s15103_s1 + $0x1208] ss:$16 sps:$4 sm:$0xff]  }
 0x282   : > { %5769 = vmatpush2.bf16.msra.mxu0 %v10977_v2  ;;  %v11046_v2 = vld [vmem:[%s15103_s1 + $0x11ec] ss:$16 sps:$4 sm:$0xff]  }
 0x283   : > { %5810 = vmatpush2.bf16.msra.mxu1 %v10980_v63  ;;  %5770 = vmatprep.subr.bf16.mxu0 %v10985_v30  ;;  %v11049_v63 = vld [vmem:[%s15103_s1 + $0x13ec] ss:$16 sps:$4 sm:$0xff]   ;;  %v11044_v30 = vld [vmem:[%s15103_s1 + $0x11e8] ss:$16 sps:$4 sm:$0xff]  }
 0x284   : > { %5811 = vmatprep.subr.bf16.mxu1 %v10988_v31  ;;  %v11047_v31 = vld [vmem:[%s15103_s1 + $0x13e8] ss:$16 sps:$4 sm:$0xff]  }
 0x286   : > { %5771 = vmatpush2.bf16.msra.mxu0 %v10983_v32  ;;  %v11052_v32 = vld [vmem:[%s15103_s1 + $0x11cc] ss:$16 sps:$4 sm:$0xff]  }
 0x287   : > { %5812 = vmatpush2.bf16.msra.mxu1 %v10986_v36  ;;  %5772 = vmatprep.subr.bf16.mxu0 %v10991_v3  ;;  %v11055_v36 = vld [vmem:[%s15103_s1 + $0x13cc] ss:$16 sps:$4 sm:$0xff]   ;;  %v11050_v3 = vld [vmem:[%s15103_s1 + $0x11c8] ss:$16 sps:$4 sm:$0xff]  }
 0x288   : > { %5813 = vmatprep.subr.bf16.mxu1 %v10994_v38  ;;  %v11053_v38 = vld [vmem:[%s15103_s1 + $0x13c8] ss:$16 sps:$4 sm:$0xff]  }
 0x28a   : > { %5773 = vmatpush2.bf16.msra.mxu0 %v10989_v40  ;;  %v11058_v40 = vld [vmem:[%s15103_s1 + $0x11ac] ss:$16 sps:$4 sm:$0xff]  }
 0x28b   : > { %5814 = vmatpush2.bf16.msra.mxu1 %v10992_v10  ;;  %5824 = vmatprep.subr.bf16.mxu0 %v10998_v16  ;;  %v11061_v10 = vld [vmem:[%s15103_s1 + $0x13ac] ss:$16 sps:$4 sm:$0xff]   ;;  %v11056_v16 = vld [vmem:[%s15103_s1 + $0x11a8] ss:$16 sps:$4 sm:$0xff]  }
 0x28c   : > { %5865 = vmatprep.subr.bf16.mxu1 %v11001_v62  ;;  %v11059_v62 = vld [vmem:[%s15103_s1 + $0x13a8] ss:$16 sps:$4 sm:$0xff]  }
 0x28d   : > { %v3931_v50 = vpop.f32.mrf.mxu0  ;;  %5775 = vmatmul.mubr.bf16.vlgmr.msra.gmra.mxu0 %v13742_v6 }
 0x28e   : > { %v3972_v15 = vpop.f32.mrf.mxu1  ;;  %5816 = vmatmul.mubr.bf16.vlgmr.msra.gmra.mxu1 %v13758_v9  ;;  %v3932_v21 = vadd.f32 %v3931_v50, %v13135_v41  ;;  %5825 = vmatpush1.bf16.msra.mxu0 %v10996_v45  ;;  %v11013_v41 = vld [vmem:[%s15103_s1 + $0x12ac] ss:$16 sps:$4 sm:$0xff]  }
 0x28f   : > { %5866 = vmatpush1.bf16.msra.mxu1 %v10999_v46  ;;  %v3933_v54 = vpop.f32.mrf.mxu0  ;;  %5826 = vmatprep.subr.bf16.mxu0 %v11004_v48  ;;  %v11064_v45 = vld [vmem:[%s15103_s1 + $0x118c] ss:$16 sps:$4 sm:$0xff]   ;;  %v11062_v48 = vld [vmem:[%s15103_s1 + $0x1188] ss:$16 sps:$4 sm:$0xff]  }
 0x290   : > { %v3974_v56 = vpop.f32.mrf.mxu1  ;;  %5867 = vmatprep.subr.bf16.mxu1 %v11007_v13  ;;  %v13787_v4 = vadd.f32 %v3972_v15, %v3932_v21  ;;  %v3934_v57 = vadd.f32 %v3933_v54, %v13146_v47  ;;  %5856 = vmatprep.mubr.bf16.mxu0 %v13326_v51  ;;  %v11016_v51 = vld [vmem:[%s15103_s1 + $0x108c] ss:$16 sps:$4 sm:$0xff]   ;;  %v11065_v13 = vld [vmem:[%s15103_s1 + $0x1388] ss:$16 sps:$4 sm:$0xff]  }
 0x291   : > { %5897 = vmatprep.mubr.bf16.mxu1 %v13342_v20  ;;  %v3935_v59 = vpop.f32.mrf.mxu0  ;;  %v11019_v20 = vld [vmem:[%s15103_s1 + $0x128c] ss:$16 sps:$4 sm:$0xff]   ;;  %v11068_v21 = vld [vmem:[%s15103_s1 + $0x1168] ss:$16 sps:$4 sm:$0xff]  }
 0x292   : > { %v3976_v44 = vpop.f32.mrf.mxu1  ;;  %v13792_v60 = vadd.f32 %v3974_v56, %v3934_v57  ;;  %5827 = vmatpush1.bf16.msra.mxu0 %v11002_v52  ;;  %v11067_v46 = vld [vmem:[%s15103_s1 + $0x138c] ss:$16 sps:$4 sm:$0xff]   ;;  %v11071_v52 = vld [vmem:[%s15103_s1 + $0x1368] ss:$16 sps:$4 sm:$0xff]  }
 0x293   : > { %5868 = vmatpush1.bf16.msra.mxu1 %v11005_v53  ;;  %v3936_v37 = vpop.f32.mrf.mxu0  ;;  %5828 = vmatprep.subr.bf16.mxu0 %v11010_v1  ;;  %v11070_v50 = vld [vmem:[%s15103_s1 + $0x116c] ss:$16 sps:$4 sm:$0xff]   ;;  %v11074_v56 = vld [vmem:[%s15103_s1 + $0x1148] ss:$16 sps:$4 sm:$0xff]  }
 0x294   : > { %v3977_v47 = vpop.f32.mrf.mxu1  ;;  %5869 = vmatprep.subr.bf16.mxu1 %v11013_v41  ;;  %v11073_v15 = vld [vmem:[%s15103_s1 + $0x136c] ss:$16 sps:$4 sm:$0xff]   ;;  %v11077_v1 = vld [vmem:[%s15103_s1 + $0x1348] ss:$16 sps:$4 sm:$0xff]  }
 0x295   : > { %v11076_v53 = vld [vmem:[%s15103_s1 + $0x114c] ss:$16 sps:$4 sm:$0xff]   ;;  %v11080_v59 = vld [vmem:[%s15103_s1 + $0x1128] ss:$16 sps:$4 sm:$0xff]  }
 0x296   : > { %5829 = vmatpush1.bf16.msra.mxu0 %v11008_v34  ;;  %v11079_v54 = vld [vmem:[%s15103_s1 + $0x134c] ss:$16 sps:$4 sm:$0xff]   ;;  %v11083_v44 = vld [vmem:[%s15103_s1 + $0x1328] ss:$16 sps:$4 sm:$0xff]  }
 0x297   : > { %5870 = vmatpush1.bf16.msra.mxu1 %v11011_v33  ;;  %5830 = vmatprep.subr.bf16.mxu0 %v11016_v51  ;;  %v11082_v41 = vld [vmem:[%s15103_s1 + $0x112c] ss:$16 sps:$4 sm:$0xff]   ;;  %v11086_v37 = vld [vmem:[%s15103_s1 + $0x1108] ss:$16 sps:$4 sm:$0xff]  }
 0x298   : > { %5871 = vmatprep.subr.bf16.mxu1 %v11019_v20  ;;  %v11085_v57 = vld [vmem:[%s15103_s1 + $0x132c] ss:$16 sps:$4 sm:$0xff]   ;;  %v11089_v47 = vld [vmem:[%s15103_s1 + $0x1308] ss:$16 sps:$4 sm:$0xff]  }
 0x299   : > { %v11088_v34 = vld [vmem:[%s15103_s1 + $0x110c] ss:$16 sps:$4 sm:$0xff]  }
 0x29a   : > { %5831 = vmatpush1.bf16.msra.mxu0 %v11014_v55  ;;  %v11091_v33 = vld [vmem:[%s15103_s1 + $0x130c] ss:$16 sps:$4 sm:$0xff]   ;;  %v11092_v55 = vld [vmem:[%s15103_s1 + $0x14e8] ss:$16 sps:$4 sm:$0xff]  }
 0x29b   : > { %5872 = vmatpush1.bf16.msra.mxu1 %v11017_v0  ;;  %5832 = vmatprep.subr.bf16.mxu0 %v11022_v5  ;;  %v11094_v51 = vld [vmem:[%s15103_s1 + $0x14ec] ss:$16 sps:$4 sm:$0xff]   ;;  %v11095_v0 = vld [vmem:[%s15103_s1 + $0x16e8] ss:$16 sps:$4 sm:$0xff]  }
 0x29c   : > { %5873 = vmatprep.subr.bf16.mxu1 %v11025_v58  ;;  %v11097_v20 = vld [vmem:[%s15103_s1 + $0x16ec] ss:$16 sps:$4 sm:$0xff]  }
 0x29d   : > { %v11100_v5 = vld [vmem:[%s15103_s1 + $0x14cc] ss:$16 sps:$4 sm:$0xff]  }
 0x29e   : > { %5833 = vmatpush1.bf16.msra.mxu0 %v11020_v22  ;;  %v11103_v58 = vld [vmem:[%s15103_s1 + $0x16cc] ss:$16 sps:$4 sm:$0xff]  }
 0x29f   : > { %5874 = vmatpush1.bf16.msra.mxu1 %v11023_v23  ;;  %5834 = vmatprep.subr.bf16.mxu0 %v11028_v39 }
 0x2a0   : > { %5875 = vmatprep.subr.bf16.mxu1 %v11031_v8  ;;  %v11098_v8 = vld [vmem:[%s15103_s1 + $0x14c8] ss:$16 sps:$4 sm:$0xff]  }
 0x2a2   : > { %5835 = vmatpush1.bf16.msra.mxu0 %v11026_v28  ;;  %v11101_v28 = vld [vmem:[%s15103_s1 + $0x16c8] ss:$16 sps:$4 sm:$0xff]  }
 0x2a3   : > { %5876 = vmatpush1.bf16.msra.mxu1 %v11029_v12  ;;  %5836 = vmatprep.subr.bf16.mxu0 %v11034_v14 }
 0x2a4   : > { %5877 = vmatprep.subr.bf16.mxu1 %v11037_v18 }
 0x2a6   : > { %5837 = vmatpush1.bf16.msra.mxu0 %v11032_v19 }
 0x2a7   : > { %5878 = vmatpush1.bf16.msra.mxu1 %v11035_v24  ;;  %5838 = vmatprep.subr.bf16.mxu0 %v11040_v25 }
 0x2a8   : > { %5879 = vmatprep.subr.bf16.mxu1 %v11043_v26  ;;  %v11104_v26 = vld [vmem:[%s15103_s1 + $0x14a8] ss:$16 sps:$4 sm:$0xff]  }
 0x2aa   : > { %5839 = vmatpush1.bf16.msra.mxu0 %v11038_v42  ;;  %v11107_v42 = vld [vmem:[%s15103_s1 + $0x16a8] ss:$16 sps:$4 sm:$0xff]  }
 0x2ab   : > { %5880 = vmatpush1.bf16.msra.mxu1 %v11041_v61  ;;  %5840 = vmatprep.subr.bf16.mxu0 %v11046_v2  ;;  %v11110_v2 = vld [vmem:[%s15103_s1 + $0x1488] ss:$16 sps:$4 sm:$0xff]  }
 0x2ac   : > { %5881 = vmatprep.subr.bf16.mxu1 %v11049_v63  ;;  %v11113_v63 = vld [vmem:[%s15103_s1 + $0x1688] ss:$16 sps:$4 sm:$0xff]  }
 0x2ae   : > { %5841 = vmatpush2.bf16.msra.mxu0 %v11044_v30  ;;  %v11118_v30 = vld [vmem:[%s15103_s1 + $0x146c] ss:$16 sps:$4 sm:$0xff]  }
 0x2af   : > { %5882 = vmatpush2.bf16.msra.mxu1 %v11047_v31  ;;  %5842 = vmatprep.subr.bf16.mxu0 %v11052_v32  ;;  %v11121_v31 = vld [vmem:[%s15103_s1 + $0x166c] ss:$16 sps:$4 sm:$0xff]   ;;  %v11116_v32 = vld [vmem:[%s15103_s1 + $0x1468] ss:$16 sps:$4 sm:$0xff]  }
 0x2b0   : > { %5883 = vmatprep.subr.bf16.mxu1 %v11055_v36  ;;  %v11119_v36 = vld [vmem:[%s15103_s1 + $0x1668] ss:$16 sps:$4 sm:$0xff]  }
 0x2b2   : > { %5843 = vmatpush2.bf16.msra.mxu0 %v11050_v3  ;;  %v11124_v3 = vld [vmem:[%s15103_s1 + $0x144c] ss:$16 sps:$4 sm:$0xff]  }
 0x2b3   : > { %5884 = vmatpush2.bf16.msra.mxu1 %v11053_v38  ;;  %5844 = vmatprep.subr.bf16.mxu0 %v11058_v40  ;;  %v11127_v38 = vld [vmem:[%s15103_s1 + $0x164c] ss:$16 sps:$4 sm:$0xff]   ;;  %v11122_v40 = vld [vmem:[%s15103_s1 + $0x1448] ss:$16 sps:$4 sm:$0xff]  }
 0x2b4   : > { %5885 = vmatprep.subr.bf16.mxu1 %v11061_v10  ;;  %v11125_v10 = vld [vmem:[%s15103_s1 + $0x1648] ss:$16 sps:$4 sm:$0xff]  }
 0x2b6   : > { %5845 = vmatpush2.bf16.msra.mxu0 %v11056_v16  ;;  %v11130_v16 = vld [vmem:[%s15103_s1 + $0x142c] ss:$16 sps:$4 sm:$0xff]  }
 0x2b7   : > { %5886 = vmatpush2.bf16.msra.mxu1 %v11059_v62  ;;  %5846 = vmatprep.subr.bf16.mxu0 %v11064_v45  ;;  %v11133_v62 = vld [vmem:[%s15103_s1 + $0x162c] ss:$16 sps:$4 sm:$0xff]   ;;  %v11128_v45 = vld [vmem:[%s15103_s1 + $0x1428] ss:$16 sps:$4 sm:$0xff]  }
 0x2b8   : > { %5887 = vmatprep.subr.bf16.mxu1 %v11067_v46  ;;  %v11131_v46 = vld [vmem:[%s15103_s1 + $0x1628] ss:$16 sps:$4 sm:$0xff]  }
 0x2ba   : > { %5847 = vmatpush2.bf16.msra.mxu0 %v11062_v48  ;;  %v11136_v48 = vld [vmem:[%s15103_s1 + $0x140c] ss:$16 sps:$4 sm:$0xff]  }
 0x2bb   : > { %5888 = vmatpush2.bf16.msra.mxu1 %v11065_v13  ;;  %5848 = vmatprep.subr.bf16.mxu0 %v11070_v50  ;;  %v11139_v13 = vld [vmem:[%s15103_s1 + $0x160c] ss:$16 sps:$4 sm:$0xff]   ;;  %v11134_v50 = vld [vmem:[%s15103_s1 + $0x1408] ss:$16 sps:$4 sm:$0xff]  }
 0x2bc   : > { %5889 = vmatprep.subr.bf16.mxu1 %v11073_v15  ;;  %v11137_v15 = vld [vmem:[%s15103_s1 + $0x1608] ss:$16 sps:$4 sm:$0xff]  }
 0x2be   : > { %5849 = vmatpush2.bf16.msra.mxu0 %v11068_v21  ;;  %v11142_v21 = vld [vmem:[%s15103_s1 + $0x15ec] ss:$16 sps:$4 sm:$0xff]  }
 0x2bf   : > { %5890 = vmatpush2.bf16.msra.mxu1 %v11071_v52  ;;  %5850 = vmatprep.subr.bf16.mxu0 %v11076_v53  ;;  %v11145_v52 = vld [vmem:[%s15103_s1 + $0x17ec] ss:$16 sps:$4 sm:$0xff]   ;;  %v11140_v53 = vld [vmem:[%s15103_s1 + $0x15e8] ss:$16 sps:$4 sm:$0xff]  }
 0x2c0   : > { %5891 = vmatprep.subr.bf16.mxu1 %v11079_v54  ;;  %v11143_v54 = vld [vmem:[%s15103_s1 + $0x17e8] ss:$16 sps:$4 sm:$0xff]  }
 0x2c2   : > { %5851 = vmatpush2.bf16.msra.mxu0 %v11074_v56  ;;  %v11148_v56 = vld [vmem:[%s15103_s1 + $0x15cc] ss:$16 sps:$4 sm:$0xff]  }
 0x2c3   : > { %5892 = vmatpush2.bf16.msra.mxu1 %v11077_v1  ;;  %5852 = vmatprep.subr.bf16.mxu0 %v11082_v41  ;;  %v11151_v1 = vld [vmem:[%s15103_s1 + $0x17cc] ss:$16 sps:$4 sm:$0xff]   ;;  %v11146_v41 = vld [vmem:[%s15103_s1 + $0x15c8] ss:$16 sps:$4 sm:$0xff]  }
 0x2c4   : > { %5893 = vmatprep.subr.bf16.mxu1 %v11085_v57  ;;  %v11149_v57 = vld [vmem:[%s15103_s1 + $0x17c8] ss:$16 sps:$4 sm:$0xff]  }
 0x2c6   : > { %5853 = vmatpush2.bf16.msra.mxu0 %v11080_v59  ;;  %v11154_v59 = vld [vmem:[%s15103_s1 + $0x15ac] ss:$16 sps:$4 sm:$0xff]  }
 0x2c7   : > { %5894 = vmatpush2.bf16.msra.mxu1 %v11083_v44  ;;  %5854 = vmatprep.subr.bf16.mxu0 %v11088_v34  ;;  %v11157_v44 = vld [vmem:[%s15103_s1 + $0x17ac] ss:$16 sps:$4 sm:$0xff]   ;;  %v11152_v34 = vld [vmem:[%s15103_s1 + $0x15a8] ss:$16 sps:$4 sm:$0xff]  }
 0x2c8   : > { %5895 = vmatprep.subr.bf16.mxu1 %v11091_v33  ;;  %v11155_v33 = vld [vmem:[%s15103_s1 + $0x17a8] ss:$16 sps:$4 sm:$0xff]  }
 0x2ca   : > { %5855 = vmatpush2.bf16.msra.mxu0 %v11086_v37  ;;  %v11160_v37 = vld [vmem:[%s15103_s1 + $0x158c] ss:$16 sps:$4 sm:$0xff]  }
 0x2cb   : > { %5896 = vmatpush2.bf16.msra.mxu1 %v11089_v47  ;;  %5906 = vmatprep.subr.bf16.mxu0 %v11094_v51  ;;  %v11163_v47 = vld [vmem:[%s15103_s1 + $0x178c] ss:$16 sps:$4 sm:$0xff]   ;;  %v11158_v51 = vld [vmem:[%s15103_s1 + $0x1588] ss:$16 sps:$4 sm:$0xff]  }
 0x2cc   : > { %5947 = vmatprep.subr.bf16.mxu1 %v11097_v20  ;;  %v11161_v20 = vld [vmem:[%s15103_s1 + $0x1788] ss:$16 sps:$4 sm:$0xff]  }
 0x2cd   : > { %v4013_v22 = vpop.f32.mrf.mxu0  ;;  %5857 = vmatmul.mubr.bf16.vlgmr.msra.gmra.mxu0 %v13525_v7  ;;  %v11106_v7 = vld [vmem:[%s15103_s1 + $0x14ac] ss:$16 sps:$4 sm:$0xff]  }
 0x2ce   : > { %v4054_v23 = vpop.f32.mrf.mxu1  ;;  %5898 = vmatmul.mubr.bf16.vlgmr.msra.gmra.mxu1 %v13550_v11  ;;  %v4014_v39 = vadd.f32 %v4013_v22, %v13787_v4  ;;  %5907 = vmatpush1.bf16.msra.mxu0 %v11092_v55  ;;  %v11109_v11 = vld [vmem:[%s15103_s1 + $0x16ac] ss:$16 sps:$4 sm:$0xff]   ;;  %v11167_v22 = vld [vmem:[%s15103_s1 + $0x1768] ss:$16 sps:$4 sm:$0xff]  }
 0x2cf   : > { %5948 = vmatpush1.bf16.msra.mxu1 %v11095_v0  ;;  %v4015_v12 = vpop.f32.mrf.mxu0  ;;  %5908 = vmatprep.subr.bf16.mxu0 %v11100_v5  ;;  %v11166_v55 = vld [vmem:[%s15103_s1 + $0x156c] ss:$16 sps:$4 sm:$0xff]  }
 0x2d0   : > { %v4056_v14 = vpop.f32.mrf.mxu1  ;;  %5949 = vmatprep.subr.bf16.mxu1 %v11103_v58  ;;  %v13989_v4 = vadd.f32 %v4054_v23, %v4014_v39  ;;  %v4016_v18 = vadd.f32 %v4015_v12, %v13792_v60  ;;  %5938 = vmatprep.mubr.bf16.mxu0 %v13546_v29  ;;  %v11112_v29 = vld [vmem:[%s15103_s1 + $0x148c] ss:$16 sps:$4 sm:$0xff]   ;;  %v11164_v58 = vld [vmem:[%s15103_s1 + $0x1568] ss:$16 sps:$4 sm:$0xff]  }
 0x2d1   : > { %5979 = vmatprep.mubr.bf16.mxu1 %v13560_v17  ;;  %v4017_v19 = vpop.f32.mrf.mxu0  ;;  %v11115_v17 = vld [vmem:[%s15103_s1 + $0x168c] ss:$16 sps:$4 sm:$0xff]   ;;  %v11173_v12 = vld [vmem:[%s15103_s1 + $0x1748] ss:$16 sps:$4 sm:$0xff]  }
 0x2d2   : > { %v4058_v24 = vpop.f32.mrf.mxu1  ;;  %v13994_v25 = vadd.f32 %v4056_v14, %v4016_v18  ;;  %5909 = vmatpush1.bf16.msra.mxu0 %v11098_v8  ;;  %v11169_v0 = vld [vmem:[%s15103_s1 + $0x176c] ss:$16 sps:$4 sm:$0xff]   ;;  %v11176_v18 = vld [vmem:[%s15103_s1 + $0x1528] ss:$16 sps:$4 sm:$0xff]  }
 0x2d3   : > { %5950 = vmatpush1.bf16.msra.mxu1 %v11101_v28  ;;  %v4018_v61 = vpop.f32.mrf.mxu0  ;;  %5910 = vmatprep.subr.bf16.mxu0 %v11106_v7  ;;  %v14117_v5 = vld [vmem:[%s11785_s22 + $0x8] sm:$0xff] }
 0x2d4   : > { %v4059_v60 = vpop.f32.mrf.mxu1  ;;  %5951 = vmatprep.subr.bf16.mxu1 %v11109_v11  ;;  %v11172_v23 = vld [vmem:[%s15103_s1 + $0x154c] ss:$16 sps:$4 sm:$0xff]   ;;  %v14133_v8 = vrot.slane %v14117_v5, %v11788_v49  ;;  %v11170_v28 = vld [vmem:[%s15103_s1 + $0x1548] ss:$16 sps:$4 sm:$0xff]  }
 0x2d5   : > { %v11175_v39 = vld [vmem:[%s15103_s1 + $0x174c] ss:$16 sps:$4 sm:$0xff]   ;;  %v11179_v19 = vld [vmem:[%s15103_s1 + $0x1728] ss:$16 sps:$4 sm:$0xff]  }
 0x2d6   : > { %5911 = vmatpush1.bf16.msra.mxu0 %v11104_v26  ;;  %v11178_v14 = vld [vmem:[%s15103_s1 + $0x152c] ss:$16 sps:$4 sm:$0xff]   ;;  %v6266_v11 = vcombine.high %v14133_v8, %v14133_v8  ;;  %v11182_v61 = vld [vmem:[%s15103_s1 + $0x1508] ss:$16 sps:$4 sm:$0xff]  }
 0x2d7   : > { %5952 = vmatpush1.bf16.msra.mxu1 %v11107_v42  ;;  %5912 = vmatprep.subr.bf16.mxu0 %v11112_v29  ;;  %v11181_v7 = vld [vmem:[%s15103_s1 + $0x172c] ss:$16 sps:$4 sm:$0xff]   ;;  %v11185_v60 = vld [vmem:[%s15103_s1 + $0x1708] ss:$16 sps:$4 sm:$0xff]   ;;  %v11190_v29 = vld [vmem:[%s15103_s1 + $0x18e4] ss:$16 sps:$4 sm:$0xff]  }
 0x2d8   : > { %5953 = vmatprep.subr.bf16.mxu1 %v11115_v17  ;;  %v11184_v24 = vld [vmem:[%s15103_s1 + $0x150c] ss:$16 sps:$4 sm:$0xff]   ;;  %v14162_v42 = vrot.slane %v6266_v11, %v11788_v49  ;;  %v11193_v17 = vld [vmem:[%s15103_s1 + $0x1ae4] ss:$16 sps:$4 sm:$0xff]   ;;  %v11239_v11 = vld [vmem:[%s15103_s1 + $0x1be0] ss:$16 sps:$4 sm:$0xff]  }
 0x2d9   : > { %v11187_v26 = vld [vmem:[%s15103_s1 + $0x170c] ss:$16 sps:$4 sm:$0xff]  }
 0x2da   : > { %5913 = vmatpush1.bf16.msra.mxu0 %v11110_v2  ;;  %v6298_v2 = vcombine.high %v14162_v42, %v14162_v42 }
 0x2db   : > { %5954 = vmatpush1.bf16.msra.mxu1 %v11113_v63  ;;  %5914 = vmatprep.subr.bf16.mxu0 %v11118_v30  ;;  %v11188_v63 = vld [vmem:[%s15103_s1 + $0x18e0] ss:$16 sps:$4 sm:$0xff]  }
 0x2dc   : > { %5955 = vmatprep.subr.bf16.mxu1 %v11121_v31  ;;  %v11191_v30 = vld [vmem:[%s15103_s1 + $0x1ae0] ss:$16 sps:$4 sm:$0xff]   ;;  %v11196_v31 = vld [vmem:[%s15103_s1 + $0x18c4] ss:$16 sps:$4 sm:$0xff]  }
 0x2de   : > { %5915 = vmatpush1.bf16.msra.mxu0 %v11116_v32  ;;  %v11199_v32 = vld [vmem:[%s15103_s1 + $0x1ac4] ss:$16 sps:$4 sm:$0xff]  }
 0x2df   : > { %5956 = vmatpush1.bf16.msra.mxu1 %v11119_v36  ;;  %5916 = vmatprep.subr.bf16.mxu0 %v11124_v3  ;;  %v6304_v36 = vshrl.u32 %v14162_v42, 16  ;;  %v14191_v3 = vshrl.u32 %v6298_v2, 16  ;;  %v11256_v2 = vld [vmem:[%s15103_s1 + $0x1984] ss:$16 sps:$4 sm:$0xff]   ;;  %v11401_v42 = vld [vmem:[%s15103_s1 + $0x188c] ss:$16 sps:$4 sm:$0xff]  }
 0x2e0   : > { %5957 = vmatprep.subr.bf16.mxu1 %v11127_v38 }
 0x2e2   : > { %5917 = vmatpush1.bf16.msra.mxu0 %v11122_v40 }
 0x2e3   : > { %5958 = vmatpush1.bf16.msra.mxu1 %v11125_v10  ;;  %5918 = vmatprep.subr.bf16.mxu0 %v11130_v16  ;;  %v11194_v16 = vld [vmem:[%s15103_s1 + $0x18c0] ss:$16 sps:$4 sm:$0xff]  }
 0x2e4   : > { %5959 = vmatprep.subr.bf16.mxu1 %v11133_v62  ;;  %v11197_v62 = vld [vmem:[%s15103_s1 + $0x1ac0] ss:$16 sps:$4 sm:$0xff]  }
 0x2e6   : > { %5919 = vmatpush1.bf16.msra.mxu0 %v11128_v45 }
 0x2e7   : > { %5960 = vmatpush1.bf16.msra.mxu1 %v11131_v46  ;;  %5920 = vmatprep.subr.bf16.mxu0 %v11136_v48 }
 0x2e8   : > { %5961 = vmatprep.subr.bf16.mxu1 %v11139_v13 }
 0x2ea   : > { %5921 = vmatpush1.bf16.msra.mxu0 %v11134_v50 }
 0x2eb   : > { %5962 = vmatpush1.bf16.msra.mxu1 %v11137_v15  ;;  %5922 = vmatprep.subr.bf16.mxu0 %v11142_v21  ;;  %v11200_v15 = vld [vmem:[%s15103_s1 + $0x18a0] ss:$16 sps:$4 sm:$0xff]  }
 0x2ec   : > { %5963 = vmatprep.subr.bf16.mxu1 %v11145_v52  ;;  %v11203_v21 = vld [vmem:[%s15103_s1 + $0x1aa0] ss:$16 sps:$4 sm:$0xff]  }
 0x2ee   : > { %5923 = vmatpush2.bf16.msra.mxu0 %v11140_v53 }
 0x2ef   : > { %5964 = vmatpush2.bf16.msra.mxu1 %v11143_v54  ;;  %5924 = vmatprep.subr.bf16.mxu0 %v11148_v56  ;;  %v11208_v54 = vld [vmem:[%s15103_s1 + $0x1884] ss:$16 sps:$4 sm:$0xff]  }
 0x2f0   : > { %5965 = vmatprep.subr.bf16.mxu1 %v11151_v1  ;;  %v11211_v56 = vld [vmem:[%s15103_s1 + $0x1a84] ss:$16 sps:$4 sm:$0xff]   ;;  %v11206_v1 = vld [vmem:[%s15103_s1 + $0x1880] ss:$16 sps:$4 sm:$0xff]  }
 0x2f2   : > { %5925 = vmatpush2.bf16.msra.mxu0 %v11146_v41  ;;  %v11209_v41 = vld [vmem:[%s15103_s1 + $0x1a80] ss:$16 sps:$4 sm:$0xff]  }
 0x2f3   : > { %5966 = vmatpush2.bf16.msra.mxu1 %v11149_v57  ;;  %5926 = vmatprep.subr.bf16.mxu0 %v11154_v59  ;;  %v11214_v57 = vld [vmem:[%s15103_s1 + $0x1864] ss:$16 sps:$4 sm:$0xff]  }
 0x2f4   : > { %5967 = vmatprep.subr.bf16.mxu1 %v11157_v44  ;;  %v11217_v59 = vld [vmem:[%s15103_s1 + $0x1a64] ss:$16 sps:$4 sm:$0xff]   ;;  %v11212_v44 = vld [vmem:[%s15103_s1 + $0x1860] ss:$16 sps:$4 sm:$0xff]  }
 0x2f6   : > { %5927 = vmatpush2.bf16.msra.mxu0 %v11152_v34  ;;  %v11215_v34 = vld [vmem:[%s15103_s1 + $0x1a60] ss:$16 sps:$4 sm:$0xff]  }
 0x2f7   : > { %5968 = vmatpush2.bf16.msra.mxu1 %v11155_v33  ;;  %5928 = vmatprep.subr.bf16.mxu0 %v11160_v37  ;;  %v11220_v33 = vld [vmem:[%s15103_s1 + $0x1844] ss:$16 sps:$4 sm:$0xff]  }
 0x2f8   : > { %5969 = vmatprep.subr.bf16.mxu1 %v11163_v47  ;;  %v11223_v37 = vld [vmem:[%s15103_s1 + $0x1a44] ss:$16 sps:$4 sm:$0xff]   ;;  %v11218_v47 = vld [vmem:[%s15103_s1 + $0x1840] ss:$16 sps:$4 sm:$0xff]  }
 0x2fa   : > { %5929 = vmatpush2.bf16.msra.mxu0 %v11158_v51  ;;  %v11221_v51 = vld [vmem:[%s15103_s1 + $0x1a40] ss:$16 sps:$4 sm:$0xff]  }
 0x2fb   : > { %5970 = vmatpush2.bf16.msra.mxu1 %v11161_v20  ;;  %5930 = vmatprep.subr.bf16.mxu0 %v11166_v55  ;;  %v11226_v20 = vld [vmem:[%s15103_s1 + $0x1824] ss:$16 sps:$4 sm:$0xff]  }
 0x2fc   : > { %5971 = vmatprep.subr.bf16.mxu1 %v11169_v0  ;;  %v11229_v55 = vld [vmem:[%s15103_s1 + $0x1a24] ss:$16 sps:$4 sm:$0xff]   ;;  %v11224_v0 = vld [vmem:[%s15103_s1 + $0x1820] ss:$16 sps:$4 sm:$0xff]  }
 0x2fe   : > { %5931 = vmatpush2.bf16.msra.mxu0 %v11164_v58  ;;  %v11227_v58 = vld [vmem:[%s15103_s1 + $0x1a20] ss:$16 sps:$4 sm:$0xff]  }
 0x2ff   : > { %5972 = vmatpush2.bf16.msra.mxu1 %v11167_v22  ;;  %5932 = vmatprep.subr.bf16.mxu0 %v11172_v23  ;;  %v11232_v22 = vld [vmem:[%s15103_s1 + $0x1804] ss:$16 sps:$4 sm:$0xff]  }
 0x300   : > { %5973 = vmatprep.subr.bf16.mxu1 %v11175_v39  ;;  %v11235_v23 = vld [vmem:[%s15103_s1 + $0x1a04] ss:$16 sps:$4 sm:$0xff]   ;;  %v11230_v39 = vld [vmem:[%s15103_s1 + $0x1800] ss:$16 sps:$4 sm:$0xff]  }
 0x302   : > { %5933 = vmatpush2.bf16.msra.mxu0 %v11170_v28  ;;  %v11233_v28 = vld [vmem:[%s15103_s1 + $0x1a00] ss:$16 sps:$4 sm:$0xff]  }
 0x303   : > { %5974 = vmatpush2.bf16.msra.mxu1 %v11173_v12  ;;  %5934 = vmatprep.subr.bf16.mxu0 %v11178_v14  ;;  %v11238_v12 = vld [vmem:[%s15103_s1 + $0x19e4] ss:$16 sps:$4 sm:$0xff]  }
 0x304   : > { %5975 = vmatprep.subr.bf16.mxu1 %v11181_v7  ;;  %v11241_v14 = vld [vmem:[%s15103_s1 + $0x1be4] ss:$16 sps:$4 sm:$0xff]   ;;  %v11236_v7 = vld [vmem:[%s15103_s1 + $0x19e0] ss:$16 sps:$4 sm:$0xff]  }
 0x306   : > { %5935 = vmatpush2.bf16.msra.mxu0 %v11176_v18  ;;  %v11244_v18 = vld [vmem:[%s15103_s1 + $0x19c4] ss:$16 sps:$4 sm:$0xff]  }
 0x307   : > { %5976 = vmatpush2.bf16.msra.mxu1 %v11179_v19  ;;  %5936 = vmatprep.subr.bf16.mxu0 %v11184_v24  ;;  %v11247_v19 = vld [vmem:[%s15103_s1 + $0x1bc4] ss:$16 sps:$4 sm:$0xff]   ;;  %v11242_v24 = vld [vmem:[%s15103_s1 + $0x19c0] ss:$16 sps:$4 sm:$0xff]  }
 0x308   : > { %5977 = vmatprep.subr.bf16.mxu1 %v11187_v26  ;;  %v11245_v26 = vld [vmem:[%s15103_s1 + $0x1bc0] ss:$16 sps:$4 sm:$0xff]  }
 0x30a   : > { %5937 = vmatpush2.bf16.msra.mxu0 %v11182_v61  ;;  %v11250_v61 = vld [vmem:[%s15103_s1 + $0x19a4] ss:$16 sps:$4 sm:$0xff]  }
 0x30b   : > { %5978 = vmatpush2.bf16.msra.mxu1 %v11185_v60  ;;  %7612 = vmatprep.subr.bf16.mxu0 %v11190_v29  ;;  %v11253_v60 = vld [vmem:[%s15103_s1 + $0x1ba4] ss:$16 sps:$4 sm:$0xff]   ;;  %v11248_v29 = vld [vmem:[%s15103_s1 + $0x19a0] ss:$16 sps:$4 sm:$0xff]  }
 0x30c   : > { %7653 = vmatprep.subr.bf16.mxu1 %v11193_v17  ;;  %v11251_v17 = vld [vmem:[%s15103_s1 + $0x1ba0] ss:$16 sps:$4 sm:$0xff]  }
 0x30d   : > { %v5694_v38 = vpop.f32.mrf.mxu0  ;;  %5939 = vmatmul.mubr.bf16.vlgmr.msra.gmra.mxu0 %v13742_v6  ;;  %v11202_v6 = vld [vmem:[%s15103_s1 + $0x18a4] ss:$16 sps:$4 sm:$0xff]  }
 0x30e   : > { %v5735_v40 = vpop.f32.mrf.mxu1  ;;  %5980 = vmatmul.mubr.bf16.vlgmr.msra.gmra.mxu1 %v13758_v9  ;;  %7613 = vmatpush1.bf16.msra.mxu0 %v11188_v63  ;;  %v11205_v9 = vld [vmem:[%s15103_s1 + $0x1aa4] ss:$16 sps:$4 sm:$0xff]  }
 0x30f   : > { %v14195_v10 = vadd.f32 %v5735_v40, %v5694_v38  ;;  %7654 = vmatpush1.bf16.msra.mxu1 %v11191_v30  ;;  %v5696_v45 = vpop.f32.mrf.mxu0  ;;  %7614 = vmatprep.subr.bf16.mxu0 %v11196_v31  ;;  %v11259_v63 = vld [vmem:[%s15103_s1 + $0x1b84] ss:$16 sps:$4 sm:$0xff]   ;;  %v11254_v30 = vld [vmem:[%s15103_s1 + $0x1980] ss:$16 sps:$4 sm:$0xff]   ;;  %v6251_v40 = vcombine.high %v14117_v5, %v14117_v5 }
 0x310   : > { %v5737_v46 = vpop.f32.mrf.mxu1  ;;  %7655 = vmatprep.subr.bf16.mxu1 %v11199_v32  ;;  %7644 = vmatprep.mubr.bf16.mxu0 %v6304_v36  ;;  %v11257_v31 = vld [vmem:[%s15103_s1 + $0x1b80] ss:$16 sps:$4 sm:$0xff]   ;;  %v11262_v32 = vld [vmem:[%s15103_s1 + $0x1964] ss:$16 sps:$4 sm:$0xff]  }
 0x311   : > { %v14209_v48 = vadd.f32 %v5737_v46, %v5696_v45  ;;  %7685 = vmatprep.mubr.bf16.mxu1 %v14191_v3  ;;  %v5698_v13 = vpop.f32.mrf.mxu0  ;;  %v11265_v38 = vld [vmem:[%s15103_s1 + $0x1b64] ss:$16 sps:$4 sm:$0xff]   ;;  %v14349_v46 = vrot.slane %v6251_v40, %v11788_v49  ;;  %v11308_v40 = vld [vmem:[%s15103_s1 + $0x1c60] ss:$16 sps:$4 sm:$0xff]  }
 0x312   : > { %v5739_v50 = vpop.f32.mrf.mxu1  ;;  %7615 = vmatpush1.bf16.msra.mxu0 %v11194_v16  ;;  %v11260_v16 = vld [vmem:[%s15103_s1 + $0x1960] ss:$16 sps:$4 sm:$0xff]   ;;  %v11268_v45 = vld [vmem:[%s15103_s1 + $0x1944] ss:$16 sps:$4 sm:$0xff]  }
 0x313   : > { %7656 = vmatpush1.bf16.msra.mxu1 %v11197_v62  ;;  %v5699_v52 = vpop.f32.mrf.mxu0  ;;  %7616 = vmatprep.subr.bf16.mxu0 %v11202_v6  ;;  %v11263_v62 = vld [vmem:[%s15103_s1 + $0x1b60] ss:$16 sps:$4 sm:$0xff]   ;;  %v11271_v5 = vld [vmem:[%s15103_s1 + $0x1b44] ss:$16 sps:$4 sm:$0xff]  }
 0x314   : > { %v5740_v53 = vpop.f32.mrf.mxu1  ;;  %7657 = vmatprep.subr.bf16.mxu1 %v11205_v9  ;;  %v11266_v6 = vld [vmem:[%s15103_s1 + $0x1940] ss:$16 sps:$4 sm:$0xff]   ;;  %v11274_v13 = vld [vmem:[%s15103_s1 + $0x1924] ss:$16 sps:$4 sm:$0xff]  }
 0x315   : > { %v11269_v9 = vld [vmem:[%s15103_s1 + $0x1b40] ss:$16 sps:$4 sm:$0xff]   ;;  %v11277_v50 = vld [vmem:[%s15103_s1 + $0x1b24] ss:$16 sps:$4 sm:$0xff]  }
 0x316   : > { %7617 = vmatpush1.bf16.msra.mxu0 %v11200_v15  ;;  %v6267_v15 = vcombine.high %v14349_v46, %v14349_v46  ;;  %v11272_v52 = vld [vmem:[%s15103_s1 + $0x1920] ss:$16 sps:$4 sm:$0xff]  }
 0x317   : > { %7658 = vmatpush1.bf16.msra.mxu1 %v11203_v21  ;;  %7618 = vmatprep.subr.bf16.mxu0 %v11208_v54  ;;  %v14367_v21 = vrot.slane %v14133_v8, %v11788_v49  ;;  %v11275_v53 = vld [vmem:[%s15103_s1 + $0x1b20] ss:$16 sps:$4 sm:$0xff]   ;;  %v11280_v54 = vld [vmem:[%s15103_s1 + $0x1904] ss:$16 sps:$4 sm:$0xff]  }
 0x318   : > { %7659 = vmatprep.subr.bf16.mxu1 %v11211_v56  ;;  %v11283_v8 = vld [vmem:[%s15103_s1 + $0x1b04] ss:$16 sps:$4 sm:$0xff]   ;;  %v14382_v56 = vrot.slane %v6267_v15, %v11788_v49  ;;  %v11323_v15 = vld [vmem:[%s15103_s1 + $0x1e20] ss:$16 sps:$4 sm:$0xff]  }
 0x31a   : > { %7619 = vmatpush1.bf16.msra.mxu0 %v11206_v1  ;;  %v6296_v1 = vcombine.high %v14367_v21, %v14367_v21 }
 0x31b   : > { %7660 = vmatpush1.bf16.msra.mxu1 %v11209_v41  ;;  %7620 = vmatprep.subr.bf16.mxu0 %v11214_v57  ;;  %v11278_v41 = vld [vmem:[%s15103_s1 + $0x1900] ss:$16 sps:$4 sm:$0xff]  }
 0x31c   : > { %7661 = vmatprep.subr.bf16.mxu1 %v11217_v59  ;;  %v11281_v57 = vld [vmem:[%s15103_s1 + $0x1b00] ss:$16 sps:$4 sm:$0xff]   ;;  %v11286_v59 = vld [vmem:[%s15103_s1 + $0x1ce4] ss:$16 sps:$4 sm:$0xff]  }
 0x31e   : > { %7621 = vmatpush1.bf16.msra.mxu0 %v11212_v44  ;;  %v11289_v44 = vld [vmem:[%s15103_s1 + $0x1ee4] ss:$16 sps:$4 sm:$0xff]  }
 0x31f   : > { %7662 = vmatpush1.bf16.msra.mxu1 %v11215_v34  ;;  %7622 = vmatprep.subr.bf16.mxu0 %v11220_v33  ;;  %v6299_v34 = vcombine.high %v14382_v56, %v14382_v56  ;;  %v6301_v33 = vshrl.u32 %v14367_v21, 16  ;;  %v11491_v21 = vld [vmem:[%s15103_s1 + $0x1cac] ss:$16 sps:$4 sm:$0xff]  }
 0x320   : > { %7663 = vmatprep.subr.bf16.mxu1 %v11223_v37  ;;  %v14401_v37 = vshrl.u32 %v6296_v1, 16  ;;  %v11334_v1 = vld [vmem:[%s15103_s1 + $0x1de4] ss:$16 sps:$4 sm:$0xff]  }
 0x322   : > { %7623 = vmatpush1.bf16.msra.mxu0 %v11218_v47  ;;  %v11284_v47 = vld [vmem:[%s15103_s1 + $0x1ce0] ss:$16 sps:$4 sm:$0xff]  }
 0x323   : > { %7664 = vmatpush1.bf16.msra.mxu1 %v11221_v51  ;;  %7624 = vmatprep.subr.bf16.mxu0 %v11226_v20  ;;  %v11287_v51 = vld [vmem:[%s15103_s1 + $0x1ee0] ss:$16 sps:$4 sm:$0xff]   ;;  %v11292_v20 = vld [vmem:[%s15103_s1 + $0x1cc4] ss:$16 sps:$4 sm:$0xff]  }
 0x324   : > { %7665 = vmatprep.subr.bf16.mxu1 %v11229_v55  ;;  %v11295_v55 = vld [vmem:[%s15103_s1 + $0x1ec4] ss:$16 sps:$4 sm:$0xff]  }
 0x326   : > { %7625 = vmatpush1.bf16.msra.mxu0 %v11224_v0  ;;  %v6316_v0 = vshrl.u32 %v14382_v56, 16 }
 0x327   : > { %7666 = vmatpush1.bf16.msra.mxu1 %v11227_v58  ;;  %7626 = vmatprep.subr.bf16.mxu0 %v11232_v22  ;;  %v14416_v58 = vshrl.u32 %v6299_v34, 16  ;;  %v11343_v34 = vld [vmem:[%s15103_s1 + $0x1fc4] ss:$16 sps:$4 sm:$0xff]  }
 0x328   : > { %7667 = vmatprep.subr.bf16.mxu1 %v11235_v23 }
 0x32a   : > { %7627 = vmatpush1.bf16.msra.mxu0 %v11230_v39 }
 0x32b   : > { %7668 = vmatpush1.bf16.msra.mxu1 %v11233_v28  ;;  %7628 = vmatprep.subr.bf16.mxu0 %v11238_v12  ;;  %v11290_v28 = vld [vmem:[%s15103_s1 + $0x1cc0] ss:$16 sps:$4 sm:$0xff]  }
 0x32c   : > { %7669 = vmatprep.subr.bf16.mxu1 %v11241_v14  ;;  %v11293_v12 = vld [vmem:[%s15103_s1 + $0x1ec0] ss:$16 sps:$4 sm:$0xff]  }
 0x32e   : > { %7629 = vmatpush2.bf16.msra.mxu0 %v11236_v7 }
 0x32f   : > { %7670 = vmatpush2.bf16.msra.mxu1 %v11239_v11  ;;  %7630 = vmatprep.subr.bf16.mxu0 %v11244_v18  ;;  %v11298_v11 = vld [vmem:[%s15103_s1 + $0x1ca4] ss:$16 sps:$4 sm:$0xff]  }
 0x330   : > { %7671 = vmatprep.subr.bf16.mxu1 %v11247_v19 }
 0x332   : > { %7631 = vmatpush2.bf16.msra.mxu0 %v11242_v24 }
 0x333   : > { %7672 = vmatpush2.bf16.msra.mxu1 %v11245_v26  ;;  %7632 = vmatprep.subr.bf16.mxu0 %v11250_v61 }
 0x334   : > { %7673 = vmatprep.subr.bf16.mxu1 %v11253_v60 }
 0x336   : > { %7633 = vmatpush2.bf16.msra.mxu0 %v11248_v29  ;;  %v11296_v29 = vld [vmem:[%s15103_s1 + $0x1ca0] ss:$16 sps:$4 sm:$0xff]  }
 0x337   : > { %7674 = vmatpush2.bf16.msra.mxu1 %v11251_v17  ;;  %7634 = vmatprep.subr.bf16.mxu0 %v11256_v2 }
 0x338   : > { %7675 = vmatprep.subr.bf16.mxu1 %v11259_v63  ;;  %v11307_v63 = vld [vmem:[%s15103_s1 + $0x1e84] ss:$16 sps:$4 sm:$0xff]  }
 0x33a   : > { %7635 = vmatpush2.bf16.msra.mxu0 %v11254_v30 }
 0x33b   : > { %7676 = vmatpush2.bf16.msra.mxu1 %v11257_v31  ;;  %7636 = vmatprep.subr.bf16.mxu0 %v11262_v32  ;;  %v11302_v31 = vld [vmem:[%s15103_s1 + $0x1c80] ss:$16 sps:$4 sm:$0xff]  }
 0x33c   : > { %7677 = vmatprep.subr.bf16.mxu1 %v11265_v38  ;;  %v11305_v32 = vld [vmem:[%s15103_s1 + $0x1e80] ss:$16 sps:$4 sm:$0xff]   ;;  %v11310_v38 = vld [vmem:[%s15103_s1 + $0x1c64] ss:$16 sps:$4 sm:$0xff]  }
 0x33e   : > { %7637 = vmatpush2.bf16.msra.mxu0 %v11260_v16  ;;  %v11311_v16 = vld [vmem:[%s15103_s1 + $0x1e60] ss:$16 sps:$4 sm:$0xff]  }
 0x33f   : > { %7678 = vmatpush2.bf16.msra.mxu1 %v11263_v62  ;;  %7638 = vmatprep.subr.bf16.mxu0 %v11268_v45  ;;  %v11316_v62 = vld [vmem:[%s15103_s1 + $0x1c44] ss:$16 sps:$4 sm:$0xff]  }
 0x340   : > { %7679 = vmatprep.subr.bf16.mxu1 %v11271_v5  ;;  %v11319_v45 = vld [vmem:[%s15103_s1 + $0x1e44] ss:$16 sps:$4 sm:$0xff]   ;;  %v11314_v5 = vld [vmem:[%s15103_s1 + $0x1c40] ss:$16 sps:$4 sm:$0xff]  }
 0x342   : > { %7639 = vmatpush2.bf16.msra.mxu0 %v11266_v6  ;;  %v11317_v6 = vld [vmem:[%s15103_s1 + $0x1e40] ss:$16 sps:$4 sm:$0xff]  }
 0x343   : > { %7680 = vmatpush2.bf16.msra.mxu1 %v11269_v9  ;;  %7640 = vmatprep.subr.bf16.mxu0 %v11274_v13  ;;  %v11322_v9 = vld [vmem:[%s15103_s1 + $0x1c24] ss:$16 sps:$4 sm:$0xff]  }
 0x344   : > { %7681 = vmatprep.subr.bf16.mxu1 %v11277_v50  ;;  %v11325_v13 = vld [vmem:[%s15103_s1 + $0x1e24] ss:$16 sps:$4 sm:$0xff]   ;;  %v11320_v50 = vld [vmem:[%s15103_s1 + $0x1c20] ss:$16 sps:$4 sm:$0xff]  }
 0x346   : > { %7641 = vmatpush2.bf16.msra.mxu0 %v11272_v52  ;;  %v11328_v52 = vld [vmem:[%s15103_s1 + $0x1c04] ss:$16 sps:$4 sm:$0xff]  }
 0x347   : > { %7682 = vmatpush2.bf16.msra.mxu1 %v11275_v53  ;;  %7642 = vmatprep.subr.bf16.mxu0 %v11280_v54  ;;  %v11331_v53 = vld [vmem:[%s15103_s1 + $0x1e04] ss:$16 sps:$4 sm:$0xff]   ;;  %v11326_v54 = vld [vmem:[%s15103_s1 + $0x1c00] ss:$16 sps:$4 sm:$0xff]  }
 0x348   : > { %7683 = vmatprep.subr.bf16.mxu1 %v11283_v8  ;;  %v11329_v8 = vld [vmem:[%s15103_s1 + $0x1e00] ss:$16 sps:$4 sm:$0xff]  }
 0x34a   : > { %7643 = vmatpush2.bf16.msra.mxu0 %v11278_v41  ;;  %v11337_v41 = vld [vmem:[%s15103_s1 + $0x1fe4] ss:$16 sps:$4 sm:$0xff]  }
 0x34b   : > { %7684 = vmatpush2.bf16.msra.mxu1 %v11281_v57  ;;  %7694 = vmatprep.subr.bf16.mxu0 %v11286_v59  ;;  %v11332_v57 = vld [vmem:[%s15103_s1 + $0x1de0] ss:$16 sps:$4 sm:$0xff]  }
 0x34c   : > { %7735 = vmatprep.subr.bf16.mxu1 %v11289_v44  ;;  %v11335_v59 = vld [vmem:[%s15103_s1 + $0x1fe0] ss:$16 sps:$4 sm:$0xff]   ;;  %v11340_v44 = vld [vmem:[%s15103_s1 + $0x1dc4] ss:$16 sps:$4 sm:$0xff]  }
 0x34d   : > { %v5776_v22 = vpop.f32.mrf.mxu0  ;;  %7645 = vmatmul.mubr.bf16.vlgmr.msra.gmra.mxu0 %v6301_v33 }
 0x34e   : > { %v5817_v23 = vpop.f32.mrf.mxu1  ;;  %7686 = vmatmul.mubr.bf16.vlgmr.msra.gmra.mxu1 %v14401_v37  ;;  %v5777_v39 = vadd.f32 %v5776_v22, %v14195_v10  ;;  %7695 = vmatpush1.bf16.msra.mxu0 %v11284_v47  ;;  %v11301_v10 = vld [vmem:[%s15103_s1 + $0x1ea4] ss:$16 sps:$4 sm:$0xff]   ;;  %v11338_v47 = vld [vmem:[%s15103_s1 + $0x1dc0] ss:$16 sps:$4 sm:$0xff]  }
 0x34f   : > { %7736 = vmatpush1.bf16.msra.mxu1 %v11287_v51  ;;  %v5778_v14 = vpop.f32.mrf.mxu0  ;;  %7696 = vmatprep.subr.bf16.mxu0 %v11292_v20  ;;  %v11341_v51 = vld [vmem:[%s15103_s1 + $0x1fc0] ss:$16 sps:$4 sm:$0xff]   ;;  %v11346_v20 = vld [vmem:[%s15103_s1 + $0x1da4] ss:$16 sps:$4 sm:$0xff]  }
 0x350   : > { %v5819_v7 = vpop.f32.mrf.mxu1  ;;  %7737 = vmatprep.subr.bf16.mxu1 %v11295_v55  ;;  %v5818_v18 = vadd.f32 %v5817_v23, %v5777_v39  ;;  %v5779_v19 = vadd.f32 %v5778_v14, %v14209_v48  ;;  %7726 = vmatprep.mubr.bf16.mxu0 %v6316_v0  ;;  %v11299_v48 = vld [vmem:[%s15103_s1 + $0x1ea0] ss:$16 sps:$4 sm:$0xff]   ;;  %v11349_v55 = vld [vmem:[%s15103_s1 + $0x1fa4] ss:$16 sps:$4 sm:$0xff]  }
 0x351   : > { %7767 = vmatprep.mubr.bf16.mxu1 %v14416_v58  ;;  %v5780_v24 = vpop.f32.mrf.mxu0  ;;  %v11344_v22 = vld [vmem:[%s15103_s1 + $0x1da0] ss:$16 sps:$4 sm:$0xff]   ;;  %v11352_v39 = vld [vmem:[%s15103_s1 + $0x1d84] ss:$16 sps:$4 sm:$0xff]  }
 0x352   : > { %v5821_v26 = vpop.f32.mrf.mxu1  ;;  %v14439_v61 = vadd.f32 %v5818_v18, %v13577_v27  ;;  %v5820_v60 = vadd.f32 %v5819_v7, %v5779_v19  ;;  %7697 = vmatpush1.bf16.msra.mxu0 %v11290_v28  ;;  %v11304_v27 = vld [vmem:[%s15103_s1 + $0x1c84] ss:$16 sps:$4 sm:$0xff]   ;;  %v11347_v23 = vld [vmem:[%s15103_s1 + $0x1fa0] ss:$16 sps:$4 sm:$0xff]  }
 0x353   : > { %7738 = vmatpush1.bf16.msra.mxu1 %v11293_v12  ;;  %v5781_v17 = vpop.f32.mrf.mxu0  ;;  %7698 = vmatprep.subr.bf16.mxu0 %v11298_v11  ;;  %v11355_v28 = vld [vmem:[%s15103_s1 + $0x1f84] ss:$16 sps:$4 sm:$0xff]   ;;  %v11350_v12 = vld [vmem:[%s15103_s1 + $0x1d80] ss:$16 sps:$4 sm:$0xff]  }
 0x354   : > { %v5822_v2 = vpop.f32.mrf.mxu1  ;;  %7739 = vmatprep.subr.bf16.mxu1 %v11301_v10  ;;  %v14454_v30 = vadd.f32 %v5820_v60, %v13582_v35  ;;  %v11313_v35 = vld [vmem:[%s15103_s1 + $0x1e64] ss:$16 sps:$4 sm:$0xff]   ;;  %v11353_v14 = vld [vmem:[%s15103_s1 + $0x1f80] ss:$16 sps:$4 sm:$0xff]   ;;  %v14590_v17 = vrot.slane %v14349_v46, %v11788_v49 }
 0x355   : > { %v11358_v7 = vld [vmem:[%s15103_s1 + $0x1d64] ss:$16 sps:$4 sm:$0xff]   ;;  %v11356_v10 = vld [vmem:[%s15103_s1 + $0x1d60] ss:$16 sps:$4 sm:$0xff]  }
 0x356   : > { %7699 = vmatpush1.bf16.msra.mxu0 %v11296_v29  ;;  %v11361_v11 = vld [vmem:[%s15103_s1 + $0x1f64] ss:$16 sps:$4 sm:$0xff]   ;;  %v11359_v18 = vld [vmem:[%s15103_s1 + $0x1f60] ss:$16 sps:$4 sm:$0xff]  }
 0x357   : > { %7740 = vmatpush1.bf16.msra.mxu1 %v11299_v48  ;;  %7700 = vmatprep.subr.bf16.mxu0 %v11304_v27  ;;  %v11364_v19 = vld [vmem:[%s15103_s1 + $0x1d44] ss:$16 sps:$4 sm:$0xff]   ;;  %v11362_v26 = vld [vmem:[%s15103_s1 + $0x1d40] ss:$16 sps:$4 sm:$0xff]  }
 0x358   : > { %7741 = vmatprep.subr.bf16.mxu1 %v11307_v63  ;;  %v11367_v24 = vld [vmem:[%s15103_s1 + $0x1f44] ss:$16 sps:$4 sm:$0xff]   ;;  %v11365_v60 = vld [vmem:[%s15103_s1 + $0x1f40] ss:$16 sps:$4 sm:$0xff]  }
 0x359   : > { %v11370_v29 = vld [vmem:[%s15103_s1 + $0x1d24] ss:$16 sps:$4 sm:$0xff]   ;;  %v11368_v2 = vld [vmem:[%s15103_s1 + $0x1d20] ss:$16 sps:$4 sm:$0xff]  }
 0x35a   : > { %7701 = vmatpush1.bf16.msra.mxu0 %v11302_v31  ;;  %v11373_v48 = vld [vmem:[%s15103_s1 + $0x1f24] ss:$16 sps:$4 sm:$0xff]   ;;  %v11371_v27 = vld [vmem:[%s15103_s1 + $0x1f20] ss:$16 sps:$4 sm:$0xff]   ;;  %v6297_v31 = vcombine.high %v14590_v17, %v14590_v17 }
 0x35b   : > { %7742 = vmatpush1.bf16.msra.mxu1 %v11305_v32  ;;  %7702 = vmatprep.subr.bf16.mxu0 %v11310_v38  ;;  %v11376_v63 = vld [vmem:[%s15103_s1 + $0x1d04] ss:$16 sps:$4 sm:$0xff]   ;;  %v11374_v32 = vld [vmem:[%s15103_s1 + $0x1d00] ss:$16 sps:$4 sm:$0xff]  }
 0x35c   : > { %7743 = vmatprep.subr.bf16.mxu1 %v11313_v35  ;;  %v11379_v46 = vld [vmem:[%s15103_s1 + $0x1f04] ss:$16 sps:$4 sm:$0xff]   ;;  %v11377_v38 = vld [vmem:[%s15103_s1 + $0x1f00] ss:$16 sps:$4 sm:$0xff]   ;;  %v11383_v35 = vld [vmem:[%s15103_s1 + $0x18ec] ss:$16 sps:$4 sm:$0xff]  }
 0x35e   : > { %7703 = vmatpush1.bf16.msra.mxu0 %v11308_v40  ;;  %v11386_v40 = vld [vmem:[%s15103_s1 + $0x1aec] ss:$16 sps:$4 sm:$0xff]  }
 0x35f   : > { %7744 = vmatpush1.bf16.msra.mxu1 %v11311_v16  ;;  %7704 = vmatprep.subr.bf16.mxu0 %v11316_v62  ;;  %v6313_v16 = vshrl.u32 %v14590_v17, 16  ;;  %v14619_v62 = vshrl.u32 %v6297_v31, 16  ;;  %v11437_v31 = vld [vmem:[%s15103_s1 + $0x19cc] ss:$16 sps:$4 sm:$0xff]  }
 0x360   : > { %7745 = vmatprep.subr.bf16.mxu1 %v11319_v45  ;;  %v11381_v45 = vld [vmem:[%s15103_s1 + $0x18e8] ss:$16 sps:$4 sm:$0xff]  }
 0x362   : > { %7705 = vmatpush1.bf16.msra.mxu0 %v11314_v5  ;;  %v11384_v5 = vld [vmem:[%s15103_s1 + $0x1ae8] ss:$16 sps:$4 sm:$0xff]  }
 0x363   : > { %7746 = vmatpush1.bf16.msra.mxu1 %v11317_v6  ;;  %7706 = vmatprep.subr.bf16.mxu0 %v11322_v9  ;;  %v11389_v6 = vld [vmem:[%s15103_s1 + $0x18cc] ss:$16 sps:$4 sm:$0xff]  }
 0x364   : > { %7747 = vmatprep.subr.bf16.mxu1 %v11325_v13  ;;  %v11392_v9 = vld [vmem:[%s15103_s1 + $0x1acc] ss:$16 sps:$4 sm:$0xff]  }
 0x366   : > { %7707 = vmatpush1.bf16.msra.mxu0 %v11320_v50 }
 0x367   : > { %7748 = vmatpush1.bf16.msra.mxu1 %v11323_v15  ;;  %7708 = vmatprep.subr.bf16.mxu0 %v11328_v52  ;;  %v11387_v52 = vld [vmem:[%s15103_s1 + $0x18c8] ss:$16 sps:$4 sm:$0xff]  }
 0x368   : > { %7749 = vmatprep.subr.bf16.mxu1 %v11331_v53  ;;  %v11390_v53 = vld [vmem:[%s15103_s1 + $0x1ac8] ss:$16 sps:$4 sm:$0xff]  }
 0x36a   : > { %7709 = vmatpush1.bf16.msra.mxu0 %v11326_v54 }
 0x36b   : > { %7750 = vmatpush1.bf16.msra.mxu1 %v11329_v8  ;;  %7710 = vmatprep.subr.bf16.mxu0 %v11334_v1  ;;  %v11395_v1 = vld [vmem:[%s15103_s1 + $0x18ac] ss:$16 sps:$4 sm:$0xff]  }
 0x36c   : > { %7751 = vmatprep.subr.bf16.mxu1 %v11337_v41  ;;  %v11398_v41 = vld [vmem:[%s15103_s1 + $0x1aac] ss:$16 sps:$4 sm:$0xff]  }
 0x36e   : > { %7711 = vmatpush2.bf16.msra.mxu0 %v11332_v57 }
 0x36f   : > { %7752 = vmatpush2.bf16.msra.mxu1 %v11335_v59  ;;  %7712 = vmatprep.subr.bf16.mxu0 %v11340_v44 }
 0x370   : > { %7753 = vmatprep.subr.bf16.mxu1 %v11343_v34  ;;  %v11393_v34 = vld [vmem:[%s15103_s1 + $0x18a8] ss:$16 sps:$4 sm:$0xff]  }
 0x372   : > { %7713 = vmatpush2.bf16.msra.mxu0 %v11338_v47  ;;  %v11396_v47 = vld [vmem:[%s15103_s1 + $0x1aa8] ss:$16 sps:$4 sm:$0xff]  }
 0x373   : > { %7754 = vmatpush2.bf16.msra.mxu1 %v11341_v51  ;;  %7714 = vmatprep.subr.bf16.mxu0 %v11346_v20 }
 0x374   : > { %7755 = vmatprep.subr.bf16.mxu1 %v11349_v55  ;;  %v11402_v55 = vld [vmem:[%s15103_s1 + $0x1a88] ss:$16 sps:$4 sm:$0xff]  }
 0x376   : > { %7715 = vmatpush2.bf16.msra.mxu0 %v11344_v22  ;;  %v11407_v22 = vld [vmem:[%s15103_s1 + $0x186c] ss:$16 sps:$4 sm:$0xff]  }
 0x377   : > { %7756 = vmatpush2.bf16.msra.mxu1 %v11347_v23  ;;  %7716 = vmatprep.subr.bf16.mxu0 %v11352_v39  ;;  %v11410_v23 = vld [vmem:[%s15103_s1 + $0x1a6c] ss:$16 sps:$4 sm:$0xff]   ;;  %v11405_v39 = vld [vmem:[%s15103_s1 + $0x1868] ss:$16 sps:$4 sm:$0xff]  }
 0x378   : > { %7757 = vmatprep.subr.bf16.mxu1 %v11355_v28  ;;  %v11408_v28 = vld [vmem:[%s15103_s1 + $0x1a68] ss:$16 sps:$4 sm:$0xff]  }
 0x37a   : > { %7717 = vmatpush2.bf16.msra.mxu0 %v11350_v12  ;;  %v11413_v12 = vld [vmem:[%s15103_s1 + $0x184c] ss:$16 sps:$4 sm:$0xff]  }
 0x37b   : > { %7758 = vmatpush2.bf16.msra.mxu1 %v11353_v14  ;;  %7718 = vmatprep.subr.bf16.mxu0 %v11358_v7  ;;  %v11416_v14 = vld [vmem:[%s15103_s1 + $0x1a4c] ss:$16 sps:$4 sm:$0xff]   ;;  %v11411_v7 = vld [vmem:[%s15103_s1 + $0x1848] ss:$16 sps:$4 sm:$0xff]  }
 0x37c   : > { %7759 = vmatprep.subr.bf16.mxu1 %v11361_v11  ;;  %v11414_v11 = vld [vmem:[%s15103_s1 + $0x1a48] ss:$16 sps:$4 sm:$0xff]  }
 0x37e   : > { %7719 = vmatpush2.bf16.msra.mxu0 %v11356_v10  ;;  %v11419_v10 = vld [vmem:[%s15103_s1 + $0x182c] ss:$16 sps:$4 sm:$0xff]  }
 0x37f   : > { %7760 = vmatpush2.bf16.msra.mxu1 %v11359_v18  ;;  %7720 = vmatprep.subr.bf16.mxu0 %v11364_v19  ;;  %v11422_v18 = vld [vmem:[%s15103_s1 + $0x1a2c] ss:$16 sps:$4 sm:$0xff]   ;;  %v11417_v19 = vld [vmem:[%s15103_s1 + $0x1828] ss:$16 sps:$4 sm:$0xff]  }
 0x380   : > { %7761 = vmatprep.subr.bf16.mxu1 %v11367_v24  ;;  %v11420_v24 = vld [vmem:[%s15103_s1 + $0x1a28] ss:$16 sps:$4 sm:$0xff]  }
 0x382   : > { %7721 = vmatpush2.bf16.msra.mxu0 %v11362_v26  ;;  %v11425_v26 = vld [vmem:[%s15103_s1 + $0x180c] ss:$16 sps:$4 sm:$0xff]  }
 0x383   : > { %7762 = vmatpush2.bf16.msra.mxu1 %v11365_v60  ;;  %7722 = vmatprep.subr.bf16.mxu0 %v11370_v29  ;;  %v11428_v60 = vld [vmem:[%s15103_s1 + $0x1a0c] ss:$16 sps:$4 sm:$0xff]   ;;  %v11423_v29 = vld [vmem:[%s15103_s1 + $0x1808] ss:$16 sps:$4 sm:$0xff]  }
 0x384   : > { %7763 = vmatprep.subr.bf16.mxu1 %v11373_v48  ;;  %v11426_v48 = vld [vmem:[%s15103_s1 + $0x1a08] ss:$16 sps:$4 sm:$0xff]  }
 0x386   : > { %7723 = vmatpush2.bf16.msra.mxu0 %v11368_v2  ;;  %v11431_v2 = vld [vmem:[%s15103_s1 + $0x19ec] ss:$16 sps:$4 sm:$0xff]  }
 0x387   : > { %7764 = vmatpush2.bf16.msra.mxu1 %v11371_v27  ;;  %7724 = vmatprep.subr.bf16.mxu0 %v11376_v63  ;;  %v11434_v27 = vld [vmem:[%s15103_s1 + $0x1bec] ss:$16 sps:$4 sm:$0xff]   ;;  %v11429_v63 = vld [vmem:[%s15103_s1 + $0x19e8] ss:$16 sps:$4 sm:$0xff]  }
 0x388   : > { %7765 = vmatprep.subr.bf16.mxu1 %v11379_v46  ;;  %v11432_v46 = vld [vmem:[%s15103_s1 + $0x1be8] ss:$16 sps:$4 sm:$0xff]  }
 0x38a   : > { %7725 = vmatpush2.bf16.msra.mxu0 %v11374_v32  ;;  %v11440_v32 = vld [vmem:[%s15103_s1 + $0x1bcc] ss:$16 sps:$4 sm:$0xff]  }
 0x38b   : > { %7766 = vmatpush2.bf16.msra.mxu1 %v11377_v38  ;;  %7776 = vmatprep.subr.bf16.mxu0 %v11383_v35  ;;  %v11435_v38 = vld [vmem:[%s15103_s1 + $0x19c8] ss:$16 sps:$4 sm:$0xff]  }
 0x38c   : > { %7817 = vmatprep.subr.bf16.mxu1 %v11386_v40  ;;  %v11438_v35 = vld [vmem:[%s15103_s1 + $0x1bc8] ss:$16 sps:$4 sm:$0xff]   ;;  %v11443_v40 = vld [vmem:[%s15103_s1 + $0x19ac] ss:$16 sps:$4 sm:$0xff]  }
 0x38d   : > { %v5858_v13 = vpop.f32.mrf.mxu0  ;;  %7727 = vmatmul.mubr.bf16.vlgmr.msra.gmra.mxu0 %v6313_v16 }
 0x38e   : > { %v5899_v50 = vpop.f32.mrf.mxu1  ;;  %7768 = vmatmul.mubr.bf16.vlgmr.msra.gmra.mxu1 %v14619_v62  ;;  %7777 = vmatpush1.bf16.msra.mxu0 %v11381_v45  ;;  %v11446_v45 = vld [vmem:[%s15103_s1 + $0x1bac] ss:$16 sps:$4 sm:$0xff]  }
 0x38f   : > { %v14636_v15 = vadd.f32 %v5899_v50, %v5858_v13  ;;  %7818 = vmatpush1.bf16.msra.mxu1 %v11384_v5  ;;  %v5860_v54 = vpop.f32.mrf.mxu0  ;;  %7778 = vmatprep.subr.bf16.mxu0 %v11389_v6  ;;  %v11441_v5 = vld [vmem:[%s15103_s1 + $0x19a8] ss:$16 sps:$4 sm:$0xff]   ;;  %v11452_v13 = vld [vmem:[%s15103_s1 + $0x1b8c] ss:$16 sps:$4 sm:$0xff]  }
 0x390   : > { %v5901_v8 = vpop.f32.mrf.mxu1  ;;  %7819 = vmatprep.subr.bf16.mxu1 %v11392_v9  ;;  %7808 = vmatprep.mubr.bf16.mxu0 %v6304_v36  ;;  %v11404_v36 = vld [vmem:[%s15103_s1 + $0x1a8c] ss:$16 sps:$4 sm:$0xff]   ;;  %v11444_v6 = vld [vmem:[%s15103_s1 + $0x1ba8] ss:$16 sps:$4 sm:$0xff]  }
 0x391   : > { %v14650_v57 = vadd.f32 %v5901_v8, %v5860_v54  ;;  %7849 = vmatprep.mubr.bf16.mxu1 %v14191_v3  ;;  %v5862_v59 = vpop.f32.mrf.mxu0  ;;  %v11399_v3 = vld [vmem:[%s15103_s1 + $0x1888] ss:$16 sps:$4 sm:$0xff]   ;;  %v11449_v9 = vld [vmem:[%s15103_s1 + $0x198c] ss:$16 sps:$4 sm:$0xff]  }
 0x392   : > { %v5903_v44 = vpop.f32.mrf.mxu1  ;;  %7779 = vmatpush1.bf16.msra.mxu0 %v11387_v52  ;;  %v11447_v50 = vld [vmem:[%s15103_s1 + $0x1988] ss:$16 sps:$4 sm:$0xff]   ;;  %v11458_v54 = vld [vmem:[%s15103_s1 + $0x1b6c] ss:$16 sps:$4 sm:$0xff]  }
 0x393   : > { %7820 = vmatpush1.bf16.msra.mxu1 %v11390_v53  ;;  %v5863_v51 = vpop.f32.mrf.mxu0  ;;  %7780 = vmatprep.subr.bf16.mxu0 %v11395_v1  ;;  %v11450_v52 = vld [vmem:[%s15103_s1 + $0x1b88] ss:$16 sps:$4 sm:$0xff]   ;;  %v11455_v53 = vld [vmem:[%s15103_s1 + $0x196c] ss:$16 sps:$4 sm:$0xff]  }
 0x394   : > { %v5904_v20 = vpop.f32.mrf.mxu1  ;;  %7821 = vmatprep.subr.bf16.mxu1 %v11398_v41  ;;  %v11453_v8 = vld [vmem:[%s15103_s1 + $0x1968] ss:$16 sps:$4 sm:$0xff]   ;;  %v11461_v41 = vld [vmem:[%s15103_s1 + $0x194c] ss:$16 sps:$4 sm:$0xff]  }
 0x395   : > { %v11456_v1 = vld [vmem:[%s15103_s1 + $0x1b68] ss:$16 sps:$4 sm:$0xff]   ;;  %v11464_v59 = vld [vmem:[%s15103_s1 + $0x1b4c] ss:$16 sps:$4 sm:$0xff]  }
 0x396   : > { %7781 = vmatpush1.bf16.msra.mxu0 %v11393_v34  ;;  %v11459_v44 = vld [vmem:[%s15103_s1 + $0x1948] ss:$16 sps:$4 sm:$0xff]   ;;  %v11470_v51 = vld [vmem:[%s15103_s1 + $0x1b2c] ss:$16 sps:$4 sm:$0xff]  }
 0x397   : > { %7822 = vmatpush1.bf16.msra.mxu1 %v11396_v47  ;;  %7782 = vmatprep.subr.bf16.mxu0 %v11401_v42  ;;  %v11462_v34 = vld [vmem:[%s15103_s1 + $0x1b48] ss:$16 sps:$4 sm:$0xff]   ;;  %v11467_v47 = vld [vmem:[%s15103_s1 + $0x192c] ss:$16 sps:$4 sm:$0xff]  }
 0x398   : > { %7823 = vmatprep.subr.bf16.mxu1 %v11404_v36  ;;  %v11465_v20 = vld [vmem:[%s15103_s1 + $0x1928] ss:$16 sps:$4 sm:$0xff]   ;;  %v11473_v36 = vld [vmem:[%s15103_s1 + $0x190c] ss:$16 sps:$4 sm:$0xff]  }
 0x399   : > { %v11468_v42 = vld [vmem:[%s15103_s1 + $0x1b28] ss:$16 sps:$4 sm:$0xff]  }
 0x39a   : > { %7783 = vmatpush1.bf16.msra.mxu0 %v11399_v3  ;;  %v11476_v3 = vld [vmem:[%s15103_s1 + $0x1b0c] ss:$16 sps:$4 sm:$0xff]  }
 0x39b   : > { %7824 = vmatpush1.bf16.msra.mxu1 %v11402_v55  ;;  %7784 = vmatprep.subr.bf16.mxu0 %v11407_v22  ;;  %v11471_v55 = vld [vmem:[%s15103_s1 + $0x1908] ss:$16 sps:$4 sm:$0xff]  }
 0x39c   : > { %7825 = vmatprep.subr.bf16.mxu1 %v11410_v23  ;;  %v11474_v22 = vld [vmem:[%s15103_s1 + $0x1b08] ss:$16 sps:$4 sm:$0xff]   ;;  %v11479_v23 = vld [vmem:[%s15103_s1 + $0x1cec] ss:$16 sps:$4 sm:$0xff]  }
 0x39e   : > { %7785 = vmatpush1.bf16.msra.mxu0 %v11405_v39  ;;  %v11482_v39 = vld [vmem:[%s15103_s1 + $0x1eec] ss:$16 sps:$4 sm:$0xff]  }
 0x39f   : > { %7826 = vmatpush1.bf16.msra.mxu1 %v11408_v28  ;;  %7786 = vmatprep.subr.bf16.mxu0 %v11413_v12  ;;  %v11477_v28 = vld [vmem:[%s15103_s1 + $0x1ce8] ss:$16 sps:$4 sm:$0xff]  }
 0x3a0   : > { %7827 = vmatprep.subr.bf16.mxu1 %v11416_v14  ;;  %v11480_v12 = vld [vmem:[%s15103_s1 + $0x1ee8] ss:$16 sps:$4 sm:$0xff]   ;;  %v11485_v14 = vld [vmem:[%s15103_s1 + $0x1ccc] ss:$16 sps:$4 sm:$0xff]  }
 0x3a2   : > { %7787 = vmatpush1.bf16.msra.mxu0 %v11411_v7  ;;  %v11488_v7 = vld [vmem:[%s15103_s1 + $0x1ecc] ss:$16 sps:$4 sm:$0xff]  }
 0x3a3   : > { %7828 = vmatpush1.bf16.msra.mxu1 %v11414_v11  ;;  %7788 = vmatprep.subr.bf16.mxu0 %v11419_v10 }
 0x3a4   : > { %7829 = vmatprep.subr.bf16.mxu1 %v11422_v18 }
 0x3a6   : > { %7789 = vmatpush1.bf16.msra.mxu0 %v11417_v19  ;;  %v11483_v19 = vld [vmem:[%s15103_s1 + $0x1cc8] ss:$16 sps:$4 sm:$0xff]  }
 0x3a7   : > { %7830 = vmatpush1.bf16.msra.mxu1 %v11420_v24  ;;  %7790 = vmatprep.subr.bf16.mxu0 %v11425_v26  ;;  %v11486_v24 = vld [vmem:[%s15103_s1 + $0x1ec8] ss:$16 sps:$4 sm:$0xff]  }
 0x3a8   : > { %7831 = vmatprep.subr.bf16.mxu1 %v11428_v60 }
 0x3aa   : > { %7791 = vmatpush1.bf16.msra.mxu0 %v11423_v29 }
 0x3ab   : > { %7832 = vmatpush1.bf16.msra.mxu1 %v11426_v48  ;;  %7792 = vmatprep.subr.bf16.mxu0 %v11431_v2 }
 0x3ac   : > { %7833 = vmatprep.subr.bf16.mxu1 %v11434_v27 }
 0x3ae   : > { %7793 = vmatpush2.bf16.msra.mxu0 %v11429_v63  ;;  %v11489_v63 = vld [vmem:[%s15103_s1 + $0x1ca8] ss:$16 sps:$4 sm:$0xff]  }
 0x3af   : > { %7834 = vmatpush2.bf16.msra.mxu1 %v11432_v46  ;;  %7794 = vmatprep.subr.bf16.mxu0 %v11437_v31  ;;  %v11495_v31 = vld [vmem:[%s15103_s1 + $0x1c88] ss:$16 sps:$4 sm:$0xff]  }
 0x3b0   : > { %7835 = vmatprep.subr.bf16.mxu1 %v11440_v32  ;;  %v11498_v32 = vld [vmem:[%s15103_s1 + $0x1e88] ss:$16 sps:$4 sm:$0xff]  }
 0x3b2   : > { %7795 = vmatpush2.bf16.msra.mxu0 %v11435_v38  ;;  %v11503_v38 = vld [vmem:[%s15103_s1 + $0x1c6c] ss:$16 sps:$4 sm:$0xff]  }
 0x3b3   : > { %7836 = vmatpush2.bf16.msra.mxu1 %v11438_v35  ;;  %7796 = vmatprep.subr.bf16.mxu0 %v11443_v40  ;;  %v11501_v35 = vld [vmem:[%s15103_s1 + $0x1c68] ss:$16 sps:$4 sm:$0xff]  }
 0x3b4   : > { %7837 = vmatprep.subr.bf16.mxu1 %v11446_v45  ;;  %v11504_v40 = vld [vmem:[%s15103_s1 + $0x1e68] ss:$16 sps:$4 sm:$0xff]   ;;  %v11509_v45 = vld [vmem:[%s15103_s1 + $0x1c4c] ss:$16 sps:$4 sm:$0xff]  }
 0x3b6   : > { %7797 = vmatpush2.bf16.msra.mxu0 %v11441_v5  ;;  %v11512_v5 = vld [vmem:[%s15103_s1 + $0x1e4c] ss:$16 sps:$4 sm:$0xff]  }
 0x3b7   : > { %7838 = vmatpush2.bf16.msra.mxu1 %v11444_v6  ;;  %7798 = vmatprep.subr.bf16.mxu0 %v11449_v9  ;;  %v11507_v6 = vld [vmem:[%s15103_s1 + $0x1c48] ss:$16 sps:$4 sm:$0xff]  }
 0x3b8   : > { %7839 = vmatprep.subr.bf16.mxu1 %v11452_v13  ;;  %v11510_v9 = vld [vmem:[%s15103_s1 + $0x1e48] ss:$16 sps:$4 sm:$0xff]   ;;  %v11515_v13 = vld [vmem:[%s15103_s1 + $0x1c2c] ss:$16 sps:$4 sm:$0xff]  }
 0x3ba   : > { %7799 = vmatpush2.bf16.msra.mxu0 %v11447_v50  ;;  %v11518_v50 = vld [vmem:[%s15103_s1 + $0x1e2c] ss:$16 sps:$4 sm:$0xff]  }
 0x3bb   : > { %7840 = vmatpush2.bf16.msra.mxu1 %v11450_v52  ;;  %7800 = vmatprep.subr.bf16.mxu0 %v11455_v53  ;;  %v11513_v52 = vld [vmem:[%s15103_s1 + $0x1c28] ss:$16 sps:$4 sm:$0xff]  }
 0x3bc   : > { %7841 = vmatprep.subr.bf16.mxu1 %v11458_v54  ;;  %v11516_v53 = vld [vmem:[%s15103_s1 + $0x1e28] ss:$16 sps:$4 sm:$0xff]   ;;  %v11521_v54 = vld [vmem:[%s15103_s1 + $0x1c0c] ss:$16 sps:$4 sm:$0xff]  }
 0x3be   : > { %7801 = vmatpush2.bf16.msra.mxu0 %v11453_v8  ;;  %v11524_v8 = vld [vmem:[%s15103_s1 + $0x1e0c] ss:$16 sps:$4 sm:$0xff]  }
 0x3bf   : > { %7842 = vmatpush2.bf16.msra.mxu1 %v11456_v1  ;;  %7802 = vmatprep.subr.bf16.mxu0 %v11461_v41  ;;  %v11519_v1 = vld [vmem:[%s15103_s1 + $0x1c08] ss:$16 sps:$4 sm:$0xff]  }
 0x3c0   : > { %7843 = vmatprep.subr.bf16.mxu1 %v11464_v59  ;;  %v11522_v41 = vld [vmem:[%s15103_s1 + $0x1e08] ss:$16 sps:$4 sm:$0xff]   ;;  %v11527_v59 = vld [vmem:[%s15103_s1 + $0x1dec] ss:$16 sps:$4 sm:$0xff]  }
 0x3c2   : > { %7803 = vmatpush2.bf16.msra.mxu0 %v11459_v44  ;;  %v11530_v44 = vld [vmem:[%s15103_s1 + $0x1fec] ss:$16 sps:$4 sm:$0xff]  }
 0x3c3   : > { %7844 = vmatpush2.bf16.msra.mxu1 %v11462_v34  ;;  %7804 = vmatprep.subr.bf16.mxu0 %v11467_v47  ;;  %v11525_v34 = vld [vmem:[%s15103_s1 + $0x1de8] ss:$16 sps:$4 sm:$0xff]  }
 0x3c4   : > { %7845 = vmatprep.subr.bf16.mxu1 %v11470_v51  ;;  %v11528_v47 = vld [vmem:[%s15103_s1 + $0x1fe8] ss:$16 sps:$4 sm:$0xff]   ;;  %v11533_v51 = vld [vmem:[%s15103_s1 + $0x1dcc] ss:$16 sps:$4 sm:$0xff]  }
 0x3c6   : > { %7805 = vmatpush2.bf16.msra.mxu0 %v11465_v20  ;;  %v11536_v20 = vld [vmem:[%s15103_s1 + $0x1fcc] ss:$16 sps:$4 sm:$0xff]  }
 0x3c7   : > { %7846 = vmatpush2.bf16.msra.mxu1 %v11468_v42  ;;  %7806 = vmatprep.subr.bf16.mxu0 %v11473_v36  ;;  %v11531_v42 = vld [vmem:[%s15103_s1 + $0x1dc8] ss:$16 sps:$4 sm:$0xff]  }
 0x3c8   : > { %7847 = vmatprep.subr.bf16.mxu1 %v11476_v3  ;;  %v11534_v36 = vld [vmem:[%s15103_s1 + $0x1fc8] ss:$16 sps:$4 sm:$0xff]   ;;  %v11539_v3 = vld [vmem:[%s15103_s1 + $0x1dac] ss:$16 sps:$4 sm:$0xff]  }
 0x3ca   : > { %7807 = vmatpush2.bf16.msra.mxu0 %v11471_v55  ;;  %v11542_v55 = vld [vmem:[%s15103_s1 + $0x1fac] ss:$16 sps:$4 sm:$0xff]  }
 0x3cb   : > { %7848 = vmatpush2.bf16.msra.mxu1 %v11474_v22  ;;  %7858 = vmatprep.subr.bf16.mxu0 %v11479_v23  ;;  %v11537_v22 = vld [vmem:[%s15103_s1 + $0x1da8] ss:$16 sps:$4 sm:$0xff]  }
 0x3cc   : > { %7899 = vmatprep.subr.bf16.mxu1 %v11482_v39  ;;  %v11540_v23 = vld [vmem:[%s15103_s1 + $0x1fa8] ss:$16 sps:$4 sm:$0xff]   ;;  %v11545_v39 = vld [vmem:[%s15103_s1 + $0x1d8c] ss:$16 sps:$4 sm:$0xff]  }
 0x3cd   : > { %v5940_v11 = vpop.f32.mrf.mxu0  ;;  %7809 = vmatmul.mubr.bf16.vlgmr.msra.gmra.mxu0 %v6301_v33  ;;  %v11494_v33 = vld [vmem:[%s15103_s1 + $0x1eac] ss:$16 sps:$4 sm:$0xff]  }
 0x3ce   : > { %v5981_v10 = vpop.f32.mrf.mxu1  ;;  %7850 = vmatmul.mubr.bf16.vlgmr.msra.gmra.mxu1 %v14401_v37  ;;  %v5941_v18 = vadd.f32 %v5940_v11, %v14636_v15  ;;  %7859 = vmatpush1.bf16.msra.mxu0 %v11477_v28  ;;  %v11548_v28 = vld [vmem:[%s15103_s1 + $0x1f8c] ss:$16 sps:$4 sm:$0xff]  }
 0x3cf   : > { %7900 = vmatpush1.bf16.msra.mxu1 %v11480_v12  ;;  %v5942_v26 = vpop.f32.mrf.mxu0  ;;  %7860 = vmatprep.subr.bf16.mxu0 %v11485_v14  ;;  %v11543_v12 = vld [vmem:[%s15103_s1 + $0x1d88] ss:$16 sps:$4 sm:$0xff]   ;;  %v11554_v11 = vld [vmem:[%s15103_s1 + $0x1f6c] ss:$16 sps:$4 sm:$0xff]  }
 0x3d0   : > { %v5983_v60 = vpop.f32.mrf.mxu1  ;;  %7901 = vmatprep.subr.bf16.mxu1 %v11488_v7  ;;  %v5982_v37 = vadd.f32 %v5981_v10, %v5941_v18  ;;  %v5943_v15 = vadd.f32 %v5942_v26, %v14650_v57  ;;  %7890 = vmatprep.mubr.bf16.mxu0 %v6316_v0  ;;  %v11492_v57 = vld [vmem:[%s15103_s1 + $0x1ea8] ss:$16 sps:$4 sm:$0xff]   ;;  %v11551_v7 = vld [vmem:[%s15103_s1 + $0x1d6c] ss:$16 sps:$4 sm:$0xff]  }
 0x3d1   : > { %7931 = vmatprep.mubr.bf16.mxu1 %v14416_v58  ;;  %v5944_v29 = vpop.f32.mrf.mxu0  ;;  %v11500_v58 = vld [vmem:[%s15103_s1 + $0x1e8c] ss:$16 sps:$4 sm:$0xff]   ;;  %v11546_v14 = vld [vmem:[%s15103_s1 + $0x1f88] ss:$16 sps:$4 sm:$0xff]  }
 0x3d2   : > { %v5985_v48 = vpop.f32.mrf.mxu1  ;;  %v14856_v2 = vadd.f32 %v5982_v37, %v13989_v4  ;;  %v5984_v27 = vadd.f32 %v5983_v60, %v5943_v15  ;;  %7861 = vmatpush1.bf16.msra.mxu0 %v11483_v19  ;;  %v11497_v4 = vld [vmem:[%s15103_s1 + $0x1c8c] ss:$16 sps:$4 sm:$0xff]   ;;  %v11549_v10 = vld [vmem:[%s15103_s1 + $0x1d68] ss:$16 sps:$4 sm:$0xff]  }
 0x3d3   : > { %7902 = vmatpush1.bf16.msra.mxu1 %v11486_v24  ;;  %v5945_v56 = vpop.f32.mrf.mxu0  ;;  %7862 = vmatprep.subr.bf16.mxu0 %v11491_v21  ;;  %v11552_v18 = vld [vmem:[%s15103_s1 + $0x1f68] ss:$16 sps:$4 sm:$0xff]   ;;  %v11557_v19 = vld [vmem:[%s15103_s1 + $0x1d4c] ss:$16 sps:$4 sm:$0xff]  }
 0x3d4   : > { %v5986_v0 = vpop.f32.mrf.mxu1  ;;  %7903 = vmatprep.subr.bf16.mxu1 %v11494_v33  ;;  %v14871_v46 = vadd.f32 %v5984_v27, %v13994_v25  ;;  %v11506_v25 = vld [vmem:[%s15103_s1 + $0x1e6c] ss:$16 sps:$4 sm:$0xff]   ;;  %v11555_v26 = vld [vmem:[%s15103_s1 + $0x1d48] ss:$16 sps:$4 sm:$0xff]  }
 0x3d5   : > { %v11560_v24 = vld [vmem:[%s15103_s1 + $0x1f4c] ss:$16 sps:$4 sm:$0xff]   ;;  %v11558_v60 = vld [vmem:[%s15103_s1 + $0x1f48] ss:$16 sps:$4 sm:$0xff]  }
 0x3d6   : > { %7863 = vmatpush1.bf16.msra.mxu0 %v11489_v63  ;;  %v11563_v21 = vld [vmem:[%s15103_s1 + $0x1d2c] ss:$16 sps:$4 sm:$0xff]   ;;  %v11561_v37 = vld [vmem:[%s15103_s1 + $0x1d28] ss:$16 sps:$4 sm:$0xff]  }
 0x3d7   : > { %7904 = vmatpush1.bf16.msra.mxu1 %v11492_v57  ;;  %7864 = vmatprep.subr.bf16.mxu0 %v11497_v4  ;;  %v11566_v33 = vld [vmem:[%s15103_s1 + $0x1f2c] ss:$16 sps:$4 sm:$0xff]   ;;  %v11564_v15 = vld [vmem:[%s15103_s1 + $0x1f28] ss:$16 sps:$4 sm:$0xff]  }
 0x3d8   : > { %7905 = vmatprep.subr.bf16.mxu1 %v11500_v58  ;;  %v11569_v29 = vld [vmem:[%s15103_s1 + $0x1d0c] ss:$16 sps:$4 sm:$0xff]   ;;  %v11567_v27 = vld [vmem:[%s15103_s1 + $0x1d08] ss:$16 sps:$4 sm:$0xff]  }
 0x3d9   : > { %v11572_v48 = vld [vmem:[%s15103_s1 + $0x1f0c] ss:$16 sps:$4 sm:$0xff]   ;;  %v11570_v63 = vld [vmem:[%s15103_s1 + $0x1f08] ss:$16 sps:$4 sm:$0xff]  }
 0x3da   : > { %7865 = vmatpush1.bf16.msra.mxu0 %v11495_v31 }
 0x3db   : > { %7906 = vmatpush1.bf16.msra.mxu1 %v11498_v32  ;;  %7866 = vmatprep.subr.bf16.mxu0 %v11503_v38 }
 0x3dc   : > { %7907 = vmatprep.subr.bf16.mxu1 %v11506_v25 }
 0x3de   : > { %7867 = vmatpush1.bf16.msra.mxu0 %v11501_v35  ;;  %v7947_v35 = vsub.s32 0, %v11764_v43 }
 0x3df   : > { %7908 = vmatpush1.bf16.msra.mxu1 %v11504_v40  ;;  %7868 = vmatprep.subr.bf16.mxu0 %v11509_v45  ;;  %v15030_v45 = vld [vmem:[%s15104_s2] sm:$0xf] }
 0x3e0   : > { %7909 = vmatprep.subr.bf16.mxu1 %v11512_v5 }
 0x3e2   : > { %7869 = vmatpush1.bf16.msra.mxu0 %v11507_v6 }
 0x3e3   : > { %7910 = vmatpush1.bf16.msra.mxu1 %v11510_v9  ;;  %7870 = vmatprep.subr.bf16.mxu0 %v11515_v13 }
 0x3e4   : > { %7911 = vmatprep.subr.bf16.mxu1 %v11518_v50  ;;  %v7948_v50 = vrot.slane %v15030_v45, %v7947_v35 }
 0x3e6   : > { %7871 = vmatpush1.bf16.msra.mxu0 %v11513_v52 }
 0x3e7   : > { %7912 = vmatpush1.bf16.msra.mxu1 %v11516_v53  ;;  %7872 = vmatprep.subr.bf16.mxu0 %v11521_v54 }
 0x3e8   : > { %7913 = vmatprep.subr.bf16.mxu1 %v11524_v8 }
 0x3ea   : > { %7873 = vmatpush1.bf16.msra.mxu0 %v11519_v1 }
 0x3eb   : > { %7914 = vmatpush1.bf16.msra.mxu1 %v11522_v41  ;;  %7874 = vmatprep.subr.bf16.mxu0 %v11527_v59 }
 0x3ec   : > { %7915 = vmatprep.subr.bf16.mxu1 %v11530_v44 }
 0x3ee   : > { %7875 = vmatpush2.bf16.msra.mxu0 %v11525_v34 }
 0x3ef   : > { %7916 = vmatpush2.bf16.msra.mxu1 %v11528_v47  ;;  %7876 = vmatprep.subr.bf16.mxu0 %v11533_v51 }
 0x3f0   : > { %7917 = vmatprep.subr.bf16.mxu1 %v11536_v20 }
 0x3f2   : > { %7877 = vmatpush2.bf16.msra.mxu0 %v11531_v42 }
 0x3f3   : > { %7918 = vmatpush2.bf16.msra.mxu1 %v11534_v36  ;;  %7878 = vmatprep.subr.bf16.mxu0 %v11539_v3 }
 0x3f4   : > { %7919 = vmatprep.subr.bf16.mxu1 %v11542_v55 }
 0x3f6   : > { %7879 = vmatpush2.bf16.msra.mxu0 %v11537_v22 }
 0x3f7   : > { %7920 = vmatpush2.bf16.msra.mxu1 %v11540_v23  ;;  %7880 = vmatprep.subr.bf16.mxu0 %v11545_v39 }
 0x3f8   : > { %7921 = vmatprep.subr.bf16.mxu1 %v11548_v28 }
 0x3fa   : > { %7881 = vmatpush2.bf16.msra.mxu0 %v11543_v12 }
 0x3fb   : > { %7922 = vmatpush2.bf16.msra.mxu1 %v11546_v14  ;;  %7882 = vmatprep.subr.bf16.mxu0 %v11551_v7 }
 0x3fc   : > { %7923 = vmatprep.subr.bf16.mxu1 %v11554_v11 }
 0x3fe   : > { %7883 = vmatpush2.bf16.msra.mxu0 %v11549_v10 }
 0x3ff   : > { %7924 = vmatpush2.bf16.msra.mxu1 %v11552_v18  ;;  %7884 = vmatprep.subr.bf16.mxu0 %v11557_v19 }
 0x400   : > { %7925 = vmatprep.subr.bf16.mxu1 %v11560_v24  ;;  %v7955_v24 = vsub.s32 2, %v11764_v43 }
 0x402   : > { %7885 = vmatpush2.bf16.msra.mxu0 %v11555_v26 }
 0x403   : > { %7926 = vmatpush2.bf16.msra.mxu1 %v11558_v60  ;;  %7886 = vmatprep.subr.bf16.mxu0 %v11563_v21 }
 0x404   : > { %7927 = vmatprep.subr.bf16.mxu1 %v11566_v33 }
 0x406   : > { %7887 = vmatpush2.bf16.msra.mxu0 %v11561_v37  ;;  %v7959_v37 = vsub.s32 3, %v11764_v43 }
 0x407   : > { %7928 = vmatpush2.bf16.msra.mxu1 %v11564_v15  ;;  %7888 = vmatprep.subr.bf16.mxu0 %v11569_v29 }
 0x408   : > { %7929 = vmatprep.subr.bf16.mxu1 %v11572_v48 }
 0x40a   : > { %7889 = vmatpush2.bf16.msra.mxu0 %v11567_v27  ;;  %v7956_v27 = vrot.slane %v15030_v45, %v7955_v24 }
 0x40b   : > { %7930 = vmatpush2.bf16.msra.mxu1 %v11570_v63 }
 0x40d   : > { %v7646_v57 = vpop.f32.mrf.mxu0  ;;  %7891 = vmatmul.mubr.bf16.vlgmr.msra.gmra.mxu0 %v6313_v16 }
 0x40e   : > { %v7687_v56 = vpop.f32.mrf.mxu1  ;;  %7932 = vmatmul.mubr.bf16.vlgmr.msra.gmra.mxu1 %v14619_v62  ;;  %v7951_v62 = vsub.s32 1, %v11764_v43 }
 0x40f   : > { %v7648_v0 = vpop.f32.mrf.mxu0  ;;  %v7688_v25 = vadd.f32 %v7687_v56, %v7646_v57 }
 0x410   : > { %v7689_v4 = vpop.f32.mrf.mxu1  ;;  %v7952_v41 = vrot.slane %v15030_v45, %v7951_v62 }
 0x411   : > { %v7650_v58 = vpop.f32.mrf.mxu0  ;;  %v7690_v17 = vadd.f32 %v7689_v4, %v7648_v0 }
 0x412   : > { %v7691_v31 = vpop.f32.mrf.mxu1 }
 0x413   : > { %v7651_v32 = vpop.f32.mrf.mxu0  ;;  %v7960_v31 = vrot.slane %v15030_v45, %v7959_v37 }
 0x414   : > { %v7692_v38 = vpop.f32.mrf.mxu1 }
 0x44d   : > { %v7728_v40 = vpop.f32.mrf.mxu0 }
 0x44e   : > { %v7769_v5 = vpop.f32.mrf.mxu1  ;;  %v7729_v16 = vadd.f32 %v7728_v40, %v7688_v25 }
 0x44f   : > { %v7730_v6 = vpop.f32.mrf.mxu0 }
 0x450   : > { %v7771_v9 = vpop.f32.mrf.mxu1  ;;  %v7770_v13 = vadd.f32 %v7769_v5, %v7729_v16  ;;  %v7731_v52 = vadd.f32 %v7730_v6, %v7690_v17 }
 0x451   : > { %v7732_v53 = vpop.f32.mrf.mxu0 }
 0x452   : > { %v7773_v54 = vpop.f32.mrf.mxu1  ;;  %v7940_v8 = vadd.f32 %v7770_v13, %v14439_v61  ;;  %v7772_v1 = vadd.f32 %v7771_v9, %v7731_v52  ;;  %v8017_v53 = vld [vmem:[%s228_s9] sm:$0xf] }
 0x453   : > { %v7733_v59 = vpop.f32.mrf.mxu0 }
 0x454   : > { %v7774_v44 = vpop.f32.mrf.mxu1  ;;  %v15036_v34 = vadd.f32 %v7948_v50, %v7940_v8  ;;  %v7941_v47 = vadd.f32 %v7772_v1, %v14454_v30 }
 0x456   : > { %v8028_v51 = vmul.f32 %v15036_v34, %v15036_v34  ;;  %v7966_v20 = vadd.f32 %v7952_v41, %v7941_v47 }
 0x458   : > { %v8044_v42 = vrot.slane %v8028_v51, 7  ;;  %v10004_v36 = vpack.c.bf16 %v7966_v20, %v15036_v34  ;;  %v8029_v61 = vmul.f32 %v7966_v20, %v7966_v20 }
 0x45a   : > { %v8053_v30 = vsel %vm8002_vm0, %v15036_v34, %v8044_v42  ;;  %v8045_v3 = vrot.slane %v8029_v61, 7 }
 0x45b   : > { %v8058_v55 = vsel %vm8057_vm1, %v8053_v30, 0.0 }
 0x45c   : > { %8062 = vst [vmem:[%s15046_s5] sm:$0xff] %v8058_v55  ;;  %v8054_v22 = vsel %vm8002_vm0, %v7966_v20, %v8045_v3 }
 0x45d   : > { %v8059_v23 = vsel %vm8057_vm1, %v8054_v22, 0.0 }
 0x45e   : > { %8063 = vst [vmem:[%s15046_s5 + $0x8] sm:$0xff] %v8059_v23 }
 0x48d   : > { %v7810_v39 = vpop.f32.mrf.mxu0 }
 0x48e   : > { %v7851_v28 = vpop.f32.mrf.mxu1 }
 0x48f   : > { %v7812_v12 = vpop.f32.mrf.mxu0  ;;  %v7852_v19 = vadd.f32 %v7851_v28, %v7810_v39 }
 0x490   : > { %v7853_v14 = vpop.f32.mrf.mxu1 }
 0x491   : > { %v7814_v7 = vpop.f32.mrf.mxu0  ;;  %v7854_v21 = vadd.f32 %v7853_v14, %v7812_v12 }
 0x492   : > { %v7855_v11 = vpop.f32.mrf.mxu1 }
 0x493   : > { %v7815_v10 = vpop.f32.mrf.mxu0 }
 0x494   : > { %v7856_v18 = vpop.f32.mrf.mxu1 }
 0x4cd   : > { %v7892_v26 = vpop.f32.mrf.mxu0 }
 0x4ce   : > { %v7933_v60 = vpop.f32.mrf.mxu1  ;;  %v7893_v33 = vadd.f32 %v7892_v26, %v7852_v19 }
 0x4cf   : > { %v7894_v15 = vpop.f32.mrf.mxu0 }
 0x4d0   : > { %v7935_v29 = vpop.f32.mrf.mxu1  ;;  %v7934_v48 = vadd.f32 %v7933_v60, %v7893_v33  ;;  %v7895_v63 = vadd.f32 %v7894_v15, %v7854_v21 }
 0x4d1   : > { %v7896_v56 = vpop.f32.mrf.mxu0 }
 0x4d2   : > { %v7937_v0 = vpop.f32.mrf.mxu1  ;;  %v7942_v43 = vadd.f32 %v7934_v48, %v14856_v2  ;;  %v7936_v58 = vadd.f32 %v7935_v29, %v7895_v63 }
 0x4d3   : > { %v7897_v32 = vpop.f32.mrf.mxu0 }
 0x4d4   : > { %v7938_v38 = vpop.f32.mrf.mxu1  ;;  %v7967_v25 = vadd.f32 %v7956_v27, %v7942_v43  ;;  %v7943_v35 = vadd.f32 %v7936_v58, %v14871_v46  ;;  %v7985_v46 = vrot.slane %v10004_v36, %v11788_v49 }
 0x4d6   : > { %v8030_v40 = vmul.f32 %v7967_v25, %v7967_v25  ;;  %v7968_v5 = vadd.f32 %v7960_v31, %v7943_v35 }
 0x4d8   : > { %v8046_v2 = vrot.slane %v8030_v40, 7  ;;  %v10005_v45 = vpack.c.bf16 %v7968_v5, %v7967_v25  ;;  %v8031_v17 = vmul.f32 %v7968_v5, %v7968_v5 }
 0x4da   : > { %v8055_v62 = vsel %vm8002_vm0, %v7967_v25, %v8046_v2  ;;  %v7992_v6 = vrot.slane %v10005_v45, %v11788_v49  ;;  %v8047_v9 = vrot.slane %v8031_v17, 7 }
 0x4db   : > { %v8060_v13 = vsel %vm8057_vm1, %v8055_v62, 0.0 }
 0x4dc   : > { %8064 = vst [vmem:[%s15046_s5 + $0x10] sm:$0xff] %v8060_v13  ;;  %v7993_v50 = vcombine.low %v7985_v46, %v7992_v6  ;;  %v8056_v52 = vsel %vm8002_vm0, %v7968_v5, %v8047_v9 }
 0x4dd   : > { %v8061_v54 = vsel %vm8057_vm1, %v8056_v52, 0.0 }
 0x4de   : > { %v8000_v8 = vrot.slane %v7993_v50, %v11788_v49  ;;  %8065 = vst [vmem:[%s15046_s5 + $0x18] sm:$0xff] %v8061_v54 }
 0x4e0   : > { %v8018_v1 = vsel %vm8016_vm15, %v8000_v8, %v8017_v53 }
 0x4e1   : > { %8019 = vst [vmem:[%s228_s9] sm:$0xf] %v8018_v1 }
 0x4e2 PF: > { %s15_s17 = sadd.s32 1, %s11595_s17   ;;  %s15113_s15 = smov %s11591_s16 }
 0x4e3   : > { %p12_p5 = scmp.ge.s32.totalorder %s15_s17, 4   ;;  %s15114_s16 = smov %s15116_s18 }
 0x4e5   :  { %14 = sbr.rel (!%p12_p5) target bundleno = 2 (0x2), region = 79 }

</bundles_post_ra>
